<compile_context>
chip_gen: v5e
topology: v5e:2x2
jax: 0.10.0
libtpu: 0.0.40
codegen_flags: <defaults>
</compile_context>

<pallas_src>
import jax
import jax.numpy as jnp
from jax.experimental import pallas as pl
from jax.experimental.pallas import tpu as pltpu


# ---------------------------------------------------------------------------
# Pre-pass kernel: x projection for all frames.
#   xproj[b,t] = im2col(x[b,t]) @ W_x + bias          (fully parallel over b,t)
# ---------------------------------------------------------------------------
def xproj_kernel(xcol_ref, wx_ref, b_ref, o_ref):
    # xcol_ref: (1, H*W, 9*Cin)   wx_ref: (9*Cin, 4F)   b_ref: (1, 4F)
    o_ref[0] = jnp.dot(xcol_ref[0], wx_ref[...],
                       preferred_element_type=jnp.float32) + b_ref[...]


# ---------------------------------------------------------------------------
# Fused recurrent kernel: grid = (B, T), state resident in VMEM scratch.
# ---------------------------------------------------------------------------
def fused_convlstm_kernel(xproj_ref, w_h_ref, wci_ref, wcf_ref, wco_ref,
                          head_w_ref, head_b_ref, out_ref,
                          h_pad_ref, c_ref, acc_ref):
    # xproj_ref : (1, 1, H*W, 4F)   x contribution for this (b, t), incl. bias
    # w_h_ref   : (9, F, 4F)        h-part of the 3x3 conv weight (tap-major)
    # wci/wcf/wco_ref : (H*W, F)    peephole weights
    # head_w_ref: (Cout, F), head_b_ref: (Cout, 1)
    # out_ref   : (1, Cout, H*W)    lane-dense head output (written at t = T-1)
    # scratch   : h_pad (H+2, W+2, F), c (H*W, F), acc (H*W, 4F)
    t = pl.program_id(1)
    Hp2, Wp2, F = h_pad_ref.shape
    H, W = Hp2 - 2, Wp2 - 2
    HW, _ = acc_ref.shape

    # Reset recurrent state at the start of each batch element's sequence.
    @pl.when(t == 0)
    def _():
        h_pad_ref[...] = jnp.zeros_like(h_pad_ref)
        c_ref[...] = jnp.zeros_like(c_ref)

    # Gate pre-activations: precomputed x projection (+bias) plus conv(h, W_h).
    # 9 shifted-window matmuls accumulated into a VMEM scratch ref (no spills).
    # (On v6e/v7x, cast the dot operands to bf16 here for ~2x MXU throughput.)
    acc_ref[...] = xproj_ref[0, 0]
    for k in range(9):
        dy, dx = divmod(k, 3)
        tap = h_pad_ref[dy:dy + H, dx:dx + W, :].reshape(HW, F)
        acc_ref[...] += jnp.dot(tap, w_h_ref[k],
                                preferred_element_type=jnp.float32)

    gates = acc_ref[...]
    i_g = gates[:, 0 * F:1 * F]
    f_g = gates[:, 1 * F:2 * F]
    g_g = gates[:, 2 * F:3 * F]
    o_g = gates[:, 3 * F:4 * F]

    c_old = c_ref[...]
    i = jax.nn.sigmoid(i_g + wci_ref[...] * c_old)
    f = jax.nn.sigmoid(f_g + wcf_ref[...] * c_old)
    c_new = f * c_old + i * jnp.tanh(g_g)
    o = jax.nn.sigmoid(o_g + wco_ref[...] * c_new)
    h_new = o * jnp.tanh(c_new)

    c_ref[...] = c_new
    # Write h back into the interior of the zero-padded state buffer.
    h_pad_ref[1:H + 1, 1:W + 1, :] = h_new.reshape(H, W, F)

    # Fused 1x1 conv head on the final timestep, lane-dense (Cout, H*W) output.
    @pl.when(t == pl.num_programs(1) - 1)
    def _():
        head = jax.lax.dot_general(
            head_w_ref[...], h_new,
            dimension_numbers=(((1,), (1,)), ((), ())),
            preferred_element_type=jnp.float32)
        out_ref[0] = head + head_b_ref[...]


# ---------------------------------------------------------------------------
# Parameters (random init mirroring the PyTorch module's shapes).
# ---------------------------------------------------------------------------
def init_params(key, input_channel, num_filter, b_h_w, out_channels=3):
    _, H, W = b_h_w
    F = num_filter
    k1, k2, k3, k4, k5 = jax.random.split(key, 5)
    # 3x3 conv over cat([x, h]) split into x / h parts, layout (tap, cin, 4F),
    # tap = ky*3 + kx (PyTorch cross-correlation order).
    w_x = 0.05 * jax.random.normal(k1, (9, input_channel, 4 * F), jnp.float32)
    w_h = 0.05 * jax.random.normal(k2, (9, F, 4 * F), jnp.float32)
    conv_b = 0.05 * jax.random.normal(k3, (4 * F,), jnp.float32)
    # Peephole weights: zeros, PyTorch layout (1, F, H, W).
    Wci = jnp.zeros((1, F, H, W), jnp.float32)
    Wcf = jnp.zeros((1, F, H, W), jnp.float32)
    Wco = jnp.zeros((1, F, H, W), jnp.float32)
    # 1x1 conv head.
    head_w = 0.05 * jax.random.normal(k4, (out_channels, F), jnp.float32)
    head_b = 0.05 * jax.random.normal(k5, (out_channels,), jnp.float32)
    return dict(w_x=w_x.reshape(9 * input_channel, 4 * F),
                w_h=w_h,
                conv_b=conv_b.reshape(1, 4 * F),
                Wci=Wci, Wcf=Wcf, Wco=Wco,
                head_w=head_w, head_b=head_b)


# ---------------------------------------------------------------------------
# Forward pass (matches the PyTorch `Predictor.forward` semantics).
# ---------------------------------------------------------------------------
@jax.jit
def predictor_forward(inputs_nchw, params):
    # inputs_nchw: (B, T, Cin, H, W) float32 -- same as PyTorch `inputs`.
    B, T, Cin, H, W = inputs_nchw.shape
    F = params["w_h"].shape[1]
    F4 = 4 * F
    Cout = params["head_w"].shape[0]
    HW = H * W

    # --- trace-time glue: im2col of x for all T frames (off the recurrent path)
    x = jnp.transpose(inputs_nchw, (0, 1, 3, 4, 2))           # (B,T,H,W,Cin)
    xp = jnp.pad(x, ((0, 0), (0, 0), (1, 1), (1, 1), (0, 0)))
    taps = [xp[:, :, dy:dy + H, dx:dx + W, :]
            for dy in range(3) for dx in range(3)]
    x_col = jnp.stack(taps, axis=4).reshape(B * T, HW, 9 * Cin)

    # --- parallel pre-pass: x projection (+ conv bias) --------------------
    xproj = pl.pallas_call(
        xproj_kernel,
        out_shape=jax.ShapeDtypeStruct((B * T, HW, F4), jnp.float32),
        grid_spec=pltpu.PrefetchScalarGridSpec(
            num_scalar_prefetch=0,
            grid=(B * T,),
            in_specs=[pl.BlockSpec((1, HW, 9 * Cin), lambda i: (i, 0, 0)),
                      pl.BlockSpec((9 * Cin, F4), lambda i: (0, 0)),
                      pl.BlockSpec((1, F4), lambda i: (0, 0))],
            out_specs=pl.BlockSpec((1, HW, F4), lambda i: (i, 0, 0))),
        compiler_params=pltpu.CompilerParams(
            dimension_semantics=("parallel",)),
    )(x_col, params["w_x"], params["conv_b"])
    xproj = xproj.reshape(B, T, HW, F4)

    # Peephole weights -> (H*W, F); broadcast against (H*W, F) state in-kernel.
    wci = jnp.transpose(params["Wci"], (0, 2, 3, 1)).reshape(HW, F)
    wcf = jnp.transpose(params["Wcf"], (0, 2, 3, 1)).reshape(HW, F)
    wco = jnp.transpose(params["Wco"], (0, 2, 3, 1)).reshape(HW, F)
    head_b = params["head_b"].reshape(Cout, 1)

    # --- fused recurrent kernel: one pallas_call for the whole sequence ----
    out = pl.pallas_call(
        fused_convlstm_kernel,
        out_shape=jax.ShapeDtypeStruct((B, Cout, HW), jnp.float32),
        grid_spec=pltpu.PrefetchScalarGridSpec(
            num_scalar_prefetch=0,
            grid=(B, T),
            in_specs=[
                pl.BlockSpec((1, 1, HW, F4), lambda b, t: (b, t, 0, 0)),
                pl.BlockSpec((9, F, F4), lambda b, t: (0, 0, 0)),
                pl.BlockSpec((HW, F), lambda b, t: (0, 0)),
                pl.BlockSpec((HW, F), lambda b, t: (0, 0)),
                pl.BlockSpec((HW, F), lambda b, t: (0, 0)),
                pl.BlockSpec((Cout, F), lambda b, t: (0, 0)),
                pl.BlockSpec((Cout, 1), lambda b, t: (0, 0)),
            ],
            out_specs=pl.BlockSpec((1, Cout, HW), lambda b, t: (b, 0, 0)),
            scratch_shapes=[
                pltpu.VMEM((H + 2, W + 2, F), jnp.float32),   # padded h state
                pltpu.VMEM((HW, F), jnp.float32),             # c state
                pltpu.VMEM((HW, F4), jnp.float32),            # gate accumulator
            ]),
        compiler_params=pltpu.CompilerParams(
            dimension_semantics=("parallel", "arbitrary")),
    )(xproj, params["w_h"], wci, wcf, wco, params["head_w"], head_b)

    # (B, Cout, H*W) -> (B, Cout, H, W): already NCHW, free reshape.
    return out.reshape(B, Cout, H, W)


# ---------------------------------------------------------------------------
# Pure-JAX reference (for a correctness sanity check).
# ---------------------------------------------------------------------------
def reference_forward(inputs_nchw, params):
    B, T, Cin, H, W = inputs_nchw.shape
    F = params["w_h"].shape[1]
    w_x = params["w_x"].reshape(9, Cin, 4 * F)
    w_h = params["w_h"]
    w_full = jnp.concatenate([w_x, w_h], axis=1)              # (9, Cin+F, 4F)
    w_full = jnp.transpose(w_full.reshape(3, 3, Cin + F, 4 * F), (3, 2, 0, 1))
    bias = params["conv_b"].reshape(4 * F)

    def conv3(x_nchw):
        y = jax.lax.conv_general_dilated(
            x_nchw, w_full, window_strides=(1, 1), padding=((1, 1), (1, 1)),
            dimension_numbers=("NCHW", "OIHW", "NCHW"))
        return y + bias[None, :, None, None]

    h = jnp.zeros((B, F, H, W), jnp.float32)
    c = jnp.zeros((B, F, H, W), jnp.float32)
    for t in range(T):
        conv_x = conv3(jnp.concatenate([inputs_nchw[:, t], h], axis=1))
        i_g, f_g, g_g, o_g = jnp.split(conv_x, 4, axis=1)
        i = jax.nn.sigmoid(i_g + params["Wci"] * c)
        f = jax.nn.sigmoid(f_g + params["Wcf"] * c)
        c = f * c + i * jnp.tanh(g_g)
        o = jax.nn.sigmoid(o_g + params["Wco"] * c)
        h = o * jnp.tanh(c)
    out = jnp.einsum("bfhw,of->bohw", h, params["head_w"])
    return out + params["head_b"][None, :, None, None]


if __name__ == "__main__":
    B, T, Cin, H, W = 2, 8, 4, 16, 16
    num_filter = 32
    out_channels = 3

    key = jax.random.PRNGKey(0)
    k_in, k_par = jax.random.split(key)
    inputs = jax.random.normal(k_in, (B, T, Cin, H, W), dtype=jnp.float32)
    params = init_params(k_par, Cin, num_filter, (B, H, W), out_channels)

    out = predictor_forward(inputs, params)
    out = jax.block_until_ready(out)
    assert out.shape == (B, out_channels, H, W), out.shape

    ref = reference_forward(inputs, params)
    max_err = float(jnp.max(jnp.abs(out - ref)))
    assert max_err < 1e-3, f"mismatch vs reference: max_err={max_err}"

    print("KERNEL_OK")
</pallas_src>

<mosaic_0001>
module attributes {stable_mosaic.version = 11 : i64} {
  func.func @xproj_kernel(%arg0: i32, %arg1: memref<1x256x36xf32, #tpu.memory_space<vmem>>, %arg2: memref<36x128xf32, #tpu.memory_space<vmem>>, %arg3: memref<1x128xf32, #tpu.memory_space<vmem>>, %arg4: memref<1x256x128xf32, #tpu.memory_space<vmem>>) attributes {dimension_semantics = [#tpu.dimension_semantics<parallel>], iteration_bounds = array<i64: 16>, scalar_prefetch = 0 : i64, scratch_operands = 0 : i64, tpu.core_type = #tpu.core_type<tc>, window_params = [{transform_indices = @transform_0, window_bounds = array<i64: 1, 256, 36>}, {pipeline_mode = #tpu.pipeline_mode<synchronous>, transform_indices = @transform_1, window_bounds = array<i64: 36, 128>}, {pipeline_mode = #tpu.pipeline_mode<synchronous>, transform_indices = @transform_2, window_bounds = array<i64: 1, 128>}, {transform_indices = @transform_3, window_bounds = array<i64: 1, 256, 128>}]} {
    %c0 = arith.constant 0 : index
    %c0_0 = arith.constant 0 : index
    %c0_1 = arith.constant 0 : index
    %0 = vector.load %arg1[%c0, %c0_0, %c0_1] : memref<1x256x36xf32, #tpu.memory_space<vmem>>, vector<1x256x36xf32>
    %1 = vector.shape_cast %0 : vector<1x256x36xf32> to vector<256x36xf32>
    %c0_2 = arith.constant 0 : index
    %c0_3 = arith.constant 0 : index
    %2 = vector.load %arg2[%c0_2, %c0_3] : memref<36x128xf32, #tpu.memory_space<vmem>>, vector<36x128xf32>
    %cst = arith.constant dense<0.000000e+00> : vector<256x128xf32>
    %3 = tpu.matmul %1, %2, %cst {dimension_numbers = #tpu.dot_dimension_numbers<[1], [0], [0], [1], [0, 0, 1, 1], [], []>} : vector<256x36xf32>, vector<36x128xf32>, vector<256x128xf32> -> vector<256x128xf32>
    %c0_4 = arith.constant 0 : index
    %c0_5 = arith.constant 0 : index
    %4 = vector.load %arg3[%c0_4, %c0_5] : memref<1x128xf32, #tpu.memory_space<vmem>>, vector<1x128xf32>
    %5 = vector.broadcast %4 : vector<1x128xf32> to vector<256x128xf32>
    %6 = arith.addf %3, %5 : vector<256x128xf32>
    %c0_6 = arith.constant 0 : index
    %c0_7 = arith.constant 0 : index
    %c0_8 = arith.constant 0 : index
    %7 = vector.load %arg4[%c0_6, %c0_7, %c0_8] : memref<1x256x128xf32, #tpu.memory_space<vmem>>, vector<1x256x128xf32>
    %8 = vector.shape_cast %7 : vector<1x256x128xf32> to vector<256x128xf32>
    %9 = vector.shape_cast %6 : vector<256x128xf32> to vector<1x256x128xf32>
    tpu.vector_store %arg4[%c0_6, %c0_7, %c0_8], %9 {strides = array<i32>} : memref<1x256x128xf32, #tpu.memory_space<vmem>>, vector<1x256x128xf32>,
    return
  }
  func.func @transform_0(%arg0: i32) -> (i32, i32, i32) {
    %c0_i32 = arith.constant 0 : i32
    %c0_i32_0 = arith.constant 0 : i32
    %c0_i32_1 = arith.constant 0 : i32
    return %arg0, %c0_i32, %c0_i32_0 : i32, i32, i32
  }
  func.func @transform_1(%arg0: i32) -> (i32, i32) {
    %c0_i32 = arith.constant 0 : i32
    %c0_i32_0 = arith.constant 0 : i32
    %c0_i32_1 = arith.constant 0 : i32
    return %c0_i32, %c0_i32_0 : i32, i32
  }
  func.func @transform_2(%arg0: i32) -> (i32, i32) {
    %c0_i32 = arith.constant 0 : i32
    %c0_i32_0 = arith.constant 0 : i32
    %c0_i32_1 = arith.constant 0 : i32
    return %c0_i32, %c0_i32_0 : i32, i32
  }
  func.func @transform_3(%arg0: i32) -> (i32, i32, i32) {
    %c0_i32 = arith.constant 0 : i32
    %c0_i32_0 = arith.constant 0 : i32
    %c0_i32_1 = arith.constant 0 : i32
    return %arg0, %c0_i32, %c0_i32_0 : i32, i32, i32
  }
}

module attributes {stable_mosaic.version = 11 : i64} {
  func.func @fused_convlstm_kernel(%arg0: i32, %arg1: i32, %arg2: memref<1x1x256x128xf32, #tpu.memory_space<vmem>>, %arg3: memref<9x32x128xf32, #tpu.memory_space<vmem>>, %arg4: memref<256x32xf32, #tpu.memory_space<vmem>>, %arg5: memref<256x32xf32, #tpu.memory_space<vmem>>, %arg6: memref<256x32xf32, #tpu.memory_space<vmem>>, %arg7: memref<3x32xf32, #tpu.memory_space<vmem>>, %arg8: memref<3x1xf32, #tpu.memory_space<vmem>>, %arg9: memref<1x3x256xf32, #tpu.memory_space<vmem>>, %arg10: memref<18x18x32xf32, #tpu.memory_space<vmem>>, %arg11: memref<256x32xf32, #tpu.memory_space<vmem>>, %arg12: memref<256x128xf32, #tpu.memory_space<vmem>>) attributes {dimension_semantics = [#tpu.dimension_semantics<parallel>, #tpu.dimension_semantics<arbitrary>], iteration_bounds = array<i64: 2, 8>, scalar_prefetch = 0 : i64, scratch_operands = 3 : i64, tpu.core_type = #tpu.core_type<tc>, window_params = [{transform_indices = @transform_0, window_bounds = array<i64: 1, 1, 256, 128>}, {pipeline_mode = #tpu.pipeline_mode<synchronous>, transform_indices = @transform_1, window_bounds = array<i64: 9, 32, 128>}, {pipeline_mode = #tpu.pipeline_mode<synchronous>, transform_indices = @transform_2, window_bounds = array<i64: 256, 32>}, {pipeline_mode = #tpu.pipeline_mode<synchronous>, transform_indices = @transform_3, window_bounds = array<i64: 256, 32>}, {pipeline_mode = #tpu.pipeline_mode<synchronous>, transform_indices = @transform_4, window_bounds = array<i64: 256, 32>}, {pipeline_mode = #tpu.pipeline_mode<synchronous>, transform_indices = @transform_5, window_bounds = array<i64: 3, 32>}, {pipeline_mode = #tpu.pipeline_mode<synchronous>, transform_indices = @transform_6, window_bounds = array<i64: 3, 1>}, {transform_indices = @transform_7, window_bounds = array<i64: 1, 3, 256>}]} {
    %c0_i32 = arith.constant 0 : i32
    %0 = arith.cmpi eq, %arg1, %c0_i32 : i32
    %1 = arith.extui %0 : i1 to i32
    %c0_i32_0 = arith.constant 0 : i32
    %2 = arith.cmpi ne, %1, %c0_i32_0 : i32
    scf.if %2 {
      %cst_115 = arith.constant 0.000000e+00 : f32
      %120 = vector.broadcast %cst_115 : f32 to vector<18x18x32xf32>
      %c0_116 = arith.constant 0 : index
      %c0_117 = arith.constant 0 : index
      %c0_118 = arith.constant 0 : index
      %121 = vector.load %arg10[%c0_116, %c0_117, %c0_118] : memref<18x18x32xf32, #tpu.memory_space<vmem>>, vector<18x18x32xf32>
      tpu.vector_store %arg10[%c0_116, %c0_117, %c0_118], %120 {strides = array<i32>} : memref<18x18x32xf32, #tpu.memory_space<vmem>>, vector<18x18x32xf32>,
      %cst_119 = arith.constant 0.000000e+00 : f32
      %122 = vector.broadcast %cst_119 : f32 to vector<256x32xf32>
      %c0_120 = arith.constant 0 : index
      %c0_121 = arith.constant 0 : index
      %123 = vector.load %arg11[%c0_120, %c0_121] : memref<256x32xf32, #tpu.memory_space<vmem>>, vector<256x32xf32>
      tpu.vector_store %arg11[%c0_120, %c0_121], %122 {strides = array<i32>} : memref<256x32xf32, #tpu.memory_space<vmem>>, vector<256x32xf32>,
    } else {
    }
    %c0 = arith.constant 0 : index
    %c0_1 = arith.constant 0 : index
    %c0_2 = arith.constant 0 : index
    %c0_3 = arith.constant 0 : index
    %3 = vector.load %arg2[%c0, %c0_1, %c0_2, %c0_3] : memref<1x1x256x128xf32, #tpu.memory_space<vmem>>, vector<1x1x256x128xf32>
    %4 = vector.shape_cast %3 : vector<1x1x256x128xf32> to vector<256x128xf32>
    %c0_4 = arith.constant 0 : index
    %c0_5 = arith.constant 0 : index
    %5 = vector.load %arg12[%c0_4, %c0_5] : memref<256x128xf32, #tpu.memory_space<vmem>>, vector<256x128xf32>
    tpu.vector_store %arg12[%c0_4, %c0_5], %4 {strides = array<i32>} : memref<256x128xf32, #tpu.memory_space<vmem>>, vector<256x128xf32>,
    %c0_6 = arith.constant 0 : index
    %c0_7 = arith.constant 0 : index
    %c0_8 = arith.constant 0 : index
    %6 = vector.load %arg10[%c0_6, %c0_7, %c0_8] : memref<18x18x32xf32, #tpu.memory_space<vmem>>, vector<16x16x32xf32>
    %7 = vector.shape_cast %6 : vector<16x16x32xf32> to vector<256x32xf32>
    %c0_9 = arith.constant 0 : index
    %c0_10 = arith.constant 0 : index
    %8 = vector.load %arg12[%c0_9, %c0_10] : memref<256x128xf32, #tpu.memory_space<vmem>>, vector<256x128xf32>
    %c0_11 = arith.constant 0 : index
    %c0_12 = arith.constant 0 : index
    %c0_13 = arith.constant 0 : index
    %9 = vector.load %arg3[%c0_11, %c0_12, %c0_13] : memref<9x32x128xf32, #tpu.memory_space<vmem>>, vector<1x32x128xf32>
    %10 = vector.shape_cast %9 : vector<1x32x128xf32> to vector<32x128xf32>
    %cst = arith.constant dense<0.000000e+00> : vector<256x128xf32>
    %11 = tpu.matmul %7, %10, %cst {dimension_numbers = #tpu.dot_dimension_numbers<[1], [0], [0], [1], [0, 0, 1, 1], [], []>} : vector<256x32xf32>, vector<32x128xf32>, vector<256x128xf32> -> vector<256x128xf32>
    %12 = arith.addf %8, %11 : vector<256x128xf32>
    %c0_14 = arith.constant 0 : index
    %c0_15 = arith.constant 0 : index
    %13 = vector.load %arg12[%c0_14, %c0_15] : memref<256x128xf32, #tpu.memory_space<vmem>>, vector<256x128xf32>
    tpu.vector_store %arg12[%c0_14, %c0_15], %12 {strides = array<i32>} : memref<256x128xf32, #tpu.memory_space<vmem>>, vector<256x128xf32>,
    %c0_16 = arith.constant 0 : index
    %c1 = arith.constant 1 : index
    %c0_17 = arith.constant 0 : index
    %14 = vector.load %arg10[%c0_16, %c1, %c0_17] : memref<18x18x32xf32, #tpu.memory_space<vmem>>, vector<16x16x32xf32>
    %15 = vector.shape_cast %14 : vector<16x16x32xf32> to vector<256x32xf32>
    %c0_18 = arith.constant 0 : index
    %c0_19 = arith.constant 0 : index
    %16 = vector.load %arg12[%c0_18, %c0_19] : memref<256x128xf32, #tpu.memory_space<vmem>>, vector<256x128xf32>
    %c1_20 = arith.constant 1 : index
    %c0_21 = arith.constant 0 : index
    %c0_22 = arith.constant 0 : index
    %17 = vector.load %arg3[%c1_20, %c0_21, %c0_22] : memref<9x32x128xf32, #tpu.memory_space<vmem>>, vector<1x32x128xf32>
    %18 = vector.shape_cast %17 : vector<1x32x128xf32> to vector<32x128xf32>
    %cst_23 = arith.constant dense<0.000000e+00> : vector<256x128xf32>
    %19 = tpu.matmul %15, %18, %cst_23 {dimension_numbers = #tpu.dot_dimension_numbers<[1], [0], [0], [1], [0, 0, 1, 1], [], []>} : vector<256x32xf32>, vector<32x128xf32>, vector<256x128xf32> -> vector<256x128xf32>
    %20 = arith.addf %16, %19 : vector<256x128xf32>
    %c0_24 = arith.constant 0 : index
    %c0_25 = arith.constant 0 : index
    %21 = vector.load %arg12[%c0_24, %c0_25] : memref<256x128xf32, #tpu.memory_space<vmem>>, vector<256x128xf32>
    tpu.vector_store %arg12[%c0_24, %c0_25], %20 {strides = array<i32>} : memref<256x128xf32, #tpu.memory_space<vmem>>, vector<256x128xf32>,
    %c0_26 = arith.constant 0 : index
    %c2 = arith.constant 2 : index
    %c0_27 = arith.constant 0 : index
    %22 = vector.load %arg10[%c0_26, %c2, %c0_27] : memref<18x18x32xf32, #tpu.memory_space<vmem>>, vector<16x16x32xf32>
    %23 = vector.shape_cast %22 : vector<16x16x32xf32> to vector<256x32xf32>
    %c0_28 = arith.constant 0 : index
    %c0_29 = arith.constant 0 : index
    %24 = vector.load %arg12[%c0_28, %c0_29] : memref<256x128xf32, #tpu.memory_space<vmem>>, vector<256x128xf32>
    %c2_30 = arith.constant 2 : index
    %c0_31 = arith.constant 0 : index
    %c0_32 = arith.constant 0 : index
    %25 = vector.load %arg3[%c2_30, %c0_31, %c0_32] : memref<9x32x128xf32, #tpu.memory_space<vmem>>, vector<1x32x128xf32>
    %26 = vector.shape_cast %25 : vector<1x32x128xf32> to vector<32x128xf32>
    %cst_33 = arith.constant dense<0.000000e+00> : vector<256x128xf32>
    %27 = tpu.matmul %23, %26, %cst_33 {dimension_numbers = #tpu.dot_dimension_numbers<[1], [0], [0], [1], [0, 0, 1, 1], [], []>} : vector<256x32xf32>, vector<32x128xf32>, vector<256x128xf32> -> vector<256x128xf32>
    %28 = arith.addf %24, %27 : vector<256x128xf32>
    %c0_34 = arith.constant 0 : index
    %c0_35 = arith.constant 0 : index
    %29 = vector.load %arg12[%c0_34, %c0_35] : memref<256x128xf32, #tpu.memory_space<vmem>>, vector<256x128xf32>
    tpu.vector_store %arg12[%c0_34, %c0_35], %28 {strides = array<i32>} : memref<256x128xf32, #tpu.memory_space<vmem>>, vector<256x128xf32>,
    %c1_36 = arith.constant 1 : index
    %c0_37 = arith.constant 0 : index
    %c0_38 = arith.constant 0 : index
    %30 = vector.load %arg10[%c1_36, %c0_37, %c0_38] : memref<18x18x32xf32, #tpu.memory_space<vmem>>, vector<16x16x32xf32>
    %31 = vector.shape_cast %30 : vector<16x16x32xf32> to vector<256x32xf32>
    %c0_39 = arith.constant 0 : index
    %c0_40 = arith.constant 0 : index
    %32 = vector.load %arg12[%c0_39, %c0_40] : memref<256x128xf32, #tpu.memory_space<vmem>>, vector<256x128xf32>
    %c3 = arith.constant 3 : index
    %c0_41 = arith.constant 0 : index
    %c0_42 = arith.constant 0 : index
    %33 = vector.load %arg3[%c3, %c0_41, %c0_42] : memref<9x32x128xf32, #tpu.memory_space<vmem>>, vector<1x32x128xf32>
    %34 = vector.shape_cast %33 : vector<1x32x128xf32> to vector<32x128xf32>
    %cst_43 = arith.constant dense<0.000000e+00> : vector<256x128xf32>
    %35 = tpu.matmul %31, %34, %cst_43 {dimension_numbers = #tpu.dot_dimension_numbers<[1], [0], [0], [1], [0, 0, 1, 1], [], []>} : vector<256x32xf32>, vector<32x128xf32>, vector<256x128xf32> -> vector<256x128xf32>
    %36 = arith.addf %32, %35 : vector<256x128xf32>
    %c0_44 = arith.constant 0 : index
    %c0_45 = arith.constant 0 : index
    %37 = vector.load %arg12[%c0_44, %c0_45] : memref<256x128xf32, #tpu.memory_space<vmem>>, vector<256x128xf32>
    tpu.vector_store %arg12[%c0_44, %c0_45], %36 {strides = array<i32>} : memref<256x128xf32, #tpu.memory_space<vmem>>, vector<256x128xf32>,
    %c1_46 = arith.constant 1 : index
    %c1_47 = arith.constant 1 : index
    %c0_48 = arith.constant 0 : index
    %38 = vector.load %arg10[%c1_46, %c1_47, %c0_48] : memref<18x18x32xf32, #tpu.memory_space<vmem>>, vector<16x16x32xf32>
    %39 = vector.shape_cast %38 : vector<16x16x32xf32> to vector<256x32xf32>
    %c0_49 = arith.constant 0 : index
    %c0_50 = arith.constant 0 : index
    %40 = vector.load %arg12[%c0_49, %c0_50] : memref<256x128xf32, #tpu.memory_space<vmem>>, vector<256x128xf32>
    %c4 = arith.constant 4 : index
    %c0_51 = arith.constant 0 : index
    %c0_52 = arith.constant 0 : index
    %41 = vector.load %arg3[%c4, %c0_51, %c0_52] : memref<9x32x128xf32, #tpu.memory_space<vmem>>, vector<1x32x128xf32>
    %42 = vector.shape_cast %41 : vector<1x32x128xf32> to vector<32x128xf32>
    %cst_53 = arith.constant dense<0.000000e+00> : vector<256x128xf32>
    %43 = tpu.matmul %39, %42, %cst_53 {dimension_numbers = #tpu.dot_dimension_numbers<[1], [0], [0], [1], [0, 0, 1, 1], [], []>} : vector<256x32xf32>, vector<32x128xf32>, vector<256x128xf32> -> vector<256x128xf32>
    %44 = arith.addf %40, %43 : vector<256x128xf32>
    %c0_54 = arith.constant 0 : index
    %c0_55 = arith.constant 0 : index
    %45 = vector.load %arg12[%c0_54, %c0_55] : memref<256x128xf32, #tpu.memory_space<vmem>>, vector<256x128xf32>
    tpu.vector_store %arg12[%c0_54, %c0_55], %44 {strides = array<i32>} : memref<256x128xf32, #tpu.memory_space<vmem>>, vector<256x128xf32>,
    %c1_56 = arith.constant 1 : index
    %c2_57 = arith.constant 2 : index
    %c0_58 = arith.constant 0 : index
    %46 = vector.load %arg10[%c1_56, %c2_57, %c0_58] : memref<18x18x32xf32, #tpu.memory_space<vmem>>, vector<16x16x32xf32>
    %47 = vector.shape_cast %46 : vector<16x16x32xf32> to vector<256x32xf32>
    %c0_59 = arith.constant 0 : index
    %c0_60 = arith.constant 0 : index
    %48 = vector.load %arg12[%c0_59, %c0_60] : memref<256x128xf32, #tpu.memory_space<vmem>>, vector<256x128xf32>
    %c5 = arith.constant 5 : index
    %c0_61 = arith.constant 0 : index
    %c0_62 = arith.constant 0 : index
    %49 = vector.load %arg3[%c5, %c0_61, %c0_62] : memref<9x32x128xf32, #tpu.memory_space<vmem>>, vector<1x32x128xf32>
    %50 = vector.shape_cast %49 : vector<1x32x128xf32> to vector<32x128xf32>
    %cst_63 = arith.constant dense<0.000000e+00> : vector<256x128xf32>
    %51 = tpu.matmul %47, %50, %cst_63 {dimension_numbers = #tpu.dot_dimension_numbers<[1], [0], [0], [1], [0, 0, 1, 1], [], []>} : vector<256x32xf32>, vector<32x128xf32>, vector<256x128xf32> -> vector<256x128xf32>
    %52 = arith.addf %48, %51 : vector<256x128xf32>
    %c0_64 = arith.constant 0 : index
    %c0_65 = arith.constant 0 : index
    %53 = vector.load %arg12[%c0_64, %c0_65] : memref<256x128xf32, #tpu.memory_space<vmem>>, vector<256x128xf32>
    tpu.vector_store %arg12[%c0_64, %c0_65], %52 {strides = array<i32>} : memref<256x128xf32, #tpu.memory_space<vmem>>, vector<256x128xf32>,
    %c2_66 = arith.constant 2 : index
    %c0_67 = arith.constant 0 : index
    %c0_68 = arith.constant 0 : index
    %54 = vector.load %arg10[%c2_66, %c0_67, %c0_68] : memref<18x18x32xf32, #tpu.memory_space<vmem>>, vector<16x16x32xf32>
    %55 = vector.shape_cast %54 : vector<16x16x32xf32> to vector<256x32xf32>
    %c0_69 = arith.constant 0 : index
    %c0_70 = arith.constant 0 : index
    %56 = vector.load %arg12[%c0_69, %c0_70] : memref<256x128xf32, #tpu.memory_space<vmem>>, vector<256x128xf32>
    %c6 = arith.constant 6 : index
    %c0_71 = arith.constant 0 : index
    %c0_72 = arith.constant 0 : index
    %57 = vector.load %arg3[%c6, %c0_71, %c0_72] : memref<9x32x128xf32, #tpu.memory_space<vmem>>, vector<1x32x128xf32>
    %58 = vector.shape_cast %57 : vector<1x32x128xf32> to vector<32x128xf32>
    %cst_73 = arith.constant dense<0.000000e+00> : vector<256x128xf32>
    %59 = tpu.matmul %55, %58, %cst_73 {dimension_numbers = #tpu.dot_dimension_numbers<[1], [0], [0], [1], [0, 0, 1, 1], [], []>} : vector<256x32xf32>, vector<32x128xf32>, vector<256x128xf32> -> vector<256x128xf32>
    %60 = arith.addf %56, %59 : vector<256x128xf32>
    %c0_74 = arith.constant 0 : index
    %c0_75 = arith.constant 0 : index
    %61 = vector.load %arg12[%c0_74, %c0_75] : memref<256x128xf32, #tpu.memory_space<vmem>>, vector<256x128xf32>
    tpu.vector_store %arg12[%c0_74, %c0_75], %60 {strides = array<i32>} : memref<256x128xf32, #tpu.memory_space<vmem>>, vector<256x128xf32>,
    %c2_76 = arith.constant 2 : index
    %c1_77 = arith.constant 1 : index
    %c0_78 = arith.constant 0 : index
    %62 = vector.load %arg10[%c2_76, %c1_77, %c0_78] : memref<18x18x32xf32, #tpu.memory_space<vmem>>, vector<16x16x32xf32>
    %63 = vector.shape_cast %62 : vector<16x16x32xf32> to vector<256x32xf32>
    %c0_79 = arith.constant 0 : index
    %c0_80 = arith.constant 0 : index
    %64 = vector.load %arg12[%c0_79, %c0_80] : memref<256x128xf32, #tpu.memory_space<vmem>>, vector<256x128xf32>
    %c7 = arith.constant 7 : index
    %c0_81 = arith.constant 0 : index
    %c0_82 = arith.constant 0 : index
    %65 = vector.load %arg3[%c7, %c0_81, %c0_82] : memref<9x32x128xf32, #tpu.memory_space<vmem>>, vector<1x32x128xf32>
    %66 = vector.shape_cast %65 : vector<1x32x128xf32> to vector<32x128xf32>
    %cst_83 = arith.constant dense<0.000000e+00> : vector<256x128xf32>
    %67 = tpu.matmul %63, %66, %cst_83 {dimension_numbers = #tpu.dot_dimension_numbers<[1], [0], [0], [1], [0, 0, 1, 1], [], []>} : vector<256x32xf32>, vector<32x128xf32>, vector<256x128xf32> -> vector<256x128xf32>
    %68 = arith.addf %64, %67 : vector<256x128xf32>
    %c0_84 = arith.constant 0 : index
    %c0_85 = arith.constant 0 : index
    %69 = vector.load %arg12[%c0_84, %c0_85] : memref<256x128xf32, #tpu.memory_space<vmem>>, vector<256x128xf32>
    tpu.vector_store %arg12[%c0_84, %c0_85], %68 {strides = array<i32>} : memref<256x128xf32, #tpu.memory_space<vmem>>, vector<256x128xf32>,
    %c2_86 = arith.constant 2 : index
    %c2_87 = arith.constant 2 : index
    %c0_88 = arith.constant 0 : index
    %70 = vector.load %arg10[%c2_86, %c2_87, %c0_88] : memref<18x18x32xf32, #tpu.memory_space<vmem>>, vector<16x16x32xf32>
    %71 = vector.shape_cast %70 : vector<16x16x32xf32> to vector<256x32xf32>
    %c0_89 = arith.constant 0 : index
    %c0_90 = arith.constant 0 : index
    %72 = vector.load %arg12[%c0_89, %c0_90] : memref<256x128xf32, #tpu.memory_space<vmem>>, vector<256x128xf32>
    %c8 = arith.constant 8 : index
    %c0_91 = arith.constant 0 : index
    %c0_92 = arith.constant 0 : index
    %73 = vector.load %arg3[%c8, %c0_91, %c0_92] : memref<9x32x128xf32, #tpu.memory_space<vmem>>, vector<1x32x128xf32>
    %74 = vector.shape_cast %73 : vector<1x32x128xf32> to vector<32x128xf32>
    %cst_93 = arith.constant dense<0.000000e+00> : vector<256x128xf32>
    %75 = tpu.matmul %71, %74, %cst_93 {dimension_numbers = #tpu.dot_dimension_numbers<[1], [0], [0], [1], [0, 0, 1, 1], [], []>} : vector<256x32xf32>, vector<32x128xf32>, vector<256x128xf32> -> vector<256x128xf32>
    %76 = arith.addf %72, %75 : vector<256x128xf32>
    %c0_94 = arith.constant 0 : index
    %c0_95 = arith.constant 0 : index
    %77 = vector.load %arg12[%c0_94, %c0_95] : memref<256x128xf32, #tpu.memory_space<vmem>>, vector<256x128xf32>
    tpu.vector_store %arg12[%c0_94, %c0_95], %76 {strides = array<i32>} : memref<256x128xf32, #tpu.memory_space<vmem>>, vector<256x128xf32>,
    %c0_96 = arith.constant 0 : index
    %c0_97 = arith.constant 0 : index
    %78 = vector.load %arg12[%c0_96, %c0_97] : memref<256x128xf32, #tpu.memory_space<vmem>>, vector<256x128xf32>
    %79 = vector.extract_strided_slice %78 {offsets = [0, 0], sizes = [256, 32], strides = [1, 1]} : vector<256x128xf32> to vector<256x32xf32>
    %80 = vector.extract_strided_slice %78 {offsets = [0, 32], sizes = [256, 32], strides = [1, 1]} : vector<256x128xf32> to vector<256x32xf32>
    %81 = vector.extract_strided_slice %78 {offsets = [0, 64], sizes = [256, 32], strides = [1, 1]} : vector<256x128xf32> to vector<256x32xf32>
    %82 = vector.extract_strided_slice %78 {offsets = [0, 96], sizes = [256, 32], strides = [1, 1]} : vector<256x128xf32> to vector<256x32xf32>
    %c0_98 = arith.constant 0 : index
    %c0_99 = arith.constant 0 : index
    %83 = vector.load %arg11[%c0_98, %c0_99] : memref<256x32xf32, #tpu.memory_space<vmem>>, vector<256x32xf32>
    %c0_100 = arith.constant 0 : index
    %c0_101 = arith.constant 0 : index
    %84 = vector.load %arg4[%c0_100, %c0_101] : memref<256x32xf32, #tpu.memory_space<vmem>>, vector<256x32xf32>
    %85 = arith.mulf %84, %83 : vector<256x32xf32>
    %86 = arith.addf %79, %85 : vector<256x32xf32>
    %87 = arith.negf %86 : vector<256x32xf32>
    %88 = math.exp %87 : vector<256x32xf32>
    %cst_102 = arith.constant 1.000000e+00 : f32
    %89 = vector.broadcast %cst_102 : f32 to vector<256x32xf32>
    %90 = arith.addf %89, %88 : vector<256x32xf32>
    %91 = arith.divf %89, %90 : vector<256x32xf32>
    %c0_103 = arith.constant 0 : index
    %c0_104 = arith.constant 0 : index
    %92 = vector.load %arg5[%c0_103, %c0_104] : memref<256x32xf32, #tpu.memory_space<vmem>>, vector<256x32xf32>
    %93 = arith.mulf %92, %83 : vector<256x32xf32>
    %94 = arith.addf %80, %93 : vector<256x32xf32>
    %95 = arith.negf %94 : vector<256x32xf32>
    %96 = math.exp %95 : vector<256x32xf32>
    %cst_105 = arith.constant 1.000000e+00 : f32
    %97 = vector.broadcast %cst_105 : f32 to vector<256x32xf32>
    %98 = arith.addf %97, %96 : vector<256x32xf32>
    %99 = arith.divf %97, %98 : vector<256x32xf32>
    %100 = arith.mulf %99, %83 : vector<256x32xf32>
    %101 = math.tanh %81 : vector<256x32xf32>
    %102 = arith.mulf %91, %101 : vector<256x32xf32>
    %103 = arith.addf %100, %102 : vector<256x32xf32>
    %c0_106 = arith.constant 0 : index
    %c0_107 = arith.constant 0 : index
    %104 = vector.load %arg6[%c0_106, %c0_107] : memref<256x32xf32, #tpu.memory_space<vmem>>, vector<256x32xf32>
    %105 = arith.mulf %104, %103 : vector<256x32xf32>
    %106 = arith.addf %82, %105 : vector<256x32xf32>
    %107 = arith.negf %106 : vector<256x32xf32>
    %108 = math.exp %107 : vector<256x32xf32>
    %cst_108 = arith.constant 1.000000e+00 : f32
    %109 = vector.broadcast %cst_108 : f32 to vector<256x32xf32>
    %110 = arith.addf %109, %108 : vector<256x32xf32>
    %111 = arith.divf %109, %110 : vector<256x32xf32>
    %112 = math.tanh %103 : vector<256x32xf32>
    %113 = arith.mulf %111, %112 : vector<256x32xf32>
    %c0_109 = arith.constant 0 : index
    %c0_110 = arith.constant 0 : index
    %114 = vector.load %arg11[%c0_109, %c0_110] : memref<256x32xf32, #tpu.memory_space<vmem>>, vector<256x32xf32>
    tpu.vector_store %arg11[%c0_109, %c0_110], %103 {strides = array<i32>} : memref<256x32xf32, #tpu.memory_space<vmem>>, vector<256x32xf32>,
    %115 = vector.shape_cast %113 : vector<256x32xf32> to vector<16x16x32xf32>
    %c1_111 = arith.constant 1 : index
    %c1_112 = arith.constant 1 : index
    %c0_113 = arith.constant 0 : index
    %116 = vector.load %arg10[%c1_111, %c1_112, %c0_113] : memref<18x18x32xf32, #tpu.memory_space<vmem>>, vector<16x16x32xf32>
    tpu.vector_store %arg10[%c1_111, %c1_112, %c0_113], %115 {strides = array<i32>} : memref<18x18x32xf32, #tpu.memory_space<vmem>>, vector<16x16x32xf32>,
    %c7_i32 = arith.constant 7 : i32
    %117 = arith.cmpi eq, %arg1, %c7_i32 : i32
    %118 = arith.extui %117 : i1 to i32
    %c0_i32_114 = arith.constant 0 : i32
    %119 = arith.cmpi ne, %118, %c0_i32_114 : i32
    scf.if %119 {
      %c0_115 = arith.constant 0 : index
      %c0_116 = arith.constant 0 : index
      %120 = vector.load %arg7[%c0_115, %c0_116] : memref<3x32xf32, #tpu.memory_space<vmem>>, vector<3x32xf32>
      %cst_117 = arith.constant dense<0.000000e+00> : vector<3x256xf32>
      %121 = tpu.matmul %120, %113, %cst_117 {dimension_numbers = #tpu.dot_dimension_numbers<[1], [1], [0], [0], [0, 0, 1, 0], [], []>} : vector<3x32xf32>, vector<256x32xf32>, vector<3x256xf32> -> vector<3x256xf32>
      %c0_118 = arith.constant 0 : index
      %c0_119 = arith.constant 0 : index
      %122 = vector.load %arg8[%c0_118, %c0_119] : memref<3x1xf32, #tpu.memory_space<vmem>>, vector<3x1xf32>
      %123 = vector.broadcast %122 : vector<3x1xf32> to vector<3x256xf32>
      %124 = arith.addf %121, %123 : vector<3x256xf32>
      %c0_120 = arith.constant 0 : index
      %c0_121 = arith.constant 0 : index
      %c0_122 = arith.constant 0 : index
      %125 = vector.load %arg9[%c0_120, %c0_121, %c0_122] : memref<1x3x256xf32, #tpu.memory_space<vmem>>, vector<1x3x256xf32>
      %126 = vector.shape_cast %125 : vector<1x3x256xf32> to vector<3x256xf32>
      %127 = vector.shape_cast %124 : vector<3x256xf32> to vector<1x3x256xf32>
      tpu.vector_store %arg9[%c0_120, %c0_121, %c0_122], %127 {strides = array<i32>} : memref<1x3x256xf32, #tpu.memory_space<vmem>>, vector<1x3x256xf32>,
    } else {
    }
    return
  }
  func.func @transform_0(%arg0: i32, %arg1: i32) -> (i32, i32, i32, i32) {
    %c0_i32 = arith.constant 0 : i32
    %c0_i32_0 = arith.constant 0 : i32
    %c0_i32_1 = arith.constant 0 : i32
    return %arg0, %arg1, %c0_i32, %c0_i32_0 : i32, i32, i32, i32
  }
  func.func @transform_1(%arg0: i32, %arg1: i32) -> (i32, i32, i32) {
    %c0_i32 = arith.constant 0 : i32
    %c0_i32_0 = arith.constant 0 : i32
    %c0_i32_1 = arith.constant 0 : i32
    %c0_i32_2 = arith.constant 0 : i32
    return %c0_i32, %c0_i32_0, %c0_i32_1 : i32, i32, i32
  }
  func.func @transform_2(%arg0: i32, %arg1: i32) -> (i32, i32) {
    %c0_i32 = arith.constant 0 : i32
    %c0_i32_0 = arith.constant 0 : i32
    %c0_i32_1 = arith.constant 0 : i32
    return %c0_i32, %c0_i32_0 : i32, i32
  }
  func.func @transform_3(%arg0: i32, %arg1: i32) -> (i32, i32) {
    %c0_i32 = arith.constant 0 : i32
    %c0_i32_0 = arith.constant 0 : i32
    %c0_i32_1 = arith.constant 0 : i32
    return %c0_i32, %c0_i32_0 : i32, i32
  }
  func.func @transform_4(%arg0: i32, %arg1: i32) -> (i32, i32) {
    %c0_i32 = arith.constant 0 : i32
    %c0_i32_0 = arith.constant 0 : i32
    %c0_i32_1 = arith.constant 0 : i32
    return %c0_i32, %c0_i32_0 : i32, i32
  }
  func.func @transform_5(%arg0: i32, %arg1: i32) -> (i32, i32) {
    %c0_i32 = arith.constant 0 : i32
    %c0_i32_0 = arith.constant 0 : i32
    %c0_i32_1 = arith.constant 0 : i32
    return %c0_i32, %c0_i32_0 : i32, i32
  }
  func.func @transform_6(%arg0: i32, %arg1: i32) -> (i32, i32) {
    %c0_i32 = arith.constant 0 : i32
    %c0_i32_0 = arith.constant 0 : i32
    %c0_i32_1 = arith.constant 0 : i32
    return %c0_i32, %c0_i32_0 : i32, i32
  }
  func.func @transform_7(%arg0: i32, %arg1: i32) -> (i32, i32, i32) {
    %c0_i32 = arith.constant 0 : i32
    %c0_i32_0 = arith.constant 0 : i32
    %c0_i32_1 = arith.constant 0 : i32
    return %arg0, %c0_i32, %c0_i32_0 : i32, i32, i32
  }
}

</mosaic_0001>

<bundles_post_ra>
// kernel: predictor_forward.2
= control target key start
LH: loop header
LB: loop body
LE: loop exit
PB: predicated region body
PF: predicated region fallthrough
CT: control target
= control target key end

     0   :  { %s611_s12 = smov 0   ;;  %s787_s0 = inlined_call_operand.vmem [shape: f32[16,256,36], index: 0, kind: input, shape index: {}]   ;;  %s788_s1 = inlined_call_operand.vmem [shape: f32[36,128], index: 1, kind: input, shape index: {}]   ;;  %s789_s2 = inlined_call_operand.vmem [shape: f32[1,128], index: 2, kind: input, shape index: {}]   ;;  %s790_s3 = inlined_call_operand.vmem [shape: f32[16,256,128], index: 3, kind: output, shape index: {}]  }
   0x1 LB: > { %s513_s13 = sadd.s32 4294967295, %s589_s12   ;;  %p517_p0 = scmp.ge.s32.totalorder %s589_s12, 1  ;;  %s589_s12 = sphi %s611_s12, %s13_s12  }
   0x2   : > { %p137_p1 = scmp.lt.s32.totalorder %s589_s12, 17 }
   0x4   : > { %p138_p2 = pnand %p517_p0, %p137_p1 }
   0x5   : > { %p161_p3 = scmp.lt.s32.totalorder (!%p138_p2), %s513_s13, 15 }
   0x6   : > { %141 = sbr.rel (%p138_p2) target bundleno = 213 (0xd5), region = 32 }
   0xb   : > { %v207_v0 = vld [vmem:[%s788_s1 + $0x20] sm:$0xf]  ;;  %vm309_vm0 = vcmask 1043456   ;;  %v206_v1 = vld [vmem:[%s788_s1 + $0x18] sm:$0xff]  ;;  %v205_v2 = vld [vmem:[%s788_s1 + $0x10] sm:$0xff]  ;;  %s792_s13 = smov (!%p161_p3, %s513_s13), 15 }
   0xc   : > { %560 = vmatpush.msk.msra.mxu2 %vm309_vm0, %v207_v0  ;;  %561 = vmatpush.msk.msra.mxu3 %vm309_vm0, %v207_v0  ;;  %v204_v3 = vld [vmem:[%s788_s1 + $0x8] sm:$0xff]  ;;  %s557_s22 = sshll.u32 %s792_s13, 8  ;;  %v203_v4 = vld [vmem:[%s788_s1] sm:$0xff]  ;;  %vm212_vm1 = vcmask 293888  }
   0xd   : > { %522 = vmatpush.msk.msra.mxu0 %vm309_vm0, %v207_v0  ;;  %559 = vmatpush.msk.msra.mxu1 %vm309_vm0, %v207_v0  ;;  %s639_s25 = scalar_lea.vmem %s787_s0, %s557_s22  ;;  %v711_v37 = vld [vmem:[%s789_s2] ss:$0 sm:$0xff]  ;;  %s718_s5 = scalar_lea.vmem %s790_s3, %s557_s22 }
   0xe   : > { %563 = vmatpush.msra.mxu2 %v206_v1  ;;  %564 = vmatpush.msra.mxu3 %v206_v1  ;;  %v187_v5 = vld [vmem:[%s639_s25 + $0x80] sm:$0xff]  ;;  %v188_v9 = vld [vmem:[%s639_s25 + $0x88] sm:$0xff]  ;;  %v189_v13 = vld [vmem:[%s639_s25 + $0x90] sm:$0xff] }
   0xf   : > { %325 = vmatpush.msra.mxu0 %v206_v1  ;;  %562 = vmatpush.msra.mxu1 %v206_v1  ;;  %v195_v6 = vld [vmem:[%s639_s25 + $0xc0] sm:$0xff]  ;;  %v196_v10 = vld [vmem:[%s639_s25 + $0xc8] sm:$0xff]  ;;  %v197_v14 = vld [vmem:[%s639_s25 + $0xd0] sm:$0xff] }
  0x10   : > { %566 = vmatpush.msra.mxu2 %v205_v2  ;;  %567 = vmatpush.msra.mxu3 %v205_v2  ;;  %v171_v7 = vld [vmem:[%s639_s25] sm:$0xff]  ;;  %v172_v11 = vld [vmem:[%s639_s25 + $0x8] sm:$0xff]  ;;  %v173_v15 = vld [vmem:[%s639_s25 + $0x10] sm:$0xff] }
  0x11   : > { %326 = vmatpush.msra.mxu0 %v205_v2  ;;  %565 = vmatpush.msra.mxu1 %v205_v2  ;;  %v179_v8 = vld [vmem:[%s639_s25 + $0x40] sm:$0xff]  ;;  %v180_v12 = vld [vmem:[%s639_s25 + $0x48] sm:$0xff]  ;;  %v181_v16 = vld [vmem:[%s639_s25 + $0x50] sm:$0xff] }
  0x12   : > { %569 = vmatpush.msra.mxu2 %v204_v3  ;;  %570 = vmatpush.msra.mxu3 %v204_v3  ;;  %v190_v17 = vld [vmem:[%s639_s25 + $0x98] sm:$0xff]  ;;  %v191_v21 = vld [vmem:[%s639_s25 + $0xa0] sm:$0xff]  ;;  %v192_v25 = vld [vmem:[%s639_s25 + $0xa8] sm:$0xff] }
  0x13   : > { %327 = vmatpush.msra.mxu0 %v204_v3  ;;  %568 = vmatpush.msra.mxu1 %v204_v3  ;;  %v198_v18 = vld [vmem:[%s639_s25 + $0xd8] sm:$0xff]  ;;  %v199_v22 = vld [vmem:[%s639_s25 + $0xe0] sm:$0xff]  ;;  %v200_v26 = vld [vmem:[%s639_s25 + $0xe8] sm:$0xff] }
  0x14   : > { %572 = vmatpush.msra.mxu2 %v203_v4  ;;  %573 = vmatpush.msra.mxu3 %v203_v4  ;;  %v174_v19 = vld [vmem:[%s639_s25 + $0x18] sm:$0xff]  ;;  %v175_v23 = vld [vmem:[%s639_s25 + $0x20] sm:$0xff]  ;;  %v176_v27 = vld [vmem:[%s639_s25 + $0x28] sm:$0xff] }
  0x15   : > { %539 = vmatmul.msk.f32.vlgmr.msra.gmra.mxu2 %vm212_vm1, %v187_v5  ;;  %547 = vmatmul.msk.f32.vlgmr.msra.gmra.mxu3 %vm212_vm1, %v195_v6  ;;  %v182_v20 = vld [vmem:[%s639_s25 + $0x58] sm:$0xff]  ;;  %v183_v24 = vld [vmem:[%s639_s25 + $0x60] sm:$0xff]  ;;  %v184_v28 = vld [vmem:[%s639_s25 + $0x68] sm:$0xff] }
  0x16   : > { %328 = vmatpush.msra.mxu0 %v203_v4  ;;  %571 = vmatpush.msra.mxu1 %v203_v4  ;;  %v193_v29 = vld [vmem:[%s639_s25 + $0xb0] sm:$0xff]  ;;  %v194_v33 = vld [vmem:[%s639_s25 + $0xb8] sm:$0xff] }
  0x17   : > { %523 = vmatmul.msk.f32.vlgmr.msra.gmra.mxu0 %vm212_vm1, %v171_v7  ;;  %531 = vmatmul.msk.f32.vlgmr.msra.gmra.mxu1 %vm212_vm1, %v179_v8  ;;  %v201_v30 = vld [vmem:[%s639_s25 + $0xf0] sm:$0xff]  ;;  %v202_v34 = vld [vmem:[%s639_s25 + $0xf8] sm:$0xff] }
  0x18   : > { %v177_v31 = vld [vmem:[%s639_s25 + $0x30] sm:$0xff]  ;;  %v178_v35 = vld [vmem:[%s639_s25 + $0x38] sm:$0xff] }
  0x19   : > { %v185_v32 = vld [vmem:[%s639_s25 + $0x70] sm:$0xff]  ;;  %v186_v36 = vld [vmem:[%s639_s25 + $0x78] sm:$0xff] }
  0x1d   : > { %540 = vmatmul.msk.f32.gmra.mxu2 %vm212_vm1, %v188_v9  ;;  %548 = vmatmul.msk.f32.gmra.mxu3 %vm212_vm1, %v196_v10 }
  0x1f   : > { %524 = vmatmul.msk.f32.gmra.mxu0 %vm212_vm1, %v172_v11  ;;  %532 = vmatmul.msk.f32.gmra.mxu1 %vm212_vm1, %v180_v12 }
  0x25   : > { %541 = vmatmul.msk.f32.gmra.mxu2 %vm212_vm1, %v189_v13  ;;  %549 = vmatmul.msk.f32.gmra.mxu3 %vm212_vm1, %v197_v14 }
  0x27   : > { %525 = vmatmul.msk.f32.gmra.mxu0 %vm212_vm1, %v173_v15  ;;  %533 = vmatmul.msk.f32.gmra.mxu1 %vm212_vm1, %v181_v16 }
  0x2d   : > { %542 = vmatmul.msk.f32.gmra.mxu2 %vm212_vm1, %v190_v17  ;;  %550 = vmatmul.msk.f32.gmra.mxu3 %vm212_vm1, %v198_v18 }
  0x2f   : > { %526 = vmatmul.msk.f32.gmra.mxu0 %vm212_vm1, %v174_v19  ;;  %534 = vmatmul.msk.f32.gmra.mxu1 %vm212_vm1, %v182_v20 }
  0x35   : > { %543 = vmatmul.msk.f32.gmra.mxu2 %vm212_vm1, %v191_v21  ;;  %551 = vmatmul.msk.f32.gmra.mxu3 %vm212_vm1, %v199_v22 }
  0x37   : > { %527 = vmatmul.msk.f32.gmra.mxu0 %vm212_vm1, %v175_v23  ;;  %535 = vmatmul.msk.f32.gmra.mxu1 %vm212_vm1, %v183_v24 }
  0x3d   : > { %544 = vmatmul.msk.f32.gmra.mxu2 %vm212_vm1, %v192_v25  ;;  %552 = vmatmul.msk.f32.gmra.mxu3 %vm212_vm1, %v200_v26 }
  0x3f   : > { %528 = vmatmul.msk.f32.gmra.mxu0 %vm212_vm1, %v176_v27  ;;  %536 = vmatmul.msk.f32.gmra.mxu1 %vm212_vm1, %v184_v28 }
  0x45   : > { %545 = vmatmul.msk.f32.gmra.mxu2 %vm212_vm1, %v193_v29  ;;  %553 = vmatmul.msk.f32.gmra.mxu3 %vm212_vm1, %v201_v30 }
  0x47   : > { %529 = vmatmul.msk.f32.gmra.mxu0 %vm212_vm1, %v177_v31  ;;  %537 = vmatmul.msk.f32.gmra.mxu1 %vm212_vm1, %v185_v32 }
  0x4d   : > { %546 = vmatmul.msk.f32.gmra.mxu2 %vm212_vm1, %v194_v33  ;;  %554 = vmatmul.msk.f32.gmra.mxu3 %vm212_vm1, %v202_v34 }
  0x4f   : > { %530 = vmatmul.msk.f32.gmra.mxu0 %vm212_vm1, %v178_v35  ;;  %538 = vmatmul.msk.f32.gmra.mxu1 %vm212_vm1, %v186_v36 }
  0x94   : > { %v330_v38 = vpop.f32.mrf.mxu0  ;;  %v354_v39 = vpop.f32.mrf.mxu1 }
  0x95   : > { %v331_v40 = vadd.f32 %v711_v37, %v330_v38  ;;  %v355_v41 = vadd.f32 %v711_v37, %v354_v39 }
  0x97   : > { %426 = vst [vmem:[%s718_s5] sm:$0xff] %v331_v40 }
  0x98   : > { %434 = vst [vmem:[%s718_s5 + $0x40] sm:$0xff] %v355_v41  ;;  %v378_v42 = vpop.f32.mrf.mxu2  ;;  %v402_v43 = vpop.f32.mrf.mxu3 }
  0x99   : > { %v379_v44 = vadd.f32 %v711_v37, %v378_v42  ;;  %v403_v45 = vadd.f32 %v711_v37, %v402_v43 }
  0x9b   : > { %442 = vst [vmem:[%s718_s5 + $0x80] sm:$0xff] %v379_v44 }
  0x9c   : > { %450 = vst [vmem:[%s718_s5 + $0xc0] sm:$0xff] %v403_v45  ;;  %v333_v46 = vpop.f32.mrf.mxu0  ;;  %v357_v47 = vpop.f32.mrf.mxu1 }
  0x9d   : > { %v334_v48 = vadd.f32 %v711_v37, %v333_v46  ;;  %v358_v49 = vadd.f32 %v711_v37, %v357_v47 }
  0x9f   : > { %427 = vst [vmem:[%s718_s5 + $0x8] sm:$0xff] %v334_v48 }
  0xa0   : > { %435 = vst [vmem:[%s718_s5 + $0x48] sm:$0xff] %v358_v49  ;;  %v381_v50 = vpop.f32.mrf.mxu2  ;;  %v405_v51 = vpop.f32.mrf.mxu3 }
  0xa1   : > { %v382_v52 = vadd.f32 %v711_v37, %v381_v50  ;;  %v406_v53 = vadd.f32 %v711_v37, %v405_v51 }
  0xa3   : > { %443 = vst [vmem:[%s718_s5 + $0x88] sm:$0xff] %v382_v52 }
  0xa4   : > { %451 = vst [vmem:[%s718_s5 + $0xc8] sm:$0xff] %v406_v53  ;;  %v336_v54 = vpop.f32.mrf.mxu0  ;;  %v360_v55 = vpop.f32.mrf.mxu1 }
  0xa5   : > { %v337_v56 = vadd.f32 %v711_v37, %v336_v54  ;;  %v361_v57 = vadd.f32 %v711_v37, %v360_v55 }
  0xa7   : > { %428 = vst [vmem:[%s718_s5 + $0x10] sm:$0xff] %v337_v56 }
  0xa8   : > { %436 = vst [vmem:[%s718_s5 + $0x50] sm:$0xff] %v361_v57  ;;  %v384_v58 = vpop.f32.mrf.mxu2  ;;  %v408_v59 = vpop.f32.mrf.mxu3 }
  0xa9   : > { %v385_v60 = vadd.f32 %v711_v37, %v384_v58  ;;  %v409_v61 = vadd.f32 %v711_v37, %v408_v59 }
  0xab   : > { %444 = vst [vmem:[%s718_s5 + $0x90] sm:$0xff] %v385_v60 }
  0xac   : > { %452 = vst [vmem:[%s718_s5 + $0xd0] sm:$0xff] %v409_v61  ;;  %v339_v62 = vpop.f32.mrf.mxu0  ;;  %v363_v63 = vpop.f32.mrf.mxu1 }
  0xad   : > { %v340_v0 = vadd.f32 %v711_v37, %v339_v62  ;;  %v364_v1 = vadd.f32 %v711_v37, %v363_v63 }
  0xaf   : > { %429 = vst [vmem:[%s718_s5 + $0x18] sm:$0xff] %v340_v0 }
  0xb0   : > { %437 = vst [vmem:[%s718_s5 + $0x58] sm:$0xff] %v364_v1  ;;  %v387_v2 = vpop.f32.mrf.mxu2  ;;  %v411_v3 = vpop.f32.mrf.mxu3 }
  0xb1   : > { %v388_v4 = vadd.f32 %v711_v37, %v387_v2  ;;  %v412_v5 = vadd.f32 %v711_v37, %v411_v3 }
  0xb3   : > { %445 = vst [vmem:[%s718_s5 + $0x98] sm:$0xff] %v388_v4 }
  0xb4   : > { %453 = vst [vmem:[%s718_s5 + $0xd8] sm:$0xff] %v412_v5  ;;  %v342_v6 = vpop.f32.mrf.mxu0  ;;  %v366_v7 = vpop.f32.mrf.mxu1 }
  0xb5   : > { %v343_v8 = vadd.f32 %v711_v37, %v342_v6  ;;  %v367_v9 = vadd.f32 %v711_v37, %v366_v7 }
  0xb7   : > { %430 = vst [vmem:[%s718_s5 + $0x20] sm:$0xff] %v343_v8 }
  0xb8   : > { %438 = vst [vmem:[%s718_s5 + $0x60] sm:$0xff] %v367_v9  ;;  %v390_v10 = vpop.f32.mrf.mxu2  ;;  %v414_v11 = vpop.f32.mrf.mxu3 }
  0xb9   : > { %v391_v12 = vadd.f32 %v711_v37, %v390_v10  ;;  %v415_v13 = vadd.f32 %v711_v37, %v414_v11 }
  0xbb   : > { %446 = vst [vmem:[%s718_s5 + $0xa0] sm:$0xff] %v391_v12 }
  0xbc   : > { %454 = vst [vmem:[%s718_s5 + $0xe0] sm:$0xff] %v415_v13  ;;  %v345_v14 = vpop.f32.mrf.mxu0  ;;  %v369_v15 = vpop.f32.mrf.mxu1 }
  0xbd   : > { %v346_v16 = vadd.f32 %v711_v37, %v345_v14  ;;  %v370_v17 = vadd.f32 %v711_v37, %v369_v15 }
  0xbf   : > { %431 = vst [vmem:[%s718_s5 + $0x28] sm:$0xff] %v346_v16 }
  0xc0   : > { %439 = vst [vmem:[%s718_s5 + $0x68] sm:$0xff] %v370_v17  ;;  %v393_v18 = vpop.f32.mrf.mxu2  ;;  %v417_v19 = vpop.f32.mrf.mxu3 }
  0xc1   : > { %v394_v20 = vadd.f32 %v711_v37, %v393_v18  ;;  %v418_v21 = vadd.f32 %v711_v37, %v417_v19 }
  0xc3   : > { %447 = vst [vmem:[%s718_s5 + $0xa8] sm:$0xff] %v394_v20 }
  0xc4   : > { %455 = vst [vmem:[%s718_s5 + $0xe8] sm:$0xff] %v418_v21  ;;  %v348_v22 = vpop.f32.mrf.mxu0  ;;  %v372_v23 = vpop.f32.mrf.mxu1 }
  0xc5   : > { %v349_v24 = vadd.f32 %v711_v37, %v348_v22  ;;  %v373_v25 = vadd.f32 %v711_v37, %v372_v23 }
  0xc7   : > { %432 = vst [vmem:[%s718_s5 + $0x30] sm:$0xff] %v349_v24 }
  0xc8   : > { %440 = vst [vmem:[%s718_s5 + $0x70] sm:$0xff] %v373_v25  ;;  %v396_v26 = vpop.f32.mrf.mxu2  ;;  %v420_v27 = vpop.f32.mrf.mxu3 }
  0xc9   : > { %v397_v28 = vadd.f32 %v711_v37, %v396_v26  ;;  %v421_v29 = vadd.f32 %v711_v37, %v420_v27 }
  0xcb   : > { %448 = vst [vmem:[%s718_s5 + $0xb0] sm:$0xff] %v397_v28 }
  0xcc   : > { %456 = vst [vmem:[%s718_s5 + $0xf0] sm:$0xff] %v421_v29  ;;  %v351_v30 = vpop.f32.mrf.mxu0  ;;  %v375_v31 = vpop.f32.mrf.mxu1 }
  0xcd   : > { %v352_v32 = vadd.f32 %v711_v37, %v351_v30  ;;  %v376_v33 = vadd.f32 %v711_v37, %v375_v31 }
  0xcf   : > { %433 = vst [vmem:[%s718_s5 + $0x38] sm:$0xff] %v352_v32 }
  0xd0   : > { %441 = vst [vmem:[%s718_s5 + $0x78] sm:$0xff] %v376_v33  ;;  %v399_v34 = vpop.f32.mrf.mxu2  ;;  %v423_v35 = vpop.f32.mrf.mxu3 }
  0xd1   : > { %v400_v36 = vadd.f32 %v711_v37, %v399_v34  ;;  %v424_v38 = vadd.f32 %v711_v37, %v423_v35 }
  0xd3   : > { %449 = vst [vmem:[%s718_s5 + $0xb8] sm:$0xff] %v400_v36 }
  0xd4   : > { %457 = vst [vmem:[%s718_s5 + $0xf8] sm:$0xff] %v424_v38 }
  0xd5 PF: > { %s13_s12 = sadd.s32 1, %s589_s12  }
  0xd6   : > { %p10_p4 = scmp.ge.s32.totalorder %s13_s12, 18  }
  0xd8   :  { %12 = sbr.rel (!%p10_p4) target bundleno = 1 (0x1), region = 62 }

// kernel: predictor_forward.3
= control target key start
LH: loop header
LB: loop body
LE: loop exit
PB: predicated region body
PF: predicated region fallthrough
CT: control target
= control target key end

     0   :  { %s8349_s24 = smov 0   ;;  %s8351_s25 = smov 0   ;;  %s12531_s0 = inlined_call_operand.vmem [shape: f32[2,8,256,128], index: 0, kind: input, shape index: {}]   ;;  %s12532_s1 = inlined_call_operand.vmem [shape: f32[9,32,128], index: 1, kind: input, shape index: {}]   ;;  %s12533_s2 = inlined_call_operand.vmem [shape: f32[256,32], index: 2, kind: input, shape index: {}]   ;;  %s12534_s3 = inlined_call_operand.vmem [shape: f32[256,32], index: 3, kind: input, shape index: {}]   ;;  %s12535_s4 = inlined_call_operand.vmem [shape: f32[256,32], index: 4, kind: input, shape index: {}]   ;;  %s12536_s5 = inlined_call_operand.vmem [shape: f32[3,32], index: 5, kind: input, shape index: {}]   ;;  %s12537_s6 = inlined_call_operand.vmem [shape: f32[3,1], index: 6, kind: input, shape index: {}]   ;;  %s12538_s7 = inlined_call_operand.vmem [shape: f32[2,3,256], index: 7, kind: output, shape index: {}]  }
   0x1   :  { %s8353_s26 = smov 0   ;;  %s8355_s27 = smov 0  }
   0x2   :  { %s8357_s28 = smov 0  }
   0x3 LB: > { %s26_s29 = sadd.s32 1, %s8294_s26  ;;  %s29_s30 = sadd.s32 1, %s8298_s27  ;;  %s8302_s28 = sphi %s8357_s28, %s17_s28   ;;  %s8298_s27 = sphi %s8355_s27, %s12940_s27   ;;  %s8294_s26 = sphi %s8353_s26, %s12939_s26   ;;  %s8290_s25 = sphi %s8351_s25, %s12938_s25   ;;  %s8286_s24 = sphi %s8349_s24, %s12937_s24  }
   0x4   : > { %p27_p0 = scmp.ge.s32.totalorder %s26_s29, 8  ;;  %p7201_p1 = scmp.ge.s32.totalorder %s8302_s28, 1 }
   0x5   : > { %p255_p2 = scmp.lt.s32.totalorder %s8302_s28, 17 }
   0x6   : > { %s12942_s29 = smov (%p27_p0, %s26_s29), 0  ;;  %s12944_s30 = smov (!%p27_p0, %s29_s30), %s8298_s27 }
   0x7   : > { %p256_p3 = pnand %p7201_p1, %p255_p2  ;;  %p31_p4 = scmp.ge.s32.totalorder %s12944_s30, 2 }
   0x9   : > { %s12946_s30 = smov (%p31_p4, %s12944_s30), 0  ;;  %259 = sbr.rel (%p256_p3) target bundleno = 1649 (0x671), region = 48 }
   0xe   : > { %p291_p5 = scmp.lt.s32.totalorder %s8290_s25, 1  ;;  %p293_p6 = scmp.lt.s32.totalorder %s8286_s24, 7 }
   0xf   : > { %p7207_p7 = scmp.ne.s32.totalorder %s8286_s24, 0 }
  0x10   : > { %s12948_s25 = smov (!%p291_p5, %s8290_s25), 1 }
  0x11   : > { %s294_s8 = scalar_select %p293_p6, %s8286_s24, 7 }
  0x12   : > { %s7203_s9 = sshll.u32 %s12948_s25, 8  ;;  %s7661_s10 = sshll.u32 %s12948_s25, 3 }
  0x13   : > { %s7202_s11 = sshll.u32 %s294_s8, 5  ;;  %s8386_s14 = scalar_lea.vmem %s12538_s7, %s7661_s10 }
  0x14   : > { %s297_s15 = sadd.s32 %s7203_s9, %s7202_s11  ;;  %308 = sbr.rel (%p7207_p7) target bundleno = 112 (0x70), region = 52 }
  0x15   : > { %s7204_s16 = sshll.u32 %s297_s15, 3 }
  0x16   : > { %s8391_s19 = scalar_lea.vmem %s12531_s0, %s7204_s16 }
  0x19   : > { %vm309_vm0 = vcmask 261120   ;;  %v8304_v0 = vmov 0.0   ;;  %vm312_vm1 = vcmask 254976  }
  0x1a   : > { %310 = vst.msk [vmem:[#allocation2] sm:$0xff] %vm309_vm0, %v8304_v0 }
  0x1b   : > { %311 = vst.msk [vmem:[#allocation2 + $0x8] sm:$0xff] %vm309_vm0, %v8304_v0 }
  0x1c   : > { %314 = vst.msk [vmem:[#allocation2 + $0x18] sm:$0xff] %vm309_vm0, %v8304_v0 }
  0x1d   : > { %315 = vst.msk [vmem:[#allocation2 + $0x20] sm:$0xff] %vm309_vm0, %v8304_v0 }
  0x1e   : > { %317 = vst.msk [vmem:[#allocation2 + $0x30] sm:$0xff] %vm309_vm0, %v8304_v0 }
  0x1f   : > { %318 = vst.msk [vmem:[#allocation2 + $0x38] sm:$0xff] %vm309_vm0, %v8304_v0 }
  0x20   : > { %320 = vst.msk [vmem:[#allocation2 + $0x48] sm:$0xff] %vm309_vm0, %v8304_v0 }
  0x21   : > { %321 = vst.msk [vmem:[#allocation2 + $0x50] sm:$0xff] %vm309_vm0, %v8304_v0 }
  0x22   : > { %323 = vst.msk [vmem:[#allocation2 + $0x60] sm:$0xff] %vm309_vm0, %v8304_v0 }
  0x23   : > { %324 = vst.msk [vmem:[#allocation2 + $0x68] sm:$0xff] %vm309_vm0, %v8304_v0 }
  0x24   : > { %326 = vst.msk [vmem:[#allocation2 + $0x78] sm:$0xff] %vm309_vm0, %v8304_v0 }
  0x25   : > { %327 = vst.msk [vmem:[#allocation2 + $0x80] sm:$0xff] %vm309_vm0, %v8304_v0 }
  0x26   : > { %329 = vst.msk [vmem:[#allocation2 + $0x90] sm:$0xff] %vm309_vm0, %v8304_v0 }
  0x27   : > { %330 = vst.msk [vmem:[#allocation2 + $0x98] sm:$0xff] %vm309_vm0, %v8304_v0 }
  0x28   : > { %332 = vst.msk [vmem:[#allocation2 + $0xa8] sm:$0xff] %vm309_vm0, %v8304_v0 }
  0x29   : > { %333 = vst.msk [vmem:[#allocation2 + $0xb0] sm:$0xff] %vm309_vm0, %v8304_v0 }
  0x2a   : > { %335 = vst.msk [vmem:[#allocation2 + $0xc0] sm:$0xff] %vm309_vm0, %v8304_v0 }
  0x2b   : > { %336 = vst.msk [vmem:[#allocation2 + $0xc8] sm:$0xff] %vm309_vm0, %v8304_v0 }
  0x2c   : > { %338 = vst.msk [vmem:[#allocation2 + $0xd8] sm:$0xff] %vm309_vm0, %v8304_v0 }
  0x2d   : > { %339 = vst.msk [vmem:[#allocation2 + $0xe0] sm:$0xff] %vm309_vm0, %v8304_v0 }
  0x2e   : > { %341 = vst.msk [vmem:[#allocation2 + $0xf0] sm:$0xff] %vm309_vm0, %v8304_v0 }
  0x2f   : > { %342 = vst.msk [vmem:[#allocation2 + $0xf8] sm:$0xff] %vm309_vm0, %v8304_v0 }
  0x30   : > { %344 = vst.msk [vmem:[#allocation2 + $0x108] sm:$0xff] %vm309_vm0, %v8304_v0 }
  0x31   : > { %345 = vst.msk [vmem:[#allocation2 + $0x110] sm:$0xff] %vm309_vm0, %v8304_v0 }
  0x32   : > { %347 = vst.msk [vmem:[#allocation2 + $0x120] sm:$0xff] %vm309_vm0, %v8304_v0 }
  0x33   : > { %348 = vst.msk [vmem:[#allocation2 + $0x128] sm:$0xff] %vm309_vm0, %v8304_v0 }
  0x34   : > { %350 = vst.msk [vmem:[#allocation2 + $0x138] sm:$0xff] %vm309_vm0, %v8304_v0 }
  0x35   : > { %351 = vst.msk [vmem:[#allocation2 + $0x140] sm:$0xff] %vm309_vm0, %v8304_v0 }
  0x36   : > { %353 = vst.msk [vmem:[#allocation2 + $0x150] sm:$0xff] %vm309_vm0, %v8304_v0 }
  0x37   : > { %354 = vst.msk [vmem:[#allocation2 + $0x158] sm:$0xff] %vm309_vm0, %v8304_v0 }
  0x38   : > { %356 = vst.msk [vmem:[#allocation2 + $0x168] sm:$0xff] %vm309_vm0, %v8304_v0 }
  0x39   : > { %357 = vst.msk [vmem:[#allocation2 + $0x170] sm:$0xff] %vm309_vm0, %v8304_v0 }
  0x3a   : > { %359 = vst.msk [vmem:[#allocation2 + $0x180] sm:$0xff] %vm309_vm0, %v8304_v0 }
  0x3b   : > { %360 = vst.msk [vmem:[#allocation2 + $0x188] sm:$0xff] %vm309_vm0, %v8304_v0 }
  0x3c   : > { %362 = vst.msk [vmem:[#allocation2 + $0x198] sm:$0xff] %vm309_vm0, %v8304_v0 }
  0x3d   : > { %363 = vst.msk [vmem:[#allocation2 + $0x1a0] sm:$0xff] %vm309_vm0, %v8304_v0 }
  0x3e   : > { %365 = vst.msk [vmem:[#allocation3] sm:$0xff] %vm309_vm0, %v8304_v0 }
  0x3f   : > { %366 = vst.msk [vmem:[#allocation3 + $0x8] sm:$0xff] %vm309_vm0, %v8304_v0 }
  0x40   : > { %367 = vst.msk [vmem:[#allocation3 + $0x10] sm:$0xff] %vm309_vm0, %v8304_v0 }
  0x41   : > { %368 = vst.msk [vmem:[#allocation3 + $0x18] sm:$0xff] %vm309_vm0, %v8304_v0 }
  0x42   : > { %369 = vst.msk [vmem:[#allocation3 + $0x20] sm:$0xff] %vm309_vm0, %v8304_v0 }
  0x43   : > { %370 = vst.msk [vmem:[#allocation3 + $0x28] sm:$0xff] %vm309_vm0, %v8304_v0 }
  0x44   : > { %371 = vst.msk [vmem:[#allocation3 + $0x30] sm:$0xff] %vm309_vm0, %v8304_v0 }
  0x45   : > { %372 = vst.msk [vmem:[#allocation3 + $0x38] sm:$0xff] %vm309_vm0, %v8304_v0 }
  0x46   : > { %373 = vst.msk [vmem:[#allocation3 + $0x40] sm:$0xff] %vm309_vm0, %v8304_v0 }
  0x47   : > { %374 = vst.msk [vmem:[#allocation3 + $0x48] sm:$0xff] %vm309_vm0, %v8304_v0 }
  0x48   : > { %375 = vst.msk [vmem:[#allocation3 + $0x50] sm:$0xff] %vm309_vm0, %v8304_v0 }
  0x49   : > { %376 = vst.msk [vmem:[#allocation3 + $0x58] sm:$0xff] %vm309_vm0, %v8304_v0 }
  0x4a   : > { %377 = vst.msk [vmem:[#allocation3 + $0x60] sm:$0xff] %vm309_vm0, %v8304_v0 }
  0x4b   : > { %378 = vst.msk [vmem:[#allocation3 + $0x68] sm:$0xff] %vm309_vm0, %v8304_v0 }
  0x4c   : > { %379 = vst.msk [vmem:[#allocation3 + $0x70] sm:$0xff] %vm309_vm0, %v8304_v0 }
  0x4d   : > { %380 = vst.msk [vmem:[#allocation3 + $0x78] sm:$0xff] %vm309_vm0, %v8304_v0 }
  0x4e   : > { %381 = vst.msk [vmem:[#allocation3 + $0x80] sm:$0xff] %vm309_vm0, %v8304_v0 }
  0x4f   : > { %382 = vst.msk [vmem:[#allocation3 + $0x88] sm:$0xff] %vm309_vm0, %v8304_v0 }
  0x50   : > { %383 = vst.msk [vmem:[#allocation3 + $0x90] sm:$0xff] %vm309_vm0, %v8304_v0 }
  0x51   : > { %384 = vst.msk [vmem:[#allocation3 + $0x98] sm:$0xff] %vm309_vm0, %v8304_v0 }
  0x52   : > { %385 = vst.msk [vmem:[#allocation3 + $0xa0] sm:$0xff] %vm309_vm0, %v8304_v0 }
  0x53   : > { %386 = vst.msk [vmem:[#allocation3 + $0xa8] sm:$0xff] %vm309_vm0, %v8304_v0 }
  0x54   : > { %387 = vst.msk [vmem:[#allocation3 + $0xb0] sm:$0xff] %vm309_vm0, %v8304_v0 }
  0x55   : > { %388 = vst.msk [vmem:[#allocation3 + $0xb8] sm:$0xff] %vm309_vm0, %v8304_v0 }
  0x56   : > { %389 = vst.msk [vmem:[#allocation3 + $0xc0] sm:$0xff] %vm309_vm0, %v8304_v0 }
  0x57   : > { %390 = vst.msk [vmem:[#allocation3 + $0xc8] sm:$0xff] %vm309_vm0, %v8304_v0 }
  0x58   : > { %391 = vst.msk [vmem:[#allocation3 + $0xd0] sm:$0xff] %vm309_vm0, %v8304_v0 }
  0x59   : > { %392 = vst.msk [vmem:[#allocation3 + $0xd8] sm:$0xff] %vm309_vm0, %v8304_v0 }
  0x5a   : > { %393 = vst.msk [vmem:[#allocation3 + $0xe0] sm:$0xff] %vm309_vm0, %v8304_v0 }
  0x5b   : > { %394 = vst.msk [vmem:[#allocation3 + $0xe8] sm:$0xff] %vm309_vm0, %v8304_v0 }
  0x5c   : > { %395 = vst.msk [vmem:[#allocation3 + $0xf0] sm:$0xff] %vm309_vm0, %v8304_v0 }
  0x5d   : > { %396 = vst.msk [vmem:[#allocation3 + $0xf8] sm:$0xff] %vm309_vm0, %v8304_v0 }
  0x5e   : > { %313 = vst.msk [vmem:[#allocation2 + $0x10] sm:$0x3] %vm312_vm1, %v8304_v0 }
  0x5f   : > { %316 = vst.msk [vmem:[#allocation2 + $0x28] sm:$0x3] %vm312_vm1, %v8304_v0 }
  0x60   : > { %319 = vst.msk [vmem:[#allocation2 + $0x40] sm:$0x3] %vm312_vm1, %v8304_v0 }
  0x61   : > { %322 = vst.msk [vmem:[#allocation2 + $0x58] sm:$0x3] %vm312_vm1, %v8304_v0 }
  0x62   : > { %325 = vst.msk [vmem:[#allocation2 + $0x70] sm:$0x3] %vm312_vm1, %v8304_v0 }
  0x63   : > { %328 = vst.msk [vmem:[#allocation2 + $0x88] sm:$0x3] %vm312_vm1, %v8304_v0 }
  0x64   : > { %331 = vst.msk [vmem:[#allocation2 + $0xa0] sm:$0x3] %vm312_vm1, %v8304_v0 }
  0x65   : > { %334 = vst.msk [vmem:[#allocation2 + $0xb8] sm:$0x3] %vm312_vm1, %v8304_v0 }
  0x66   : > { %337 = vst.msk [vmem:[#allocation2 + $0xd0] sm:$0x3] %vm312_vm1, %v8304_v0 }
  0x67   : > { %340 = vst.msk [vmem:[#allocation2 + $0xe8] sm:$0x3] %vm312_vm1, %v8304_v0 }
  0x68   : > { %343 = vst.msk [vmem:[#allocation2 + $0x100] sm:$0x3] %vm312_vm1, %v8304_v0 }
  0x69   : > { %346 = vst.msk [vmem:[#allocation2 + $0x118] sm:$0x3] %vm312_vm1, %v8304_v0 }
  0x6a   : > { %349 = vst.msk [vmem:[#allocation2 + $0x130] sm:$0x3] %vm312_vm1, %v8304_v0 }
  0x6b   : > { %352 = vst.msk [vmem:[#allocation2 + $0x148] sm:$0x3] %vm312_vm1, %v8304_v0 }
  0x6c   : > { %355 = vst.msk [vmem:[#allocation2 + $0x160] sm:$0x3] %vm312_vm1, %v8304_v0 }
  0x6d   : > { %358 = vst.msk [vmem:[#allocation2 + $0x178] sm:$0x3] %vm312_vm1, %v8304_v0 }
  0x6e   : > { %361 = vst.msk [vmem:[#allocation2 + $0x190] sm:$0x3] %vm312_vm1, %v8304_v0 }
  0x6f   : > { %364 = vst.msk [vmem:[#allocation2 + $0x1a8] sm:$0x3] %vm312_vm1, %v8304_v0 }
  0x70 PF: > { %v528_v1 = vld [vmem:[%s12532_s1 + $0x18] sm:$0xff]  ;;  %v527_v2 = vld [vmem:[%s12532_s1 + $0x10] sm:$0xff]  ;;  %v526_v3 = vld [vmem:[%s12532_s1 + $0x8] sm:$0xff]  ;;  %vm529_vm2 = vcmask 261120   ;;  %s8305_s18 = smov 32   ;;  %s8307_s13 = smov 96  }
  0x71   : > { %7662 = vmatpush.msra.mxu1 %v528_v1  ;;  %7663 = vmatpush.msra.mxu2 %v528_v1  ;;  %v525_v4 = vld [vmem:[%s12532_s1] sm:$0xff]  ;;  %v7279_v7 = vld [vmem:[%s12532_s1 + $0x58] sm:$0xff]  ;;  %v7278_v12 = vld [vmem:[%s12532_s1 + $0x50] sm:$0xff]  ;;  %p7624_p8 = scmp.ne.s32.totalorder %s8286_s24, 7 }
  0x72   : > { %7664 = vmatpush.msra.mxu3 %v528_v1  ;;  %638 = vmatpush.msra.mxu0 %v528_v1  ;;  %v8578_v5 = vld [vmem:[#allocation2 + $0x60] sm:$0xff]  ;;  %v7243_v9 = vld [vmem:[%s12532_s1 + $0x38] sm:$0xff]  ;;  %v7314_v14 = vld [vmem:[%s12532_s1 + $0x70] sm:$0xff] }
  0x73   : > { %7665 = vmatpush.msra.mxu1 %v527_v2  ;;  %7666 = vmatpush.msra.mxu2 %v527_v2  ;;  %v8580_v6 = vld [vmem:[#allocation2 + $0xc0] sm:$0xff]  ;;  %v7315_v10 = vld [vmem:[%s12532_s1 + $0x78] sm:$0xff]  ;;  %v7242_v15 = vld [vmem:[%s12532_s1 + $0x30] sm:$0xff] }
  0x74   : > { %7667 = vmatpush.msra.mxu3 %v527_v2  ;;  %639 = vmatpush.msra.mxu0 %v527_v2  ;;  %v8585_v8 = vld [vmem:[#allocation2 + $0x120] sm:$0xff]  ;;  %v7351_v13 = vld [vmem:[%s12532_s1 + $0x98] sm:$0xff]  ;;  %v7277_v16 = vld [vmem:[%s12532_s1 + $0x48] sm:$0xff] }
  0x75   : > { %7668 = vmatpush.msra.mxu1 %v526_v3  ;;  %7669 = vmatpush.msra.mxu2 %v526_v3  ;;  %v461_v11 = vld [vmem:[#allocation2] sm:$0xff]  ;;  %v7350_v17 = vld [vmem:[%s12532_s1 + $0x90] sm:$0xff]  ;;  %v7313_v18 = vld [vmem:[%s12532_s1 + $0x68] sm:$0xff] }
  0x76   : > { %7670 = vmatpush.msra.mxu3 %v526_v3  ;;  %640 = vmatpush.msra.mxu0 %v526_v3  ;;  %v8621_v19 = vld [vmem:[#allocation2 + $0x68] sm:$0xff]  ;;  %v8640_v25 = vld [vmem:[#allocation2 + $0x78] sm:$0xff]  ;;  %v7276_v28 = vld [vmem:[%s12532_s1 + $0x40] sm:$0xff] }
  0x77   : > { %7671 = vmatpush.msra.mxu1 %v525_v4  ;;  %7672 = vmatpush.msra.mxu2 %v525_v4  ;;  %v8623_v20 = vld [vmem:[#allocation2 + $0xc8] sm:$0xff]  ;;  %v8642_v26 = vld [vmem:[#allocation2 + $0xd8] sm:$0xff]  ;;  %v7312_v30 = vld [vmem:[%s12532_s1 + $0x60] sm:$0xff] }
  0x78   : > { %7216 = vmatmul.msk.f32.vlgmr.msra.gmra.mxu1 %vm529_vm2, %v8578_v5  ;;  %7224 = vmatmul.msk.f32.vlgmr.msra.gmra.mxu2 %vm529_vm2, %v8580_v6  ;;  %v7241_v21 = vld [vmem:[%s12532_s1 + $0x28] sm:$0xff]  ;;  %v8644_v27 = vld [vmem:[#allocation2 + $0x138] sm:$0xff]  ;;  %v7240_v31 = vld [vmem:[%s12532_s1 + $0x20] sm:$0xff] }
  0x79   : > { %1322 = vmatpush.msrb.mxu2 %v7279_v7  ;;  %7673 = vmatpush.msra.mxu3 %v525_v4  ;;  %v8628_v22 = vld [vmem:[#allocation2 + $0x128] sm:$0xff]  ;;  %v8653_v29 = vld [vmem:[#allocation2 + $0x18] sm:$0xff]  ;;  %v8665_v32 = vld [vmem:[#allocation2 + $0x80] sm:$0xff] }
  0x7a   : > { %7232 = vmatmul.msk.f32.vlgmr.msra.gmra.mxu3 %vm529_vm2, %v8585_v8  ;;  %980 = vmatpush.msrb.mxu1 %v7243_v9  ;;  %v462_v23 = vld [vmem:[#allocation2 + $0x8] sm:$0xff]  ;;  %v8667_v33 = vld [vmem:[#allocation2 + $0xe0] sm:$0xff]  ;;  %v8681_v37 = vld [vmem:[#allocation2 + $0x90] sm:$0xff] }
  0x7b   : > { %1665 = vmatpush.msrb.mxu3 %v7315_v10  ;;  %641 = vmatpush.msra.mxu0 %v525_v4  ;;  %v7349_v24 = vld [vmem:[%s12532_s1 + $0x88] sm:$0xff]  ;;  %v8669_v34 = vld [vmem:[#allocation2 + $0x140] sm:$0xff]  ;;  %v8683_v38 = vld [vmem:[#allocation2 + $0xf0] sm:$0xff] }
  0x7c   : > { %7208 = vmatmul.msk.f32.vlgmr.msra.gmra.mxu0 %vm529_vm2, %v461_v11  ;;  %1323 = vmatpush.msrb.mxu2 %v7278_v12  ;;  %v464_v35 = vld [vmem:[#allocation2 + $0x20] sm:$0xff]  ;;  %v8685_v39 = vld [vmem:[#allocation2 + $0x150] sm:$0xff]  ;;  %v7423_v40 = vld [vmem:[%s12532_s1 + $0xd8] sm:$0xff] }
  0x7d   : > { %2007 = vmatpush.msrb.mxu0 %v7351_v13  ;;  %1666 = vmatpush.msrb.mxu3 %v7314_v14  ;;  %v7348_v36 = vld [vmem:[%s12532_s1 + $0x80] sm:$0xff]  ;;  %v465_v41 = vld [vmem:[#allocation2 + $0x30] sm:$0xff]  ;;  %v7459_v42 = vld [vmem:[%s12532_s1 + $0xf8] sm:$0xff] }
  0x7e   : > { %981 = vmatpush.msrb.mxu1 %v7242_v15  ;;  %1324 = vmatpush.msrb.mxu2 %v7277_v16  ;;  %v7387_v43 = vld [vmem:[%s12532_s1 + $0xb8] sm:$0xff]  ;;  %v8719_v49 = vld [vmem:[#allocation2 + $0xa8] sm:$0xff]  ;;  %v8732_v53 = vld [vmem:[#allocation2 + $0xb0] sm:$0xff] }
  0x7f   : > { %2008 = vmatpush.msrb.mxu0 %v7350_v17  ;;  %1667 = vmatpush.msrb.mxu3 %v7313_v18  ;;  %v8703_v44 = vld [vmem:[#allocation2 + $0x98] sm:$0xff]  ;;  %v8721_v50 = vld [vmem:[#allocation2 + $0x108] sm:$0xff]  ;;  %v8734_v54 = vld [vmem:[#allocation2 + $0x110] sm:$0xff] }
  0x80   : > { %7217 = vmatmul.msk.f32.gmra.mxu1 %vm529_vm2, %v8621_v19  ;;  %7225 = vmatmul.msk.f32.gmra.mxu2 %vm529_vm2, %v8623_v20  ;;  %v8705_v45 = vld [vmem:[#allocation2 + $0xf8] sm:$0xff]  ;;  %v8723_v51 = vld [vmem:[#allocation2 + $0x168] sm:$0xff]  ;;  %v8736_v55 = vld [vmem:[#allocation2 + $0x170] sm:$0xff] }
  0x81   : > { %982 = vmatpush.msrb.mxu1 %v7241_v21  ;;  %2009 = vmatpush.msrb.mxu0 %v7349_v24  ;;  %v8707_v46 = vld [vmem:[#allocation2 + $0x158] sm:$0xff]  ;;  %v467_v52 = vld [vmem:[#allocation2 + $0x48] sm:$0xff]  ;;  %v468_v56 = vld [vmem:[#allocation2 + $0x50] sm:$0xff] }
  0x82   : > { %7233 = vmatmul.msk.f32.gmra.mxu3 %vm529_vm2, %v8628_v22  ;;  %1325 = vmatpush.msrb.mxu2 %v7276_v28  ;;  %v466_v47 = vld [vmem:[#allocation2 + $0x38] sm:$0xff]  ;;  %v803_v57 = vld [vmem:[#allocation2 + $0x1] sm:$0xff]  ;;  %v804_v60 = vld [vmem:[#allocation2 + $0x9] sm:$0xff] }
  0x83   : > { %1668 = vmatpush.msrb.mxu3 %v7312_v30  ;;  %983 = vmatpush.msrb.mxu1 %v7240_v31  ;;  %v7495_v48 = vld [vmem:[%s12532_s1 + $0x118] sm:$0xff]  ;;  %v1145_v58 = vld [vmem:[#allocation2 + $0x2] sm:$0xff]  ;;  %v1146_v61 = vld [vmem:[#allocation2 + $0xa] sm:$0xff] }
  0x84   : > { %7209 = vmatmul.msk.f32.gmra.mxu0 %vm529_vm2, %v462_v23  ;;  %2692 = vmatpush.msra.mxu2 %v7423_v40  ;;  %v1830_v59 = vld [vmem:[#allocation2 + $0x19] sm:$0xff]  ;;  %v1831_v62 = vld [vmem:[#allocation2 + $0x21] sm:$0xff]  ;;  %v1832_v0 = vld [vmem:[#allocation2 + $0x31] sm:$0xff] }
  0x85   : > { %2010 = vmatpush.msrb.mxu0 %v7348_v36  ;;  %3034 = vmatpush.msra.mxu3 %v7459_v42  ;;  %v1147_v63 = vld [vmem:[#allocation2 + $0x1a] sm:$0xff]  ;;  %v1148_v1 = vld [vmem:[#allocation2 + $0x22] sm:$0xff]  ;;  %v1149_v3 = vld [vmem:[#allocation2 + $0x32] sm:$0xff] }
  0x86   : > { %2349 = vmatpush.msra.mxu1 %v7387_v43  ;;  %v1833_v2 = vld [vmem:[#allocation2 + $0x39] sm:$0xff]  ;;  %v7422_v4 = vld [vmem:[%s12532_s1 + $0xd0] sm:$0xff]  ;;  %v1836_v15 = vld [vmem:[#allocation2 + $0x61] sm:$0xff] }
  0x87   : > { %3376 = vmatpush.msra.mxu0 %v7495_v48  ;;  %v1834_v7 = vld [vmem:[#allocation2 + $0x49] sm:$0xff]  ;;  %2693 = vmatpush.msra.mxu2 %v7422_v4  ;;  %v1150_v11 = vld [vmem:[#allocation2 + $0x3a] sm:$0xff]  ;;  %v1835_v12 = vld [vmem:[#allocation2 + $0x51] sm:$0xff] }
  0x88   : > { %7218 = vmatmul.msk.f32.gmra.mxu1 %vm529_vm2, %v8640_v25  ;;  %7226 = vmatmul.msk.f32.gmra.mxu2 %vm529_vm2, %v8642_v26  ;;  %v7458_v9 = vld [vmem:[%s12532_s1 + $0xf0] sm:$0xff]  ;;  %v1153_v21 = vld [vmem:[#allocation2 + $0x62] sm:$0xff]  ;;  %v1838_v23 = vld [vmem:[#allocation2 + $0x79] sm:$0xff] }
  0x89   : > { %3035 = vmatpush.msra.mxu3 %v7458_v9  ;;  %v7386_v10 = vld [vmem:[%s12532_s1 + $0xb0] sm:$0xff]  ;;  %v1839_v31 = vld [vmem:[#allocation2 + $0x81] sm:$0xff] }
  0x8a   : > { %7234 = vmatmul.msk.f32.gmra.mxu3 %vm529_vm2, %v8644_v27  ;;  %2350 = vmatpush.msra.mxu1 %v7386_v10  ;;  %v7494_v13 = vld [vmem:[%s12532_s1 + $0x110] sm:$0xff]  ;;  %v1155_v40 = vld [vmem:[#allocation2 + $0x7a] sm:$0xff]  ;;  %v1156_v48 = vld [vmem:[#allocation2 + $0x82] sm:$0xff] }
  0x8b   : > { %3377 = vmatpush.msra.mxu0 %v7494_v13  ;;  %v1151_v14 = vld [vmem:[#allocation2 + $0x4a] sm:$0xff]  ;;  %v1152_v16 = vld [vmem:[#allocation2 + $0x52] sm:$0xff]  ;;  %v1844_v13 = vld [vmem:[#allocation2 + $0xc1] sm:$0xff] }
  0x8c   : > { %7210 = vmatmul.msk.f32.gmra.mxu0 %vm529_vm2, %v8653_v29  ;;  %v1837_v17 = vld [vmem:[#allocation2 + $0x69] sm:$0xff]  ;;  %v1840_v42 = vld [vmem:[#allocation2 + $0x91] sm:$0xff] }
  0x8d   : > { %v1843_v4 = vld [vmem:[#allocation2 + $0xb1] sm:$0xff] }
  0x90   : > { %7219 = vmatmul.msk.f32.gmra.mxu1 %vm529_vm2, %v8665_v32  ;;  %7227 = vmatmul.msk.f32.gmra.mxu2 %vm529_vm2, %v8667_v33 }
  0x92   : > { %7235 = vmatmul.msk.f32.gmra.mxu3 %vm529_vm2, %v8669_v34 }
  0x94   : > { %7211 = vmatmul.msk.f32.gmra.mxu0 %vm529_vm2, %v464_v35 }
  0x98   : > { %7220 = vmatmul.msk.f32.gmra.mxu1 %vm529_vm2, %v8681_v37  ;;  %7228 = vmatmul.msk.f32.gmra.mxu2 %vm529_vm2, %v8683_v38 }
  0x9a   : > { %7236 = vmatmul.msk.f32.gmra.mxu3 %vm529_vm2, %v8685_v39 }
  0x9c   : > { %7212 = vmatmul.msk.f32.gmra.mxu0 %vm529_vm2, %v465_v41 }
  0xa0   : > { %7221 = vmatmul.msk.f32.gmra.mxu1 %vm529_vm2, %v8703_v44  ;;  %7229 = vmatmul.msk.f32.gmra.mxu2 %vm529_vm2, %v8705_v45 }
  0xa2   : > { %7237 = vmatmul.msk.f32.gmra.mxu3 %vm529_vm2, %v8707_v46 }
  0xa4   : > { %7213 = vmatmul.msk.f32.gmra.mxu0 %vm529_vm2, %v466_v47 }
  0xa8   : > { %7222 = vmatmul.msk.f32.gmra.mxu1 %vm529_vm2, %v8719_v49  ;;  %7230 = vmatmul.msk.f32.gmra.mxu2 %vm529_vm2, %v8721_v50 }
  0xaa   : > { %7238 = vmatmul.msk.f32.gmra.mxu3 %vm529_vm2, %v8723_v51 }
  0xac   : > { %7214 = vmatmul.msk.f32.gmra.mxu0 %vm529_vm2, %v467_v52 }
  0xb0   : > { %7223 = vmatmul.msk.f32.gmra.mxu1 %vm529_vm2, %v8732_v53  ;;  %7231 = vmatmul.msk.f32.gmra.mxu2 %vm529_vm2, %v8734_v54 }
  0xb2   : > { %7239 = vmatmul.msk.f32.gmra.mxu3 %vm529_vm2, %v8736_v55 }
  0xb4   : > { %7215 = vmatmul.msk.f32.gmra.mxu0 %vm529_vm2, %v468_v56 }
  0xb8   : > { %7244 = vmatmul.msk.f32.vlgmr.msrb.gmra.mxu1 %vm529_vm2, %v803_v57  ;;  %7280 = vmatmul.msk.f32.vlgmr.msrb.gmra.mxu2 %vm529_vm2, %v1145_v58 }
  0xba   : > { %7316 = vmatmul.msk.f32.vlgmr.msrb.gmra.mxu3 %vm529_vm2, %v8653_v29  ;;  %v1154_v29 = vld [vmem:[#allocation2 + $0x6a] sm:$0xff] }
  0xbc   : > { %7352 = vmatmul.msk.f32.vlgmr.msrb.gmra.mxu0 %vm529_vm2, %v1830_v59 }
  0xc0   : > { %7245 = vmatmul.msk.f32.gmra.mxu1 %vm529_vm2, %v804_v60  ;;  %7281 = vmatmul.msk.f32.gmra.mxu2 %vm529_vm2, %v1146_v61  ;;  %v7421_v60 = vld [vmem:[%s12532_s1 + $0xc8] sm:$0xff] }
  0xc1   : > { %2694 = vmatpush.msra.mxu2 %v7421_v60 }
  0xc2   : > { %7317 = vmatmul.msk.f32.gmra.mxu3 %vm529_vm2, %v464_v35 }
  0xc4   : > { %7353 = vmatmul.msk.f32.gmra.mxu0 %vm529_vm2, %v1831_v62 }
  0xc8   : > { %7246 = vmatmul.msk.f32.gmra.mxu1 %vm529_vm2, %v1830_v59  ;;  %7282 = vmatmul.msk.f32.gmra.mxu2 %vm529_vm2, %v1147_v63  ;;  %v1157_v59 = vld [vmem:[#allocation2 + $0x92] sm:$0xff] }
  0xca   : > { %7318 = vmatmul.msk.f32.gmra.mxu3 %vm529_vm2, %v465_v41 }
  0xcc   : > { %7354 = vmatmul.msk.f32.gmra.mxu0 %vm529_vm2, %v1832_v0 }
  0xd0   : > { %7247 = vmatmul.msk.f32.gmra.mxu1 %vm529_vm2, %v1831_v62  ;;  %7283 = vmatmul.msk.f32.gmra.mxu2 %vm529_vm2, %v1148_v1  ;;  %v7457_v62 = vld [vmem:[%s12532_s1 + $0xe8] sm:$0xff] }
  0xd1   : > { %3036 = vmatpush.msra.mxu3 %v7457_v62  ;;  %v398_v62 = vld [vmem:[%s8391_s19 + $0x8] sm:$0xff] }
  0xd2   : > { %7319 = vmatmul.msk.f32.gmra.mxu3 %vm529_vm2, %v466_v47 }
  0xd4   : > { %7355 = vmatmul.msk.f32.gmra.mxu0 %vm529_vm2, %v1833_v2 }
  0xd8   : > { %7248 = vmatmul.msk.f32.gmra.mxu1 %vm529_vm2, %v1832_v0  ;;  %7284 = vmatmul.msk.f32.gmra.mxu2 %vm529_vm2, %v1149_v3  ;;  %v7385_v0 = vld [vmem:[%s12532_s1 + $0xa8] sm:$0xff]  ;;  %v1158_v3 = vld [vmem:[#allocation2 + $0x9a] sm:$0xff] }
  0xd9   : > { %2351 = vmatpush.msra.mxu1 %v7385_v0 }
  0xda   : > { %7320 = vmatmul.msk.f32.gmra.mxu3 %vm529_vm2, %v467_v52 }
  0xdc   : > { %7356 = vmatmul.msk.f32.gmra.mxu0 %vm529_vm2, %v1834_v7 }
  0xe0   : > { %7249 = vmatmul.msk.f32.gmra.mxu1 %vm529_vm2, %v1833_v2  ;;  %7285 = vmatmul.msk.f32.gmra.mxu2 %vm529_vm2, %v1150_v11 }
  0xe2   : > { %7321 = vmatmul.msk.f32.gmra.mxu3 %vm529_vm2, %v468_v56  ;;  %v1841_v56 = vld [vmem:[#allocation2 + $0x99] sm:$0xff] }
  0xe4   : > { %7357 = vmatmul.msk.f32.gmra.mxu0 %vm529_vm2, %v1835_v12 }
  0xe8   : > { %7250 = vmatmul.msk.f32.gmra.mxu1 %vm529_vm2, %v1834_v7  ;;  %7286 = vmatmul.msk.f32.gmra.mxu2 %vm529_vm2, %v1151_v14  ;;  %v7493_v7 = vld [vmem:[%s12532_s1 + $0x108] sm:$0xff] }
  0xe9   : > { %3378 = vmatpush.msra.mxu0 %v7493_v7 }
  0xea   : > { %7322 = vmatmul.msk.f32.gmra.mxu3 %vm529_vm2, %v8578_v5 }
  0xec   : > { %7358 = vmatmul.msk.f32.gmra.mxu0 %vm529_vm2, %v1836_v15 }
  0xf0   : > { %7251 = vmatmul.msk.f32.gmra.mxu1 %vm529_vm2, %v1835_v12  ;;  %7287 = vmatmul.msk.f32.gmra.mxu2 %vm529_vm2, %v1152_v16  ;;  %v1159_v12 = vld [vmem:[#allocation2 + $0xaa] sm:$0xff] }
  0xf2   : > { %7323 = vmatmul.msk.f32.gmra.mxu3 %vm529_vm2, %v8621_v19 }
  0xf4   : > { %7359 = vmatmul.msk.f32.gmra.mxu0 %vm529_vm2, %v1837_v17 }
  0xf5   : > { %v8792_v18 = vpop.f32.mrf.mxu1 }
  0xf8   : > { %7252 = vmatmul.msk.f32.gmra.mxu1 %vm529_vm2, %v1836_v15  ;;  %7288 = vmatmul.msk.f32.gmra.mxu2 %vm529_vm2, %v1153_v21 }
  0xf9   : > { %v8796_v5 = vpop.f32.mrf.mxu0 }
  0xfa   : > { %7324 = vmatmul.msk.f32.gmra.mxu3 %vm529_vm2, %v8640_v25 }
  0xfb   : > { %v8800_v24 = vpop.f32.mrf.mxu2 }
  0xfc   : > { %7360 = vmatmul.msk.f32.gmra.mxu0 %vm529_vm2, %v1838_v23 }
  0xfd   : > { %v8803_v19 = vpop.f32.mrf.mxu1  ;;  %v8805_v28 = vpop.f32.mrf.mxu3 }
 0x100   : > { %7253 = vmatmul.msk.f32.gmra.mxu1 %vm529_vm2, %v1837_v17  ;;  %7289 = vmatmul.msk.f32.gmra.mxu2 %vm529_vm2, %v1154_v29  ;;  %v1160_v17 = vld [vmem:[#allocation2 + $0xb2] sm:$0xff]  ;;  %v397_v29 = vld [vmem:[%s8391_s19] sm:$0xff] }
 0x101   : > { %v8809_v30 = vpop.f32.mrf.mxu0 }
 0x102   : > { %7325 = vmatmul.msk.f32.gmra.mxu3 %vm529_vm2, %v8665_v32  ;;  %v740_v7 = vadd.f32 %v8809_v30, %v398_v62 }
 0x103   : > { %v8813_v25 = vpop.f32.mrf.mxu2 }
 0x104   : > { %7361 = vmatmul.msk.f32.gmra.mxu0 %vm529_vm2, %v1839_v31 }
 0x105   : > { %v8816_v35 = vpop.f32.mrf.mxu1  ;;  %v8818_v36 = vpop.f32.mrf.mxu3 }
 0x108   : > { %7254 = vmatmul.msk.f32.gmra.mxu1 %vm529_vm2, %v1838_v23  ;;  %7290 = vmatmul.msk.f32.gmra.mxu2 %vm529_vm2, %v1155_v40  ;;  %v1845_v23 = vld [vmem:[#allocation2 + $0xc9] sm:$0xff] }
 0x109   : > { %v8822_v41 = vpop.f32.mrf.mxu0 }
 0x10a   : > { %7326 = vmatmul.msk.f32.gmra.mxu3 %vm529_vm2, %v8681_v37 }
 0x10b   : > { %v8826_v32 = vpop.f32.mrf.mxu2 }
 0x10c   : > { %7362 = vmatmul.msk.f32.gmra.mxu0 %vm529_vm2, %v1840_v42 }
 0x10d   : > { %v8829_v43 = vpop.f32.mrf.mxu1  ;;  %v8831_v47 = vpop.f32.mrf.mxu3 }
 0x110   : > { %7255 = vmatmul.msk.f32.gmra.mxu1 %vm529_vm2, %v1839_v31  ;;  %7291 = vmatmul.msk.f32.gmra.mxu2 %vm529_vm2, %v1156_v48  ;;  %v739_v48 = vadd.f32 %v8796_v5, %v397_v29 }
 0x111   : > { %v8835_v52 = vpop.f32.mrf.mxu0 }
 0x112   : > { %7327 = vmatmul.msk.f32.gmra.mxu3 %vm529_vm2, %v8703_v44  ;;  %v1842_v44 = vld [vmem:[#allocation2 + $0xa9] sm:$0xff] }
 0x113   : > { %v8839_v37 = vpop.f32.mrf.mxu2 }
 0x114   : > { %7363 = vmatmul.msk.f32.gmra.mxu0 %vm529_vm2, %v1841_v56 }
 0x115   : > { %v8842_v57 = vpop.f32.mrf.mxu1  ;;  %v8844_v58 = vpop.f32.mrf.mxu3 }
 0x118   : > { %7256 = vmatmul.msk.f32.gmra.mxu1 %vm529_vm2, %v1840_v42  ;;  %7292 = vmatmul.msk.f32.gmra.mxu2 %vm529_vm2, %v1157_v59  ;;  %v1161_v42 = vld [vmem:[#allocation2 + $0xc2] sm:$0xff]  ;;  %v1846_v59 = vld [vmem:[#allocation2 + $0xd9] sm:$0xff] }
 0x119   : > { %v8851_v61 = vpop.f32.mrf.mxu0 }
 0x11a   : > { %7328 = vmatmul.msk.f32.gmra.mxu3 %vm529_vm2, %v8719_v49 }
 0x11b   : > { %v8858_v63 = vpop.f32.mrf.mxu2 }
 0x11c   : > { %7364 = vmatmul.msk.f32.gmra.mxu0 %vm529_vm2, %v1842_v44 }
 0x11d   : > { %v8864_v1 = vpop.f32.mrf.mxu1  ;;  %v8866_v2 = vpop.f32.mrf.mxu3 }
 0x120   : > { %7257 = vmatmul.msk.f32.gmra.mxu1 %vm529_vm2, %v1841_v56  ;;  %7293 = vmatmul.msk.f32.gmra.mxu2 %vm529_vm2, %v1158_v3 }
 0x121   : > { %v8870_v49 = vpop.f32.mrf.mxu0 }
 0x122   : > { %7329 = vmatmul.msk.f32.gmra.mxu3 %vm529_vm2, %v8732_v53 }
 0x123   : > { %v8877_v9 = vpop.f32.mrf.mxu2 }
 0x124   : > { %7365 = vmatmul.msk.f32.gmra.mxu0 %vm529_vm2, %v1843_v4 }
 0x125   : > { %v8880_v10 = vpop.f32.mrf.mxu1  ;;  %v8882_v11 = vpop.f32.mrf.mxu3 }
 0x128   : > { %7258 = vmatmul.msk.f32.gmra.mxu1 %vm529_vm2, %v1842_v44  ;;  %7294 = vmatmul.msk.f32.gmra.mxu2 %vm529_vm2, %v1159_v12 }
 0x129   : > { %v8886_v53 = vpop.f32.mrf.mxu0 }
 0x12a   : > { %7330 = vmatmul.msk.f32.gmra.mxu3 %vm529_vm2, %v8580_v6 }
 0x12b   : > { %v8890_v14 = vpop.f32.mrf.mxu2 }
 0x12c   : > { %7366 = vmatmul.msk.f32.gmra.mxu0 %vm529_vm2, %v1844_v13 }
 0x12d   : > { %v8893_v15 = vpop.f32.mrf.mxu1  ;;  %v8895_v16 = vpop.f32.mrf.mxu3 }
 0x130   : > { %7259 = vmatmul.msk.f32.gmra.mxu1 %vm529_vm2, %v1843_v4  ;;  %7295 = vmatmul.msk.f32.gmra.mxu2 %vm529_vm2, %v1160_v17  ;;  %v1162_v4 = vld [vmem:[#allocation2 + $0xca] sm:$0xff] }
 0x131   : > { %v8899_v21 = vpop.f32.mrf.mxu0 }
 0x132   : > { %7331 = vmatmul.msk.f32.gmra.mxu3 %vm529_vm2, %v8623_v20 }
 0x133   : > { %v8903_v6 = vpop.f32.mrf.mxu2 }
 0x134   : > { %7367 = vmatmul.msk.f32.gmra.mxu0 %vm529_vm2, %v1845_v23 }
 0x135   : > { %v8907_v31 = vpop.f32.mrf.mxu3  ;;  %v985_v40 = vpop.f32.mrf.mxu1 }
 0x136   : > { %v1081_v60 = vadd.f32 %v985_v40, %v739_v48 }
 0x138   : > { %7260 = vmatmul.msk.f32.gmra.mxu1 %vm529_vm2, %v1844_v13  ;;  %7296 = vmatmul.msk.f32.gmra.mxu2 %vm529_vm2, %v1161_v42  ;;  %v399_v42 = vld [vmem:[%s8391_s19 + $0x10] sm:$0xff] }
 0x139   : > { %v2012_v56 = vpop.f32.mrf.mxu0 }
 0x13a   : > { %7332 = vmatmul.msk.f32.gmra.mxu3 %vm529_vm2, %v8642_v26  ;;  %v1847_v26 = vld [vmem:[#allocation2 + $0xe1] sm:$0xff] }
 0x13b   : > { %v1327_v20 = vpop.f32.mrf.mxu2 }
 0x13c   : > { %v1423_v44 = vadd.f32 %v1327_v20, %v1081_v60  ;;  %7368 = vmatmul.msk.f32.gmra.mxu0 %vm529_vm2, %v1846_v59 }
 0x13d   : > { %v988_v0 = vpop.f32.mrf.mxu1  ;;  %v1670_v3 = vpop.f32.mrf.mxu3 }
 0x13e   : > { %v1766_v5 = vadd.f32 %v1670_v3, %v1423_v44  ;;  %v1082_v17 = vadd.f32 %v988_v0, %v740_v7  ;;  %v1164_v7 = vld [vmem:[#allocation2 + $0xe2] sm:$0xff] }
 0x140   : > { %v8917_v12 = vadd.f32 %v2012_v56, %v1766_v5  ;;  %7261 = vmatmul.msk.f32.gmra.mxu1 %vm529_vm2, %v1845_v23  ;;  %7297 = vmatmul.msk.f32.gmra.mxu2 %vm529_vm2, %v1162_v4  ;;  %v1163_v56 = vld [vmem:[#allocation2 + $0xda] sm:$0xff]  ;;  %v741_v23 = vadd.f32 %v8822_v41, %v399_v42 }
 0x141   : > { %v2015_v13 = vpop.f32.mrf.mxu0  ;;  %v400_v4 = vld [vmem:[%s8391_s19 + $0x18] sm:$0xff] }
 0x142   : > { %7333 = vmatmul.msk.f32.gmra.mxu3 %vm529_vm2, %v8667_v33  ;;  %v1848_v33 = vld [vmem:[#allocation2 + $0xf1] sm:$0xff] }
 0x143   : > { %v1330_v29 = vpop.f32.mrf.mxu2 }
 0x144   : > { %v1424_v40 = vadd.f32 %v1330_v29, %v1082_v17  ;;  %7369 = vmatmul.msk.f32.gmra.mxu0 %vm529_vm2, %v1847_v26 }
 0x145   : > { %v991_v48 = vpop.f32.mrf.mxu1  ;;  %v1673_v30 = vpop.f32.mrf.mxu3 }
 0x146   : > { %v1767_v60 = vadd.f32 %v1673_v30, %v1424_v40  ;;  %v1083_v62 = vadd.f32 %v991_v48, %v741_v23  ;;  %v401_v30 = vld [vmem:[%s8391_s19 + $0x20] sm:$0xff] }
 0x148   : > { %v8926_v20 = vadd.f32 %v2015_v13, %v1767_v60  ;;  %7262 = vmatmul.msk.f32.gmra.mxu1 %vm529_vm2, %v1846_v59  ;;  %7298 = vmatmul.msk.f32.gmra.mxu2 %vm529_vm2, %v1163_v56  ;;  %v742_v59 = vadd.f32 %v8835_v52, %v400_v4  ;;  %v1165_v52 = vld [vmem:[#allocation2 + $0xf2] sm:$0xff] }
 0x149   : > { %v2018_v44 = vpop.f32.mrf.mxu0 }
 0x14a   : > { %12574 = vst [vmem:[#allocation5_spill] sm:$0xff] %v8926_v20  ;;  %7334 = vmatmul.msk.f32.gmra.mxu3 %vm529_vm2, %v8683_v38  ;;  %v1849_v38 = vld [vmem:[#allocation2 + $0xf9] sm:$0xff] }
 0x14b   : > { %v1333_v0 = vpop.f32.mrf.mxu2 }
 0x14c   : > { %v1425_v3 = vadd.f32 %v1333_v0, %v1083_v62  ;;  %7370 = vmatmul.msk.f32.gmra.mxu0 %vm529_vm2, %v1848_v33  ;;  %v1850_v0 = vld [vmem:[#allocation2 + $0x109] sm:$0xff] }
 0x14d   : > { %v994_v5 = vpop.f32.mrf.mxu1  ;;  %v1676_v41 = vpop.f32.mrf.mxu3 }
 0x14e   : > { %v1768_v13 = vadd.f32 %v1676_v41, %v1425_v3  ;;  %v1084_v40 = vadd.f32 %v994_v5, %v742_v59  ;;  %v7384_v5 = vld [vmem:[%s12532_s1 + $0xa0] sm:$0xff]  ;;  %v402_v41 = vld [vmem:[%s8391_s19 + $0x28] sm:$0xff] }
 0x14f   : > { %v1166_v59 = vld [vmem:[#allocation2 + $0xfa] sm:$0xff]  ;;  %2352 = vmatpush.msra.mxu1 %v7384_v5 }
 0x150   : > { %v8935_v17 = vadd.f32 %v2018_v44, %v1768_v13  ;;  %7263 = vmatmul.msk.f32.gmra.mxu1 %vm529_vm2, %v1847_v26  ;;  %7299 = vmatmul.msk.f32.gmra.mxu2 %vm529_vm2, %v1164_v7  ;;  %v743_v44 = vadd.f32 %v8851_v61, %v401_v30  ;;  %v7456_v61 = vld [vmem:[%s12532_s1 + $0xe0] sm:$0xff] }
 0x151   : > { %v2021_v29 = vpop.f32.mrf.mxu0  ;;  %3037 = vmatpush.msra.mxu3 %v7456_v61  ;;  %v1852_v61 = vld [vmem:[#allocation2 + $0x121] sm:$0xff] }
 0x152   : > { %12575 = vst [vmem:[#allocation6_spill] sm:$0xff] %v8935_v17  ;;  %7335 = vmatmul.msk.f32.gmra.mxu3 %vm529_vm2, %v8705_v45  ;;  %v7420_v45 = vld [vmem:[%s12532_s1 + $0xc0] sm:$0xff] }
 0x153   : > { %v1336_v42 = vpop.f32.mrf.mxu2  ;;  %2695 = vmatpush.msra.mxu2 %v7420_v45 }
 0x154   : > { %v1426_v48 = vadd.f32 %v1336_v42, %v1084_v40  ;;  %7371 = vmatmul.msk.f32.gmra.mxu0 %vm529_vm2, %v1849_v38 }
 0x155   : > { %v997_v56 = vpop.f32.mrf.mxu1  ;;  %v1679_v60 = vpop.f32.mrf.mxu3 }
 0x156   : > { %v1769_v23 = vadd.f32 %v1679_v60, %v1426_v48  ;;  %v1085_v3 = vadd.f32 %v997_v56, %v743_v44  ;;  %v1851_v48 = vld [vmem:[#allocation2 + $0x111] sm:$0xff]  ;;  %v7492_v56 = vld [vmem:[%s12532_s1 + $0x100] sm:$0xff] }
 0x157   : > { %3379 = vmatpush.msra.mxu0 %v7492_v56  ;;  %v1167_v44 = vld [vmem:[#allocation2 + $0x10a] sm:$0xff] }
 0x158   : > { %v8944_v26 = vadd.f32 %v2021_v29, %v1769_v23  ;;  %7264 = vmatmul.msk.f32.gmra.mxu1 %vm529_vm2, %v1848_v33  ;;  %7300 = vmatmul.msk.f32.gmra.mxu2 %vm529_vm2, %v1165_v52  ;;  %v744_v29 = vadd.f32 %v8870_v49, %v402_v41  ;;  %v403_v49 = vld [vmem:[%s8391_s19 + $0x30] sm:$0xff]  ;;  %v404_v41 = vld [vmem:[%s8391_s19 + $0x38] sm:$0xff] }
 0x159   : > { %v2024_v62 = vpop.f32.mrf.mxu0 }
 0x15a   : > { %12576 = vst [vmem:[#allocation7_spill] sm:$0xff] %v8944_v26  ;;  %7336 = vmatmul.msk.f32.gmra.mxu3 %vm529_vm2, %v8721_v50  ;;  %v3202_v26 = vld [vmem:[#allocation2 + $0x52] sm:$0xff] }
 0x15b   : > { %v1339_v4 = vpop.f32.mrf.mxu2 }
 0x15c   : > { %v1427_v33 = vadd.f32 %v1339_v4, %v1085_v3  ;;  %7372 = vmatmul.msk.f32.gmra.mxu0 %vm529_vm2, %v1850_v0 }
 0x15d   : > { %v1000_v7 = vpop.f32.mrf.mxu1  ;;  %v1682_v13 = vpop.f32.mrf.mxu3 }
 0x15e   : > { %v1770_v50 = vadd.f32 %v1682_v13, %v1427_v33  ;;  %v1086_v30 = vadd.f32 %v1000_v7, %v744_v29  ;;  %v1168_v13 = vld [vmem:[#allocation2 + $0x112] sm:$0xff] }
 0x160   : > { %v8962_v40 = vadd.f32 %v2024_v62, %v1770_v50  ;;  %7265 = vmatmul.msk.f32.gmra.mxu1 %vm529_vm2, %v1849_v38  ;;  %7301 = vmatmul.msk.f32.gmra.mxu2 %vm529_vm2, %v1166_v59  ;;  %v745_v62 = vadd.f32 %v8886_v53, %v403_v49 }
 0x161   : > { %v2027_v42 = vpop.f32.mrf.mxu0 }
 0x162   : > { %12577 = vst [vmem:[#allocation8_spill] sm:$0xff] %v8962_v40  ;;  %7337 = vmatmul.msk.f32.gmra.mxu3 %vm529_vm2, %v8734_v54  ;;  %v9286_v40 = vld [vmem:[#allocation3 + $0xf0] sm:$0xff] }
 0x163   : > { %v1342_v60 = vpop.f32.mrf.mxu2 }
 0x164   : > { %v1428_v52 = vadd.f32 %v1342_v60, %v1086_v30  ;;  %7373 = vmatmul.msk.f32.gmra.mxu0 %vm529_vm2, %v1851_v48  ;;  %v405_v60 = vld [vmem:[%s8391_s19 + $0x40] sm:$0xff] }
 0x165   : > { %v1003_v38 = vpop.f32.mrf.mxu1  ;;  %v1685_v23 = vpop.f32.mrf.mxu3 }
 0x166   : > { %v1771_v45 = vadd.f32 %v1685_v23, %v1428_v52  ;;  %v1087_v4 = vadd.f32 %v1003_v38, %v745_v62  ;;  %v8998_v62 = vld [vmem:[#allocation3] sm:$0xff] }
 0x168   : > { %v8974_v3 = vadd.f32 %v2027_v42, %v1771_v45  ;;  %7266 = vmatmul.msk.f32.gmra.mxu1 %vm529_vm2, %v1850_v0  ;;  %7302 = vmatmul.msk.f32.gmra.mxu2 %vm529_vm2, %v1167_v44  ;;  %v746_v0 = vadd.f32 %v8899_v21, %v404_v41  ;;  %v1169_v21 = vld [vmem:[#allocation2 + $0x122] sm:$0xff] }
 0x169   : > { %v2030_v54 = vpop.f32.mrf.mxu0 }
 0x16a   : > { %12578 = vst [vmem:[#allocation9_spill] sm:$0xff] %v8974_v3  ;;  %7338 = vmatmul.msk.f32.gmra.mxu3 %vm529_vm2, %v8585_v8  ;;  %v1853_v8 = vld [vmem:[#allocation2 + $0x129] sm:$0xff] }
 0x16b   : > { %v1345_v33 = vpop.f32.mrf.mxu2 }
 0x16c   : > { %v1429_v5 = vadd.f32 %v1345_v33, %v1087_v4  ;;  %7374 = vmatmul.msk.f32.gmra.mxu0 %vm529_vm2, %v1852_v61 }
 0x16d   : > { %v1006_v7 = vpop.f32.mrf.mxu1  ;;  %v1688_v53 = vpop.f32.mrf.mxu3 }
 0x16e   : > { %v1772_v59 = vadd.f32 %v1688_v53, %v1429_v5  ;;  %v1088_v42 = vadd.f32 %v1006_v7, %v746_v0  ;;  %v1170_v7 = vld [vmem:[#allocation2 + $0x12a] sm:$0xff]  ;;  %v9007_v53 = vld [vmem:[#allocation3 + $0x10] sm:$0xff] }
 0x170   : > { %v8983_v50 = vadd.f32 %v2030_v54, %v1772_v59  ;;  %7267 = vmatmul.msk.f32.gmra.mxu1 %vm529_vm2, %v1851_v48  ;;  %7303 = vmatmul.msk.f32.gmra.mxu2 %vm529_vm2, %v1168_v13  ;;  %v747_v48 = vadd.f32 %v8792_v18, %v405_v60  ;;  %v4309_v54 = vld [vmem:[%s12534_s3] sm:$0xff]  ;;  %v4311_v13 = vld [vmem:[%s12534_s3 + $0x10] sm:$0xff]  ;;  %v9021_v60 = vld [vmem:[#allocation3 + $0x8] sm:$0xff] }
 0x171   : > { %v2033_v29 = vpop.f32.mrf.mxu0  ;;  %v4341_v18 = vmul.f32 %v4309_v54, %v8998_v62  ;;  %v4343_v59 = vmul.f32 %v4311_v13, %v9007_v53  ;;  %v4313_v54 = vld [vmem:[%s12534_s3 + $0x20] sm:$0xff] }
 0x172   : > { %12579 = vst [vmem:[#allocation10_spill] sm:$0xff] %v8983_v50  ;;  %7339 = vmatmul.msk.f32.gmra.mxu3 %vm529_vm2, %v8628_v22  ;;  %v1854_v22 = vld [vmem:[#allocation2 + $0x139] sm:$0xff]  ;;  %v9257_v50 = vld [vmem:[#allocation3 + $0xd8] sm:$0xff] }
 0x173   : > { %v1348_v30 = vpop.f32.mrf.mxu2  ;;  %4405 = vrot.lane.b32.xlu0 %v4341_v18, %s8305_s18  ;;  %4409 = vrot.lane.b32.xlu1 %v4343_v59, %s8305_s18 }
 0x174   : > { %v1430_v56 = vadd.f32 %v1348_v30, %v1088_v42  ;;  %7375 = vmatmul.msk.f32.gmra.mxu0 %vm529_vm2, %v1853_v8  ;;  %v1855_v30 = vld [vmem:[#allocation2 + $0x141] sm:$0xff] }
 0x175   : > { %v1009_v52 = vpop.f32.mrf.mxu1  ;;  %v1691_v49 = vpop.f32.mrf.mxu3 }
 0x176   : > { %v1773_v38 = vadd.f32 %v1691_v49, %v1430_v56  ;;  %v1089_v45 = vadd.f32 %v1009_v52, %v747_v48 }
 0x178   : > { %v8992_v23 = vadd.f32 %v2033_v29, %v1773_v38  ;;  %7268 = vmatmul.msk.f32.gmra.mxu1 %vm529_vm2, %v1852_v61  ;;  %7304 = vmatmul.msk.f32.gmra.mxu2 %vm529_vm2, %v1169_v21  ;;  %v406_v61 = vld [vmem:[%s8391_s19 + $0x48] sm:$0xff]  ;;  %v407_v21 = vld [vmem:[%s8391_s19 + $0x50] sm:$0xff] }
 0x179   : > { %v2036_v44 = vpop.f32.mrf.mxu0  ;;  %v748_v0 = vadd.f32 %v8803_v19, %v406_v61  ;;  %v4310_v19 = vld [vmem:[%s12534_s3 + $0x8] sm:$0xff]  ;;  %v749_v61 = vadd.f32 %v8816_v35, %v407_v21  ;;  %v9051_v35 = vld [vmem:[#allocation3 + $0x30] sm:$0xff] }
 0x17a   : > { %12580 = vst [vmem:[#allocation11_spill] sm:$0xff] %v8992_v23  ;;  %7340 = vmatmul.msk.f32.gmra.mxu3 %vm529_vm2, %v8644_v27  ;;  %v4342_v49 = vmul.f32 %v4310_v19, %v9021_v60  ;;  %v4314_v21 = vld [vmem:[%s12534_s3 + $0x28] sm:$0xff] }
 0x17b   : > { %v1351_v4 = vpop.f32.mrf.mxu2 }
 0x17c   : > { %v1431_v33 = vadd.f32 %v1351_v4, %v1089_v45  ;;  %7376 = vmatmul.msk.f32.gmra.mxu0 %vm529_vm2, %v1854_v22  ;;  %4407 = vrot.lane.b32.xlu0 %v4342_v49, %s8305_s18  ;;  %v9035_v4 = vld [vmem:[#allocation3 + $0x18] sm:$0xff] }
 0x17d   : > { %v1012_v5 = vpop.f32.mrf.mxu1  ;;  %v1694_v41 = vpop.f32.mrf.mxu3  ;;  %v1172_v49 = vld [vmem:[#allocation2 + $0x142] sm:$0xff] }
 0x17e   : > { %v1774_v27 = vadd.f32 %v1694_v41, %v1431_v33  ;;  %v1090_v56 = vadd.f32 %v1012_v5, %v748_v0  ;;  %v4312_v33 = vld [vmem:[%s12534_s3 + $0x18] sm:$0xff] }
 0x17f   : > { %v4344_v41 = vmul.f32 %v4312_v33, %v9035_v4 }
 0x180   : > { %v9014_v29 = vadd.f32 %v2036_v44, %v1774_v27  ;;  %7269 = vmatmul.msk.f32.gmra.mxu1 %vm529_vm2, %v1853_v8  ;;  %7305 = vmatmul.msk.f32.gmra.mxu2 %vm529_vm2, %v1170_v7  ;;  %v1171_v44 = vld [vmem:[#allocation2 + $0x13a] sm:$0xff]  ;;  %v1856_v27 = vld [vmem:[#allocation2 + $0x151] sm:$0xff] }
 0x181   : > { %v2039_v42 = vpop.f32.mrf.mxu0  ;;  %4411 = vrot.lane.b32.xlu1 %v4344_v41, %s8305_s18 }
 0x182   : > { %12581 = vst [vmem:[#allocation12_spill] sm:$0xff] %v9014_v29  ;;  %7341 = vmatmul.msk.f32.gmra.mxu3 %vm529_vm2, %v8669_v34  ;;  %v9030_v34 = vld [vmem:[#allocation3 + $0x20] sm:$0xff] }
 0x183   : > { %v1354_v52 = vpop.f32.mrf.mxu2  ;;  %v4345_v18 = vmul.f32 %v4313_v54, %v9030_v34 }
 0x184   : > { %v1432_v8 = vadd.f32 %v1354_v52, %v1090_v56  ;;  %7377 = vmatmul.msk.f32.gmra.mxu0 %vm529_vm2, %v1855_v30  ;;  %v408_v56 = vld [vmem:[%s8391_s19 + $0x58] sm:$0xff] }
 0x185   : > { %v1015_v38 = vpop.f32.mrf.mxu1  ;;  %v1697_v48 = vpop.f32.mrf.mxu3  ;;  %4413 = vrot.lane.b32.xlu2 %v4345_v18, %s8305_s18 }
 0x186   : > { %v1775_v45 = vadd.f32 %v1697_v48, %v1432_v8  ;;  %v1091_v13 = vadd.f32 %v1015_v38, %v749_v61  ;;  %v9060_v8 = vld [vmem:[#allocation3 + $0x28] sm:$0xff]  ;;  %v9065_v38 = vld [vmem:[#allocation3 + $0x38] sm:$0xff] }
 0x187   : > { %v4346_v48 = vmul.f32 %v4314_v21, %v9060_v8  ;;  %v1857_v61 = vld [vmem:[#allocation2 + $0x159] sm:$0xff]  ;;  %v4319_v21 = vld [vmem:[%s12534_s3 + $0x50] sm:$0xff] }
 0x188   : > { %v9042_v5 = vadd.f32 %v2039_v42, %v1775_v45  ;;  %7270 = vmatmul.msk.f32.gmra.mxu1 %vm529_vm2, %v1854_v22  ;;  %7306 = vmatmul.msk.f32.gmra.mxu2 %vm529_vm2, %v1171_v44  ;;  %v4315_v22 = vld [vmem:[%s12534_s3 + $0x30] sm:$0xff]  ;;  %v4316_v44 = vld [vmem:[%s12534_s3 + $0x38] sm:$0xff]  ;;  %v750_v45 = vadd.f32 %v8829_v43, %v408_v56 }
 0x189   : > { %v2042_v7 = vpop.f32.mrf.mxu0  ;;  %v4347_v0 = vmul.f32 %v4315_v22, %v9051_v35  ;;  %v4348_v18 = vmul.f32 %v4316_v44, %v9065_v38  ;;  %v9081_v43 = vld [vmem:[#allocation3 + $0x48] sm:$0xff] }
 0x18a   : > { %12582 = vst [vmem:[#allocation13_spill] sm:$0xff] %v9042_v5  ;;  %7342 = vmatmul.msk.f32.gmra.mxu3 %vm529_vm2, %v8685_v39  ;;  %v1173_v56 = vld [vmem:[#allocation2 + $0x152] sm:$0xff] }
 0x18b   : > { %v1357_v59 = vpop.f32.mrf.mxu2  ;;  %4417 = vrot.lane.b32.xlu0 %v4347_v0, %s8305_s18  ;;  %4419 = vrot.lane.b32.xlu1 %v4348_v18, %s8305_s18  ;;  %v9228_v5 = vld [vmem:[#allocation3 + $0xc0] sm:$0xff] }
 0x18c   : > { %v1433_v42 = vadd.f32 %v1357_v59, %v1091_v13  ;;  %7378 = vmatmul.msk.f32.gmra.mxu0 %vm529_vm2, %v1856_v27  ;;  %v409_v59 = vld [vmem:[%s8391_s19 + $0x60] sm:$0xff] }
 0x18d   : > { %v1018_v19 = vpop.f32.mrf.mxu1  ;;  %v1700_v52 = vpop.f32.mrf.mxu3  ;;  %4415 = vrot.lane.b32.xlu2 %v4346_v48, %s8305_s18  ;;  %v751_v48 = vadd.f32 %v8842_v57, %v409_v59  ;;  %v9111_v57 = vld [vmem:[#allocation3 + $0x60] sm:$0xff] }
 0x18e   : > { %v1776_v39 = vadd.f32 %v1700_v52, %v1433_v42  ;;  %v1092_v41 = vadd.f32 %v1018_v19, %v750_v45  ;;  %v9090_v19 = vld [vmem:[#allocation3 + $0x40] sm:$0xff]  ;;  %v4317_v52 = vld [vmem:[%s12534_s3 + $0x40] sm:$0xff] }
 0x190   : > { %v9072_v54 = vadd.f32 %v2042_v7, %v1776_v39  ;;  %7271 = vmatmul.msk.f32.gmra.mxu1 %vm529_vm2, %v1855_v30  ;;  %7307 = vmatmul.msk.f32.gmra.mxu2 %vm529_vm2, %v1172_v49  ;;  %v4318_v30 = vld [vmem:[%s12534_s3 + $0x48] sm:$0xff]  ;;  %v9095_v49 = vld [vmem:[#allocation3 + $0x50] sm:$0xff]  ;;  %v4349_v39 = vmul.f32 %v4317_v52, %v9090_v19  ;;  %v9125_v52 = vld [vmem:[#allocation3 + $0x68] sm:$0xff] }
 0x191   : > { %v2045_v33 = vpop.f32.mrf.mxu0  ;;  %v4350_v13 = vmul.f32 %v4318_v30, %v9081_v43  ;;  %v4351_v45 = vmul.f32 %v4319_v21, %v9095_v49  ;;  %v4322_v21 = vld [vmem:[%s12534_s3 + $0x68] sm:$0xff] }
 0x192   : > { %12583 = vst [vmem:[#allocation14_spill] sm:$0xff] %v9072_v54  ;;  %7343 = vmatmul.msk.f32.gmra.mxu3 %vm529_vm2, %v8707_v46 }
 0x193   : > { %v1360_v7 = vpop.f32.mrf.mxu2  ;;  %4423 = vrot.lane.b32.xlu0 %v4350_v13, %s8305_s18  ;;  %4425 = vrot.lane.b32.xlu1 %v4351_v45, %s8305_s18 }
 0x194   : > { %v1434_v22 = vadd.f32 %v1360_v7, %v1092_v41  ;;  %7379 = vmatmul.msk.f32.gmra.mxu0 %vm529_vm2, %v1857_v61  ;;  %v1858_v41 = vld [vmem:[#allocation2 + $0x169] sm:$0xff] }
 0x195   : > { %v1021_v0 = vpop.f32.mrf.mxu1  ;;  %v1703_v42 = vpop.f32.mrf.mxu3  ;;  %4421 = vrot.lane.b32.xlu2 %v4349_v39, %s8305_s18 }
 0x196   : > { %v1777_v46 = vadd.f32 %v1703_v42, %v1434_v22  ;;  %v1093_v30 = vadd.f32 %v1021_v0, %v751_v48  ;;  %v410_v22 = vld [vmem:[%s8391_s19 + $0x68] sm:$0xff]  ;;  %v1174_v42 = vld [vmem:[#allocation2 + $0x15a] sm:$0xff] }
 0x197   : > { %v752_v48 = vadd.f32 %v8864_v1, %v410_v22  ;;  %v9141_v1 = vld [vmem:[#allocation3 + $0x78] sm:$0xff] }
 0x198   : > { %v9102_v44 = vadd.f32 %v2045_v33, %v1777_v46  ;;  %7272 = vmatmul.msk.f32.gmra.mxu1 %vm529_vm2, %v1856_v27  ;;  %7308 = vmatmul.msk.f32.gmra.mxu2 %vm529_vm2, %v1173_v56  ;;  %v4321_v27 = vld [vmem:[%s12534_s3 + $0x60] sm:$0xff]  ;;  %v9120_v56 = vld [vmem:[#allocation3 + $0x58] sm:$0xff]  ;;  %v4320_v46 = vld [vmem:[%s12534_s3 + $0x58] sm:$0xff] }
 0x199   : > { %v2048_v18 = vpop.f32.mrf.mxu0  ;;  %v4353_v7 = vmul.f32 %v4321_v27, %v9111_v57  ;;  %v4352_v39 = vmul.f32 %v4320_v46, %v9120_v56  ;;  %v9150_v46 = vld [vmem:[#allocation3 + $0x70] sm:$0xff] }
 0x19a   : > { %12584 = vst [vmem:[#allocation15_spill] sm:$0xff] %v9102_v44  ;;  %7344 = vmatmul.msk.f32.gmra.mxu3 %vm529_vm2, %v8723_v51  ;;  %v9199_v44 = vld [vmem:[#allocation3 + $0xa8] sm:$0xff] }
 0x19b   : > { %v1363_v33 = vpop.f32.mrf.mxu2  ;;  %4429 = vrot.lane.b32.xlu0 %v4353_v7, %s8305_s18 }
 0x19c   : > { %v1435_v13 = vadd.f32 %v1363_v33, %v1093_v30  ;;  %7380 = vmatmul.msk.f32.gmra.mxu0 %vm529_vm2, %v1858_v41  ;;  %v4354_v30 = vmul.f32 %v4322_v21, %v9125_v52  ;;  %v1859_v33 = vld [vmem:[#allocation2 + $0x171] sm:$0xff] }
 0x19d   : > { %v1024_v59 = vpop.f32.mrf.mxu1  ;;  %v1706_v0 = vpop.f32.mrf.mxu3  ;;  %4427 = vrot.lane.b32.xlu2 %v4352_v39, %s8305_s18  ;;  %v4323_v39 = vld [vmem:[%s12534_s3 + $0x70] sm:$0xff] }
 0x19e   : > { %v1778_v51 = vadd.f32 %v1706_v0, %v1435_v13  ;;  %v1094_v7 = vadd.f32 %v1024_v59, %v752_v48  ;;  %4431 = vrot.lane.b32.xlu1 %v4354_v30, %s8305_s18  ;;  %v411_v0 = vld [vmem:[%s8391_s19 + $0x70] sm:$0xff]  ;;  %v1518_v48 = vld [vmem:[#allocation2 + $0x180] sm:$0xff]  ;;  %v4355_v30 = vmul.f32 %v4323_v39, %v9150_v46 }
 0x19f   : > { %v9155_v21 = vld [vmem:[#allocation3 + $0x80] sm:$0xff] }
 0x1a0   : > { %v9132_v45 = vadd.f32 %v2048_v18, %v1778_v51  ;;  %7273 = vmatmul.msk.f32.gmra.mxu1 %vm529_vm2, %v1857_v61  ;;  %7309 = vmatmul.msk.f32.gmra.mxu2 %vm529_vm2, %v1174_v42  ;;  %v4324_v61 = vld [vmem:[%s12534_s3 + $0x78] sm:$0xff]  ;;  %v1175_v51 = vld [vmem:[#allocation2 + $0x16a] sm:$0xff] }
 0x1a1   : > { %v2051_v27 = vpop.f32.mrf.mxu0  ;;  %v4356_v13 = vmul.f32 %v4324_v61, %v9141_v1  ;;  %v753_v61 = vadd.f32 %v8880_v10, %v411_v0  ;;  %v4327_v10 = vld [vmem:[%s12534_s3 + $0x90] sm:$0xff] }
 0x1a2   : > { %12585 = vst [vmem:[#allocation16_spill] sm:$0xff] %v9132_v45  ;;  %7345 = vmatmul.msk.f32.gmra.mxu3 %vm529_vm2, %v8736_v55  ;;  %v9170_v45 = vld [vmem:[#allocation3 + $0x90] sm:$0xff] }
 0x1a3   : > { %v1366_v18 = vpop.f32.mrf.mxu2  ;;  %4435 = vrot.lane.b32.xlu0 %v4356_v13, %s8305_s18 }
 0x1a4   : > { %v1436_v22 = vadd.f32 %v1366_v18, %v1094_v7  ;;  %7381 = vmatmul.msk.f32.gmra.mxu0 %vm529_vm2, %v1859_v33  ;;  %v4325_v7 = vld [vmem:[%s12534_s3 + $0x80] sm:$0xff] }
 0x1a5   : > { %v1027_v42 = vpop.f32.mrf.mxu1  ;;  %v1709_v59 = vpop.f32.mrf.mxu3  ;;  %v4357_v13 = vmul.f32 %v4325_v7, %v9155_v21  ;;  %4433 = vrot.lane.b32.xlu2 %v4355_v30, %s8305_s18  ;;  %v9179_v7 = vld [vmem:[#allocation3 + $0x88] sm:$0xff] }
 0x1a6   : > { %v1779_v55 = vadd.f32 %v1709_v59, %v1436_v22  ;;  %v1860_v59 = vld [vmem:[#allocation2 + $0x181] sm:$0xff]  ;;  %v1095_v39 = vadd.f32 %v1027_v42, %v753_v61  ;;  %v1176_v42 = vld [vmem:[#allocation2 + $0x172] sm:$0xff] }
 0x1a7   : > { %4437 = vrot.lane.b32.xlu1 %v4357_v13, %s8305_s18  ;;  %v4326_v61 = vld [vmem:[%s12534_s3 + $0x88] sm:$0xff] }
 0x1a8   : > { %v9162_v18 = vadd.f32 %v2051_v27, %v1779_v55  ;;  %7274 = vmatmul.msk.f32.gmra.mxu1 %vm529_vm2, %v1858_v41  ;;  %7310 = vmatmul.msk.f32.gmra.mxu2 %vm529_vm2, %v1175_v51  ;;  %v4359_v27 = vmul.f32 %v4327_v10, %v9170_v45  ;;  %v412_v51 = vld [vmem:[%s8391_s19 + $0x78] sm:$0xff]  ;;  %v9184_v13 = vld [vmem:[#allocation3 + $0x98] sm:$0xff] }
 0x1a9   : > { %v2054_v22 = vpop.f32.mrf.mxu0  ;;  %v754_v10 = vadd.f32 %v8893_v15, %v412_v51  ;;  %v4330_v15 = vld [vmem:[%s12534_s3 + $0xa8] sm:$0xff] }
 0x1aa   : > { %12586 = vst [vmem:[#allocation17_spill] sm:$0xff] %v9162_v18  ;;  %7346 = vmatmul.msk.f32.gmra.mxu3 %vm529_vm2, %v1518_v48  ;;  %v1519_v18 = vld [vmem:[#allocation2 + $0x188] sm:$0xff] }
 0x1ab   : > { %v1369_v41 = vpop.f32.mrf.mxu2  ;;  %4441 = vrot.lane.b32.xlu0 %v4359_v27, %s8305_s18 }
 0x1ac   : > { %v1437_v0 = vadd.f32 %v1369_v41, %v1095_v39  ;;  %7382 = vmatmul.msk.f32.gmra.mxu0 %vm529_vm2, %v1860_v59  ;;  %v4358_v39 = vmul.f32 %v4326_v61, %v9179_v7  ;;  %v4328_v59 = vld [vmem:[%s12534_s3 + $0x98] sm:$0xff] }
 0x1ad   : > { %v1030_v55 = vpop.f32.mrf.mxu1  ;;  %v1712_v30 = vpop.f32.mrf.mxu3  ;;  %v4360_v27 = vmul.f32 %v4328_v59, %v9184_v13  ;;  %v2515_v59 = vld [vmem:[#allocation2 + $0x30] sm:$0xff] }
 0x1ae   : > { %v1780_v48 = vadd.f32 %v1712_v30, %v1437_v0  ;;  %v1861_v30 = vld [vmem:[#allocation2 + $0x189] sm:$0xff]  ;;  %4439 = vrot.lane.b32.xlu2 %v4358_v39, %s8305_s18  ;;  %v1096_v61 = vadd.f32 %v1030_v55, %v754_v10  ;;  %v2172_v55 = vld [vmem:[#allocation2 + $0x1a] sm:$0xff] }
 0x1af   : > { %4443 = vrot.lane.b32.xlu1 %v4360_v27, %s8305_s18  ;;  %v9208_v10 = vld [vmem:[#allocation3 + $0xa0] sm:$0xff]  ;;  %v4329_v27 = vld [vmem:[%s12534_s3 + $0xa0] sm:$0xff] }
 0x1b0   : > { %v9191_v41 = vadd.f32 %v2054_v22, %v1780_v48  ;;  %7275 = vmatmul.msk.f32.gmra.mxu1 %vm529_vm2, %v1859_v33  ;;  %7311 = vmatmul.msk.f32.gmra.mxu2 %vm529_vm2, %v1176_v42  ;;  %v4362_v22 = vmul.f32 %v4330_v15, %v9199_v44  ;;  %v413_v42 = vld [vmem:[%s8391_s19 + $0x80] sm:$0xff]  ;;  %v2857_v15 = vld [vmem:[#allocation2 + $0x31] sm:$0xff] }
 0x1b1   : > { %v2057_v0 = vpop.f32.mrf.mxu0 }
 0x1b2   : > { %12587 = vst [vmem:[#allocation18_spill] sm:$0xff] %v9191_v41  ;;  %7347 = vmatmul.msk.f32.gmra.mxu3 %vm529_vm2, %v1519_v18  ;;  %v9213_v41 = vld [vmem:[#allocation3 + $0xb0] sm:$0xff] }
 0x1b3   : > { %v1372_v33 = vpop.f32.mrf.mxu2  ;;  %4447 = vrot.lane.b32.xlu0 %v4362_v22, %s8305_s18 }
 0x1b4   : > { %v1438_v51 = vadd.f32 %v1372_v33, %v1096_v61  ;;  %7383 = vmatmul.msk.f32.gmra.mxu0 %vm529_vm2, %v1861_v30  ;;  %v4361_v61 = vmul.f32 %v4329_v27, %v9208_v10  ;;  %v4331_v30 = vld [vmem:[%s12534_s3 + $0xb0] sm:$0xff]  ;;  %v755_v33 = vadd.f32 %v8800_v24, %v413_v42  ;;  %v4333_v24 = vld [vmem:[%s12534_s3 + $0xc0] sm:$0xff] }
 0x1b5   : > { %v1033_v48 = vpop.f32.mrf.mxu1  ;;  %v1715_v39 = vpop.f32.mrf.mxu3  ;;  %v4363_v22 = vmul.f32 %v4331_v30, %v9213_v41  ;;  %v4365_v42 = vmul.f32 %v4333_v24, %v9228_v5  ;;  %v2516_v30 = vld [vmem:[#allocation2 + $0x38] sm:$0xff] }
 0x1b6   : > { %v1781_v18 = vadd.f32 %v1715_v39, %v1438_v51  ;;  %v3199_v39 = vld [vmem:[#allocation2 + $0x32] sm:$0xff]  ;;  %4445 = vrot.lane.b32.xlu2 %v4361_v61, %s8305_s18  ;;  %v1097_v27 = vadd.f32 %v1033_v48, %v755_v33  ;;  %v2173_v48 = vld [vmem:[#allocation2 + $0x22] sm:$0xff] }
 0x1b7   : > { %4449 = vrot.lane.b32.xlu1 %v4363_v22, %s8305_s18  ;;  %v9237_v33 = vld [vmem:[#allocation3 + $0xb8] sm:$0xff]  ;;  %v4332_v22 = vld [vmem:[%s12534_s3 + $0xb8] sm:$0xff] }
 0x1b8   : > { %v9220_v54 = vadd.f32 %v2057_v0, %v1781_v18  ;;  %7388 = vmatmul.msk.f32.vlgmr.msra.gmra.mxu1 %vm529_vm2, %v2172_v55  ;;  %7424 = vmatmul.msk.f32.vlgmr.msra.gmra.mxu2 %vm529_vm2, %v2515_v59  ;;  %v414_v59 = vld [vmem:[%s8391_s19 + $0x88] sm:$0xff]  ;;  %v2858_v24 = vld [vmem:[#allocation2 + $0x39] sm:$0xff] }
 0x1b9   : > { %v2060_v51 = vpop.f32.mrf.mxu0  ;;  %v756_v29 = vadd.f32 %v8813_v25, %v414_v59  ;;  %v4336_v25 = vld [vmem:[%s12534_s3 + $0xd8] sm:$0xff] }
 0x1ba   : > { %12588 = vst [vmem:[#allocation19_spill] sm:$0xff] %v9220_v54  ;;  %7460 = vmatmul.msk.f32.vlgmr.msra.gmra.mxu3 %vm529_vm2, %v2857_v15  ;;  %v9242_v54 = vld [vmem:[#allocation3 + $0xc8] sm:$0xff]  ;;  %v4368_v59 = vmul.f32 %v4336_v25, %v9257_v50  ;;  %v4337_v25 = vld [vmem:[%s12534_s3 + $0xe0] sm:$0xff] }
 0x1bb   : > { %v1375_v0 = vpop.f32.mrf.mxu2  ;;  %4453 = vrot.lane.b32.xlu0 %v4365_v42, %s8305_s18 }
 0x1bc   : > { %v1439_v55 = vadd.f32 %v1375_v0, %v1097_v27  ;;  %7496 = vmatmul.msk.f32.vlgmr.msra.gmra.mxu0 %vm529_vm2, %v3199_v39  ;;  %v4364_v27 = vmul.f32 %v4332_v22, %v9237_v33  ;;  %v4334_v0 = vld [vmem:[%s12534_s3 + $0xc8] sm:$0xff] }
 0x1bd   : > { %v1036_v18 = vpop.f32.mrf.mxu1  ;;  %v1718_v61 = vpop.f32.mrf.mxu3  ;;  %v4366_v42 = vmul.f32 %v4334_v0, %v9242_v54  ;;  %v4335_v0 = vld [vmem:[%s12534_s3 + $0xd0] sm:$0xff] }
 0x1be   : > { %v1782_v15 = vadd.f32 %v1718_v61, %v1439_v55  ;;  %v3200_v61 = vld [vmem:[#allocation2 + $0x3a] sm:$0xff]  ;;  %4451 = vrot.lane.b32.xlu2 %v4364_v27, %s8305_s18  ;;  %v1098_v22 = vadd.f32 %v1036_v18, %v756_v29  ;;  %v2517_v29 = vld [vmem:[#allocation2 + $0x48] sm:$0xff] }
 0x1bf   : > { %4455 = vrot.lane.b32.xlu1 %v4366_v42, %s8305_s18  ;;  %v9271_v42 = vld [vmem:[#allocation3 + $0xe0] sm:$0xff] }
 0x1c0   : > { %v9249_v23 = vadd.f32 %v2060_v51, %v1782_v15  ;;  %7389 = vmatmul.msk.f32.gmra.mxu1 %vm529_vm2, %v2173_v48  ;;  %7425 = vmatmul.msk.f32.gmra.mxu2 %vm529_vm2, %v2516_v30  ;;  %v415_v30 = vld [vmem:[%s8391_s19 + $0x90] sm:$0xff] }
 0x1c1   : > { %v2063_v55 = vpop.f32.mrf.mxu0 }
 0x1c2   : > { %12589 = vst [vmem:[#allocation20_spill] sm:$0xff] %v9249_v23  ;;  %7461 = vmatmul.msk.f32.gmra.mxu3 %vm529_vm2, %v2858_v24  ;;  %v9266_v24 = vld [vmem:[#allocation3 + $0xd0] sm:$0xff]  ;;  %v2859_v23 = vld [vmem:[#allocation2 + $0x49] sm:$0xff] }
 0x1c3   : > { %v1378_v51 = vpop.f32.mrf.mxu2  ;;  %4459 = vrot.lane.b32.xlu0 %v4368_v59, %s8305_s18  ;;  %v4369_v59 = vmul.f32 %v4337_v25, %v9271_v42  ;;  %v9295_v25 = vld [vmem:[#allocation3 + $0xe8] sm:$0xff] }
 0x1c4   : > { %v1440_v48 = vadd.f32 %v1378_v51, %v1098_v22  ;;  %7497 = vmatmul.msk.f32.gmra.mxu0 %vm529_vm2, %v3200_v61  ;;  %v4367_v22 = vmul.f32 %v4335_v0, %v9266_v24  ;;  %v757_v51 = vadd.f32 %v8826_v32, %v415_v30  ;;  %v4339_v32 = vld [vmem:[%s12534_s3 + $0xf0] sm:$0xff] }
 0x1c5   : > { %v1039_v15 = vpop.f32.mrf.mxu1  ;;  %v1721_v27 = vpop.f32.mrf.mxu3 }
 0x1c6   : > { %v1783_v18 = vadd.f32 %v1721_v27, %v1440_v48  ;;  %v3201_v27 = vld [vmem:[#allocation2 + $0x4a] sm:$0xff]  ;;  %4457 = vrot.lane.b32.xlu2 %v4367_v22, %s8305_s18  ;;  %v1099_v0 = vadd.f32 %v1039_v15, %v757_v51 }
 0x1c7   : > { %4461 = vrot.lane.b32.xlu1 %v4369_v59, %s8305_s18  ;;  %v2518_v15 = vld [vmem:[#allocation2 + $0x50] sm:$0xff]  ;;  %v4338_v51 = vld [vmem:[%s12534_s3 + $0xe8] sm:$0xff] }
 0x1c8   : > { %v9278_v3 = vadd.f32 %v2063_v55, %v1783_v18  ;;  %7390 = vmatmul.msk.f32.gmra.mxu1 %vm529_vm2, %v3199_v39  ;;  %7426 = vmatmul.msk.f32.gmra.mxu2 %vm529_vm2, %v2517_v29  ;;  %v4371_v55 = vmul.f32 %v4339_v32, %v9286_v40  ;;  %v416_v29 = vld [vmem:[%s8391_s19 + $0x98] sm:$0xff]  ;;  %v9300_v59 = vld [vmem:[#allocation3 + $0xf8] sm:$0xff] }
 0x1c9   : > { %v2066_v48 = vpop.f32.mrf.mxu0  ;;  %v4340_v32 = vld [vmem:[%s12534_s3 + $0xf8] sm:$0xff] }
 0x1ca   : > { %12590 = vst [vmem:[#allocation21_spill] sm:$0xff] %v9278_v3  ;;  %7462 = vmatmul.msk.f32.gmra.mxu3 %vm529_vm2, %v2859_v23  ;;  %v2860_v3 = vld [vmem:[#allocation2 + $0x51] sm:$0xff] }
 0x1cb   : > { %v1381_v39 = vpop.f32.mrf.mxu2  ;;  %4465 = vrot.lane.b32.xlu0 %v4371_v55, %s8305_s18 }
 0x1cc   : > { %v1441_v30 = vadd.f32 %v1381_v39, %v1099_v0  ;;  %7498 = vmatmul.msk.f32.gmra.mxu0 %vm529_vm2, %v3201_v27  ;;  %v4370_v0 = vmul.f32 %v4338_v51, %v9295_v25  ;;  %v758_v39 = vadd.f32 %v8839_v37, %v416_v29  ;;  %v417_v37 = vld [vmem:[%s8391_s19 + $0xa0] sm:$0xff] }
 0x1cd   : > { %v1042_v18 = vpop.f32.mrf.mxu1  ;;  %v1724_v22 = vpop.f32.mrf.mxu3  ;;  %v2519_v29 = vld [vmem:[#allocation2 + $0x60] sm:$0xff] }
 0x1ce   : > { %v1784_v23 = vadd.f32 %v1724_v22, %v1441_v30  ;;  %v4372_v30 = vmul.f32 %v4340_v32, %v9300_v59  ;;  %4463 = vrot.lane.b32.xlu2 %v4370_v0, %s8305_s18  ;;  %v1100_v51 = vadd.f32 %v1042_v18, %v758_v39  ;;  %v759_v18 = vadd.f32 %v8858_v63, %v417_v37  ;;  %v418_v63 = vld [vmem:[%s8391_s19 + $0xa8] sm:$0xff] }
 0x1d0   : > { %v9307_v55 = vadd.f32 %v2066_v48, %v1784_v23  ;;  %7391 = vmatmul.msk.f32.gmra.mxu1 %vm529_vm2, %v3200_v61  ;;  %7427 = vmatmul.msk.f32.gmra.mxu2 %vm529_vm2, %v2518_v15  ;;  %v2861_v23 = vld [vmem:[#allocation2 + $0x61] sm:$0xff] }
 0x1d1   : > { %v2069_v22 = vpop.f32.mrf.mxu0  ;;  %4467 = vrot.lane.b32.xlu1 %v4372_v30, %s8305_s18  ;;  %v2520_v30 = vld [vmem:[#allocation2 + $0x68] sm:$0xff] }
 0x1d2   : > { %7463 = vmatmul.msk.f32.gmra.mxu3 %vm529_vm2, %v2860_v3  ;;  %v3203_v3 = vld [vmem:[#allocation2 + $0x62] sm:$0xff] }
 0x1d3   : > { %v1384_v17 = vpop.f32.mrf.mxu2  ;;  %5175 = vrot.lane.b32.xlu0 %v9021_v60, %s8305_s18 }
 0x1d4   : > { %v1442_v20 = vadd.f32 %v1384_v17, %v1100_v51  ;;  %7499 = vmatmul.msk.f32.gmra.mxu0 %vm529_vm2, %v3202_v26  ;;  %v760_v51 = vadd.f32 %v8877_v9, %v418_v63  ;;  %v419_v9 = vld [vmem:[%s8391_s19 + $0xb0] sm:$0xff] }
 0x1d5   : > { %v1045_v48 = vpop.f32.mrf.mxu1  ;;  %v1727_v61 = vpop.f32.mrf.mxu3 }
 0x1d6   : > { %v1785_v15 = vadd.f32 %v1727_v61, %v1442_v20  ;;  %5173 = vrot.lane.b32.xlu2 %v8998_v62, %s8305_s18  ;;  %v1101_v32 = vadd.f32 %v1045_v48, %v759_v18  ;;  %v2862_v62 = vld [vmem:[#allocation2 + $0x69] sm:$0xff] }
 0x1d7   : > { %v3204_v48 = vld [vmem:[#allocation2 + $0x6a] sm:$0xff] }
 0x1d8   : > { %v9320_v0 = vadd.f32 %v2069_v22, %v1785_v15  ;;  %7392 = vmatmul.msk.f32.gmra.mxu1 %vm529_vm2, %v3201_v27  ;;  %7428 = vmatmul.msk.f32.gmra.mxu2 %vm529_vm2, %v2519_v29 }
 0x1d9   : > { %v2072_v17 = vpop.f32.mrf.mxu0  ;;  %5177 = vrot.lane.b32.xlu1 %v9007_v53, %s8305_s18 }
 0x1da   : > { %7464 = vmatmul.msk.f32.gmra.mxu3 %vm529_vm2, %v2861_v23  ;;  %v2521_v23 = vld [vmem:[#allocation2 + $0x78] sm:$0xff] }
 0x1db   : > { %v1387_v20 = vpop.f32.mrf.mxu2  ;;  %5181 = vrot.lane.b32.xlu0 %v9030_v34, %s8305_s18 }
 0x1dc   : > { %v1443_v60 = vadd.f32 %v1387_v20, %v1101_v32  ;;  %7500 = vmatmul.msk.f32.gmra.mxu0 %vm529_vm2, %v3203_v3  ;;  %v3205_v20 = vld [vmem:[#allocation2 + $0x7a] sm:$0xff] }
 0x1dd   : > { %v1048_v39 = vpop.f32.mrf.mxu1  ;;  %v1730_v27 = vpop.f32.mrf.mxu3 }
 0x1de   : > { %v1786_v22 = vadd.f32 %v1730_v27, %v1443_v60  ;;  %5179 = vrot.lane.b32.xlu2 %v9035_v4, %s8305_s18  ;;  %v1102_v61 = vadd.f32 %v1048_v39, %v760_v51  ;;  %v2863_v4 = vld [vmem:[#allocation2 + $0x79] sm:$0xff]  ;;  %v3206_v51 = vld [vmem:[#allocation2 + $0x82] sm:$0xff] }
 0x1df   : > { %v2522_v27 = vld [vmem:[#allocation2 + $0x80] sm:$0xff] }
 0x1e0   : > { %v9334_v37 = vadd.f32 %v2072_v17, %v1786_v22  ;;  %7393 = vmatmul.msk.f32.gmra.mxu1 %vm529_vm2, %v3202_v26  ;;  %7429 = vmatmul.msk.f32.gmra.mxu2 %vm529_vm2, %v2520_v30  ;;  %v761_v17 = vadd.f32 %v8890_v14, %v419_v9  ;;  %v420_v14 = vld [vmem:[%s8391_s19 + $0xb8] sm:$0xff]  ;;  %v2864_v22 = vld [vmem:[#allocation2 + $0x81] sm:$0xff] }
 0x1e1   : > { %v2075_v53 = vpop.f32.mrf.mxu0  ;;  %5183 = vrot.lane.b32.xlu1 %v9060_v8, %s8305_s18 }
 0x1e2   : > { %7465 = vmatmul.msk.f32.gmra.mxu3 %vm529_vm2, %v2862_v62 }
 0x1e3   : > { %v1390_v34 = vpop.f32.mrf.mxu2  ;;  %5187 = vrot.lane.b32.xlu0 %v9065_v38, %s8305_s18 }
 0x1e4   : > { %v1444_v29 = vadd.f32 %v1390_v34, %v1102_v61  ;;  %7501 = vmatmul.msk.f32.gmra.mxu0 %vm529_vm2, %v3204_v48 }
 0x1e5   : > { %v1051_v15 = vpop.f32.mrf.mxu1  ;;  %v1733_v26 = vpop.f32.mrf.mxu3 }
 0x1e6   : > { %v1787_v18 = vadd.f32 %v1733_v26, %v1444_v29  ;;  %5185 = vrot.lane.b32.xlu2 %v9051_v35, %s8305_s18  ;;  %v1103_v60 = vadd.f32 %v1051_v15, %v761_v17  ;;  %v762_v35 = vadd.f32 %v8903_v6, %v420_v14  ;;  %v421_v29 = vld [vmem:[%s8391_s19 + $0xc0] sm:$0xff]  ;;  %v2523_v26 = vld [vmem:[#allocation2 + $0x90] sm:$0xff] }
 0x1e7   : > { %v3207_v17 = vld [vmem:[#allocation2 + $0x92] sm:$0xff] }
 0x1e8   : > { %v9348_v32 = vadd.f32 %v2075_v53, %v1787_v18  ;;  %7394 = vmatmul.msk.f32.gmra.mxu1 %vm529_vm2, %v3203_v3  ;;  %7430 = vmatmul.msk.f32.gmra.mxu2 %vm529_vm2, %v2521_v23  ;;  %v9366_v53 = vpop.permute.xlu2 %4413  ;;  %v2865_v23 = vld [vmem:[#allocation2 + $0x91] sm:$0xff]  ;;  %v763_v18 = vadd.f32 %v8805_v28, %v421_v29  ;;  %v2525_v29 = vld [vmem:[#allocation2 + $0xa8] sm:$0xff] }
 0x1e9   : > { %v2078_v8 = vpop.f32.mrf.mxu0  ;;  %5189 = vrot.lane.b32.xlu1 %v9090_v19, %s8305_s18 }
 0x1ea   : > { %7466 = vmatmul.msk.f32.gmra.mxu3 %vm529_vm2, %v2863_v4 }
 0x1eb   : > { %v1393_v38 = vpop.f32.mrf.mxu2  ;;  %5193 = vrot.lane.b32.xlu0 %v9095_v49, %s8305_s18  ;;  %v9371_v49 = vpop.permute.xlu0 %4405 }
 0x1ec   : > { %v1445_v63 = vadd.f32 %v1393_v38, %v1103_v60  ;;  %7502 = vmatmul.msk.f32.gmra.mxu0 %vm529_vm2, %v3205_v20 }
 0x1ed   : > { %v1054_v39 = vpop.f32.mrf.mxu1  ;;  %v1736_v3 = vpop.f32.mrf.mxu3 }
 0x1ee   : > { %v1788_v30 = vadd.f32 %v1736_v3, %v1445_v63  ;;  %5191 = vrot.lane.b32.xlu2 %v9081_v43, %s8305_s18  ;;  %v1104_v61 = vadd.f32 %v1054_v39, %v762_v35  ;;  %v422_v63 = vld [vmem:[%s8391_s19 + $0xc8] sm:$0xff]  ;;  %v3208_v35 = vld [vmem:[#allocation2 + $0x9a] sm:$0xff] }
 0x1f0   : > { %v9362_v62 = vadd.f32 %v2078_v8, %v1788_v30  ;;  %7395 = vmatmul.msk.f32.gmra.mxu1 %vm529_vm2, %v3204_v48  ;;  %7431 = vmatmul.msk.f32.gmra.mxu2 %vm529_vm2, %v2522_v27  ;;  %v9376_v48 = vpop.permute.xlu1 %4409  ;;  %v9391_v28 = vpop.permute.xlu2 %4415  ;;  %v764_v27 = vadd.f32 %v8818_v36, %v422_v63  ;;  %v2526_v63 = vld [vmem:[#allocation2 + $0xb0] sm:$0xff] }
 0x1f1   : > { %v2081_v19 = vpop.f32.mrf.mxu0  ;;  %5195 = vrot.lane.b32.xlu1 %v9120_v56, %s8305_s18 }
 0x1f2   : > { %7467 = vmatmul.msk.f32.gmra.mxu3 %vm529_vm2, %v2864_v22 }
 0x1f3   : > { %v1396_v6 = vpop.f32.mrf.mxu2  ;;  %5199 = vrot.lane.b32.xlu0 %v9125_v52, %s8305_s18 }
 0x1f4   : > { %v1446_v34 = vadd.f32 %v1396_v6, %v1104_v61  ;;  %7503 = vmatmul.msk.f32.gmra.mxu0 %vm529_vm2, %v3206_v51 }
 0x1f5   : > { %v1057_v9 = vpop.f32.mrf.mxu1  ;;  %v1739_v15 = vpop.f32.mrf.mxu3 }
 0x1f6   : > { %v1789_v43 = vadd.f32 %v1739_v15, %v1446_v34  ;;  %5197 = vrot.lane.b32.xlu2 %v9111_v57, %s8305_s18  ;;  %v1105_v8 = vadd.f32 %v1057_v9, %v763_v18  ;;  %v2524_v57 = vld [vmem:[#allocation2 + $0x98] sm:$0xff]  ;;  %v3209_v18 = vld [vmem:[#allocation2 + $0xaa] sm:$0xff] }
 0x1f8   : > { %v9382_v4 = vadd.f32 %v2081_v19, %v1789_v43  ;;  %7396 = vmatmul.msk.f32.gmra.mxu1 %vm529_vm2, %v3205_v20  ;;  %7432 = vmatmul.msk.f32.gmra.mxu2 %vm529_vm2, %v2523_v26  ;;  %v9394_v20 = vpop.permute.xlu0 %4407  ;;  %v9396_v38 = vpop.permute.xlu1 %4411 }
 0x1f9   : > { %v2084_v56 = vpop.f32.mrf.mxu0  ;;  %5201 = vrot.lane.b32.xlu1 %v9150_v46, %s8305_s18  ;;  %v2866_v46 = vld [vmem:[#allocation2 + $0x99] sm:$0xff]  ;;  %v9417_v9 = vpop.permute.xlu2 %4421 }
 0x1fa   : > { %7468 = vmatmul.msk.f32.gmra.mxu3 %vm529_vm2, %v2865_v23  ;;  %12591 = vst [vmem:[#allocation22_spill] sm:$0xff] %v9417_v9 }
 0x1fb   : > { %v1399_v52 = vpop.f32.mrf.mxu2  ;;  %5205 = vrot.lane.b32.xlu0 %v9155_v21, %s8305_s18 }
 0x1fc   : > { %v1447_v60 = vadd.f32 %v1399_v52, %v1105_v8  ;;  %7504 = vmatmul.msk.f32.gmra.mxu0 %vm529_vm2, %v3207_v17 }
 0x1fd   : > { %v1060_v14 = vpop.f32.mrf.mxu1  ;;  %v1742_v39 = vpop.f32.mrf.mxu3 }
 0x1fe   : > { %v1790_v3 = vadd.f32 %v1742_v39, %v1447_v60  ;;  %5203 = vrot.lane.b32.xlu2 %v9141_v1, %s8305_s18  ;;  %v1106_v19 = vadd.f32 %v1060_v14, %v764_v27  ;;  %v2868_v14 = vld [vmem:[#allocation2 + $0xb1] sm:$0xff] }
 0x1ff   : > { %v3210_v27 = vld [vmem:[#allocation2 + $0xb2] sm:$0xff] }
 0x200   : > { %v9402_v30 = vadd.f32 %v2084_v56, %v1790_v3  ;;  %7397 = vmatmul.msk.f32.gmra.mxu1 %vm529_vm2, %v3206_v51  ;;  %7433 = vmatmul.msk.f32.gmra.mxu2 %vm529_vm2, %v2524_v57  ;;  %v9412_v36 = vpop.permute.xlu1 %4419  ;;  %v423_v51 = vld [vmem:[%s8391_s19 + $0xd0] sm:$0xff]  ;;  %v9419_v15 = vpop.permute.xlu0 %4417 }
 0x201   : > { %v2087_v22 = vpop.f32.mrf.mxu0  ;;  %5207 = vrot.lane.b32.xlu1 %v9179_v7, %s8305_s18  ;;  %v2867_v7 = vld [vmem:[#allocation2 + $0xa9] sm:$0xff]  ;;  %v765_v26 = vadd.f32 %v8831_v47, %v423_v51  ;;  %v2527_v51 = vld [vmem:[#allocation2 + $0xc0] sm:$0xff] }
 0x202   : > { %7469 = vmatmul.msk.f32.gmra.mxu3 %vm529_vm2, %v2866_v46 }
 0x203   : > { %v1402_v21 = vpop.f32.mrf.mxu2  ;;  %5211 = vrot.lane.b32.xlu0 %v9184_v13, %s8305_s18 }
 0x204   : > { %v1448_v61 = vadd.f32 %v1402_v21, %v1106_v19  ;;  %7505 = vmatmul.msk.f32.gmra.mxu0 %vm529_vm2, %v3208_v35  ;;  %v425_v19 = vld [vmem:[%s8391_s19 + $0xe0] sm:$0xff] }
 0x205   : > { %v1063_v6 = vpop.f32.mrf.mxu1  ;;  %v1745_v34 = vpop.f32.mrf.mxu3 }
 0x206   : > { %v1791_v1 = vadd.f32 %v1745_v34, %v1448_v61  ;;  %5209 = vrot.lane.b32.xlu2 %v9170_v45, %s8305_s18  ;;  %v1107_v13 = vadd.f32 %v1063_v6, %v765_v26  ;;  %v2869_v6 = vld [vmem:[#allocation2 + $0xc1] sm:$0xff]  ;;  %v767_v34 = vadd.f32 %v8866_v2, %v425_v19 }
 0x208   : > { %v9422_v43 = vadd.f32 %v2087_v22, %v1791_v1  ;;  %7398 = vmatmul.msk.f32.gmra.mxu1 %vm529_vm2, %v3207_v17  ;;  %7434 = vmatmul.msk.f32.gmra.mxu2 %vm529_vm2, %v2525_v29  ;;  %v9432_v47 = vpop.permute.xlu1 %4425  ;;  %v424_v17 = vld [vmem:[%s8391_s19 + $0xd8] sm:$0xff]  ;;  %v9444_v3 = vpop.permute.xlu0 %4423  ;;  %v3211_v1 = vld [vmem:[#allocation2 + $0xc2] sm:$0xff] }
 0x209   : > { %v2090_v23 = vpop.f32.mrf.mxu0  ;;  %5213 = vrot.lane.b32.xlu1 %v9208_v10, %s8305_s18  ;;  %12592 = vst [vmem:[#allocation23_spill] sm:$0xff] %v9432_v47  ;;  %v766_v39 = vadd.f32 %v8844_v58, %v424_v17  ;;  %v9442_v10 = vpop.permute.xlu2 %4427 }
 0x20a   : > { %7470 = vmatmul.msk.f32.gmra.mxu3 %vm529_vm2, %v2867_v7  ;;  %12594 = vst [vmem:[#allocation25_spill] sm:$0xff] %v9442_v10 }
 0x20b   : > { %v1405_v56 = vpop.f32.mrf.mxu2  ;;  %5217 = vrot.lane.b32.xlu0 %v9213_v41, %s8305_s18  ;;  %12595 = vst [vmem:[#allocation26_spill] sm:$0xff] %v9444_v3 }
 0x20c   : > { %v1449_v8 = vadd.f32 %v1405_v56, %v1107_v13  ;;  %7506 = vmatmul.msk.f32.gmra.mxu0 %vm529_vm2, %v3209_v18  ;;  %v426_v13 = vld [vmem:[%s8391_s19 + $0xe8] sm:$0xff] }
 0x20d   : > { %v1066_v52 = vpop.f32.mrf.mxu1  ;;  %v1748_v60 = vpop.f32.mrf.mxu3 }
 0x20e   : > { %v1792_v45 = vadd.f32 %v1748_v60, %v1449_v8  ;;  %5215 = vrot.lane.b32.xlu2 %v9199_v44, %s8305_s18  ;;  %v1108_v41 = vadd.f32 %v1066_v52, %v766_v39  ;;  %v2870_v52 = vld [vmem:[#allocation2 + $0xc9] sm:$0xff]  ;;  %v768_v60 = vadd.f32 %v8882_v11, %v426_v13 }
 0x210   : > { %v9438_v57 = vadd.f32 %v2090_v23, %v1792_v45  ;;  %7399 = vmatmul.msk.f32.gmra.mxu1 %vm529_vm2, %v3208_v35  ;;  %7435 = vmatmul.msk.f32.gmra.mxu2 %vm529_vm2, %v2526_v63  ;;  %v9452_v35 = vpop.permute.xlu1 %4431  ;;  %v9467_v26 = vpop.permute.xlu0 %4429  ;;  %v3212_v45 = vld [vmem:[#allocation2 + $0xca] sm:$0xff] }
 0x211   : > { %v2093_v46 = vpop.f32.mrf.mxu0  ;;  %5219 = vrot.lane.b32.xlu1 %v9237_v33, %s8305_s18  ;;  %12596 = vst [vmem:[#allocation27_spill] sm:$0xff] %v9452_v35 }
 0x212   : > { %12593 = vst [vmem:[#allocation24_spill] sm:$0xff] %v9438_v57  ;;  %7471 = vmatmul.msk.f32.gmra.mxu3 %vm529_vm2, %v2868_v14 }
 0x213   : > { %v1408_v58 = vpop.f32.mrf.mxu2  ;;  %5223 = vrot.lane.b32.xlu0 %v9242_v54, %s8305_s18  ;;  %v9465_v54 = vpop.permute.xlu2 %4433  ;;  %12599 = vst [vmem:[#allocation30_spill] sm:$0xff] %v9467_v26 }
 0x214   : > { %v1450_v22 = vadd.f32 %v1408_v58, %v1108_v41  ;;  %7507 = vmatmul.msk.f32.gmra.mxu0 %vm529_vm2, %v3210_v27  ;;  %12598 = vst [vmem:[#allocation29_spill] sm:$0xff] %v9465_v54 }
 0x215   : > { %v1069_v21 = vpop.f32.mrf.mxu1  ;;  %v1751_v61 = vpop.f32.mrf.mxu3 }
 0x216   : > { %v1793_v44 = vadd.f32 %v1751_v61, %v1450_v22  ;;  %5221 = vrot.lane.b32.xlu2 %v9228_v5, %s8305_s18  ;;  %v1109_v7 = vadd.f32 %v1069_v21, %v767_v34  ;;  %v2528_v5 = vld [vmem:[#allocation2 + $0xc8] sm:$0xff]  ;;  %v2529_v22 = vld [vmem:[#allocation2 + $0xd8] sm:$0xff] }
 0x218   : > { %v9458_v29 = vadd.f32 %v2093_v46, %v1793_v44  ;;  %7400 = vmatmul.msk.f32.gmra.mxu1 %vm529_vm2, %v3209_v18  ;;  %7436 = vmatmul.msk.f32.gmra.mxu2 %vm529_vm2, %v2527_v51  ;;  %v9490_v46 = vpop.permute.xlu0 %4435  ;;  %v3213_v44 = vld [vmem:[#allocation2 + $0xda] sm:$0xff] }
 0x219   : > { %v2096_v33 = vpop.f32.mrf.mxu0  ;;  %5225 = vrot.lane.b32.xlu1 %v9266_v24, %s8305_s18  ;;  %v9472_v18 = vpop.permute.xlu1 %4437  ;;  %12603 = vst [vmem:[#allocation34_spill] sm:$0xff] %v9490_v46  ;;  %v12658_v46 = vld [vmem:[#allocation15_spill] sm:$0xff] }
 0x21a   : > { %12597 = vst [vmem:[#allocation28_spill] sm:$0xff] %v9458_v29  ;;  %7472 = vmatmul.msk.f32.gmra.mxu3 %vm529_vm2, %v2869_v6 }
 0x21b   : > { %v1411_v2 = vpop.f32.mrf.mxu2  ;;  %12600 = vst [vmem:[#allocation31_spill] sm:$0xff] %v9472_v18  ;;  %5229 = vrot.lane.b32.xlu0 %v9271_v42, %s8305_s18  ;;  %v9488_v11 = vpop.permute.xlu2 %4439 }
 0x21c   : > { %v1451_v23 = vadd.f32 %v1411_v2, %v1109_v7  ;;  %7508 = vmatmul.msk.f32.gmra.mxu0 %vm529_vm2, %v3211_v1  ;;  %12602 = vst [vmem:[#allocation33_spill] sm:$0xff] %v9488_v11  ;;  %v2530_v2 = vld [vmem:[#allocation2 + $0xe0] sm:$0xff]  ;;  %v3225_v11 = vld [vmem:[#allocation2 + $0x16a] sm:$0xff] }
 0x21d   : > { %v1072_v56 = vpop.f32.mrf.mxu1  ;;  %v1754_v8 = vpop.f32.mrf.mxu3 }
 0x21e   : > { %v1794_v17 = vadd.f32 %v1754_v8, %v1451_v23  ;;  %5227 = vrot.lane.b32.xlu2 %v9257_v50, %s8305_s18  ;;  %v1110_v14 = vadd.f32 %v1072_v56, %v768_v60  ;;  %v2872_v56 = vld [vmem:[#allocation2 + $0xe1] sm:$0xff] }
 0x220   : > { %v9478_v63 = vadd.f32 %v2096_v33, %v1794_v17  ;;  %7401 = vmatmul.msk.f32.gmra.mxu1 %vm529_vm2, %v3210_v27  ;;  %7437 = vmatmul.msk.f32.gmra.mxu2 %vm529_vm2, %v2528_v5  ;;  %v427_v27 = vld [vmem:[%s8391_s19 + $0xf0] sm:$0xff]  ;;  %v428_v33 = vld [vmem:[%s8391_s19 + $0xf8] sm:$0xff]  ;;  %v9509_v13 = vpop.permute.xlu0 %4441  ;;  %s8306_s19 = smov 64  }
 0x221   : > { %v2099_v24 = vpop.f32.mrf.mxu0  ;;  %5231 = vrot.lane.b32.xlu1 %v9295_v25, %s8305_s18  ;;  %v9495_v19 = vpop.permute.xlu1 %4443  ;;  %v2871_v25 = vld [vmem:[#allocation2 + $0xd9] sm:$0xff]  ;;  %v769_v21 = vadd.f32 %v8895_v16, %v427_v27  ;;  %12607 = vst [vmem:[#allocation38_spill] sm:$0xff] %v9509_v13  ;;  %v770_v8 = vadd.f32 %v8907_v31, %v428_v33  ;;  %v2531_v31 = vld [vmem:[#allocation2 + $0xf0] sm:$0xff] }
 0x222   : > { %12601 = vst [vmem:[#allocation32_spill] sm:$0xff] %v9478_v63  ;;  %7473 = vmatmul.msk.f32.gmra.mxu3 %vm529_vm2, %v2870_v52  ;;  %v3214_v52 = vld [vmem:[#allocation2 + $0xe2] sm:$0xff]  ;;  %v2532_v33 = vld [vmem:[#allocation2 + $0xf8] sm:$0xff] }
 0x223   : > { %v1414_v42 = vpop.f32.mrf.mxu2  ;;  %5235 = vrot.lane.b32.xlu0 %v9300_v59, %s8305_s18  ;;  %12604 = vst [vmem:[#allocation35_spill] sm:$0xff] %v9495_v19 }
 0x224   : > { %v1452_v39 = vadd.f32 %v1414_v42, %v1110_v14  ;;  %7509 = vmatmul.msk.f32.gmra.mxu0 %vm529_vm2, %v3212_v45 }
 0x225   : > { %v1075_v41 = vpop.f32.mrf.mxu1  ;;  %v1757_v58 = vpop.f32.mrf.mxu3 }
 0x226   : > { %v1795_v50 = vadd.f32 %v1757_v58, %v1452_v39  ;;  %5233 = vrot.lane.b32.xlu2 %v9286_v40, %s8305_s18  ;;  %v1111_v6 = vadd.f32 %v1075_v41, %v769_v21  ;;  %v2873_v41 = vld [vmem:[#allocation2 + $0xf1] sm:$0xff] }
 0x228   : > { %v9498_v61 = vadd.f32 %v2099_v24, %v1795_v50  ;;  %7402 = vmatmul.msk.f32.gmra.mxu1 %vm529_vm2, %v3211_v1  ;;  %7438 = vmatmul.msk.f32.gmra.mxu2 %vm529_vm2, %v2529_v22  ;;  %v9507_v1 = vpop.permute.xlu2 %4445  ;;  %v9526_v22 = vpop.permute.xlu0 %4447 }
 0x229   : > { %v2102_v51 = vpop.f32.mrf.mxu0  ;;  %12606 = vst [vmem:[#allocation37_spill] sm:$0xff] %v9507_v1  ;;  %v9516_v5 = vpop.permute.xlu1 %4449 }
 0x22a   : > { %12605 = vst [vmem:[#allocation36_spill] sm:$0xff] %v9498_v61  ;;  %7474 = vmatmul.msk.f32.gmra.mxu3 %vm529_vm2, %v2871_v25  ;;  %v3215_v25 = vld [vmem:[#allocation2 + $0xf2] sm:$0xff] }
 0x22b   : > { %v1417_v59 = vpop.f32.mrf.mxu2  ;;  %12609 = vst [vmem:[#allocation40_spill] sm:$0xff] %v9516_v5  ;;  %v2880_v5 = vld [vmem:[#allocation2 + $0x141] sm:$0xff] }
 0x22c   : > { %v1453_v34 = vadd.f32 %v1417_v59, %v1111_v6  ;;  %7510 = vmatmul.msk.f32.gmra.mxu0 %vm529_vm2, %v3213_v44  ;;  %12612 = vst [vmem:[#allocation43_spill] sm:$0xff] %v9526_v22 }
 0x22d   : > { %v1078_v16 = vpop.f32.mrf.mxu1  ;;  %v1760_v7 = vpop.f32.mrf.mxu3 }
 0x22e   : > { %v1796_v23 = vadd.f32 %v1760_v7, %v1453_v34  ;;  %v1112_v60 = vadd.f32 %v1078_v16, %v770_v8  ;;  %v2874_v7 = vld [vmem:[#allocation2 + $0xf9] sm:$0xff] }
 0x230   : > { %v9512_v40 = vadd.f32 %v2102_v51, %v1796_v23  ;;  %7403 = vmatmul.msk.f32.gmra.mxu1 %vm529_vm2, %v3212_v45  ;;  %7439 = vmatmul.msk.f32.gmra.mxu2 %vm529_vm2, %v2530_v2  ;;  %v9524_v45 = vpop.permute.xlu2 %4451  ;;  %v3216_v23 = vld [vmem:[#allocation2 + $0xfa] sm:$0xff] }
 0x231   : > { %v2105_v17 = vpop.f32.mrf.mxu0  ;;  %12611 = vst [vmem:[#allocation42_spill] sm:$0xff] %v9524_v45  ;;  %v9530_v51 = vpop.permute.xlu1 %4455 }
 0x232   : > { %12608 = vst [vmem:[#allocation39_spill] sm:$0xff] %v9512_v40  ;;  %7475 = vmatmul.msk.f32.gmra.mxu3 %vm529_vm2, %v2872_v56  ;;  %v12615_v56 = vld [vmem:[#allocation5_spill] sm:$0xff] }
 0x233   : > { %v1420_v24 = vpop.f32.mrf.mxu2  ;;  %12613 = vst [vmem:[#allocation44_spill] sm:$0xff] %v9530_v51  ;;  %v2879_v51 = vld [vmem:[#allocation2 + $0x139] sm:$0xff] }
 0x234   : > { %v1454_v14 = vadd.f32 %v1420_v24, %v1112_v60  ;;  %7511 = vmatmul.msk.f32.gmra.mxu0 %vm529_vm2, %v3214_v52  ;;  %v9542_v60 = vpop.permute.xlu0 %4453 }
 0x235   : > { %v1763_v42 = vpop.f32.mrf.mxu3  ;;  %v2354_v39 = vpop.f32.mrf.mxu1  ;;  %12617 = vst [vmem:[#allocation46_spill] sm:$0xff] %v9542_v60 }
 0x236   : > { %v1797_v27 = vadd.f32 %v1763_v42, %v1454_v14  ;;  %v2450_v21 = vadd.f32 %v2354_v39, %v8917_v12 }
 0x238   : > { %v9520_v58 = vadd.f32 %v2105_v17, %v1797_v27  ;;  %7404 = vmatmul.msk.f32.gmra.mxu1 %vm529_vm2, %v3213_v44  ;;  %7440 = vmatmul.msk.f32.gmra.mxu2 %vm529_vm2, %v2531_v31  ;;  %v9540_v17 = vpop.permute.xlu2 %4457  ;;  %v2533_v31 = vld [vmem:[#allocation2 + $0x108] sm:$0xff] }
 0x239   : > { %v3381_v50 = vpop.f32.mrf.mxu0  ;;  %12616 = vst [vmem:[#allocation5_spill] sm:$0xff] %v9540_v17  ;;  %v9545_v42 = vpop.permute.xlu1 %4461 }
 0x23a   : > { %12610 = vst [vmem:[#allocation41_spill] sm:$0xff] %v9520_v58  ;;  %7476 = vmatmul.msk.f32.gmra.mxu3 %vm529_vm2, %v2873_v41  ;;  %v2875_v41 = vld [vmem:[#allocation2 + $0x109] sm:$0xff] }
 0x23b   : > { %v2697_v6 = vpop.f32.mrf.mxu2  ;;  %12618 = vst [vmem:[#allocation47_spill] sm:$0xff] %v9545_v42 }
 0x23c   : > { %v2793_v59 = vadd.f32 %v2697_v6, %v2450_v21  ;;  %7512 = vmatmul.msk.f32.gmra.mxu0 %vm529_vm2, %v3215_v25 }
 0x23d   : > { %v2357_v34 = vpop.f32.mrf.mxu1  ;;  %v3039_v44 = vpop.f32.mrf.mxu3 }
 0x23e   : > { %v3135_v16 = vadd.f32 %v3039_v44, %v2793_v59  ;;  %v2451_v8 = vadd.f32 %v2357_v34, %v12615_v56  ;;  %v3217_v59 = vld [vmem:[#allocation2 + $0x10a] sm:$0xff]  ;;  %v12620_v34 = vld [vmem:[#allocation6_spill] sm:$0xff] }
 0x240   : > { %v9533_v2 = vadd.f32 %v3381_v50, %v3135_v16  ;;  %7405 = vmatmul.msk.f32.gmra.mxu1 %vm529_vm2, %v3214_v52  ;;  %7441 = vmatmul.msk.f32.gmra.mxu2 %vm529_vm2, %v2532_v33  ;;  %v9555_v16 = vpop.permute.xlu2 %4463 }
 0x241   : > { %v3384_v12 = vpop.f32.mrf.mxu0  ;;  %12621 = vst [vmem:[#allocation6_spill] sm:$0xff] %v9555_v16 }
 0x242   : > { %12614 = vst [vmem:[#allocation45_spill] sm:$0xff] %v9533_v2  ;;  %7719 = vtanh.f32 %v9533_v2  ;;  %7477 = vmatmul.msk.f32.gmra.mxu3 %vm529_vm2, %v2874_v7 }
 0x243   : > { %v2700_v24 = vpop.f32.mrf.mxu2 }
 0x244   : > { %v2794_v14 = vadd.f32 %v2700_v24, %v2451_v8  ;;  %7513 = vmatmul.msk.f32.gmra.mxu0 %vm529_vm2, %v3216_v23  ;;  %v2534_v8 = vld [vmem:[#allocation2 + $0x110] sm:$0xff] }
 0x245   : > { %v2360_v52 = vpop.f32.mrf.mxu1  ;;  %v3042_v39 = vpop.f32.mrf.mxu3 }
 0x246   : > { %v3136_v27 = vadd.f32 %v3042_v39, %v2794_v14  ;;  %v2452_v44 = vadd.f32 %v2360_v52, %v12620_v34  ;;  %v9560_v14 = vpop.permute.xlu1 %4467  ;;  %v2876_v39 = vld [vmem:[#allocation2 + $0x111] sm:$0xff] }
 0x247   : > { %12623 = vst [vmem:[#allocation50_spill] sm:$0xff] %v9560_v14 }
 0x248   : > { %v7720_v50 = vpop.eup %7719  ;;  %v9547_v21 = vadd.f32 %v3384_v12, %v3136_v27  ;;  %7406 = vmatmul.msk.f32.gmra.mxu1 %vm529_vm2, %v3215_v25  ;;  %7442 = vmatmul.msk.f32.gmra.mxu2 %vm529_vm2, %v2533_v31  ;;  %v9558_v25 = vpop.permute.xlu0 %4459 }
 0x249   : > { %5365 = vrot.lane.b32.xlu1 %v7720_v50, %s8306_s19  ;;  %v3387_v6 = vpop.f32.mrf.mxu0  ;;  %12622 = vst [vmem:[#allocation49_spill] sm:$0xff] %v9558_v25  ;;  %v12625_v50 = vld [vmem:[#allocation7_spill] sm:$0xff] }
 0x24a   : > { %12619 = vst [vmem:[#allocation48_spill] sm:$0xff] %v9547_v21  ;;  %7721 = vtanh.f32 %v9547_v21  ;;  %7478 = vmatmul.msk.f32.gmra.mxu3 %vm529_vm2, %v2875_v41  ;;  %v3218_v41 = vld [vmem:[#allocation2 + $0x112] sm:$0xff] }
 0x24b   : > { %v2703_v33 = vpop.f32.mrf.mxu2 }
 0x24c   : > { %v2795_v7 = vadd.f32 %v2703_v33, %v2452_v44  ;;  %7514 = vmatmul.msk.f32.gmra.mxu0 %vm529_vm2, %v3217_v59 }
 0x24d   : > { %v2363_v12 = vpop.f32.mrf.mxu1  ;;  %v3045_v56 = vpop.f32.mrf.mxu3 }
 0x24e   : > { %v3137_v24 = vadd.f32 %v3045_v56, %v2795_v7  ;;  %v2453_v34 = vadd.f32 %v2363_v12, %v12625_v50  ;;  %v2535_v56 = vld [vmem:[#allocation2 + $0x120] sm:$0xff]  ;;  %v9579_v12 = vpop.permute.xlu1 %5177 }
 0x24f   : > { %v3219_v50 = vld [vmem:[#allocation2 + $0x122] sm:$0xff] }
 0x250   : > { %v7722_v52 = vpop.eup %7721  ;;  %v9562_v31 = vadd.f32 %v3387_v6, %v3137_v24  ;;  %7407 = vmatmul.msk.f32.gmra.mxu1 %vm529_vm2, %v3216_v23  ;;  %7443 = vmatmul.msk.f32.gmra.mxu2 %vm529_vm2, %v2534_v8  ;;  %v9571_v23 = vpop.permute.xlu2 %5173 }
 0x251   : > { %5367 = vrot.lane.b32.xlu2 %v7722_v52, %s8306_s19  ;;  %v3390_v27 = vpop.f32.mrf.mxu0  ;;  %v9573_v24 = vpop.permute.xlu0 %4465  ;;  %v2877_v52 = vld [vmem:[#allocation2 + $0x121] sm:$0xff] }
 0x252   : > { %12624 = vst [vmem:[#allocation51_spill] sm:$0xff] %v9562_v31  ;;  %7723 = vtanh.f32 %v9562_v31  ;;  %7479 = vmatmul.msk.f32.gmra.mxu3 %vm529_vm2, %v2876_v39 }
 0x253   : > { %v2706_v44 = vpop.f32.mrf.mxu2  ;;  %12626 = vst [vmem:[#allocation7_spill] sm:$0xff] %v9573_v24  ;;  %v2878_v24 = vld [vmem:[#allocation2 + $0x129] sm:$0xff] }
 0x254   : > { %v2796_v33 = vadd.f32 %v2706_v44, %v2453_v34  ;;  %7515 = vmatmul.msk.f32.gmra.mxu0 %vm529_vm2, %v3218_v41  ;;  %v12628_v34 = vld [vmem:[#allocation8_spill] sm:$0xff] }
 0x255   : > { %v2366_v6 = vpop.f32.mrf.mxu1  ;;  %v3048_v7 = vpop.f32.mrf.mxu3 }
 0x256   : > { %v3138_v8 = vadd.f32 %v3048_v7, %v2796_v33  ;;  %v2454_v44 = vadd.f32 %v2366_v6, %v12628_v34 }
 0x258   : > { %v7724_v14 = vpop.eup %7723  ;;  %v9575_v16 = vadd.f32 %v3390_v27, %v3138_v8  ;;  %7408 = vmatmul.msk.f32.gmra.mxu1 %vm529_vm2, %v3217_v59  ;;  %7444 = vmatmul.msk.f32.gmra.mxu2 %vm529_vm2, %v2535_v56  ;;  %v2536_v8 = vld [vmem:[#allocation2 + $0x128] sm:$0xff]  ;;  %v9586_v42 = vpop.permute.xlu2 %5179 }
 0x259   : > { %5369 = vrot.lane.b32.xlu0 %v7724_v14, %s8306_s19  ;;  %v3393_v39 = vpop.f32.mrf.mxu0  ;;  %12629 = vst [vmem:[#allocation8_spill] sm:$0xff] %v9586_v42  ;;  %v9592_v6 = vpop.permute.xlu0 %5175  ;;  %v8238_v42 = vld [vmem:[#allocation3 + $0x38] sm:$0xff] }
 0x25a   : > { %12627 = vst [vmem:[#allocation52_spill] sm:$0xff] %v9575_v16  ;;  %7480 = vmatmul.msk.f32.gmra.mxu3 %vm529_vm2, %v2877_v52  ;;  %7725 = vtanh.f32 %v9575_v16 }
 0x25b   : > { %v2709_v33 = vpop.f32.mrf.mxu2 }
 0x25c   : > { %v2797_v7 = vadd.f32 %v2709_v33, %v2454_v44  ;;  %7516 = vmatmul.msk.f32.gmra.mxu0 %vm529_vm2, %v3219_v50  ;;  %v3220_v44 = vld [vmem:[#allocation2 + $0x12a] sm:$0xff] }
 0x25d   : > { %v2369_v27 = vpop.f32.mrf.mxu1  ;;  %v3051_v59 = vpop.f32.mrf.mxu3  ;;  %v12631_v33 = vld [vmem:[#allocation9_spill] sm:$0xff] }
 0x25e   : > { %v3139_v56 = vadd.f32 %v3051_v59, %v2797_v7  ;;  %v2455_v25 = vadd.f32 %v2369_v27, %v12631_v33  ;;  %v9598_v7 = vpop.permute.xlu1 %5183  ;;  %v12636_v33 = vld [vmem:[#allocation10_spill] sm:$0xff] }
 0x25f   : > { %12632 = vst [vmem:[#allocation9_spill] sm:$0xff] %v9598_v7  ;;  %v12653_v7 = vld [vmem:[#allocation14_spill] sm:$0xff] }
 0x260   : > { %v9588_v14 = vadd.f32 %v3393_v39, %v3139_v56  ;;  %7409 = vmatmul.msk.f32.gmra.mxu1 %vm529_vm2, %v3218_v41  ;;  %7445 = vmatmul.msk.f32.gmra.mxu2 %vm529_vm2, %v2536_v8  ;;  %v7726_v52 = vpop.eup %7725  ;;  %v2537_v56 = vld [vmem:[#allocation2 + $0x138] sm:$0xff] }
 0x261   : > { %v3396_v34 = vpop.f32.mrf.mxu0  ;;  %5371 = vrot.lane.b32.xlu1 %v7726_v52, %s8306_s19  ;;  %v9605_v27 = vpop.permute.xlu0 %5181 }
 0x262   : > { %12630 = vst [vmem:[#allocation53_spill] sm:$0xff] %v9588_v14  ;;  %7727 = vtanh.f32 %v9588_v14  ;;  %7481 = vmatmul.msk.f32.gmra.mxu3 %vm529_vm2, %v2878_v24  ;;  %v9608_v52 = vpop.permute.xlu2 %5185 }
 0x263   : > { %v2712_v39 = vpop.f32.mrf.mxu2  ;;  %12634 = vst [vmem:[#allocation55_spill] sm:$0xff] %v9605_v27 }
 0x264   : > { %v2798_v59 = vadd.f32 %v2712_v39, %v2455_v25  ;;  %7517 = vmatmul.msk.f32.gmra.mxu0 %vm529_vm2, %v3220_v44  ;;  %v3221_v25 = vld [vmem:[#allocation2 + $0x13a] sm:$0xff]  ;;  %12635 = vst [vmem:[#allocation56_spill] sm:$0xff] %v9608_v52 }
 0x265   : > { %v2372_v41 = vpop.f32.mrf.mxu1  ;;  %v3054_v8 = vpop.f32.mrf.mxu3  ;;  %v2882_v52 = vld [vmem:[#allocation2 + $0x159] sm:$0xff] }
 0x266   : > { %v3140_v17 = vadd.f32 %v3054_v8, %v2798_v59  ;;  %v2456_v39 = vadd.f32 %v2372_v41, %v12636_v33  ;;  %v3222_v41 = vld [vmem:[#allocation2 + $0x142] sm:$0xff] }
 0x267   : > { %v12639_v33 = vld [vmem:[#allocation11_spill] sm:$0xff] }
 0x268   : > { %v7728_v60 = vpop.eup %7727  ;;  %v9601_v45 = vadd.f32 %v3396_v34, %v3140_v17  ;;  %7410 = vmatmul.msk.f32.gmra.mxu1 %vm529_vm2, %v3219_v50  ;;  %7446 = vmatmul.msk.f32.gmra.mxu2 %vm529_vm2, %v2537_v56  ;;  %v9614_v50 = vpop.permute.xlu1 %5189  ;;  %v2538_v56 = vld [vmem:[#allocation2 + $0x140] sm:$0xff] }
 0x269   : > { %5373 = vrot.lane.b32.xlu2 %v7728_v60, %s8306_s19  ;;  %v3399_v24 = vpop.f32.mrf.mxu0  ;;  %12637 = vst [vmem:[#allocation10_spill] sm:$0xff] %v9614_v50  ;;  %v2881_v50 = vld [vmem:[#allocation2 + $0x151] sm:$0xff] }
 0x26a   : > { %12633 = vst [vmem:[#allocation54_spill] sm:$0xff] %v9601_v45  ;;  %7729 = vtanh.f32 %v9601_v45  ;;  %7482 = vmatmul.msk.f32.gmra.mxu3 %vm529_vm2, %v2879_v51 }
 0x26b   : > { %v2715_v17 = vpop.f32.mrf.mxu2 }
 0x26c   : > { %v2799_v34 = vadd.f32 %v2715_v17, %v2456_v39  ;;  %7518 = vmatmul.msk.f32.gmra.mxu0 %vm529_vm2, %v3221_v25  ;;  %v9623_v17 = vpop.permute.xlu0 %5187 }
 0x26d   : > { %v2375_v59 = vpop.f32.mrf.mxu1  ;;  %v3057_v8 = vpop.f32.mrf.mxu3  ;;  %12640 = vst [vmem:[#allocation11_spill] sm:$0xff] %v9623_v17  ;;  %v3223_v17 = vld [vmem:[#allocation2 + $0x152] sm:$0xff] }
 0x26e   : > { %v3141_v60 = vadd.f32 %v3057_v8, %v2799_v34  ;;  %v2457_v39 = vadd.f32 %v2375_v59, %v12639_v33  ;;  %v9626_v8 = vpop.permute.xlu2 %5191 }
 0x26f   : > { %12641 = vst [vmem:[#allocation58_spill] sm:$0xff] %v9626_v8  ;;  %v12644_v8 = vld [vmem:[#allocation12_spill] sm:$0xff] }
 0x270   : > { %v7730_v22 = vpop.eup %7729  ;;  %v9616_v1 = vadd.f32 %v3399_v24, %v3141_v60  ;;  %7411 = vmatmul.msk.f32.gmra.mxu1 %vm529_vm2, %v3220_v44  ;;  %7447 = vmatmul.msk.f32.gmra.mxu2 %vm529_vm2, %v2538_v56  ;;  %v2539_v60 = vld [vmem:[#allocation2 + $0x150] sm:$0xff]  ;;  %v9629_v19 = vpop.permute.xlu1 %5195 }
 0x271   : > { %5375 = vrot.lane.b32.xlu0 %v7730_v22, %s8306_s19  ;;  %v3402_v51 = vpop.f32.mrf.mxu0  ;;  %12642 = vst [vmem:[#allocation59_spill] sm:$0xff] %v9629_v19 }
 0x272   : > { %12638 = vst [vmem:[#allocation57_spill] sm:$0xff] %v9616_v1  ;;  %7483 = vmatmul.msk.f32.gmra.mxu3 %vm529_vm2, %v2880_v5  ;;  %7731 = vtanh.f32 %v9616_v1 }
 0x273   : > { %v2718_v34 = vpop.f32.mrf.mxu2 }
 0x274   : > { %v2800_v24 = vadd.f32 %v2718_v34, %v2457_v39  ;;  %7519 = vmatmul.msk.f32.gmra.mxu0 %vm529_vm2, %v3222_v41 }
 0x275   : > { %v2378_v44 = vpop.f32.mrf.mxu1  ;;  %v3060_v56 = vpop.f32.mrf.mxu3 }
 0x276   : > { %v3142_v22 = vadd.f32 %v3060_v56, %v2800_v24  ;;  %v2458_v39 = vadd.f32 %v2378_v44, %v12644_v8 }
 0x278   : > { %v9631_v59 = vadd.f32 %v3402_v51, %v3142_v22  ;;  %7412 = vmatmul.msk.f32.gmra.mxu1 %vm529_vm2, %v3221_v25  ;;  %7448 = vmatmul.msk.f32.gmra.mxu2 %vm529_vm2, %v2539_v60  ;;  %v7732_v5 = vpop.eup %7731  ;;  %v9640_v51 = vpop.permute.xlu0 %5193  ;;  %v2540_v60 = vld [vmem:[#allocation2 + $0x158] sm:$0xff] }
 0x279   : > { %v3405_v33 = vpop.f32.mrf.mxu0  ;;  %5377 = vrot.lane.b32.xlu1 %v7732_v5, %s8306_s19  ;;  %12645 = vst [vmem:[#allocation12_spill] sm:$0xff] %v9640_v51  ;;  %v9642_v22 = vpop.permute.xlu2 %5197 }
 0x27a   : > { %12643 = vst [vmem:[#allocation60_spill] sm:$0xff] %v9631_v59  ;;  %7484 = vmatmul.msk.f32.gmra.mxu3 %vm529_vm2, %v2881_v50  ;;  %7733 = vtanh.f32 %v9631_v59  ;;  %v9648_v50 = vpop.permute.xlu1 %5201 }
 0x27b   : > { %v2721_v34 = vpop.f32.mrf.mxu2  ;;  %12646 = vst [vmem:[#allocation61_spill] sm:$0xff] %v9642_v22 }
 0x27c   : > { %v2801_v24 = vadd.f32 %v2721_v34, %v2458_v39  ;;  %7520 = vmatmul.msk.f32.gmra.mxu0 %vm529_vm2, %v3223_v17  ;;  %12648 = vst [vmem:[#allocation63_spill] sm:$0xff] %v9648_v50  ;;  %v3224_v39 = vld [vmem:[#allocation2 + $0x15a] sm:$0xff]  ;;  %v12649_v34 = vld [vmem:[#allocation13_spill] sm:$0xff] }
 0x27d   : > { %v2381_v25 = vpop.f32.mrf.mxu1  ;;  %v3063_v56 = vpop.f32.mrf.mxu3 }
 0x27e   : > { %v3143_v19 = vadd.f32 %v3063_v56, %v2801_v24  ;;  %v2459_v51 = vadd.f32 %v2381_v25, %v12649_v34  ;;  %v2883_v25 = vld [vmem:[#allocation2 + $0x169] sm:$0xff] }
 0x280   : > { %v9644_v8 = vadd.f32 %v3405_v33, %v3143_v19  ;;  %7413 = vmatmul.msk.f32.gmra.mxu1 %vm529_vm2, %v3222_v41  ;;  %7449 = vmatmul.msk.f32.gmra.mxu2 %vm529_vm2, %v2540_v60  ;;  %v7734_v44 = vpop.eup %7733  ;;  %v3605_v41 = vld [vmem:[%s12533_s2] sm:$0xff]  ;;  %v2541_v60 = vld [vmem:[#allocation2 + $0x168] sm:$0xff]  ;;  %v9658_v22 = vpop.permute.xlu0 %5199 }
 0x281   : > { %v3408_v5 = vpop.f32.mrf.mxu0  ;;  %5379 = vrot.lane.b32.xlu2 %v7734_v44, %s8306_s19  ;;  %12650 = vst [vmem:[#allocation13_spill] sm:$0xff] %v9658_v22  ;;  %v8231_v44 = vld [vmem:[#allocation3] sm:$0xff] }
 0x282   : > { %12647 = vst [vmem:[#allocation62_spill] sm:$0xff] %v9644_v8  ;;  %7485 = vmatmul.msk.f32.gmra.mxu3 %vm529_vm2, %v2882_v52  ;;  %7735 = vtanh.f32 %v9644_v8  ;;  %v3637_v34 = vmul.f32 %v8231_v44, %v3605_v41  ;;  %v9660_v52 = vpop.permute.xlu2 %5203  ;;  %v2884_v44 = vld [vmem:[#allocation2 + $0x171] sm:$0xff] }
 0x283   : > { %v2724_v24 = vpop.f32.mrf.mxu2  ;;  %12651 = vst [vmem:[#allocation64_spill] sm:$0xff] %v9660_v52  ;;  %v3226_v22 = vld [vmem:[#allocation2 + $0x172] sm:$0xff] }
 0x284   : > { %v2802_v19 = vadd.f32 %v2724_v24, %v2459_v51  ;;  %7521 = vmatmul.msk.f32.gmra.mxu0 %vm529_vm2, %v3224_v39 }
 0x285   : > { %v2384_v33 = vpop.f32.mrf.mxu1  ;;  %v3066_v56 = vpop.f32.mrf.mxu3 }
 0x286   : > { %v3144_v50 = vadd.f32 %v3066_v56, %v2802_v19  ;;  %v2460_v27 = vadd.f32 %v2384_v33, %v12653_v7  ;;  %v9669_v19 = vpop.permute.xlu1 %5207  ;;  %v2542_v33 = vld [vmem:[#allocation2 + $0x170] sm:$0xff] }
 0x287   : > { %12654 = vst [vmem:[#allocation14_spill] sm:$0xff] %v9669_v19 }
 0x288   : > { %v9662_v13 = vadd.f32 %v3408_v5, %v3144_v50  ;;  %7414 = vmatmul.msk.f32.gmra.mxu1 %vm529_vm2, %v3223_v17  ;;  %7450 = vmatmul.msk.f32.gmra.mxu2 %vm529_vm2, %v2541_v60  ;;  %v7736_v51 = vpop.eup %7735  ;;  %v3669_v50 = vadd.f32 %v3637_v34, %v9533_v2  ;;  %v3606_v17 = vld [vmem:[%s12533_s2 + $0x8] sm:$0xff] }
 0x289   : > { %v3411_v24 = vpop.f32.mrf.mxu0  ;;  %5381 = vrot.lane.b32.xlu0 %v7736_v51, %s8306_s19  ;;  %v8232_v51 = vld [vmem:[#allocation3 + $0x8] sm:$0xff] }
 0x28a   : > { %12652 = vst [vmem:[#allocation65_spill] sm:$0xff] %v9662_v13  ;;  %7486 = vmatmul.msk.f32.gmra.mxu3 %vm529_vm2, %v2883_v25  ;;  %7737 = vtanh.f32 %v9662_v13  ;;  %v7528_v25 = vmul.f32 -1.442695, %v3669_v50  ;;  %v3638_v19 = vmul.f32 %v8232_v51, %v3606_v17  ;;  %v9683_v18 = vpop.permute.xlu2 %5209  ;;  %v3607_v17 = vld [vmem:[%s12533_s2 + $0x10] sm:$0xff] }
 0x28b   : > { %v2727_v41 = vpop.f32.mrf.mxu2  ;;  %12657 = vst [vmem:[#allocation68_spill] sm:$0xff] %v9683_v18 }
 0x28c   : > { %v2803_v5 = vadd.f32 %v2727_v41, %v2460_v27  ;;  %7522 = vmatmul.msk.f32.gmra.mxu0 %vm529_vm2, %v3225_v11  ;;  %v9681_v27 = vpop.permute.xlu0 %5205 }
 0x28d   : > { %v2387_v56 = vpop.f32.mrf.mxu1  ;;  %v3069_v7 = vpop.f32.mrf.mxu3  ;;  %12656 = vst [vmem:[#allocation67_spill] sm:$0xff] %v9681_v27 }
 0x28e   : > { %v3145_v60 = vadd.f32 %v3069_v7, %v2803_v5  ;;  %v2461_v54 = vadd.f32 %v2387_v56, %v12658_v46  ;;  %v9691_v5 = vpop.permute.xlu1 %5213  ;;  %v2543_v7 = vld [vmem:[#allocation2 + $0x180] sm:$0xff] }
 0x28f   : > { %12659 = vst [vmem:[#allocation15_spill] sm:$0xff] %v9691_v5  ;;  %v12661_v5 = vld [vmem:[#allocation16_spill] sm:$0xff] }
 0x290   : > { %v9677_v52 = vadd.f32 %v3411_v24, %v3145_v60  ;;  %7415 = vmatmul.msk.f32.gmra.mxu1 %vm529_vm2, %v3224_v39  ;;  %7451 = vmatmul.msk.f32.gmra.mxu2 %vm529_vm2, %v2542_v33  ;;  %v7738_v34 = vpop.eup %7737  ;;  %v3670_v39 = vadd.f32 %v3638_v19, %v9547_v21  ;;  %v2885_v60 = vld [vmem:[#allocation2 + $0x181] sm:$0xff] }
 0x291   : > { %v3414_v41 = vpop.f32.mrf.mxu0  ;;  %5383 = vrot.lane.b32.xlu1 %v7738_v34, %s8306_s19  ;;  %v3227_v19 = vld [vmem:[#allocation2 + $0x182] sm:$0xff] }
 0x292   : > { %12655 = vst [vmem:[#allocation66_spill] sm:$0xff] %v9677_v52  ;;  %7739 = vtanh.f32 %v9677_v52  ;;  %7487 = vmatmul.msk.f32.gmra.mxu3 %vm529_vm2, %v2884_v44  ;;  %v8233_v44 = vld [vmem:[#allocation3 + $0x10] sm:$0xff] }
 0x293   : > { %v2730_v24 = vpop.f32.mrf.mxu2  ;;  %7741 = vpow2.f32 %v7528_v25  ;;  %v3639_v34 = vmul.f32 %v8233_v44, %v3607_v17  ;;  %v7529_v25 = vmul.f32 -1.442695, %v3670_v39  ;;  %v2886_v44 = vld [vmem:[#allocation2 + $0x189] sm:$0xff] }
 0x294   : > { %v2804_v50 = vadd.f32 %v2730_v24, %v2461_v54  ;;  %7523 = vmatmul.msk.f32.gmra.mxu0 %vm529_vm2, %v3226_v22 }
 0x295   : > { %v2390_v46 = vpop.f32.mrf.mxu1  ;;  %v3072_v56 = vpop.f32.mrf.mxu3 }
 0x296   : > { %v3146_v33 = vadd.f32 %v3072_v56, %v2804_v50  ;;  %v2462_v27 = vadd.f32 %v2390_v46, %v12661_v5  ;;  %v9704_v50 = vpop.permute.xlu0 %5211  ;;  %v3608_v5 = vld [vmem:[%s12533_s2 + $0x18] sm:$0xff] }
 0x297   : > { %12662 = vst [vmem:[#allocation16_spill] sm:$0xff] %v9704_v50  ;;  %v8234_v50 = vld [vmem:[#allocation3 + $0x18] sm:$0xff] }
 0x298   : > { %v7740_v51 = vpop.eup %7739  ;;  %v9696_v18 = vadd.f32 %v3414_v41, %v3146_v33  ;;  %7416 = vmatmul.msk.f32.gmra.mxu1 %vm529_vm2, %v3225_v11  ;;  %7452 = vmatmul.msk.f32.gmra.mxu2 %vm529_vm2, %v2543_v7  ;;  %v3671_v41 = vadd.f32 %v3639_v34, %v9562_v31  ;;  %v9707_v11 = vpop.permute.xlu2 %5215  ;;  %v2544_v33 = vld [vmem:[#allocation2 + $0x188] sm:$0xff] }
 0x299   : > { %5385 = vrot.lane.b32.xlu2 %v7740_v51, %s8306_s19  ;;  %v3417_v54 = vpop.f32.mrf.mxu0  ;;  %v7742_v24 = vpop.eup %7741  ;;  %12663 = vst [vmem:[#allocation70_spill] sm:$0xff] %v9707_v11  ;;  %v3640_v11 = vmul.f32 %v8234_v50, %v3608_v5  ;;  %v3609_v5 = vld [vmem:[%s12533_s2 + $0x20] sm:$0xff] }
 0x29a   : > { %12660 = vst [vmem:[#allocation69_spill] sm:$0xff] %v9696_v18  ;;  %7743 = vtanh.f32 %v9696_v18  ;;  %7488 = vmatmul.msk.f32.gmra.mxu3 %vm529_vm2, %v2885_v60  ;;  %v9710_v56 = vadd.f32 1.0, %v7742_v24  ;;  %v9715_v51 = vpop.permute.xlu1 %5219  ;;  %v7530_v34 = vmul.f32 -1.442695, %v3671_v41 }
 0x29b   : > { %v2733_v39 = vpop.f32.mrf.mxu2  ;;  %7745 = vpow2.f32 %v7529_v25  ;;  %12664 = vst [vmem:[#allocation71_spill] sm:$0xff] %v9715_v51 }
 0x29c   : > { %v2805_v17 = vadd.f32 %v2733_v39, %v2462_v27  ;;  %7524 = vmatmul.msk.f32.gmra.mxu0 %vm529_vm2, %v3227_v19  ;;  %7747 = vrcp.f32 %v9710_v56  ;;  %v3228_v39 = vld [vmem:[#allocation2 + $0x18a] sm:$0xff]  ;;  %v3840_v47 = vand.u32 2147483648, %v9710_v56  ;;  %vm3834_vm4 = vweird.f32 %v9710_v56 }
 0x29d   : > { %v2393_v46 = vpop.f32.mrf.mxu1  ;;  %v3075_v7 = vpop.f32.mrf.mxu3 }
 0x29e   : > { %v3147_v60 = vadd.f32 %v3075_v7, %v2805_v17  ;;  %v12666_v7 = vld [vmem:[#allocation17_spill] sm:$0xff]  ;;  %v9728_v41 = vpop.permute.xlu0 %5217 }
 0x29f   : > { %v2463_v51 = vadd.f32 %v2393_v46, %v12666_v7  ;;  %12667 = vst [vmem:[#allocation17_spill] sm:$0xff] %v9728_v41  ;;  %v4501_v41 = vadd.f32 %v9371_v49, %v9533_v2 }
 0x2a0   : > { %v7744_v25 = vpop.eup %7743  ;;  %v9717_v27 = vadd.f32 %v3417_v54, %v3147_v60  ;;  %7417 = vmatmul.msk.f32.gmra.mxu1 %vm529_vm2, %v3226_v22  ;;  %7453 = vmatmul.msk.f32.gmra.mxu2 %vm529_vm2, %v2544_v33  ;;  %v3672_v54 = vadd.f32 %v3640_v11, %v9575_v16  ;;  %v9735_v7 = vpop.permute.xlu2 %5221  ;;  %v2887_v11 = vld [vmem:[#allocation2 + $0x199] sm:$0xff] }
 0x2a1   : > { %5387 = vrot.lane.b32.xlu0 %v7744_v25, %s8306_s19  ;;  %v3420_v24 = vpop.f32.mrf.mxu0  ;;  %v7746_v17 = vpop.eup %7745  ;;  %v2545_v25 = vld [vmem:[#allocation2 + $0x198] sm:$0xff]  ;;  %12668 = vst [vmem:[#allocation73_spill] sm:$0xff] %v9735_v7 }
 0x2a2   : > { %12665 = vst [vmem:[#allocation72_spill] sm:$0xff] %v9717_v27  ;;  %7749 = vtanh.f32 %v9717_v27  ;;  %7489 = vmatmul.msk.f32.gmra.mxu3 %vm529_vm2, %v2886_v44  ;;  %v9733_v33 = vadd.f32 1.0, %v7746_v17  ;;  %v7531_v35 = vmul.f32 -1.442695, %v3672_v54  ;;  %v9745_v17 = vpop.permute.xlu1 %5225 }
 0x2a3   : > { %v2736_v50 = vpop.f32.mrf.mxu2  ;;  %7751 = vpow2.f32 %v7530_v34  ;;  %v9737_v34 = vpop.eup %7747  ;;  %12670 = vst [vmem:[#allocation75_spill] sm:$0xff] %v9745_v17 }
 0x2a4   : > { %v2806_v22 = vadd.f32 %v2736_v50, %v2463_v51  ;;  %7525 = vmatmul.msk.f32.gmra.mxu0 %vm529_vm2, %v3228_v39  ;;  %v8235_v50 = vld [vmem:[#allocation3 + $0x20] sm:$0xff]  ;;  %7753 = vrcp.f32 %v9733_v33  ;;  %vm3835_vm3 = vweird.f32 %v9737_v34  ;;  %vm3849_vm8 = vweird.f32 %v9733_v33 }
 0x2a5   : > { %v2396_v46 = vpop.f32.mrf.mxu1  ;;  %v3078_v60 = vpop.f32.mrf.mxu3  ;;  %v3641_v58 = vmul.f32 %v8235_v50, %v3609_v5  ;;  %v12671_v5 = vld [vmem:[#allocation18_spill] sm:$0xff]  ;;  %vm9809_vm5 = vmor %vm3834_vm4, %vm3835_vm3 }
 0x2a6   : > { %v3148_v44 = vadd.f32 %v3078_v60, %v2806_v22  ;;  %v3229_v60 = vld [vmem:[#allocation2 + $0x19a] sm:$0xff]  ;;  %v2464_v50 = vadd.f32 %v2396_v46, %v12671_v5  ;;  %v3610_v46 = vld [vmem:[%s12533_s2 + $0x28] sm:$0xff]  ;;  %v9761_v17 = vpop.permute.xlu0 %5223 }
 0x2a7   : > { %v3673_v54 = vadd.f32 %v3641_v58, %v9588_v14  ;;  %12672 = vst [vmem:[#allocation18_spill] sm:$0xff] %v9761_v17  ;;  %v12674_v17 = vld [vmem:[#allocation19_spill] sm:$0xff] }
 0x2a8   : > { %v7750_v51 = vpop.eup %7749  ;;  %v9741_v40 = vadd.f32 %v3420_v24, %v3148_v44  ;;  %7418 = vmatmul.msk.f32.gmra.mxu1 %vm529_vm2, %v3227_v19  ;;  %7454 = vmatmul.msk.f32.gmra.mxu2 %vm529_vm2, %v2545_v25  ;;  %v3830_v19 = vmul.f32 %v9737_v34, %v9710_v56  ;;  %v7560_v24 = vmul.f32 -1.442695, %v4501_v41 }
 0x2a9   : > { %5389 = vrot.lane.b32.xlu1 %v7750_v51, %s8306_s19  ;;  %v3423_v22 = vpop.f32.mrf.mxu0  ;;  %v7752_v7 = vpop.eup %7751 }
 0x2aa   : > { %12669 = vst [vmem:[#allocation74_spill] sm:$0xff] %v9741_v40  ;;  %7755 = vtanh.f32 %v9741_v40  ;;  %7490 = vmatmul.msk.f32.gmra.mxu3 %vm529_vm2, %v2887_v11  ;;  %v9756_v44 = vadd.f32 1.0, %v7752_v7  ;;  %v2546_v11 = vld [vmem:[#allocation2 + $0x1a0] sm:$0xff]  ;;  %v9763_v26 = vpop.eup %7753  ;;  %v3831_v41 = vsub.f32 1.0, %v3830_v19 }
 0x2ab   : > { %v2739_v49 = vpop.f32.mrf.mxu2  ;;  %7757 = vpow2.f32 %v7531_v35  ;;  %v2888_v35 = vld [vmem:[#allocation2 + $0x1a1] sm:$0xff]  ;;  %vm3850_vm7 = vweird.f32 %v9763_v26 }
 0x2ac   : > { %v2807_v25 = vadd.f32 %v2739_v49, %v2464_v50  ;;  %7526 = vmatmul.msk.f32.gmra.mxu0 %vm529_vm2, %v3229_v60  ;;  %7759 = vpow2.f32 %v7560_v24  ;;  %v7532_v50 = vmul.f32 -1.442695, %v3673_v54  ;;  %v8236_v60 = vld [vmem:[#allocation3 + $0x28] sm:$0xff]  ;;  %v9765_v49 = vpop.permute.xlu2 %5227  ;;  %v9776_v54 = vpop.permute.xlu1 %5231  ;;  %vm9842_vm9 = vmor %vm3849_vm8, %vm3850_vm7  ;;  %vm3864_vm12 = vweird.f32 %v9756_v44 }
 0x2ad   : > { %v2399_v51 = vpop.f32.mrf.mxu1  ;;  %v3081_v5 = vpop.f32.mrf.mxu3  ;;  %v3642_v7 = vmul.f32 %v8236_v60, %v3610_v46  ;;  %12673 = vst [vmem:[#allocation76_spill] sm:$0xff] %v9765_v49  ;;  %7761 = vrcp.f32 %v9756_v44 }
 0x2ae   : > { %v3149_v2 = vadd.f32 %v3081_v5, %v2807_v25  ;;  %v3230_v5 = vld [vmem:[#allocation2 + $0x1a2] sm:$0xff]  ;;  %v2465_v24 = vadd.f32 %v2399_v51, %v12674_v17  ;;  %12675 = vst [vmem:[#allocation19_spill] sm:$0xff] %v9776_v54  ;;  %v3611_v17 = vld [vmem:[%s12533_s2 + $0x30] sm:$0xff] }
 0x2af   : > { %v3674_v46 = vadd.f32 %v3642_v7, %v9601_v45 }
 0x2b0   : > { %v7756_v58 = vpop.eup %7755  ;;  %v9767_v10 = vadd.f32 %v3423_v22, %v3149_v2  ;;  %7419 = vmatmul.msk.f32.gmra.mxu1 %vm529_vm2, %v3228_v39  ;;  %7455 = vmatmul.msk.f32.gmra.mxu2 %vm529_vm2, %v2546_v11  ;;  %v3845_v2 = vmul.f32 %v9763_v26, %v9733_v33  ;;  %v3832_v22 = vmul.f32 %v9737_v34, %v3831_v41 }
 0x2b1   : > { %5391 = vrot.lane.b32.xlu2 %v7756_v58, %s8306_s19  ;;  %v3426_v25 = vpop.f32.mrf.mxu0  ;;  %v7758_v19 = vpop.eup %7757  ;;  %v7533_v7 = vmul.f32 -1.442695, %v3674_v46 }
 0x2b2   : > { %7763 = vtanh.f32 %v9767_v10  ;;  %7491 = vmatmul.msk.f32.gmra.mxu3 %vm529_vm2, %v2888_v35  ;;  %v9783_v58 = vadd.f32 1.0, %v7758_v19  ;;  %v7760_v60 = vpop.eup %7759  ;;  %v3846_v61 = vsub.f32 1.0, %v3845_v2  ;;  %v3833_v41 = vadd.f32 %v9737_v34, %v3832_v22 }
 0x2b3   : > { %v2742_v39 = vpop.f32.mrf.mxu2  ;;  %7765 = vpow2.f32 %v7532_v50  ;;  %v9788_v49 = vpop.eup %7761  ;;  %v9797_v63 = vadd.f32 1.0, %v7760_v60  ;;  %v3838_v2 = vand.u32 2147483647, %v9710_v56 }
 0x2b4   : > { %v2808_v11 = vadd.f32 %v2742_v39, %v2465_v24  ;;  %7527 = vmatmul.msk.f32.gmra.mxu0 %vm529_vm2, %v3230_v5  ;;  %v8237_v5 = vld [vmem:[#allocation3 + $0x30] sm:$0xff]  ;;  %v9794_v39 = vpop.permute.xlu0 %5229  ;;  %7767 = vrcp.f32 %v9783_v58  ;;  %v3837_v56 = vsel %vm9809_vm5, %v9737_v34, %v3833_v41  ;;  %v4502_v41 = vadd.f32 %v9394_v20, %v9547_v21 }
 0x2b5   : > { %v2402_v51 = vpop.f32.mrf.mxu1  ;;  %v3084_v35 = vpop.f32.mrf.mxu3  ;;  %v3643_v19 = vmul.f32 %v8237_v5, %v3611_v17  ;;  %12676 = vst [vmem:[#allocation77_spill] sm:$0xff] %v9794_v39  ;;  %vm3839_vm6 = vcmp.eq.f32.partialorder %v3838_v2, 8.507059e+37  ;;  %v3855_v2 = vand.u32 2147483648, %v9733_v33  ;;  %v3853_v20 = vand.u32 2147483647, %v9733_v33 }
 0x2b6   : > { %v3150_v54 = vadd.f32 %v3084_v35, %v2808_v11  ;;  %v9803_v11 = vpop.permute.xlu2 %5233  ;;  %v3847_v35 = vmul.f32 %v9763_v26, %v3846_v61  ;;  %v3612_v61 = vld [vmem:[%s12533_s2 + $0x38] sm:$0xff]  ;;  %vm3865_vm11 = vweird.f32 %v9788_v49  ;;  %vm4666_vm14 = vweird.f32 %v9797_v63 }
 0x2b7   : > { %12677 = vst [vmem:[#allocation78_spill] sm:$0xff] %v9803_v11  ;;  %v3841_v11 = vor.u32 1.1754944e-38, %v3840_v47  ;;  %v3644_v9 = vmul.f32 %v8238_v42, %v3612_v61  ;;  %vm3854_vm10 = vcmp.eq.f32.partialorder %v3853_v20, 8.507059e+37  ;;  %vm9885_vm13 = vmor %vm3864_vm12, %vm3865_vm11  ;;  %vm3879_vm3 = vweird.f32 %v9783_v58 }
 0x2b8   : > { %v7764_v50 = vpop.eup %7763  ;;  %v9792_v24 = vadd.f32 %v3426_v25, %v3150_v54  ;;  %v12678_v25 = vld [vmem:[#allocation20_spill] sm:$0xff]  ;;  %v3848_v47 = vadd.f32 %v9763_v26, %v3847_v35 }
 0x2b9   : > { %5393 = vrot.lane.b32.xlu0 %v7764_v50, %s8306_s19  ;;  %v3429_v22 = vpop.f32.mrf.mxu0  ;;  %v7766_v46 = vpop.eup %7765  ;;  %v2466_v54 = vadd.f32 %v2402_v51, %v12678_v25  ;;  %v3860_v50 = vmul.f32 %v9788_v49, %v9756_v44  ;;  %v3675_v51 = vadd.f32 %v3643_v19, %v9616_v1 }
 0x2ba   : > { %7769 = vtanh.f32 %v9792_v24  ;;  %v9821_v39 = vadd.f32 1.0, %v7766_v46  ;;  %v9828_v19 = vpop.eup %7767 }
 0x2bb   : > { %v2745_v60 = vpop.f32.mrf.mxu2  ;;  %7771 = vpow2.f32 %v7533_v7  ;;  %v5366_v25 = vpop.permute.xlu1 %5365  ;;  %v3842_v7 = vsel %vm3839_vm6, %v3841_v11, %v3837_v56  ;;  %v7534_v29 = vmul.f32 -1.442695, %v3675_v51  ;;  %v7561_v56 = vmul.f32 -1.442695, %v4502_v41 }
 0x2bc   : > { %v2809_v5 = vadd.f32 %v2745_v60, %v2466_v54  ;;  %7773 = vrcp.f32 %v9797_v63  ;;  %v5461_v46 = vmul.f32 %v5366_v25, %v3842_v7  ;;  %v3861_v54 = vsub.f32 1.0, %v3860_v50  ;;  %v9848_v50 = vpop.permute.xlu0 %5235 }
 0x2bd   : > { %v2405_v17 = vpop.f32.mrf.mxu1  ;;  %v3087_v34 = vpop.f32.mrf.mxu3  ;;  %7775 = vrcp.f32 %v9821_v39  ;;  %v3852_v51 = vsel %vm9842_vm9, %v9763_v26, %v3848_v47  ;;  %v3875_v61 = vmul.f32 %v9828_v19, %v9783_v58  ;;  %v3856_v41 = vor.u32 1.1754944e-38, %v3855_v2  ;;  %v3613_v26 = vld [vmem:[%s12533_s2 + $0x40] sm:$0xff] }
 0x2be   : > { %v3151_v3 = vadd.f32 %v3087_v34, %v2809_v5  ;;  %v3862_v25 = vmul.f32 %v9788_v49, %v3861_v54  ;;  %v3676_v34 = vadd.f32 %v3644_v9, %v9631_v59  ;;  %vm3880_vm1 = vweird.f32 %v9828_v19 }
 0x2bf   : > { %v3857_v9 = vsel %vm3854_vm10, %v3856_v41, %v3852_v51  ;;  %v3868_v51 = vand.u32 2147483647, %v9756_v44  ;;  %v4672_v41 = vand.u32 2147483648, %v9797_v63  ;;  %vm9930_vm5 = vmor %vm3879_vm3, %vm3880_vm1  ;;  %vm3894_vm9 = vweird.f32 %v9821_v39 }
 0x2c0   : > { %v7770_v60 = vpop.eup %7769  ;;  %v9833_v57 = vadd.f32 %v3429_v22, %v3151_v3  ;;  %v12684_v3 = vld [vmem:[#allocation21_spill] sm:$0xff] }
 0x2c1   : > { %5395 = vrot.lane.b32.xlu1 %v7770_v60, %s8306_s19  ;;  %5525 = vrot.lane.b32.xlu0 %v5461_v46, %s8305_s18  ;;  %v3432_v11 = vpop.f32.mrf.mxu0  ;;  %v7772_v35 = vpop.eup %7771  ;;  %v2467_v22 = vadd.f32 %v2405_v17, %v12684_v3  ;;  %12685 = vst [vmem:[#allocation21_spill] sm:$0xff] %v9848_v50  ;;  %v4503_v46 = vadd.f32 %v9376_v48, %v9562_v31  ;;  %v8239_v31 = vld [vmem:[#allocation3 + $0x40] sm:$0xff]  ;;  %vm3869_vm0 = vcmp.eq.f32.partialorder %v3868_v51, 8.507059e+37  ;;  %v8240_v51 = vld [vmem:[#allocation3 + $0x48] sm:$0xff] }
 0x2c2   : > { %12681 = vst [vmem:[#allocation20_spill] sm:$0xff] %v9833_v57  ;;  %7777 = vtanh.f32 %v9833_v57  ;;  %v9850_v33 = vpop.eup %7773  ;;  %v5368_v17 = vpop.permute.xlu2 %5367  ;;  %v9861_v60 = vadd.f32 1.0, %v7772_v35  ;;  %v3863_v48 = vadd.f32 %v9788_v49, %v3862_v25  ;;  %v3876_v35 = vsub.f32 1.0, %v3875_v61 }
 0x2c3   : > { %v2748_v5 = vpop.f32.mrf.mxu2  ;;  %7779 = vpow2.f32 %v7534_v29  ;;  %v4662_v29 = vmul.f32 %v9850_v33, %v9797_v63  ;;  %v9868_v2 = vpop.eup %7775  ;;  %v5462_v3 = vmul.f32 %v5368_v17, %v3857_v9  ;;  %v3645_v20 = vmul.f32 %v8239_v31, %v3613_v26 }
 0x2c4   : > { %v2810_v7 = vadd.f32 %v2748_v5, %v2467_v22  ;;  %7781 = vpow2.f32 %v7561_v56  ;;  %v7535_v5 = vmul.f32 -1.442695, %v3676_v34  ;;  %v3870_v56 = vand.u32 2147483648, %v9756_v44 }
 0x2c5   : > { %v2408_v47 = vpop.f32.mrf.mxu1  ;;  %v3090_v54 = vpop.f32.mrf.mxu3  ;;  %v7562_v21 = vmul.f32 -1.442695, %v4503_v46  ;;  %7783 = vrcp.f32 %v9861_v60  ;;  %v4663_v34 = vsub.f32 1.0, %v4662_v29  ;;  %v4670_v31 = vand.u32 2147483647, %v9797_v63 }
 0x2c6   : > { %v3152_v42 = vadd.f32 %v3090_v54, %v2810_v7  ;;  %v3890_v44 = vmul.f32 %v9868_v2, %v9821_v39  ;;  %v3867_v46 = vsel %vm9885_vm13, %v9788_v49, %v3863_v48  ;;  %v3871_v9 = vor.u32 1.1754944e-38, %v3870_v56  ;;  %v3614_v49 = vld [vmem:[%s12533_s2 + $0x48] sm:$0xff] }
 0x2c7   : > { %vm4667_vm15 = vweird.f32 %v9850_v33  ;;  %vm9922_vm4 = vcmp.eq.f32.partialorder %v4670_v31, 8.507059e+37  ;;  %vm3895_vm8 = vweird.f32 %v9868_v2  ;;  %vm3909_vm13 = vweird.f32 %v9861_v60 }
 0x2c8   : > { %v7778_v22 = vpop.eup %7777  ;;  %v9872_v50 = vadd.f32 %v3432_v11, %v3152_v42  ;;  %v2468_v11 = vadd.f32 %v2408_v47, %v9307_v55  ;;  %v3877_v55 = vmul.f32 %v9828_v19, %v3876_v35  ;;  %v3677_v47 = vadd.f32 %v3645_v20, %v9644_v8  ;;  %vm9946_vm6 = vmor %vm4666_vm14, %vm4667_vm15 }
 0x2c9   : > { %5397 = vrot.lane.b32.xlu2 %v7778_v22, %s8306_s19  ;;  %5527 = vrot.lane.b32.xlu1 %v5462_v3, %s8305_s18  ;;  %v3435_v25 = vpop.f32.mrf.mxu0  ;;  %v7780_v61 = vpop.eup %7779  ;;  %v4664_v35 = vmul.f32 %v9850_v33, %v4663_v34  ;;  %v4504_v22 = vadd.f32 %v9396_v38, %v9575_v16  ;;  %v3885_v34 = vand.u32 2147483648, %v9783_v58  ;;  %v3883_v38 = vand.u32 2147483647, %v9783_v58  ;;  %vm9978_vm10 = vmor %vm3894_vm9, %vm3895_vm8 }
 0x2ca   : > { %12686 = vst [vmem:[#allocation79_spill] sm:$0xff] %v9872_v50  ;;  %7785 = vtanh.f32 %v9872_v50  ;;  %v7782_v26 = vpop.eup %7781  ;;  %v9899_v42 = vadd.f32 1.0, %v7780_v61  ;;  %v3878_v61 = vadd.f32 %v9828_v19, %v3877_v55  ;;  %v3646_v50 = vmul.f32 %v8240_v51, %v3614_v49 }
 0x2cb   : > { %v2751_v7 = vpop.f32.mrf.mxu2  ;;  %7787 = vpow2.f32 %v7535_v5  ;;  %v5370_v29 = vpop.permute.xlu0 %5369  ;;  %v3872_v5 = vsel %vm3869_vm0, %v3871_v9, %v3867_v46  ;;  %v9914_v57 = vadd.f32 1.0, %v7782_v26  ;;  %v4665_v55 = vadd.f32 %v9850_v33, %v4664_v35 }
 0x2cc   : > { %v2811_v54 = vadd.f32 %v2751_v7, %v2468_v11  ;;  %7789 = vpow2.f32 %v7562_v21  ;;  %v9907_v56 = vpop.eup %7783  ;;  %v3891_v21 = vsub.f32 1.0, %v3890_v44  ;;  %v5463_v11 = vmul.f32 %v5370_v29, %v3872_v5 }
 0x2cd   : > { %v2411_v3 = vpop.f32.mrf.mxu1  ;;  %v3093_v48 = vpop.f32.mrf.mxu3  ;;  %v7536_v7 = vmul.f32 -1.442695, %v3677_v47  ;;  %7791 = vrcp.f32 %v9899_v42  ;;  %v7563_v26 = vmul.f32 -1.442695, %v4504_v22  ;;  %v4673_v29 = vor.u32 1.1754944e-38, %v4672_v41 }
 0x2ce   : > { %v3153_v20 = vadd.f32 %v3093_v48, %v2811_v54  ;;  %v2469_v47 = vadd.f32 %v2411_v3, %v9320_v0  ;;  %v3892_v9 = vmul.f32 %v9868_v2, %v3891_v21  ;;  %v3882_v31 = vsel %vm9930_vm5, %v9828_v19, %v3878_v61 }
 0x2cf   : > { %v3905_v0 = vmul.f32 %v9907_v56, %v9861_v60  ;;  %v3678_v3 = vadd.f32 %v3646_v50, %v9662_v13  ;;  %v3886_v35 = vor.u32 1.1754944e-38, %v3885_v34  ;;  %v4687_v19 = vand.u32 2147483648, %v9914_v57  ;;  %v3615_v50 = vld [vmem:[%s12533_s2 + $0x50] sm:$0xff] }
 0x2d0   : > { %v7786_v17 = vpop.eup %7785  ;;  %v9911_v8 = vadd.f32 %v3435_v25, %v3153_v20  ;;  %vm3884_vm7 = vcmp.eq.f32.partialorder %v3883_v38, 8.507059e+37  ;;  %v8241_v38 = vld [vmem:[#allocation3 + $0x50] sm:$0xff]  ;;  %v4505_v25 = vadd.f32 %v9366_v53, %v9588_v14  ;;  %vm3910_vm12 = vweird.f32 %v9907_v56 }
 0x2d1   : > { %5529 = vrot.lane.b32.xlu2 %v5463_v11, %s8305_s18  ;;  %5399 = vrot.lane.b32.xlu0 %v7786_v17, %s8306_s19  ;;  %v3438_v44 = vpop.f32.mrf.mxu0  ;;  %v7788_v46 = vpop.eup %7787  ;;  %v4669_v11 = vsel %vm9946_vm6, %v9850_v33, %v4665_v55  ;;  %v3887_v63 = vsel %vm3884_vm7, %v3886_v35, %v3882_v31  ;;  %v3906_v34 = vsub.f32 1.0, %v3905_v0  ;;  %v3647_v54 = vmul.f32 %v8241_v38, %v3615_v50  ;;  %vm10027_vm15 = vmor %vm3909_vm13, %vm3910_vm12 }
 0x2d2   : > { %12689 = vst [vmem:[#allocation80_spill] sm:$0xff] %v9911_v8  ;;  %7793 = vtanh.f32 %v9911_v8  ;;  %v7790_v58 = vpop.eup %7789  ;;  %v9951_v5 = vadd.f32 1.0, %v7788_v46  ;;  %v3898_v55 = vand.u32 2147483647, %v9821_v39  ;;  %v4685_v31 = vand.u32 2147483647, %v9914_v57 }
 0x2d3   : > { %v2754_v49 = vpop.f32.mrf.mxu2  ;;  %7795 = vpow2.f32 %v7536_v7  ;;  %v5372_v22 = vpop.permute.xlu1 %5371  ;;  %v3893_v7 = vadd.f32 %v9868_v2, %v3892_v9  ;;  %v9966_v33 = vadd.f32 1.0, %v7790_v58  ;;  %v9974_v0 = vor.u32 1.1754944e-38, %v4687_v19 }
 0x2d4   : > { %v2812_v48 = vadd.f32 %v2754_v49, %v2469_v47  ;;  %7797 = vrcp.f32 %v9914_v57  ;;  %v9959_v17 = vpop.eup %7791  ;;  %v5464_v51 = vmul.f32 %v5372_v22, %v3887_v63  ;;  %v7537_v47 = vmul.f32 -1.442695, %v3678_v3 }
 0x2d5   : > { %v2414_v20 = vpop.f32.mrf.mxu1  ;;  %v3096_v21 = vpop.f32.mrf.mxu3  ;;  %7799 = vpow2.f32 %v7563_v26  ;;  %v3900_v49 = vand.u32 2147483648, %v9821_v39  ;;  %v4674_v3 = vsel %vm9922_vm4, %v4673_v29, %v4669_v11  ;;  %v3907_v22 = vmul.f32 %v9907_v56, %v3906_v34 }
 0x2d6   : > { %v3154_v61 = vadd.f32 %v3096_v21, %v2812_v48  ;;  %7801 = vrcp.f32 %v9951_v5  ;;  %v2470_v58 = vadd.f32 %v2414_v20, %v9334_v37  ;;  %v3897_v48 = vsel %vm9978_vm10, %v9868_v2, %v3893_v7  ;;  %v5374_v20 = vpop.permute.xlu2 %5373  ;;  %v3616_v2 = vld [vmem:[%s12533_s2 + $0x58] sm:$0xff] }
 0x2d7   : > { %v3920_v41 = vmul.f32 %v9959_v17, %v9899_v42  ;;  %v3679_v37 = vadd.f32 %v3647_v54, %v9677_v52  ;;  %v3901_v50 = vor.u32 1.1754944e-38, %v3900_v49  ;;  %vm3899_vm11 = vcmp.eq.f32.partialorder %v3898_v55, 8.507059e+37  ;;  %v8242_v55 = vld [vmem:[#allocation3 + $0x58] sm:$0xff] }
 0x2d8   : > { %v7794_v46 = vpop.eup %7793  ;;  %v9964_v16 = vadd.f32 %v3438_v44, %v3154_v61  ;;  %v10004_v61 = vmul.f32 %v9571_v23, %v4674_v3  ;;  %v3915_v23 = vand.u32 2147483648, %v9861_v60  ;;  %v3913_v3 = vand.u32 2147483647, %v9861_v60 }
 0x2d9   : > { %5401 = vrot.lane.b32.xlu1 %v7794_v46, %s8306_s19  ;;  %5531 = vrot.lane.b32.xlu0 %v5464_v51, %s8305_s18  ;;  %v3441_v26 = vpop.f32.mrf.mxu0  ;;  %v7796_v9 = vpop.eup %7795  ;;  %v3902_v51 = vsel %vm3899_vm11, %v3901_v50, %v3897_v48  ;;  %v3921_v38 = vsub.f32 1.0, %v3920_v41  ;;  %v7538_v49 = vmul.f32 -1.442695, %v3679_v37  ;;  %vm4681_vm0 = vweird.f32 %v9914_v57 }
 0x2da   : > { %12696 = vst [vmem:[#allocation81_spill] sm:$0xff] %v9964_v16  ;;  %7803 = vtanh.f32 %v9964_v16  ;;  %v9984_v39 = vpop.eup %7797  ;;  %v9998_v29 = vadd.f32 1.0, %v7796_v9  ;;  %v5465_v53 = vmul.f32 %v5374_v20, %v3902_v51  ;;  %v3648_v9 = vmul.f32 %v8242_v55, %v3616_v2 }
 0x2db   : > { %v2757_v35 = vpop.f32.mrf.mxu2  ;;  %v7800_v19 = vpop.eup %7799  ;;  %7805 = vpow2.f32 %v7537_v47  ;;  %v4677_v7 = vmul.f32 %v9984_v39, %v9914_v57  ;;  %v3908_v47 = vadd.f32 %v9907_v56, %v3907_v22  ;;  %vm4682_vm14 = vweird.f32 %v9984_v39 }
 0x2dc   : > { %v2813_v21 = vadd.f32 %v2757_v35, %v2470_v58  ;;  %7807 = vrcp.f32 %v9966_v33  ;;  %v10008_v46 = vpop.eup %7801  ;;  %v7564_v58 = vmul.f32 -1.442695, %v4505_v25  ;;  %v10020_v22 = vadd.f32 1.0, %v7800_v19  ;;  %vm10096_vm7 = vmor %vm4681_vm0, %vm4682_vm14 }
 0x2dd   : > { %v2417_v11 = vpop.f32.mrf.mxu1  ;;  %v3099_v63 = vpop.f32.mrf.mxu3  ;;  %7809 = vrcp.f32 %v9998_v29  ;;  %v4678_v41 = vsub.f32 1.0, %v4677_v7  ;;  %v3935_v19 = vmul.f32 %v10008_v46, %v9951_v5  ;;  %v3680_v25 = vadd.f32 %v3648_v9, %v9696_v18 }
 0x2de   : > { %v3155_v34 = vadd.f32 %v3099_v63, %v2813_v21  ;;  %v3922_v21 = vmul.f32 %v9959_v17, %v3921_v38  ;;  %v4702_v7 = vand.u32 2147483648, %v9966_v33  ;;  %vm3914_vm1 = vcmp.eq.f32.partialorder %v3913_v3, 8.507059e+37 }
 0x2df   : > { %v3936_v55 = vsub.f32 1.0, %v3935_v19  ;;  %vm3925_vm3 = vweird.f32 %v9959_v17  ;;  %vm3924_vm4 = vweird.f32 %v9899_v42  ;;  %v3928_v19 = vand.u32 2147483647, %v9899_v42 }
 0x2e0   : > { %v7804_v54 = vpop.eup %7803  ;;  %v10012_v44 = vadd.f32 %v3441_v26, %v3155_v34  ;;  %v2471_v26 = vadd.f32 %v2417_v11, %v9348_v32  ;;  %v3912_v32 = vsel %vm10027_vm15, %v9907_v56, %v3908_v47  ;;  %v3916_v11 = vor.u32 1.1754944e-38, %v3915_v23  ;;  %v3617_v34 = vld [vmem:[%s12533_s2 + $0x60] sm:$0xff]  ;;  %vm10077_vm6 = vmor %vm3924_vm4, %vm3925_vm3 }
 0x2e1   : > { %5403 = vrot.lane.b32.xlu2 %v7804_v54, %s8306_s19  ;;  %5533 = vrot.lane.b32.xlu1 %v5465_v53, %s8305_s18  ;;  %v3444_v48 = vpop.f32.mrf.mxu0  ;;  %v7806_v35 = vpop.eup %7805  ;;  %v4679_v47 = vmul.f32 %v9984_v39, %v4678_v41  ;;  %v3923_v23 = vadd.f32 %v9959_v17, %v3922_v21  ;;  %vm10067_vm5 = vcmp.eq.f32.partialorder %v4685_v31, 8.507059e+37  ;;  %v3937_v31 = vmul.f32 %v10008_v46, %v3936_v55 }
 0x2e2   : > { %12699 = vst [vmem:[#allocation82_spill] sm:$0xff] %v10012_v44  ;;  %7811 = vtanh.f32 %v10012_v44  ;;  %v10031_v50 = vpop.eup %7807  ;;  %v10043_v51 = vadd.f32 1.0, %v7806_v35  ;;  %v3917_v38 = vsel %vm3914_vm1, %v3916_v11, %v3912_v32  ;;  %v7539_v35 = vmul.f32 -1.442695, %v3680_v25 }
 0x2e3   : > { %v2760_v20 = vpop.f32.mrf.mxu2  ;;  %7813 = vpow2.f32 %v7538_v49  ;;  %v5376_v63 = vpop.permute.xlu0 %5375  ;;  %v4692_v41 = vmul.f32 %v10031_v50, %v9966_v33  ;;  %vm3929_vm8 = vcmp.eq.f32.partialorder %v3928_v19, 8.507059e+37  ;;  %v4506_v57 = vadd.f32 %v9391_v28, %v9601_v45 }
 0x2e4   : > { %v2814_v2 = vadd.f32 %v2760_v20, %v2471_v26  ;;  %7815 = vpow2.f32 %v7564_v58  ;;  %v10050_v49 = vpop.eup %7809  ;;  %v5466_v9 = vmul.f32 %v5376_v63, %v3917_v38  ;;  %v8243_v26 = vld [vmem:[#allocation3 + $0x60] sm:$0xff]  ;;  %v3930_v20 = vand.u32 2147483648, %v9899_v42 }
 0x2e5   : > { %v2420_v56 = vpop.f32.mrf.mxu1  ;;  %v3102_v53 = vpop.f32.mrf.mxu3  ;;  %7817 = vrcp.f32 %v10020_v22  ;;  %v3649_v3 = vmul.f32 %v8243_v26, %v3617_v34  ;;  %vm4697_vm9 = vweird.f32 %v10031_v50  ;;  %v3938_v42 = vadd.f32 %v10008_v46, %v3937_v31 }
 0x2e6   : > { %v3156_v54 = vadd.f32 %v3102_v53, %v2814_v2  ;;  %7819 = vrcp.f32 %v10043_v51  ;;  %v10071_v2 = vor.u32 1.1754944e-38, %v4702_v7  ;;  %v2472_v11 = vadd.f32 %v2420_v56, %v9362_v62 }
 0x2e7   : > { %v3927_v7 = vsel %vm10077_vm6, %v9959_v17, %v3923_v23  ;;  %v3950_v62 = vmul.f32 %v10050_v49, %v9998_v29  ;;  %v4693_v17 = vsub.f32 1.0, %v4692_v41  ;;  %vm3940_vm10 = vweird.f32 %v10008_v46 }
 0x2e8   : > { %v7812_v58 = vpop.eup %7811  ;;  %v10054_v37 = vadd.f32 %v3444_v48, %v3156_v54  ;;  %v4680_v48 = vadd.f32 %v9984_v39, %v4679_v47  ;;  %v3681_v47 = vadd.f32 %v3649_v3, %v9717_v27  ;;  %v3931_v54 = vor.u32 1.1754944e-38, %v3930_v20 }
 0x2e9   : > { %5535 = vrot.lane.b32.xlu2 %v5466_v9, %s8305_s18  ;;  %5405 = vrot.lane.b32.xlu0 %v7812_v58, %s8306_s19  ;;  %v3447_v32 = vpop.f32.mrf.mxu0  ;;  %v7814_v21 = vpop.eup %7813  ;;  %v4717_v58 = vand.u32 2147483648, %v10020_v22  ;;  %vm4696_vm11 = vweird.f32 %v9966_v33  ;;  %v3945_v28 = vand.u32 2147483648, %v9951_v5  ;;  %vm3939_vm12 = vweird.f32 %v9951_v5 }
 0x2ea   : > { %7821 = vtanh.f32 %v10054_v37  ;;  %v7816_v63 = vpop.eup %7815  ;;  %v10100_v23 = vadd.f32 1.0, %v7814_v21  ;;  %v4684_v20 = vsel %vm10096_vm7, %v9984_v39, %v4680_v48  ;;  %v7540_v55 = vmul.f32 -1.442695, %v3681_v47  ;;  %v8244_v39 = vld [vmem:[#allocation3 + $0x68] sm:$0xff]  ;;  %vm10129_vm13 = vmor %vm3939_vm12, %vm3940_vm10 }
 0x2eb   : > { %v2763_v53 = vpop.f32.mrf.mxu2  ;;  %v10088_v56 = vpop.eup %7817  ;;  %7823 = vpow2.f32 %v7539_v35  ;;  %v3618_v35 = vld [vmem:[%s12533_s2 + $0x68] sm:$0xff]  ;;  %v3943_v31 = vand.u32 2147483647, %v9951_v5  ;;  %v4689_v5 = vsel %vm10067_vm5, %v9974_v0, %v4684_v20  ;;  %v3946_v0 = vor.u32 1.1754944e-38, %v3945_v28  ;;  %vm10175_vm1 = vmor %vm4696_vm11, %vm4697_vm9 }
 0x2ec   : > { %v2815_v38 = vadd.f32 %v2763_v53, %v2472_v11  ;;  %v5378_v9 = vpop.permute.xlu1 %5377  ;;  %v3932_v11 = vsel %vm3929_vm8, %v3931_v54, %v3927_v7  ;;  %v10111_v21 = vpop.eup %7819  ;;  %v3951_v53 = vsub.f32 1.0, %v3950_v62  ;;  %v3650_v48 = vmul.f32 %v8244_v39, %v3618_v35 }
 0x2ed   : > { %v2423_v26 = vpop.f32.mrf.mxu1  ;;  %v3105_v3 = vpop.f32.mrf.mxu3  ;;  %v5467_v19 = vmul.f32 %v5378_v9, %v3932_v11  ;;  %v4694_v7 = vmul.f32 %v10031_v50, %v4693_v17  ;;  %7825 = vrcp.f32 %v10100_v23  ;;  %v7565_v54 = vmul.f32 -1.442695, %v4506_v57 }
 0x2ee   : > { %v3157_v41 = vadd.f32 %v3105_v3, %v2815_v38  ;;  %v10125_v38 = vor.u32 1.1754944e-38, %v4717_v58  ;;  %v2473_v9 = vadd.f32 %v2423_v26, %v9382_v4  ;;  %v3952_v17 = vmul.f32 %v10050_v49, %v3951_v53  ;;  %v5380_v26 = vpop.permute.xlu2 %5379 }
 0x2ef   : > { %v3965_v35 = vmul.f32 %v10111_v21, %v10043_v51  ;;  %v12710_v3 = vand.u32 2147483647, %v9966_v33  ;;  %v3682_v25 = vadd.f32 %v3650_v48, %v9741_v40  ;;  %v10151_v57 = vadd.f32 1.0, %v7816_v63 }
 0x2f0   : > { %v7822_v34 = vpop.eup %7821  ;;  %v10117_v60 = vadd.f32 %v3447_v32, %v3157_v41  ;;  %v3619_v41 = vld [vmem:[%s12533_s2 + $0x70] sm:$0xff]  ;;  %vm3944_vm15 = vcmp.eq.f32.partialorder %v3943_v31, 8.507059e+37  ;;  %v4707_v53 = vmul.f32 %v10088_v56, %v10020_v22  ;;  %v3953_v28 = vadd.f32 %v10050_v49, %v3952_v17 }
 0x2f1   : > { %5407 = vrot.lane.b32.xlu1 %v7822_v34, %s8306_s19  ;;  %5537 = vrot.lane.b32.xlu0 %v5467_v19, %s8305_s18  ;;  %v3450_v62 = vpop.f32.mrf.mxu0  ;;  %v7824_v47 = vpop.eup %7823  ;;  %v3942_v34 = vsel %vm10129_vm13, %v10008_v46, %v3938_v42  ;;  %vm10146_vm14 = vcmp.eq.f32.partialorder %v12710_v3, 8.507059e+37  ;;  %v4695_v46 = vadd.f32 %v10031_v50, %v4694_v7  ;;  %vm3955_vm0 = vweird.f32 %v10050_v49 }
 0x2f2   : > { %7827 = vtanh.f32 %v10117_v60  ;;  %v10154_v11 = vadd.f32 1.0, %v7824_v47  ;;  %v3966_v7 = vsub.f32 1.0, %v3965_v35  ;;  %v7541_v32 = vmul.f32 -1.442695, %v3682_v25 }
 0x2f3   : > { %v2766_v58 = vpop.f32.mrf.mxu2  ;;  %7829 = vpow2.f32 %v7540_v55  ;;  %v3947_v55 = vsel %vm3944_vm15, %v3946_v0, %v3942_v34  ;;  %v10161_v48 = vpop.eup %7825  ;;  %v3960_v3 = vand.u32 2147483648, %v9998_v29  ;;  %vm3954_vm3 = vweird.f32 %v9998_v29 }
 0x2f4   : > { %v2816_v20 = vadd.f32 %v2766_v58, %v2473_v9  ;;  %7831 = vpow2.f32 %v7565_v54  ;;  %v5468_v63 = vmul.f32 %v5380_v26, %v3947_v55  ;;  %v8245_v9 = vld [vmem:[#allocation3 + $0x70] sm:$0xff]  ;;  %v10169_v54 = vmul.f32 %v9592_v6, %v4689_v5  ;;  %vm10192_vm5 = vmor %vm3954_vm3, %vm3955_vm0 }
 0x2f5   : > { %v2426_v42 = vpop.f32.mrf.mxu1  ;;  %v3108_v19 = vpop.f32.mrf.mxu3  ;;  %v3651_v31 = vmul.f32 %v8245_v9, %v3619_v41  ;;  %7833 = vrcp.f32 %v10154_v11  ;;  %v4708_v17 = vsub.f32 1.0, %v4707_v53  ;;  %vm4712_vm4 = vweird.f32 %v10088_v56 }
 0x2f6   : > { %v3158_v39 = vadd.f32 %v3108_v19, %v2816_v20  ;;  %v4699_v33 = vsel %vm10175_vm1, %v10031_v50, %v4695_v46  ;;  %v2474_v35 = vadd.f32 %v2426_v42, %v9402_v30  ;;  %v3957_v50 = vsel %vm10192_vm5, %v10050_v49, %v3953_v28  ;;  %v3620_v49 = vld [vmem:[%s12533_s2 + $0x78] sm:$0xff] }
 0x2f7   : > { %v3967_v30 = vmul.f32 %v10111_v21, %v3966_v7  ;;  %vm4711_vm6 = vweird.f32 %v10020_v22  ;;  %v3683_v20 = vadd.f32 %v3651_v31, %v9767_v10  ;;  %v3961_v41 = vor.u32 1.1754944e-38, %v3960_v3 }
 0x2f8   : > { %v7828_v47 = vpop.eup %7827  ;;  %v10165_v58 = vadd.f32 %v3450_v62, %v3158_v39  ;;  %v3958_v62 = vand.u32 2147483647, %v9998_v29  ;;  %v3980_v29 = vmul.f32 %v10161_v48, %v10100_v23  ;;  %v4704_v19 = vsel %vm10146_vm14, %v10071_v2, %v4699_v33  ;;  %vm10261_vm12 = vmor %vm4711_vm6, %vm4712_vm4 }
 0x2f9   : > { %5409 = vrot.lane.b32.xlu2 %v7828_v47, %s8306_s19  ;;  %5539 = vrot.lane.b32.xlu1 %v5468_v63, %s8305_s18  ;;  %v3453_v6 = vpop.f32.mrf.mxu0  ;;  %v7830_v5 = vpop.eup %7829  ;;  %v4709_v28 = vmul.f32 %v10088_v56, %v4708_v17  ;;  %v4507_v7 = vadd.f32 %v9419_v15, %v9616_v1  ;;  %v3968_v31 = vadd.f32 %v10111_v21, %v3967_v30  ;;  %vm3970_vm8 = vweird.f32 %v10111_v21 }
 0x2fa   : > { %7835 = vtanh.f32 %v10165_v58  ;;  %v7832_v26 = vpop.eup %7831  ;;  %v10209_v55 = vadd.f32 1.0, %v7830_v5  ;;  %vm3959_vm7 = vcmp.eq.f32.partialorder %v3958_v62, 8.507059e+37  ;;  %v3981_v2 = vsub.f32 1.0, %v3980_v29  ;;  %v8246_v62 = vld [vmem:[#allocation3 + $0x78] sm:$0xff] }
 0x2fb   : > { %7837 = vrcp.f32 %v10151_v57  ;;  %v2769_v0 = vpop.f32.mrf.mxu2  ;;  %v5382_v42 = vpop.permute.xlu0 %5381  ;;  %v3962_v47 = vsel %vm3959_vm7, %v3961_v41, %v3957_v50  ;;  %v7542_v34 = vmul.f32 -1.442695, %v3683_v20  ;;  %v3652_v5 = vmul.f32 %v8246_v62, %v3620_v49 }
 0x2fc   : > { %7839 = vpow2.f32 %v7541_v32  ;;  %v2817_v46 = vadd.f32 %v2769_v0, %v2474_v35  ;;  %v10217_v4 = vpop.eup %7833  ;;  %v5469_v9 = vmul.f32 %v5382_v42, %v3962_v47  ;;  %v3975_v17 = vand.u32 2147483648, %v10043_v51 }
 0x2fd   : > { %v2429_v39 = vpop.f32.mrf.mxu1  ;;  %v3111_v63 = vpop.f32.mrf.mxu3  ;;  %v4732_v15 = vand.u32 2147483648, %v10151_v57  ;;  %7841 = vrcp.f32 %v10209_v55  ;;  %vm3969_vm9 = vweird.f32 %v10043_v51  ;;  %v3973_v25 = vand.u32 2147483647, %v10043_v51  ;;  %v12729_v51 = vld [vmem:[#allocation22_spill] sm:$0xff] }
 0x2fe   : > { %v3159_v32 = vadd.f32 %v3111_v63, %v2817_v46  ;;  %v10234_v50 = vmul.f32 %v9579_v12, %v4704_v19  ;;  %v2475_v30 = vadd.f32 %v2429_v39, %v9422_v43  ;;  %vm10240_vm10 = vmor %vm3969_vm9, %vm3970_vm8  ;;  %v12719_v46 = vand.u32 2147483647, %v10020_v22 }
 0x2ff   : > { %v7566_v41 = vmul.f32 -1.442695, %v4507_v7  ;;  %v3982_v12 = vmul.f32 %v10161_v48, %v3981_v2  ;;  %v3972_v43 = vsel %vm10240_vm10, %v10111_v21, %v3968_v31  ;;  %v3995_v19 = vmul.f32 %v10217_v4, %v10154_v11 }
 0x300   : > { %v7836_v3 = vpop.eup %7835  ;;  %v10221_v33 = vadd.f32 %v3453_v6, %v3159_v32  ;;  %v4710_v6 = vadd.f32 %v10088_v56, %v4709_v28  ;;  %vm10246_vm11 = vcmp.eq.f32.partialorder %v12719_v46, 8.507059e+37  ;;  %v3684_v49 = vadd.f32 %v3652_v5, %v9792_v24 }
 0x301   : > { %v10224_v35 = vpop.eup %7837  ;;  %5541 = vrot.lane.b32.xlu2 %v5469_v9, %s8305_s18  ;;  %5411 = vrot.lane.b32.xlu0 %v7836_v3, %s8306_s19  ;;  %v3456_v29 = vpop.f32.mrf.mxu0  ;;  %v3976_v63 = vor.u32 1.1754944e-38, %v3975_v17  ;;  %v10265_v47 = vadd.f32 1.0, %v7832_v26  ;;  %v10267_v21 = vor.u32 1.1754944e-38, %v4732_v15  ;;  %vm3974_vm13 = vcmp.eq.f32.partialorder %v3973_v25, 8.507059e+37  ;;  %v3621_v3 = vld [vmem:[%s12533_s2 + $0x80] sm:$0xff] }
 0x302   : > { %v7840_v0 = vpop.eup %7839  ;;  %7843 = vtanh.f32 %v10221_v33  ;;  %v4714_v31 = vsel %vm10261_vm12, %v10088_v56, %v4710_v6  ;;  %v4508_v22 = vadd.f32 %v9412_v36, %v9631_v59  ;;  %v3983_v5 = vadd.f32 %v10161_v48, %v3982_v12  ;;  %v8247_v6 = vld [vmem:[#allocation3 + $0x80] sm:$0xff] }
 0x303   : > { %v2772_v42 = vpop.f32.mrf.mxu2  ;;  %7845 = vpow2.f32 %v7542_v34  ;;  %v5384_v28 = vpop.permute.xlu1 %5383  ;;  %v10269_v32 = vadd.f32 1.0, %v7840_v0  ;;  %v3977_v26 = vsel %vm3974_vm13, %v3976_v63, %v3972_v43  ;;  %vm3985_vm14 = vweird.f32 %v10161_v48  ;;  %v12726_v43 = vld [vmem:[#allocation24_spill] sm:$0xff] }
 0x304   : > { %v2818_v39 = vadd.f32 %v2772_v42, %v2475_v30  ;;  %v10279_v62 = vpop.eup %7841  ;;  %v5470_v17 = vmul.f32 %v5384_v28, %v3977_v26  ;;  %v3996_v15 = vsub.f32 1.0, %v3995_v19  ;;  %7847 = vpow2.f32 %v7566_v41  ;;  %v12727_v26 = vld [vmem:[#allocation20_spill] sm:$0xff] }
 0x305   : > { %v2432_v2 = vpop.f32.mrf.mxu1  ;;  %v3114_v9 = vpop.f32.mrf.mxu3  ;;  %v7543_v56 = vmul.f32 -1.442695, %v3684_v49  ;;  %v3990_v0 = vand.u32 2147483648, %v10100_v23  ;;  %7849 = vrcp.f32 %v10269_v32  ;;  %v3653_v30 = vmul.f32 %v8247_v6, %v3621_v3 }
 0x306   : > { %v3160_v34 = vadd.f32 %v3114_v9, %v2818_v39  ;;  %vm3984_vm15 = vweird.f32 %v10100_v23  ;;  %v3988_v20 = vand.u32 2147483647, %v10100_v23  ;;  %v7567_v41 = vmul.f32 -1.442695, %v4508_v22  ;;  %v12734_v22 = vld [vmem:[#allocation79_spill] sm:$0xff] }
 0x307   : > { %v10293_v42 = vmul.f32 %v10224_v35, %v10151_v57  ;;  %vm10297_vm0 = vmor %vm3984_vm15, %vm3985_vm14  ;;  %v2476_v19 = vadd.f32 %v2432_v2, %v12726_v43  ;;  %v3997_v39 = vmul.f32 %v10217_v4, %v3996_v15  ;;  %v4010_v63 = vmul.f32 %v10279_v62, %v10209_v55  ;;  %v5386_v2 = vpop.permute.xlu2 %5385  ;;  %v12730_v43 = vld [vmem:[#allocation8_spill] sm:$0xff] }
 0x308   : > { %v7844_v25 = vpop.eup %7843  ;;  %v10284_v36 = vadd.f32 %v3456_v29, %v3160_v34  ;;  %v3987_v23 = vsel %vm10297_vm0, %v10161_v48, %v3983_v5  ;;  %v4719_v28 = vsel %vm10246_vm11, %v10125_v38, %v4714_v31  ;;  %v3991_v7 = vor.u32 1.1754944e-38, %v3990_v0  ;;  %v3622_v34 = vld [vmem:[%s12533_s2 + $0x88] sm:$0xff]  ;;  %v12728_v38 = vld [vmem:[#allocation62_spill] sm:$0xff] }
 0x309   : > { %5413 = vrot.lane.b32.xlu1 %v7844_v25, %s8306_s19  ;;  %5543 = vrot.lane.b32.xlu0 %v5470_v17, %s8305_s18  ;;  %v3459_v46 = vpop.f32.mrf.mxu0  ;;  %v7846_v12 = vpop.eup %7845  ;;  %v3685_v48 = vadd.f32 %v3653_v30, %v12727_v26  ;;  %vm3989_vm1 = vcmp.eq.f32.partialorder %v3988_v20, 8.507059e+37  ;;  %v4509_v31 = vadd.f32 %v12729_v51, %v12728_v38  ;;  %vm4000_vm3 = vweird.f32 %v10217_v4 }
 0x30a   : > { %7851 = vtanh.f32 %v10284_v36  ;;  %v10314_v3 = vadd.f32 1.0, %v7846_v12  ;;  %v7848_v15 = vpop.eup %7847  ;;  %v3992_v25 = vsel %vm3989_vm1, %v3991_v7, %v3987_v23  ;;  %v3998_v12 = vadd.f32 %v10217_v4, %v3997_v39 }
 0x30b   : > { %7853 = vrcp.f32 %v10265_v47  ;;  %v2775_v49 = vpop.f32.mrf.mxu2  ;;  %v10322_v0 = vpop.eup %7849  ;;  %v5471_v6 = vmul.f32 %v5386_v2, %v3992_v25  ;;  %v4011_v30 = vsub.f32 1.0, %v4010_v63  ;;  %v10327_v20 = vmul.f32 %v12730_v43, %v4719_v28 }
 0x30c   : > { %7855 = vpow2.f32 %v7543_v56  ;;  %v2819_v9 = vadd.f32 %v2775_v49, %v2476_v19  ;;  %v8248_v19 = vld [vmem:[#allocation3 + $0x88] sm:$0xff]  ;;  %v4005_v51 = vand.u32 2147483648, %v10154_v11  ;;  %v7544_v7 = vmul.f32 -1.442695, %v3685_v48 }
 0x30d   : > { %v2435_v5 = vpop.f32.mrf.mxu1  ;;  %v3117_v17 = vpop.f32.mrf.mxu3  ;;  %7857 = vpow2.f32 %v7567_v41  ;;  %v3654_v49 = vmul.f32 %v8248_v19, %v3622_v34  ;;  %vm3999_vm4 = vweird.f32 %v10154_v11  ;;  %v4003_v39 = vand.u32 2147483647, %v10154_v11 }
 0x30e   : > { %v3161_v56 = vadd.f32 %v3117_v17, %v2819_v9  ;;  %7859 = vrcp.f32 %v10314_v3  ;;  %v7568_v2 = vmul.f32 -1.442695, %v4509_v31  ;;  %v12731_v9 = vld [vmem:[#allocation28_spill] sm:$0xff]  ;;  %vm10344_vm5 = vmor %vm3999_vm4, %vm4000_vm3  ;;  %v4723_v17 = vsub.f32 1.0, %v10293_v42 }
 0x30f   : > { %v2477_v34 = vadd.f32 %v2435_v5, %v12731_v9  ;;  %v4025_v11 = vmul.f32 %v10322_v0, %v10269_v32  ;;  %v4002_v31 = vsel %vm10344_vm5, %v10217_v4, %v3998_v12  ;;  %v4012_v5 = vmul.f32 %v10279_v62, %v4011_v30  ;;  %v3623_v4 = vld [vmem:[%s12533_s2 + $0x90] sm:$0xff]  ;;  %v12735_v30 = vld [vmem:[#allocation26_spill] sm:$0xff] }
 0x310   : > { %v7852_v29 = vpop.eup %7851  ;;  %v10329_v41 = vadd.f32 %v3459_v46, %v3161_v56  ;;  %v4747_v46 = vand.u32 2147483648, %v10265_v47  ;;  %v4006_v19 = vor.u32 1.1754944e-38, %v4005_v51  ;;  %v3686_v53 = vadd.f32 %v3654_v49, %v12734_v22 }
 0x311   : > { %v10332_v23 = vpop.eup %7853  ;;  %5415 = vrot.lane.b32.xlu2 %v7852_v29, %s8306_s19  ;;  %5545 = vrot.lane.b32.xlu1 %v5471_v6, %s8305_s18  ;;  %v3462_v63 = vpop.f32.mrf.mxu0  ;;  %v10355_v6 = vadd.f32 1.0, %v7848_v15  ;;  %vm4004_vm6 = vcmp.eq.f32.partialorder %v4003_v39, 8.507059e+37  ;;  %v4510_v48 = vadd.f32 %v12735_v30, %v9662_v13  ;;  %vm4015_vm7 = vweird.f32 %v10279_v62  ;;  %v8249_v39 = vld [vmem:[#allocation3 + $0x90] sm:$0xff] }
 0x312   : > { %v7856_v28 = vpop.eup %7855  ;;  %7861 = vtanh.f32 %v10329_v41  ;;  %v10359_v29 = vmul.f32 %v10332_v23, %v10265_v47  ;;  %v4007_v1 = vsel %vm4004_vm6, %v4006_v19, %v4002_v31  ;;  %v3655_v38 = vmul.f32 %v8249_v39, %v3623_v4 }
 0x313   : > { %v2778_v25 = vpop.f32.mrf.mxu2  ;;  %v7858_v56 = vpop.eup %7857  ;;  %v10361_v9 = vadd.f32 1.0, %v7856_v28  ;;  %7863 = vpow2.f32 %v7544_v7  ;;  %v4026_v28 = vsub.f32 1.0, %v4025_v11  ;;  %v4013_v7 = vadd.f32 %v10279_v62, %v4012_v5 }
 0x314   : > { %v2820_v43 = vadd.f32 %v2778_v25, %v2477_v34  ;;  %v5388_v42 = vpop.permute.xlu0 %5387  ;;  %7865 = vpow2.f32 %v7568_v2  ;;  %v10369_v51 = vpop.eup %7859  ;;  %v10373_v59 = vadd.f32 1.0, %v7858_v56  ;;  %v4020_v2 = vand.u32 2147483648, %v10209_v55 }
 0x315   : > { %v2438_v12 = vpop.f32.mrf.mxu1  ;;  %v3120_v15 = vpop.f32.mrf.mxu3  ;;  %v5472_v25 = vmul.f32 %v5388_v42, %v4007_v1  ;;  %7867 = vrcp.f32 %v10361_v9  ;;  %v7545_v31 = vmul.f32 -1.442695, %v3686_v53  ;;  %vm4014_vm8 = vweird.f32 %v10209_v55  ;;  %v8250_v53 = vld [vmem:[#allocation3 + $0x98] sm:$0xff] }
 0x316   : > { %v3162_v34 = vadd.f32 %v3120_v15, %v2820_v43  ;;  %v4018_v1 = vand.u32 2147483647, %v10209_v55  ;;  %v10383_v5 = vor.u32 1.1754944e-38, %v4747_v46  ;;  %v7569_v56 = vmul.f32 -1.442695, %v4510_v48  ;;  %v12737_v43 = vld [vmem:[#allocation32_spill] sm:$0xff]  ;;  %vm10389_vm9 = vmor %vm4014_vm8, %vm4015_vm7 }
 0x317   : > { %v4027_v42 = vmul.f32 %v10322_v0, %v4026_v28  ;;  %v4017_v46 = vsel %vm10389_vm9, %v10279_v62, %v4013_v7  ;;  %v4040_v4 = vmul.f32 %v10369_v51, %v10314_v3  ;;  %v4724_v15 = vmul.f32 %v10224_v35, %v4723_v17  ;;  %v3624_v62 = vld [vmem:[%s12533_s2 + $0x98] sm:$0xff] }
 0x318   : > { %v7862_v49 = vpop.eup %7861  ;;  %v10375_v45 = vadd.f32 %v3462_v63, %v3162_v34  ;;  %v2478_v63 = vadd.f32 %v2438_v12, %v12737_v43  ;;  %v4021_v48 = vor.u32 1.1754944e-38, %v4020_v2  ;;  %v3687_v28 = vadd.f32 %v3655_v38, %v9911_v8 }
 0x319   : > { %5547 = vrot.lane.b32.xlu2 %v5472_v25, %s8305_s18  ;;  %5417 = vrot.lane.b32.xlu0 %v7862_v49, %s8306_s19  ;;  %v3465_v11 = vpop.f32.mrf.mxu0  ;;  %v7864_v19 = vpop.eup %7863  ;;  %v4738_v25 = vsub.f32 1.0, %v10359_v29  ;;  %vm4019_vm10 = vcmp.eq.f32.partialorder %v4018_v1, 8.507059e+37  ;;  %vm4727_vm11 = vweird.f32 %v10224_v35  ;;  %v4028_v29 = vadd.f32 %v10322_v0, %v4027_v42 }
 0x31a   : > { %12736 = vst [vmem:[#allocation24_spill] sm:$0xff] %v10375_v45  ;;  %7869 = vtanh.f32 %v10375_v45  ;;  %v7866_v12 = vpop.eup %7865  ;;  %v10408_v39 = vadd.f32 1.0, %v7864_v19  ;;  %v4022_v17 = vsel %vm4019_vm10, %v4021_v48, %v4017_v46  ;;  %vm4030_vm12 = vweird.f32 %v10322_v0 }
 0x31b   : > { %7871 = vrcp.f32 %v10355_v6  ;;  %v2781_v55 = vpop.f32.mrf.mxu2  ;;  %v5390_v34 = vpop.permute.xlu1 %5389  ;;  %vm4726_vm13 = vweird.f32 %v10151_v57  ;;  %v10415_v1 = vadd.f32 1.0, %v7866_v12  ;;  %v7546_v48 = vmul.f32 -1.442695, %v3687_v28 }
 0x31c   : > { %7873 = vrcp.f32 %v10373_v59  ;;  %v2821_v30 = vadd.f32 %v2781_v55, %v2478_v63  ;;  %v10410_v43 = vpop.eup %7867  ;;  %v5473_v38 = vmul.f32 %v5390_v34, %v4022_v17  ;;  %v3656_v55 = vmul.f32 %v8250_v53, %v3624_v62  ;;  %vm10477_vm5 = vmor %vm4726_vm13, %vm4727_vm11 }
 0x31d   : > { %7875 = vpow2.f32 %v7545_v31  ;;  %v2441_v7 = vpop.f32.mrf.mxu1  ;;  %v3123_v49 = vpop.f32.mrf.mxu3  ;;  %v4041_v31 = vsub.f32 1.0, %v4040_v4  ;;  %vm4029_vm14 = vweird.f32 %v10269_v32  ;;  %v4033_v4 = vand.u32 2147483647, %v10269_v32 }
 0x31e   : > { %7877 = vpow2.f32 %v7569_v56  ;;  %v3163_v2 = vadd.f32 %v3123_v49, %v2821_v30  ;;  %v4035_v56 = vand.u32 2147483648, %v10269_v32  ;;  %v12741_v30 = vld [vmem:[#allocation23_spill] sm:$0xff]  ;;  %v10434_v62 = vadd.f32 %v10224_v35, %v4724_v15  ;;  %vm10438_vm15 = vmor %vm4029_vm14, %vm4030_vm12  ;;  %v12744_v32 = vld [vmem:[#allocation36_spill] sm:$0xff] }
 0x31f   : > { %v4511_v42 = vadd.f32 %v12741_v30, %v9677_v52  ;;  %v2479_v49 = vadd.f32 %v2441_v7, %v12744_v32  ;;  %v4042_v15 = vmul.f32 %v10369_v51, %v4041_v31  ;;  %v3688_v7 = vadd.f32 %v3656_v55, %v9964_v16  ;;  %v5392_v30 = vpop.permute.xlu2 %5391  ;;  %v12745_v52 = vld [vmem:[#allocation25_spill] sm:$0xff]  ;;  %v12746_v31 = vld [vmem:[#allocation30_spill] sm:$0xff]  ;;  %v3625_v55 = vld [vmem:[%s12533_s2 + $0xa0] sm:$0xff] }
 0x320   : > { %v7870_v63 = vpop.eup %7869  ;;  %v10418_v19 = vadd.f32 %v3465_v11, %v3163_v2  ;;  %v10431_v11 = vmul.f32 %v10332_v23, %v4738_v25  ;;  %v4032_v25 = vsel %vm10438_vm15, %v10322_v0, %v4028_v29  ;;  %v4036_v53 = vor.u32 1.1754944e-38, %v4035_v56 }
 0x321   : > { %v10420_v46 = vpop.eup %7871  ;;  %5419 = vrot.lane.b32.xlu1 %v7870_v63, %s8306_s19  ;;  %5549 = vrot.lane.b32.xlu0 %v5473_v38, %s8305_s18  ;;  %v3468_v12 = vpop.f32.mrf.mxu0  ;;  %v4055_v38 = vmul.f32 %v10410_v43, %v10361_v9  ;;  %v7570_v13 = vmul.f32 -1.442695, %v4511_v42  ;;  %v4512_v14 = vadd.f32 %v12745_v52, %v9696_v18  ;;  %vm4034_vm0 = vcmp.eq.f32.partialorder %v4033_v4, 8.507059e+37 }
 0x322   : > { %12740 = vst [vmem:[#allocation20_spill] sm:$0xff] %v10418_v19  ;;  %v10428_v34 = vpop.eup %7873  ;;  %7879 = vtanh.f32 %v10418_v19  ;;  %vm4742_vm1 = vweird.f32 %v10332_v23  ;;  %v4513_v28 = vadd.f32 %v12746_v31, %v9717_v27  ;;  %v4037_v56 = vsel %vm4034_vm0, %v4036_v53, %v4032_v25 }
 0x323   : > { %v7876_v17 = vpop.eup %7875  ;;  %7881 = vrcp.f32 %v10408_v39  ;;  %v2784_v2 = vpop.f32.mrf.mxu2  ;;  %v4043_v52 = vadd.f32 %v10369_v51, %v4042_v15  ;;  %vm4045_vm3 = vweird.f32 %v10369_v51  ;;  %vm4741_vm4 = vweird.f32 %v10265_v47  ;;  %v8251_v15 = vld [vmem:[#allocation3 + $0xa0] sm:$0xff] }
 0x324   : > { %v7878_v63 = vpop.eup %7877  ;;  %7883 = vrcp.f32 %v10415_v1  ;;  %v2822_v32 = vadd.f32 %v2784_v2, %v2479_v49  ;;  %v10458_v19 = vadd.f32 1.0, %v7876_v17  ;;  %v5474_v49 = vmul.f32 %v5392_v30, %v4037_v56  ;;  %v12750_v30 = vld [vmem:[#allocation39_spill] sm:$0xff]  ;;  %vm10530_vm10 = vmor %vm4741_vm4, %vm4742_vm1 }
 0x325   : > { %7885 = vpow2.f32 %v7546_v48  ;;  %v2444_v0 = vpop.f32.mrf.mxu1  ;;  %v3126_v29 = vpop.f32.mrf.mxu3  ;;  %v4056_v48 = vsub.f32 1.0, %v4055_v38  ;;  %v10466_v2 = vadd.f32 1.0, %v7878_v63  ;;  %v7547_v31 = vmul.f32 -1.442695, %v3688_v7 }
 0x326   : > { %v3164_v42 = vadd.f32 %v3126_v29, %v2822_v32  ;;  %v4050_v27 = vand.u32 2147483648, %v10314_v3  ;;  %7887 = vpow2.f32 %v7570_v13  ;;  %v3657_v38 = vmul.f32 %v8251_v15, %v3625_v55 }
 0x327   : > { %vm4044_vm6 = vweird.f32 %v10314_v3  ;;  %v7571_v53 = vmul.f32 -1.442695, %v4512_v14  ;;  %v2480_v13 = vadd.f32 %v2444_v0, %v12750_v30  ;;  %v7572_v55 = vmul.f32 -1.442695, %v4513_v28 }
 0x328   : > { %v7880_v4 = vpop.eup %7879  ;;  %v10468_v17 = vadd.f32 %v3468_v12, %v3164_v42  ;;  %v4048_v12 = vand.u32 2147483647, %v10314_v3  ;;  %vm10495_vm7 = vmor %vm4044_vm6, %vm4045_vm3  ;;  %v4057_v0 = vmul.f32 %v10410_v43, %v4056_v48  ;;  %v4051_v15 = vor.u32 1.1754944e-38, %v4050_v27 }
 0x329   : > { %v10471_v18 = vpop.eup %7881  ;;  %5421 = vrot.lane.b32.xlu2 %v7880_v4, %s8306_s19  ;;  %5551 = vrot.lane.b32.xlu1 %v5474_v49, %s8305_s18  ;;  %v3471_v29 = vpop.f32.mrf.mxu0  ;;  %v4047_v14 = vsel %vm10495_vm7, %v10369_v51, %v4043_v52  ;;  %v10508_v30 = vadd.f32 %v10332_v23, %v10431_v11  ;;  %v3689_v28 = vadd.f32 %v3657_v38, %v10012_v44  ;;  %v3626_v52 = vld [vmem:[%s12533_s2 + $0xa8] sm:$0xff]  ;;  %vm4060_vm9 = vweird.f32 %v10410_v43 }
 0x32a   : > { %12747 = vst [vmem:[#allocation22_spill] sm:$0xff] %v10468_v17  ;;  %v10485_v63 = vpop.eup %7883  ;;  %7889 = vtanh.f32 %v10468_v17  ;;  %v4070_v49 = vmul.f32 %v10471_v18, %v10408_v39  ;;  %vm4049_vm8 = vcmp.eq.f32.partialorder %v4048_v12, 8.507059e+37  ;;  %v4058_v16 = vadd.f32 %v10410_v43, %v4057_v0  ;;  %v8252_v0 = vld [vmem:[#allocation3 + $0xa8] sm:$0xff] }
 0x32b   : > { %v7886_v3 = vpop.eup %7885  ;;  %7891 = vrcp.f32 %v10458_v19  ;;  %v2787_v56 = vpop.f32.mrf.mxu2  ;;  %v4052_v48 = vsel %vm4049_vm8, %v4051_v15, %v4047_v14  ;;  %vm4059_vm11 = vweird.f32 %v10361_v9  ;;  %v12757_v15 = vand.u32 2147483647, %v10151_v57 }
 0x32c   : > { %v5394_v42 = vpop.permute.xlu0 %5393  ;;  %7893 = vpow2.f32 %v7547_v31  ;;  %v2823_v4 = vadd.f32 %v2787_v56, %v2480_v13  ;;  %v10512_v51 = vadd.f32 1.0, %v7886_v3  ;;  %v7888_v27 = vpop.eup %7887  ;;  %v12753_v13 = vld [vmem:[#allocation27_spill] sm:$0xff]  ;;  %v4071_v12 = vsub.f32 1.0, %v4070_v49  ;;  %vm10554_vm13 = vmor %vm4059_vm11, %vm4060_vm9 }
 0x32d   : > { %7895 = vrcp.f32 %v10466_v2  ;;  %v3129_v32 = vpop.f32.mrf.mxu3  ;;  %v4514_v11 = vadd.f32 %v12753_v13, %v9741_v40  ;;  %v5475_v56 = vmul.f32 %v5394_v42, %v4052_v48  ;;  %v2447_v7 = vpop.f32.mrf.mxu1  ;;  %v4065_v3 = vand.u32 2147483648, %v10361_v9  ;;  %v3628_v13 = vld [vmem:[%s12533_s2 + $0xb8] sm:$0xff] }
 0x32e   : > { %7897 = vpow2.f32 %v7571_v53  ;;  %v3165_v31 = vadd.f32 %v3129_v32, %v2823_v4  ;;  %v7548_v42 = vmul.f32 -1.442695, %v3689_v28  ;;  %v3658_v4 = vmul.f32 %v8252_v0, %v3626_v52  ;;  %v12760_v52 = vld [vmem:[#allocation41_spill] sm:$0xff] }
 0x32f   : > { %7899 = vpow2.f32 %v7572_v55  ;;  %vm10544_vm12 = vcmp.eq.f32.partialorder %v12757_v15, 8.507059e+37  ;;  %v10548_v32 = vadd.f32 1.0, %v7888_v27  ;;  %v2481_v48 = vadd.f32 %v2447_v7, %v12760_v52 }
 0x330   : > { %v7890_v38 = vpop.eup %7889  ;;  %v10521_v53 = vadd.f32 %v3471_v29, %v3165_v31  ;;  %v4063_v29 = vand.u32 2147483647, %v10361_v9  ;;  %7901 = vrcp.f32 %v10512_v51  ;;  %v12763_v57 = vand.u32 2147483647, %v10265_v47 }
 0x331   : > { %v10524_v44 = vpop.eup %7891  ;;  %5553 = vrot.lane.b32.xlu2 %v5475_v56, %s8305_s18  ;;  %5423 = vrot.lane.b32.xlu0 %v7890_v38, %s8306_s19  ;;  %v10568_v27 = vmul.f32 %v10428_v34, %v10373_v59  ;;  %v7573_v56 = vmul.f32 -1.442695, %v4514_v11  ;;  %v4062_v38 = vsel %vm10554_vm13, %v10410_v43, %v4058_v16  ;;  %v4072_v47 = vmul.f32 %v10471_v18, %v4071_v12  ;;  %v3474_v45 = vpop.f32.mrf.mxu0 }
 0x332   : > { %12754 = vst [vmem:[#allocation8_spill] sm:$0xff] %v10521_v53  ;;  %v7894_v55 = vpop.eup %7893  ;;  %vm10562_vm14 = vcmp.eq.f32.partialorder %v12763_v57, 8.507059e+37  ;;  %7903 = vtanh.f32 %v10521_v53  ;;  %v4066_v57 = vor.u32 1.1754944e-38, %v4065_v3  ;;  %v4085_v40 = vmul.f32 %v10524_v44, %v10458_v19 }
 0x333   : > { %v10558_v31 = vpop.eup %7895  ;;  %v2790_v7 = vpop.f32.mrf.mxu2  ;;  %v10577_v17 = vadd.f32 1.0, %v7894_v55  ;;  %7905 = vpow2.f32 %v7548_v42  ;;  %v3690_v11 = vadd.f32 %v3658_v4, %v10054_v37  ;;  %vm4064_vm15 = vcmp.eq.f32.partialorder %v4063_v29, 8.507059e+37  ;;  %v3627_v42 = vld [vmem:[%s12533_s2 + $0xb0] sm:$0xff] }
 0x334   : > { %v5396_v0 = vpop.permute.xlu1 %5395  ;;  %v7898_v15 = vpop.eup %7897  ;;  %v2824_v52 = vadd.f32 %v2790_v7, %v2481_v48  ;;  %7907 = vrcp.f32 %v10548_v32  ;;  %v4067_v16 = vsel %vm4064_vm15, %v4066_v57, %v4062_v38  ;;  %v12766_v48 = vld [vmem:[#allocation29_spill] sm:$0xff]  ;;  %v4073_v7 = vadd.f32 %v10471_v18, %v4072_v47 }
 0x335   : > { %v5526_v49 = vpop.permute.xlu0 %5525  ;;  %v3132_v53 = vpop.f32.mrf.mxu3  ;;  %v10582_v3 = vadd.f32 1.0, %v7898_v15  ;;  %7909 = vpow2.f32 %v7573_v56  ;;  %v4515_v55 = vadd.f32 %v12766_v48, %v9767_v10  ;;  %v5476_v4 = vmul.f32 %v5396_v0, %v4067_v16  ;;  %v8253_v0 = vld [vmem:[#allocation3 + $0xb0] sm:$0xff] }
 0x336   : > { %v7900_v9 = vpop.eup %7899  ;;  %v5621_v43 = vadd.f32 %v5526_v49, %v10004_v61  ;;  %v3166_v12 = vadd.f32 %v3132_v53, %v2824_v52  ;;  %vm4075_vm0 = vweird.f32 %v10471_v18  ;;  %v4086_v61 = vsub.f32 1.0, %v4085_v40  ;;  %v12767_v49 = vld [vmem:[#allocation34_spill] sm:$0xff]  ;;  %v12773_v48 = vld [vmem:[#allocation55_spill] sm:$0xff] }
 0x337   : > { %v10589_v29 = vpop.eup %7901  ;;  %v4516_v56 = vadd.f32 %v12767_v49, %v9792_v24  ;;  %7911 = vrcp.f32 %v10577_v17  ;;  %v7549_v15 = vmul.f32 -1.442695, %v3690_v11  ;;  %v4080_v52 = vand.u32 2147483648, %v10408_v39 }
 0x338   : > { %v10593_v38 = vadd.f32 %v3474_v45, %v3166_v12  ;;  %v7904_v53 = vpop.eup %7903  ;;  %v3659_v47 = vmul.f32 %v8253_v0, %v3627_v42  ;;  %vm4074_vm1 = vweird.f32 %v10408_v39  ;;  %v4078_v40 = vand.u32 2147483647, %v10408_v39  ;;  %v5398_v45 = vpop.permute.xlu2 %5397 }
 0x339   : > { %5555 = vrot.lane.b32.xlu0 %v5476_v4, %s8305_s18  ;;  %5717 = vrot.lane.b32.xlu2 %v5621_v43, %s8307_s13  ;;  %7913 = vtanh.f32 %v5621_v43  ;;  %v7906_v57 = vpop.eup %7905  ;;  %v12768_v11 = vsel %vm10477_vm5, %v10224_v35, %v10434_v62  ;;  %v7574_v12 = vmul.f32 -1.442695, %v4515_v55  ;;  %vm10614_vm3 = vmor %vm4074_vm1, %vm4075_vm0  ;;  %v4100_v39 = vmul.f32 %v10589_v29, %v10512_v51 }
 0x33a   : > { %5425 = vrot.lane.b32.xlu1 %v7904_v53, %s8306_s19  ;;  %v4734_v16 = vsel %vm10544_vm12, %v10267_v21, %v12768_v11  ;;  %7915 = vtanh.f32 %v10593_v38  ;;  %v10621_v25 = vpop.eup %7907  ;;  %v12771_v35 = vsel %vm10530_vm10, %v10332_v23, %v10508_v30  ;;  %v4077_v62 = vsel %vm10614_vm3, %v10471_v18, %v4073_v7 }
 0x33b   : > { %v4749_v21 = vsel %vm10562_vm14, %v10383_v5, %v12771_v35  ;;  %7917 = vrcp.f32 %v10582_v3  ;;  %v4087_v43 = vmul.f32 %v10524_v44, %v4086_v61  ;;  %v7910_v55 = vpop.eup %7909  ;;  %v4768_v42 = vsub.f32 1.0, %v10568_v27 }
 0x33c   : > { %v5528_v28 = vpop.permute.xlu1 %5527  ;;  %v7575_v14 = vmul.f32 -1.442695, %v4516_v56  ;;  %7919 = vpow2.f32 %v7549_v15  ;;  %v4081_v4 = vor.u32 1.1754944e-38, %v4080_v52  ;;  %v10637_v23 = vadd.f32 1.0, %v7900_v9  ;;  %v12772_v9 = vld [vmem:[#allocation31_spill] sm:$0xff] }
 0x33d   : > { %v10639_v30 = vadd.f32 1.0, %v7906_v57  ;;  %v3691_v5 = vadd.f32 %v3659_v47, %v10117_v60  ;;  %vm4079_vm4 = vcmp.eq.f32.partialorder %v4078_v40, 8.507059e+37  ;;  %v10645_v18 = vpop.eup %7911  ;;  %7921 = vpow2.f32 %v7574_v12  ;;  %v8254_v47 = vld [vmem:[#allocation3 + $0xb8] sm:$0xff] }
 0x33e   : > { %v4082_v7 = vsel %vm4079_vm4, %v4081_v4, %v4077_v62  ;;  %v5622_v27 = vadd.f32 %v5528_v28, %v10169_v54  ;;  %v4101_v61 = vsub.f32 1.0, %v4100_v39  ;;  %v4517_v49 = vadd.f32 %v12772_v9, %v12727_v26 }
 0x33f   : > { %v7914_v53 = vpop.eup %7913  ;;  %v5477_v56 = vmul.f32 %v5398_v45, %v4082_v7  ;;  %v4088_v15 = vadd.f32 %v10524_v44, %v4087_v43  ;;  %vm4090_vm5 = vweird.f32 %v10524_v44  ;;  %v10652_v0 = vadd.f32 1.0, %v7910_v55 }
 0x340   : > { %v7916_v52 = vpop.eup %7915  ;;  %7923 = vpow2.f32 %v7575_v14  ;;  %v3660_v40 = vmul.f32 %v8254_v47, %v3628_v13  ;;  %v4095_v54 = vand.u32 2147483648, %v10458_v19  ;;  %v7550_v11 = vmul.f32 -1.442695, %v3691_v5  ;;  %v12776_v5 = vld [vmem:[#allocation9_spill] sm:$0xff] }
 0x341   : > { %6677 = vrot.lane.b32.xlu0 %v7914_v53, %s8306_s19  ;;  %v10656_v57 = vpop.eup %7917  ;;  %7925 = vrcp.f32 %v10639_v30  ;;  %5427 = vrot.lane.b32.xlu2 %v7916_v52, %s8306_s19  ;;  %vm4089_vm6 = vweird.f32 %v10458_v19  ;;  %v4093_v45 = vand.u32 2147483647, %v10458_v19  ;;  %v10664_v39 = vmul.f32 %v12773_v48, %v4734_v16  ;;  %v5530_v19 = vpop.permute.xlu2 %5529 }
 0x342   : > { %5557 = vrot.lane.b32.xlu1 %v5477_v56, %s8305_s18  ;;  %v7920_v12 = vpop.eup %7919  ;;  %v4775_v35 = vand.u32 2147483647, %v10373_v59  ;;  %7927 = vtanh.f32 %v5622_v27  ;;  %vm10669_vm7 = vmor %vm4089_vm6, %vm4090_vm5  ;;  %v4102_v43 = vmul.f32 %v10589_v29, %v4101_v61  ;;  %v7576_v55 = vmul.f32 -1.442695, %v4517_v49 }
 0x343   : > { %v5400_v28 = vpop.permute.xlu0 %5399  ;;  %7929 = vrcp.f32 %v10637_v23  ;;  %v4115_v16 = vmul.f32 %v10645_v18, %v10577_v17  ;;  %v4092_v14 = vsel %vm10669_vm7, %v10524_v44, %v4088_v15  ;;  %v7922_v4 = vpop.eup %7921  ;;  %v10681_v13 = vmul.f32 %v12776_v5, %v4749_v21  ;;  %v3629_v44 = vld [vmem:[%s12533_s2 + $0xc0] sm:$0xff]  ;;  %v12779_v5 = vld [vmem:[#allocation33_spill] sm:$0xff] }
 0x344   : > { %vm4771_vm8 = vweird.f32 %v10373_v59  ;;  %7931 = vrcp.f32 %v10652_v0  ;;  %v3692_v7 = vadd.f32 %v3660_v40, %v10165_v58  ;;  %v4096_v61 = vor.u32 1.1754944e-38, %v4095_v54 }
 0x345   : > { %v4769_v53 = vmul.f32 %v10428_v34, %v4768_v42  ;;  %v10687_v9 = vadd.f32 1.0, %v7920_v12  ;;  %7933 = vpow2.f32 %v7550_v11  ;;  %vm4094_vm9 = vcmp.eq.f32.partialorder %v4093_v45, 8.507059e+37  ;;  %v8255_v12 = vld [vmem:[#allocation3 + $0xc0] sm:$0xff] }
 0x346   : > { %v7924_v49 = vpop.eup %7923  ;;  %v10693_v21 = vadd.f32 %v5530_v19, %v10234_v50  ;;  %v4097_v56 = vsel %vm4094_vm9, %v4096_v61, %v4092_v14  ;;  %v4103_v15 = vadd.f32 %v10589_v29, %v4102_v43  ;;  %vm4105_vm10 = vweird.f32 %v10589_v29 }
 0x347   : > { %v10697_v52 = vpop.eup %7925  ;;  %7935 = vpow2.f32 %v7576_v55  ;;  %v4116_v42 = vsub.f32 1.0, %v4115_v16  ;;  %v5478_v47 = vmul.f32 %v5400_v28, %v4097_v56  ;;  %v4110_v40 = vand.u32 2147483648, %v10512_v51 }
 0x348   : > { %v7928_v54 = vpop.eup %7927  ;;  %v7551_v11 = vmul.f32 -1.442695, %v3692_v7  ;;  %v3661_v45 = vmul.f32 %v8255_v12, %v3629_v44  ;;  %vm4104_vm11 = vweird.f32 %v10512_v51  ;;  %v4108_v50 = vand.u32 2147483647, %v10512_v51 }
 0x349   : > { %5719 = vrot.lane.b32.xlu0 %v5622_v27, %s8307_s13  ;;  %v10703_v48 = vpop.eup %7929  ;;  %vm4772_vm12 = vweird.f32 %v10428_v34  ;;  %v4777_v62 = vand.u32 2147483648, %v10373_v59  ;;  %v10707_v43 = vadd.f32 1.0, %v7922_v4  ;;  %7937 = vrcp.f32 %v10687_v9  ;;  %5559 = vrot.lane.b32.xlu2 %v5478_v47, %s8305_s18  ;;  %vm10714_vm13 = vmor %vm4104_vm11, %vm4105_vm10  ;;  %v10730_v44 = vpop.permute.xlu2 %5403 }
 0x34a   : > { %6679 = vrot.lane.b32.xlu1 %v7928_v54, %s8306_s19  ;;  %v10718_v51 = vpop.eup %7931  ;;  %v4770_v28 = vadd.f32 %v10428_v34, %v4769_v53  ;;  %v10721_v55 = vadd.f32 1.0, %v7924_v49  ;;  %7939 = vtanh.f32 %v10693_v21  ;;  %v4107_v19 = vsel %vm10714_vm13, %v10589_v29, %v4103_v15  ;;  %vm10741_vm15 = vmor %vm4771_vm8, %vm4772_vm12 }
 0x34b   : > { %v5402_v16 = vpop.permute.xlu1 %5401  ;;  %v5532_v14 = vpop.permute.xlu0 %5531  ;;  %v4518_v7 = vadd.f32 %v12779_v5, %v12734_v22  ;;  %v4117_v61 = vmul.f32 %v10645_v18, %v4116_v42  ;;  %v4111_v56 = vor.u32 1.1754944e-38, %v4110_v40  ;;  %v4130_v53 = vmul.f32 %v10697_v52, %v10639_v30  ;;  %v8256_v42 = vld [vmem:[#allocation3 + $0xc8] sm:$0xff] }
 0x34c   : > { %v7934_v4 = vpop.eup %7933  ;;  %7941 = vpow2.f32 %v7551_v11  ;;  %v3693_v49 = vadd.f32 %v3661_v45, %v10221_v33  ;;  %vm4109_vm14 = vcmp.eq.f32.partialorder %v4108_v50, 8.507059e+37  ;;  %v4752_v29 = vmul.f32 %v10420_v46, %v10355_v6  ;;  %v3630_v45 = vld [vmem:[%s12533_s2 + $0xc8] sm:$0xff] }
 0x34d   : > { %v7936_v15 = vpop.eup %7935  ;;  %v4778_v47 = vor.u32 1.1754944e-38, %v4777_v62  ;;  %7943 = vrcp.f32 %v10707_v43  ;;  %v4112_v40 = vsel %vm4109_vm14, %v4111_v56, %v4107_v19  ;;  %v10747_v54 = vadd.f32 %v5532_v14, %v10327_v20 }
 0x34e   : > { %v4774_v11 = vsel %vm10741_vm15, %v10428_v34, %v4770_v28  ;;  %7945 = vrcp.f32 %v10721_v55  ;;  %v10753_v12 = vadd.f32 1.0, %v7934_v4  ;;  %v5479_v50 = vmul.f32 %v5402_v16, %v4112_v40  ;;  %v12782_v34 = vld [vmem:[#allocation38_spill] sm:$0xff] }
 0x34f   : > { %v10758_v62 = vpop.eup %7937  ;;  %v7577_v27 = vmul.f32 -1.442695, %v4518_v7  ;;  %v4118_v19 = vadd.f32 %v10645_v18, %v4117_v61  ;;  %vm4120_vm0 = vweird.f32 %v10645_v18  ;;  %v4131_v20 = vsub.f32 1.0, %v4130_v53 }
 0x350   : > { %v7940_v14 = vpop.eup %7939  ;;  %v4519_v28 = vadd.f32 %v12782_v34, %v9911_v8  ;;  %v7552_v5 = vmul.f32 -1.442695, %v3693_v49  ;;  %v4125_v4 = vand.u32 2147483648, %v10577_v17  ;;  %v4753_v56 = vsub.f32 1.0, %v4752_v29  ;;  %v8257_v8 = vld [vmem:[#allocation3 + $0xd0] sm:$0xff] }
 0x351   : > { %5561 = vrot.lane.b32.xlu0 %v5479_v50, %s8305_s18  ;;  %v3662_v16 = vmul.f32 %v8256_v42, %v3630_v45  ;;  %vm4119_vm1 = vweird.f32 %v10577_v17  ;;  %v4123_v7 = vand.u32 2147483647, %v10577_v17  ;;  %7947 = vtanh.f32 %v10747_v54  ;;  %6681 = vrot.lane.b32.xlu2 %v7940_v14, %s8306_s19  ;;  %v3631_v14 = vld [vmem:[%s12533_s2 + $0xd0] sm:$0xff] }
 0x352   : > { %5721 = vrot.lane.b32.xlu1 %v10693_v21, %s8307_s13  ;;  %v7942_v61 = vpop.eup %7941  ;;  %vm4776_vm3 = vcmp.eq.f32.partialorder %v4775_v35, 8.507059e+37  ;;  %7949 = vrcp.f32 %v10753_v12  ;;  %vm10777_vm4 = vmor %vm4119_vm1, %vm4120_vm0  ;;  %v4782_v17 = vmul.f32 %v10485_v63, %v10415_v1  ;;  %v4145_v21 = vmul.f32 %v10758_v62, %v10687_v9 }
 0x353   : > { %v10785_v49 = vpop.eup %7943  ;;  %v10787_v29 = vsel %vm4776_vm3, %v4778_v47, %v4774_v11  ;;  %7951 = vpow2.f32 %v7577_v27  ;;  %v4122_v59 = vsel %vm10777_vm4, %v10645_v18, %v4118_v19  ;;  %v5534_v35 = vpop.permute.xlu1 %5533  ;;  %v4132_v40 = vmul.f32 %v10697_v52, %v4131_v20 }
 0x354   : > { %v10793_v45 = vpop.eup %7945  ;;  %v10795_v50 = vadd.f32 1.0, %v7936_v15  ;;  %7953 = vpow2.f32 %v7552_v5  ;;  %v4126_v34 = vor.u32 1.1754944e-38, %v4125_v4  ;;  %v4754_v47 = vmul.f32 %v10420_v46, %v4753_v56  ;;  %v5536_v19 = vpop.permute.xlu2 %5535 }
 0x355   : > { %v10801_v11 = vmul.f32 -1.442695, %v4519_v28  ;;  %v10803_v27 = vadd.f32 1.0, %v7942_v61  ;;  %v3694_v18 = vadd.f32 %v3662_v16, %v10284_v36  ;;  %vm4124_vm5 = vcmp.eq.f32.partialorder %v4123_v7, 8.507059e+37  ;;  %v3632_v16 = vld [vmem:[%s12533_s2 + $0xd8] sm:$0xff] }
 0x356   : > { %v4127_v20 = vsel %vm4124_vm5, %v4126_v34, %v4122_v59  ;;  %v5625_v15 = vadd.f32 %v5534_v35, %v10664_v39  ;;  %v4783_v42 = vsub.f32 1.0, %v4782_v17  ;;  %v4146_v5 = vsub.f32 1.0, %v4145_v21 }
 0x357   : > { %v7948_v53 = vpop.eup %7947  ;;  %v3663_v22 = vmul.f32 %v8257_v8, %v3631_v14  ;;  %v5480_v4 = vmul.f32 %v10730_v44, %v4127_v20  ;;  %v4133_v56 = vadd.f32 %v10697_v52, %v4132_v40  ;;  %vm4135_vm6 = vweird.f32 %v10697_v52 }
 0x358   : > { %v10810_v28 = vpop.eup %7949  ;;  %v4140_v39 = vand.u32 2147483648, %v10639_v30  ;;  %v4755_v7 = vadd.f32 %v10420_v46, %v4754_v47  ;;  %vm4757_vm7 = vweird.f32 %v10420_v46  ;;  %v4762_v8 = vand.u32 2147483648, %v10355_v6 }
 0x359   : > { %6683 = vrot.lane.b32.xlu0 %v7948_v53, %s8306_s19  ;;  %v10820_v44 = vpop.eup %7951  ;;  %7955 = vrcp.f32 %v10803_v27  ;;  %v7553_v61 = vmul.f32 -1.442695, %v3694_v18  ;;  %5723 = vrot.lane.b32.xlu2 %v10747_v54, %s8307_s13  ;;  %vm4134_vm8 = vweird.f32 %v10639_v30  ;;  %v4138_v17 = vand.u32 2147483647, %v10639_v30  ;;  %v8258_v54 = vld [vmem:[#allocation3 + $0xd8] sm:$0xff] }
 0x35a   : > { %5563 = vrot.lane.b32.xlu1 %v5480_v4, %s8305_s18  ;;  %v7954_v21 = vpop.eup %7953  ;;  %7957 = vtanh.f32 %v5625_v15  ;;  %v4784_v59 = vmul.f32 %v10485_v63, %v4783_v42  ;;  %vm10831_vm9 = vmor %vm4134_vm8, %vm4135_vm6  ;;  %v4147_v14 = vmul.f32 %v10758_v62, %v4146_v5  ;;  %vm4756_vm10 = vweird.f32 %v10355_v6 }
 0x35b   : > { %v5406_v40 = vpop.permute.xlu0 %5405  ;;  %v3664_v34 = vmul.f32 %v8258_v54, %v3632_v16  ;;  %v4160_v30 = vmul.f32 %v10810_v28, %v10753_v12  ;;  %v4137_v47 = vsel %vm10831_vm9, %v10697_v52, %v4133_v56  ;;  %vm10844_vm11 = vmor %vm4756_vm10, %vm4757_vm7  ;;  %v4760_v20 = vand.u32 2147483647, %v10355_v6 }
 0x35c   : > { %v3695_v42 = vadd.f32 %v3663_v22, %v10329_v41  ;;  %v4141_v5 = vor.u32 1.1754944e-38, %v4140_v39  ;;  %v4759_v53 = vsel %vm10844_vm11, %v10420_v46, %v4755_v7  ;;  %v4797_v4 = vmul.f32 %v10558_v31, %v10466_v2  ;;  %v10857_v52 = vpop.permute.xlu2 %5409 }
 0x35d   : > { %v10855_v16 = vadd.f32 1.0, %v7954_v21  ;;  %7959 = vpow2.f32 %v7553_v61  ;;  %vm4139_vm12 = vcmp.eq.f32.partialorder %v4138_v17, 8.507059e+37  ;;  %v4763_v56 = vor.u32 1.1754944e-38, %v4762_v8 }
 0x35e   : > { %v10860_v35 = vadd.f32 %v5536_v19, %v10681_v13  ;;  %v4142_v6 = vsel %vm4139_vm12, %v4141_v5, %v4137_v47  ;;  %v4148_v22 = vadd.f32 %v10758_v62, %v4147_v14  ;;  %vm4150_vm13 = vweird.f32 %v10758_v62 }
 0x35f   : > { %v10864_v39 = vpop.eup %7955  ;;  %v4161_v46 = vsub.f32 1.0, %v4160_v30  ;;  %v5481_v7 = vmul.f32 %v5406_v40, %v4142_v6  ;;  %v4155_v21 = vand.u32 2147483648, %v10687_v9  ;;  %vm4761_vm14 = vcmp.eq.f32.partialorder %v4760_v20, 8.507059e+37  ;;  %v12791_v20 = vld [vmem:[#allocation56_spill] sm:$0xff] }
 0x360   : > { %v7958_v61 = vpop.eup %7957  ;;  %v7554_v54 = vmul.f32 -1.442695, %v3695_v42  ;;  %vm4149_vm15 = vweird.f32 %v10687_v9  ;;  %v4153_v13 = vand.u32 2147483647, %v10687_v9  ;;  %v4764_v19 = vsel %vm4761_vm14, %v4763_v56, %v4759_v53  ;;  %v12792_v53 = vld [vmem:[#allocation24_spill] sm:$0xff] }
 0x361   : > { %5725 = vrot.lane.b32.xlu0 %v5625_v15, %s8307_s13  ;;  %7961 = vrcp.f32 %v10855_v16  ;;  %v4785_v8 = vadd.f32 %v10485_v63, %v4784_v59  ;;  %vm4786_vm0 = vweird.f32 %v10415_v1  ;;  %vm4787_vm1 = vweird.f32 %v10485_v63  ;;  %5565 = vrot.lane.b32.xlu2 %v5481_v7, %s8305_s18  ;;  %vm10878_vm3 = vmor %vm4149_vm15, %vm4150_vm13 }
 0x362   : > { %6685 = vrot.lane.b32.xlu1 %v7958_v61, %s8306_s19  ;;  %7963 = vtanh.f32 %v10860_v35  ;;  %v4790_v9 = vand.u32 2147483647, %v10415_v1  ;;  %v4152_v17 = vsel %vm10878_vm3, %v10758_v62, %v4148_v22  ;;  %v4798_v14 = vsub.f32 1.0, %v4797_v4  ;;  %v12793_v62 = vld [vmem:[#allocation11_spill] sm:$0xff]  ;;  %vm10900_vm5 = vmor %vm4786_vm0, %vm4787_vm1 }
 0x363   : > { %v5408_v59 = vpop.permute.xlu1 %5407  ;;  %v5538_v40 = vpop.permute.xlu0 %5537  ;;  %v4162_v47 = vmul.f32 %v10810_v28, %v4161_v46  ;;  %v4156_v18 = vor.u32 1.1754944e-38, %v4155_v21  ;;  %v5275_v42 = vmul.f32 %v12791_v20, %v4764_v19  ;;  %v4175_v5 = vmul.f32 %v10864_v39, %v10803_v27 }
 0x364   : > { %v7960_v30 = vpop.eup %7959  ;;  %7965 = vpow2.f32 %v7554_v54  ;;  %v3696_v56 = vadd.f32 %v3664_v34, %v12792_v53  ;;  %v4792_v6 = vand.u32 2147483648, %v10415_v1  ;;  %vm4154_vm4 = vcmp.eq.f32.partialorder %v4153_v13, 8.507059e+37  ;;  %v10919_v13 = vpop.permute.xlu2 %5541 }
 0x365   : > { %v5276_v22 = vmul.f32 %v12793_v62, %v10787_v29  ;;  %7967 = vrcp.f32 %v10795_v50  ;;  %v4157_v46 = vsel %vm4154_vm4, %v4156_v18, %v4152_v17  ;;  %v10904_v7 = vadd.f32 %v5538_v40, %v5275_v42  ;;  %v3633_v29 = vld [vmem:[%s12533_s2 + $0xe0] sm:$0xff] }
 0x366   : > { %7969 = vpow2.f32 %v10801_v11  ;;  %v10907_v34 = vadd.f32 1.0, %v7960_v30  ;;  %v4789_v21 = vsel %vm10900_vm5, %v10485_v63, %v4785_v8  ;;  %v5482_v1 = vmul.f32 %v5408_v59, %v4157_v46  ;;  %v8259_v63 = vld [vmem:[#allocation3 + $0xe0] sm:$0xff] }
 0x367   : > { %v10915_v61 = vpop.eup %7961  ;;  %v4163_v54 = vadd.f32 %v10810_v28, %v4162_v47  ;;  %vm4165_vm6 = vweird.f32 %v10810_v28  ;;  %v4176_v11 = vsub.f32 1.0, %v4175_v5  ;;  %v4799_v19 = vmul.f32 %v10558_v31, %v4798_v14 }
 0x368   : > { %v7964_v15 = vpop.eup %7963  ;;  %v7555_v17 = vmul.f32 -1.442695, %v3696_v56  ;;  %v4170_v40 = vand.u32 2147483648, %v10753_v12  ;;  %vm4791_vm7 = vcmp.eq.f32.partialorder %v4790_v9, 8.507059e+37  ;;  %v4793_v30 = vor.u32 1.1754944e-38, %v4792_v6 }
 0x369   : > { %5567 = vrot.lane.b32.xlu0 %v5482_v1, %s8305_s18  ;;  %v3665_v8 = vmul.f32 %v8259_v63, %v3633_v29  ;;  %vm4164_vm8 = vweird.f32 %v10753_v12  ;;  %v4168_v59 = vand.u32 2147483647, %v10753_v12  ;;  %7971 = vtanh.f32 %v10904_v7  ;;  %6687 = vrot.lane.b32.xlu2 %v7964_v15, %s8306_s19 }
 0x36a   : > { %5727 = vrot.lane.b32.xlu1 %v10860_v35, %s8307_s13  ;;  %v7966_v14 = vpop.eup %7965  ;;  %7973 = vrcp.f32 %v10907_v34  ;;  %vm10933_vm9 = vmor %vm4164_vm8, %vm4165_vm6  ;;  %v4794_v47 = vsel %vm4791_vm7, %v4793_v30, %v4789_v21  ;;  %v4190_v12 = vmul.f32 %v10915_v61, %v10855_v16  ;;  %vm4801_vm10 = vweird.f32 %v10466_v2  ;;  %v3634_v21 = vld [vmem:[%s12533_s2 + $0xe8] sm:$0xff] }
 0x36b   : > { %v10940_v18 = vpop.eup %7967  ;;  %v4167_v35 = vsel %vm10933_vm9, %v10810_v28, %v4163_v54  ;;  %v5540_v20 = vpop.permute.xlu1 %5539  ;;  %v4177_v42 = vmul.f32 %v10864_v39, %v4176_v11  ;;  %v4800_v5 = vadd.f32 %v10558_v31, %v4799_v19  ;;  %vm4802_vm11 = vweird.f32 %v10558_v31  ;;  %v12798_v28 = vld [vmem:[#allocation20_spill] sm:$0xff] }
 0x36c   : > { %v10948_v56 = vpop.eup %7969  ;;  %7975 = vpow2.f32 %v7555_v17  ;;  %v4171_v6 = vor.u32 1.1754944e-38, %v4170_v40  ;;  %v4827_v62 = vmul.f32 %v10656_v57, %v10582_v3  ;;  %v4812_v4 = vmul.f32 %v10621_v25, %v10548_v32  ;;  %vm10963_vm13 = vmor %vm4801_vm10, %vm4802_vm11  ;;  %v10969_v63 = vpop.permute.xlu2 %5415 }
 0x36d   : > { %v10954_v46 = vadd.f32 1.0, %v7966_v14  ;;  %v3697_v29 = vadd.f32 %v3665_v8, %v12798_v28  ;;  %vm4169_vm12 = vcmp.eq.f32.partialorder %v4168_v59, 8.507059e+37  ;;  %v4805_v1 = vand.u32 2147483647, %v10466_v2  ;;  %v8260_v14 = vld [vmem:[#allocation3 + $0xe8] sm:$0xff] }
 0x36e   : > { %v4172_v54 = vsel %vm4169_vm12, %v4171_v6, %v4167_v35  ;;  %v5628_v11 = vadd.f32 %v5540_v20, %v5276_v22  ;;  %v4191_v19 = vsub.f32 1.0, %v4190_v12  ;;  %v4807_v17 = vand.u32 2147483648, %v10466_v2 }
 0x36f   : > { %v7972_v40 = vpop.eup %7971  ;;  %v5483_v30 = vmul.f32 %v10857_v52, %v4172_v54  ;;  %v4178_v8 = vadd.f32 %v10864_v39, %v4177_v42  ;;  %vm4180_vm14 = vweird.f32 %v10864_v39  ;;  %v4804_v22 = vsel %vm10963_vm13, %v10558_v31, %v4800_v5 }
 0x370   : > { %v10976_v59 = vpop.eup %7973  ;;  %v3666_v9 = vmul.f32 %v8260_v14, %v3634_v21  ;;  %v4828_v2 = vsub.f32 1.0, %v4827_v62  ;;  %v4185_v12 = vand.u32 2147483648, %v10803_v27  ;;  %v4813_v52 = vsub.f32 1.0, %v4812_v4  ;;  %v12804_v21 = vld [vmem:[#allocation22_spill] sm:$0xff] }
 0x371   : > { %6689 = vrot.lane.b32.xlu0 %v7972_v40, %s8306_s19  ;;  %7977 = vrcp.f32 %v10954_v46  ;;  %v7556_v35 = vmul.f32 -1.442695, %v3697_v29  ;;  %5729 = vrot.lane.b32.xlu2 %v10904_v7, %s8307_s13  ;;  %vm4179_vm15 = vweird.f32 %v10803_v27  ;;  %v4183_v31 = vand.u32 2147483647, %v10803_v27  ;;  %v12803_v7 = vld [vmem:[#allocation10_spill] sm:$0xff] }
 0x372   : > { %5569 = vrot.lane.b32.xlu1 %v5483_v30, %s8305_s18  ;;  %v7976_v20 = vpop.eup %7975  ;;  %v10987_v42 = vadd.f32 1.0, %v10820_v44  ;;  %7979 = vtanh.f32 %v5628_v11  ;;  %vm10991_vm0 = vmor %vm4179_vm15, %vm4180_vm14  ;;  %v4192_v62 = vmul.f32 %v10915_v61, %v4191_v19  ;;  %v4808_v4 = vor.u32 1.1754944e-38, %v4807_v17 }
 0x373   : > { %v5412_v6 = vpop.permute.xlu0 %5411  ;;  %v5277_v29 = vmul.f32 %v12803_v7, %v4794_v47  ;;  %v4205_v27 = vmul.f32 %v10976_v59, %v10907_v34  ;;  %v4182_v44 = vsel %vm10991_vm0, %v10864_v39, %v4178_v8  ;;  %vm4806_vm1 = vcmp.eq.f32.partialorder %v4805_v1, 8.507059e+37  ;;  %v3635_v47 = vld [vmem:[%s12533_s2 + $0xf0] sm:$0xff] }
 0x374   : > { %v3698_v54 = vadd.f32 %v3666_v9, %v12804_v21  ;;  %v4829_v15 = vmul.f32 %v10656_v57, %v4828_v2  ;;  %vm4832_vm3 = vweird.f32 %v10656_v57  ;;  %v4186_v40 = vor.u32 1.1754944e-38, %v4185_v12  ;;  %v11028_v5 = vpop.permute.xlu2 %5547 }
 0x375   : > { %v4809_v30 = vsel %vm4806_vm1, %v4808_v4, %v4804_v22  ;;  %v11005_v19 = vadd.f32 1.0, %v7976_v20  ;;  %7981 = vpow2.f32 %v7556_v35  ;;  %vm4184_vm4 = vcmp.eq.f32.partialorder %v4183_v31, 8.507059e+37  ;;  %v8261_v35 = vld [vmem:[#allocation3 + $0xf0] sm:$0xff] }
 0x376   : > { %v4814_v17 = vmul.f32 %v10621_v25, %v4813_v52  ;;  %v11012_v39 = vadd.f32 %v10919_v13, %v5277_v29  ;;  %vm4831_vm5 = vweird.f32 %v10582_v3  ;;  %v4187_v1 = vsel %vm4184_vm4, %v4186_v40, %v4182_v44 }
 0x377   : > { %v4193_v8 = vadd.f32 %v10915_v61, %v4192_v62  ;;  %vm4195_vm6 = vweird.f32 %v10915_v61  ;;  %v11017_v22 = vpop.eup %7977  ;;  %v4206_v14 = vsub.f32 1.0, %v4205_v27  ;;  %v5484_v9 = vmul.f32 %v5412_v6, %v4187_v1  ;;  %vm11078_vm14 = vmor %vm4831_vm5, %vm4832_vm3 }
 0x378   : > { %v4200_v2 = vand.u32 2147483648, %v10855_v16  ;;  %vm4816_vm7 = vweird.f32 %v10548_v32  ;;  %v7980_v12 = vpop.eup %7979  ;;  %v7557_v52 = vmul.f32 -1.442695, %v3698_v54  ;;  %v3667_v13 = vmul.f32 %v8261_v35, %v3635_v47  ;;  %v12808_v47 = vld [vmem:[#allocation8_spill] sm:$0xff] }
 0x379   : > { %5731 = vrot.lane.b32.xlu0 %v5628_v11, %s8307_s13  ;;  %vm4194_vm8 = vweird.f32 %v10855_v16  ;;  %v4198_v31 = vand.u32 2147483647, %v10855_v16  ;;  %7983 = vrcp.f32 %v11005_v19  ;;  %v11026_v20 = vadd.f32 %v10656_v57, %v4829_v15  ;;  %5571 = vrot.lane.b32.xlu2 %v5484_v9, %s8305_s18  ;;  %v12807_v11 = vld [vmem:[#allocation58_spill] sm:$0xff] }
 0x37a   : > { %6691 = vrot.lane.b32.xlu1 %v7980_v12, %s8306_s19  ;;  %vm11034_vm9 = vmor %vm4194_vm8, %vm4195_vm6  ;;  %v5278_v62 = vmul.f32 %v12807_v11, %v4809_v30  ;;  %vm4817_vm10 = vweird.f32 %v10621_v25  ;;  %7985 = vtanh.f32 %v11012_v39  ;;  %v4815_v29 = vadd.f32 %v10621_v25, %v4814_v17 }
 0x37b   : > { %v4197_v16 = vsel %vm11034_vm9, %v10915_v61, %v4193_v8  ;;  %v5414_v4 = vpop.permute.xlu1 %5413  ;;  %v5544_v7 = vpop.permute.xlu0 %5543  ;;  %v4842_v27 = vmul.f32 %v10703_v48, %v10637_v23  ;;  %v4207_v54 = vmul.f32 %v10976_v59, %v4206_v14  ;;  %v4201_v15 = vor.u32 1.1754944e-38, %v4200_v2  ;;  %vm11061_vm12 = vmor %vm4816_vm7, %vm4817_vm10  ;;  %v3636_v14 = vld [vmem:[%s12533_s2 + $0xf8] sm:$0xff] }
 0x37c   : > { %v7982_v44 = vpop.eup %7981  ;;  %v4822_v40 = vand.u32 2147483648, %v10548_v32  ;;  %v4220_v30 = vmul.f32 %v11017_v22, %v10954_v46  ;;  %7987 = vpow2.f32 %v7557_v52  ;;  %v3699_v1 = vadd.f32 %v3667_v13, %v12808_v47 }
 0x37d   : > { %vm4199_vm11 = vcmp.eq.f32.partialorder %v4198_v31, 8.507059e+37  ;;  %v4820_v61 = vand.u32 2147483647, %v10548_v32  ;;  %v4835_v17 = vand.u32 2147483647, %v10582_v3  ;;  %v4837_v8 = vand.u32 2147483648, %v10582_v3 }
 0x37e   : > { %v4202_v9 = vsel %vm4199_vm11, %v4201_v15, %v4197_v16  ;;  %v11055_v12 = vadd.f32 %v5544_v7, %v5278_v62  ;;  %v11065_v2 = vadd.f32 1.0, %v7982_v44  ;;  %v4819_v35 = vsel %vm11061_vm12, %v10621_v25, %v4815_v29 }
 0x37f   : > { %v5485_v52 = vmul.f32 %v5414_v4, %v4202_v9  ;;  %v4843_v13 = vsub.f32 1.0, %v4842_v27  ;;  %v11070_v31 = vpop.eup %7983  ;;  %v4208_v6 = vadd.f32 %v10976_v59, %v4207_v54  ;;  %vm4210_vm13 = vweird.f32 %v10976_v59 }
 0x380   : > { %v4823_v11 = vor.u32 1.1754944e-38, %v4822_v40  ;;  %v4221_v62 = vsub.f32 1.0, %v4220_v30  ;;  %v7986_v16 = vpop.eup %7985  ;;  %v7558_v4 = vmul.f32 -1.442695, %v3699_v1  ;;  %v4215_v25 = vand.u32 2147483648, %v10907_v34 }
 0x381   : > { %v4834_v7 = vsel %vm11078_vm14, %v10656_v57, %v11026_v20  ;;  %5573 = vrot.lane.b32.xlu0 %v5485_v52, %s8305_s18  ;;  %vm4821_vm15 = vcmp.eq.f32.partialorder %v4820_v61, 8.507059e+37  ;;  %vm4209_vm0 = vweird.f32 %v10907_v34  ;;  %v4213_v3 = vand.u32 2147483647, %v10907_v34  ;;  %6693 = vrot.lane.b32.xlu2 %v7986_v16, %s8306_s19  ;;  %v12815_v61 = vld [vmem:[#allocation12_spill] sm:$0xff] }
 0x382   : > { %7989 = vtanh.f32 %v11055_v12  ;;  %5733 = vrot.lane.b32.xlu1 %v11012_v39, %s8307_s13  ;;  %v4824_v29 = vsel %vm4821_vm15, %v4823_v11, %v4819_v35  ;;  %v7988_v27 = vpop.eup %7987  ;;  %vm11097_vm1 = vmor %vm4209_vm0, %vm4210_vm13  ;;  %v4838_v20 = vor.u32 1.1754944e-38, %v4837_v8  ;;  %v4235_v34 = vmul.f32 %v11070_v31, %v11005_v19 }
 0x383   : > { %7991 = vrcp.f32 %v11065_v2  ;;  %v11101_v44 = vpop.permute.xlu2 %5421  ;;  %v4844_v39 = vmul.f32 %v10703_v48, %v4843_v13  ;;  %v4212_v54 = vsel %vm11097_vm1, %v10976_v59, %v4208_v6  ;;  %vm4836_vm3 = vcmp.eq.f32.partialorder %v4835_v17, 8.507059e+37  ;;  %v5546_v15 = vpop.permute.xlu1 %5545 }
 0x384   : > { %7993 = vrcp.f32 %v10987_v42  ;;  %v4222_v40 = vmul.f32 %v11017_v22, %v4221_v62  ;;  %v4216_v30 = vor.u32 1.1754944e-38, %v4215_v25  ;;  %v4839_v1 = vsel %vm4836_vm3, %v4838_v20, %v4834_v7 }
 0x385   : > { %7995 = vpow2.f32 %v7558_v4  ;;  %v5279_v8 = vmul.f32 %v12815_v61, %v4824_v29  ;;  %v11112_v9 = vadd.f32 1.0, %v7988_v27  ;;  %vm4214_vm4 = vcmp.eq.f32.partialorder %v4213_v3, 8.507059e+37  ;;  %v8262_v4 = vld [vmem:[#allocation3 + $0xf8] sm:$0xff] }
 0x386   : > { %vm4847_vm5 = vweird.f32 %v10703_v48  ;;  %v4857_v59 = vmul.f32 %v10718_v51, %v10652_v0  ;;  %v4217_v17 = vsel %vm4214_vm4, %v4216_v30, %v4212_v54  ;;  %v4236_v35 = vsub.f32 1.0, %v4235_v34  ;;  %v12820_v54 = vld [vmem:[#allocation59_spill] sm:$0xff] }
 0x387   : > { %v5631_v52 = vadd.f32 %v5546_v15, %v5279_v8  ;;  %v4845_v13 = vadd.f32 %v10703_v48, %v4844_v39  ;;  %v5486_v32 = vmul.f32 %v10969_v63, %v4217_v17  ;;  %v4223_v11 = vadd.f32 %v11017_v22, %v4222_v40 }
 0x388   : > { %v7990_v6 = vpop.eup %7989  ;;  %vm4225_vm6 = vweird.f32 %v11017_v22  ;;  %v4852_v62 = vand.u32 2147483648, %v10637_v23  ;;  %v3668_v25 = vmul.f32 %v8262_v4, %v3636_v14  ;;  %v4230_v7 = vand.u32 2147483648, %v10954_v46 }
 0x389   : > { %v11125_v16 = vpop.eup %7991  ;;  %6695 = vrot.lane.b32.xlu0 %v7990_v6, %s8306_s19  ;;  %vm4846_vm7 = vweird.f32 %v10637_v23  ;;  %v4850_v3 = vand.u32 2147483647, %v10637_v23  ;;  %7997 = vrcp.f32 %v11112_v9  ;;  %5735 = vrot.lane.b32.xlu2 %v11055_v12, %s8307_s13  ;;  %vm4224_vm8 = vweird.f32 %v10954_v46 }
 0x38a   : > { %v11131_v29 = vpop.eup %7993  ;;  %5575 = vrot.lane.b32.xlu1 %v5486_v32, %s8305_s18  ;;  %v4228_v63 = vand.u32 2147483647, %v10954_v46  ;;  %vm11141_vm9 = vmor %vm4846_vm7, %vm4847_vm5  ;;  %v4858_v23 = vsub.f32 1.0, %v4857_v59  ;;  %7999 = vtanh.f32 %v5631_v52  ;;  %v4237_v46 = vmul.f32 %v11070_v31, %v4236_v35  ;;  %v12821_v32 = vld [vmem:[#allocation81_spill] sm:$0xff] }
 0x38b   : > { %v7996_v57 = vpop.eup %7995  ;;  %v11145_v20 = vpop.permute.xlu2 %5553  ;;  %vm11149_vm10 = vmor %vm4224_vm8, %vm4225_vm6  ;;  %v4849_v39 = vsel %vm11141_vm9, %v10703_v48, %v4845_v13  ;;  %v5280_v15 = vmul.f32 %v12820_v54, %v4839_v1  ;;  %v4250_v40 = vmul.f32 %v11125_v16, %v11065_v2  ;;  %v4853_v61 = vor.u32 1.1754944e-38, %v4852_v62 }
 0x38c   : > { %v5418_v12 = vpop.permute.xlu0 %5417  ;;  %v4227_v30 = vsel %vm11149_vm10, %v11017_v22, %v4223_v11  ;;  %v3700_v8 = vadd.f32 %v3668_v25, %v10593_v38  ;;  %v4872_v14 = vmul.f32 %v10785_v49, %v10707_v43  ;;  %v4231_v59 = vor.u32 1.1754944e-38, %v4230_v7  ;;  %v12822_v11 = vld [vmem:[#allocation35_spill] sm:$0xff] }
 0x38d   : > { %vm4851_vm11 = vcmp.eq.f32.partialorder %v4850_v3, 8.507059e+37  ;;  %v11166_v17 = vadd.f32 1.0, %v7996_v57  ;;  %vm4229_vm12 = vcmp.eq.f32.partialorder %v4228_v63, 8.507059e+37  ;;  %v4859_v1 = vmul.f32 %v10718_v51, %v4858_v23  ;;  %v12825_v57 = vld [vmem:[#allocation61_spill] sm:$0xff] }
 0x38e   : > { %v4854_v48 = vsel %vm4851_vm11, %v4853_v61, %v4849_v39  ;;  %v5632_v35 = vadd.f32 %v11028_v5, %v5280_v15  ;;  %v4232_v13 = vsel %vm4229_vm12, %v4231_v59, %v4227_v30  ;;  %v4238_v6 = vadd.f32 %v11070_v31, %v4237_v46 }
 0x38f   : > { %vm4240_vm13 = vweird.f32 %v11070_v31  ;;  %v11172_v22 = vpop.eup %7997  ;;  %v4520_v62 = vadd.f32 %v12822_v11, %v12821_v32  ;;  %v4251_v4 = vsub.f32 1.0, %v4250_v40  ;;  %v5487_v25 = vmul.f32 %v5418_v12, %v4232_v13 }
 0x390   : > { %v4245_v7 = vand.u32 2147483648, %v11005_v19  ;;  %v8000_v3 = vpop.eup %7999  ;;  %v7559_v63 = vmul.f32 -1.442695, %v3700_v8  ;;  %v4873_v27 = vsub.f32 1.0, %v4872_v14  ;;  %vm4239_vm14 = vweird.f32 %v11005_v19 }
 0x391   : > { %5737 = vrot.lane.b32.xlu0 %v5631_v52, %s8307_s13  ;;  %v4243_v5 = vand.u32 2147483647, %v11005_v19  ;;  %8001 = vrcp.f32 %v11166_v17  ;;  %5577 = vrot.lane.b32.xlu2 %v5487_v25, %s8305_s18  ;;  %vm11185_vm15 = vmor %vm4239_vm14, %vm4240_vm13  ;;  %v5281_v34 = vmul.f32 %v12825_v57, %v4854_v48  ;;  %v4860_v52 = vadd.f32 %v10718_v51, %v4859_v1 }
 0x392   : > { %6697 = vrot.lane.b32.xlu1 %v8000_v3, %s8306_s19  ;;  %vm4862_vm0 = vweird.f32 %v10718_v51  ;;  %8003 = vtanh.f32 %v5632_v35  ;;  %v4242_v19 = vsel %vm11185_vm15, %v11070_v31, %v4238_v6  ;;  %vm4861_vm1 = vweird.f32 %v10652_v0 }
 0x393   : > { %v5420_v12 = vpop.permute.xlu1 %5419  ;;  %v11195_v46 = vpop.permute.xlu2 %5717  ;;  %v4867_v39 = vand.u32 2147483648, %v10652_v0  ;;  %v4252_v54 = vmul.f32 %v11125_v16, %v4251_v4  ;;  %v4246_v15 = vor.u32 1.1754944e-38, %v4245_v7  ;;  %v4865_v30 = vand.u32 2147483647, %v10652_v0  ;;  %vm11208_vm4 = vmor %vm4861_vm1, %vm4862_vm0 }
 0x394   : > { %6805 = vst.msk [vmem:[#allocation3] sm:$0xff] %vm529_vm2, %v11195_v46  ;;  %v5550_v40 = vpop.permute.xlu0 %5549  ;;  %v4265_v61 = vmul.f32 %v11172_v22, %v11112_v9  ;;  %8005 = vpow2.f32 %v7559_v63  ;;  %v4874_v31 = vmul.f32 %v10785_v49, %v4873_v27  ;;  %vm4244_vm3 = vcmp.eq.f32.partialorder %v4243_v5, 8.507059e+37 }
 0x395   : > { %v4247_v14 = vsel %vm4244_vm3, %v4246_v15, %v4242_v19  ;;  %v5633_v59 = vadd.f32 %v5550_v40, %v5281_v34  ;;  %v4864_v48 = vsel %vm11208_vm4, %v10718_v51, %v4860_v52  ;;  %v4887_v0 = vmul.f32 %v10793_v45, %v10721_v55 }
 0x396   : > { %v11218_v1 = vadd.f32 1.0, %v10948_v56  ;;  %v7579_v13 = vmul.f32 -1.442695, %v4520_v62  ;;  %v5488_v6 = vmul.f32 %v5420_v12, %v4247_v14  ;;  %v4868_v11 = vor.u32 1.1754944e-38, %v4867_v39  ;;  %v12830_v39 = vld [vmem:[#allocation82_spill] sm:$0xff] }
 0x397   : > { %v11220_v4 = vpop.eup %8001  ;;  %v4253_v25 = vadd.f32 %v11125_v16, %v4252_v54  ;;  %vm4255_vm5 = vweird.f32 %v11125_v16  ;;  %vm4866_vm6 = vcmp.eq.f32.partialorder %v4865_v30, 8.507059e+37  ;;  %v4266_v7 = vsub.f32 1.0, %v4265_v61  ;;  %v12831_v54 = vld [vmem:[#allocation37_spill] sm:$0xff] }
 0x398   : > { %v8004_v3 = vpop.eup %8003  ;;  %v4260_v51 = vand.u32 2147483648, %v11065_v2  ;;  %v4875_v63 = vadd.f32 %v10785_v49, %v4874_v31  ;;  %vm4877_vm7 = vweird.f32 %v10785_v49  ;;  %v4869_v56 = vsel %vm4866_vm6, %v4868_v11, %v4864_v48 }
 0x399   : > { %5579 = vrot.lane.b32.xlu0 %v5488_v6, %s8305_s18  ;;  %vm4254_vm8 = vweird.f32 %v11065_v2  ;;  %v4258_v62 = vand.u32 2147483647, %v11065_v2  ;;  %8007 = vtanh.f32 %v5633_v59  ;;  %6699 = vrot.lane.b32.xlu2 %v8004_v3, %s8306_s19  ;;  %v4888_v27 = vsub.f32 1.0, %v4887_v0 }
 0x39a   : > { %5739 = vrot.lane.b32.xlu1 %v5632_v35, %s8307_s13  ;;  %v8006_v5 = vpop.eup %8005  ;;  %8009 = vpow2.f32 %v7579_v13  ;;  %vm11234_vm9 = vmor %vm4254_vm8, %vm4255_vm5  ;;  %v4882_v57 = vand.u32 2147483648, %v10707_v43  ;;  %v4280_v34 = vmul.f32 %v11220_v4, %v11166_v17  ;;  %vm4876_vm10 = vweird.f32 %v10707_v43 }
 0x39b   : > { %v4257_v2 = vsel %vm11234_vm9, %v11125_v16, %v4253_v25  ;;  %v4880_v35 = vand.u32 2147483647, %v10707_v43  ;;  %v5552_v52 = vpop.permute.xlu1 %5551  ;;  %v11246_v19 = vpop.permute.xlu2 %5427  ;;  %v4267_v12 = vmul.f32 %v11172_v22, %v4266_v7  ;;  %8011 = vrcp.f32 %v11218_v1  ;;  %vm11254_vm11 = vmor %vm4876_vm10, %vm4877_vm7  ;;  %v12834_v16 = vld [vmem:[#allocation13_spill] sm:$0xff] }
 0x39c   : > { %v4521_v15 = vadd.f32 %v12831_v54, %v12830_v39  ;;  %v4261_v40 = vor.u32 1.1754944e-38, %v4260_v51  ;;  %v5282_v61 = vmul.f32 %v12834_v16, %v4869_v56  ;;  %v11259_v43 = vadd.f32 1.0, %v8006_v5 }
 0x39d   : > { %vm4259_vm12 = vcmp.eq.f32.partialorder %v4258_v62, 8.507059e+37  ;;  %v4879_v31 = vsel %vm11254_vm11, %v10785_v49, %v4875_v63  ;;  %v4889_v8 = vmul.f32 %v10793_v45, %v4888_v27  ;;  %v4883_v48 = vor.u32 1.1754944e-38, %v4882_v57 }
 0x39e   : > { %v4262_v14 = vsel %vm4259_vm12, %v4261_v40, %v4257_v2  ;;  %v5634_v0 = vadd.f32 %v5552_v52, %v5282_v61  ;;  %v4281_v13 = vsub.f32 1.0, %v4280_v34  ;;  %vm4881_vm13 = vcmp.eq.f32.partialorder %v4880_v35, 8.507059e+37  ;;  %v12837_v34 = vld [vmem:[#allocation43_spill] sm:$0xff] }
 0x39f   : > { %v8008_v6 = vpop.eup %8007  ;;  %v5489_v11 = vmul.f32 %v11101_v44, %v4262_v14  ;;  %v4268_v25 = vadd.f32 %v11172_v22, %v4267_v12  ;;  %vm4270_vm14 = vweird.f32 %v11172_v22  ;;  %v4884_v3 = vsel %vm4881_vm13, %v4883_v48, %v4879_v31  ;;  %v12838_v35 = vld [vmem:[#allocation63_spill] sm:$0xff] }
 0x3a0   : > { %v11268_v7 = vpop.eup %8009  ;;  %v4275_v49 = vand.u32 2147483648, %v11112_v9  ;;  %vm4892_vm15 = vweird.f32 %v10793_v45  ;;  %v4897_v51 = vand.u32 2147483648, %v10721_v55  ;;  %8013 = vrcp.f32 %v11259_v43 }
 0x3a1   : > { %6701 = vrot.lane.b32.xlu0 %v8008_v6, %s8306_s19  ;;  %5741 = vrot.lane.b32.xlu2 %v5633_v59, %s8307_s13  ;;  %vm4269_vm0 = vweird.f32 %v11112_v9  ;;  %v4273_v44 = vand.u32 2147483647, %v11112_v9  ;;  %v4890_v63 = vadd.f32 %v10793_v45, %v4889_v8  ;;  %v11280_v56 = vpop.eup %8011  ;;  %8015 = vtanh.f32 %v5634_v0 }
 0x3a2   : > { %5581 = vrot.lane.b32.xlu1 %v5489_v11, %s8305_s18  ;;  %vm11284_vm1 = vmor %vm4269_vm0, %vm4270_vm14  ;;  %v4282_v5 = vmul.f32 %v11220_v4, %v4281_v13  ;;  %v7580_v23 = vmul.f32 -1.442695, %v4521_v15  ;;  %vm4891_vm3 = vweird.f32 %v10721_v55  ;;  %v4895_v57 = vand.u32 2147483647, %v10721_v55  ;;  %v5653_v11 = vld [vmem:[%s12535_s4] sm:$0xff] }
 0x3a3   : > { %v5424_v27 = vpop.permute.xlu0 %5423  ;;  %v11289_v59 = vpop.permute.xlu2 %5559  ;;  %v4272_v9 = vsel %vm11284_vm1, %v11172_v22, %v4268_v25  ;;  %v4522_v2 = vadd.f32 %v12837_v34, %v10054_v37  ;;  %v5283_v52 = vmul.f32 %v12838_v35, %v4884_v3  ;;  %v4276_v12 = vor.u32 1.1754944e-38, %v4275_v49  ;;  %vm11301_vm4 = vmor %vm4891_vm3, %vm4892_vm15 }
 0x3a4   : > { %v4902_v15 = vmul.f32 %v10940_v18, %v10795_v50  ;;  %v4917_v22 = vmul.f32 %v11131_v29, %v10987_v42  ;;  %vm4274_vm5 = vcmp.eq.f32.partialorder %v4273_v44, 8.507059e+37  ;;  %v4894_v55 = vsel %vm11301_vm4, %v10793_v45, %v4890_v63  ;;  %v12843_v63 = vld [vmem:[#allocation64_spill] sm:$0xff] }
 0x3a5   : > { %v4898_v40 = vor.u32 1.1754944e-38, %v4897_v51  ;;  %v5635_v30 = vadd.f32 %v11145_v20, %v5283_v52  ;;  %v4277_v16 = vsel %vm4274_vm5, %v4276_v12, %v4272_v9  ;;  %v4283_v61 = vadd.f32 %v11220_v4, %v4282_v5 }
 0x3a6   : > { %vm4285_vm6 = vweird.f32 %v11220_v4  ;;  %v11315_v31 = vpop.eup %8013  ;;  %8017 = vpow2.f32 %v7580_v23  ;;  %v5490_v8 = vmul.f32 %v5424_v27, %v4277_v16  ;;  %v4290_v14 = vand.u32 2147483648, %v11166_v17  ;;  %v12844_v27 = vld [vmem:[#allocation40_spill] sm:$0xff] }
 0x3a7   : > { %vm4896_vm7 = vcmp.eq.f32.partialorder %v4895_v57, 8.507059e+37  ;;  %v8016_v48 = vpop.eup %8015  ;;  %v7581_v13 = vmul.f32 -1.442695, %v4522_v2  ;;  %vm4284_vm8 = vweird.f32 %v11166_v17  ;;  %v4288_v45 = vand.u32 2147483647, %v11166_v17 }
 0x3a8   : > { %v4899_v20 = vsel %vm4896_vm7, %v4898_v40, %v4894_v55  ;;  %v4918_v6 = vsub.f32 1.0, %v4917_v22  ;;  %vm11325_vm9 = vmor %vm4284_vm8, %vm4285_vm6  ;;  %8019 = vtanh.f32 %v5635_v30  ;;  %v4903_v3 = vsub.f32 1.0, %v4902_v15  ;;  %v12845_v55 = vld [vmem:[#allocation42_spill] sm:$0xff] }
 0x3a9   : > { %5743 = vrot.lane.b32.xlu0 %v5634_v0, %s8307_s13  ;;  %5583 = vrot.lane.b32.xlu2 %v5490_v8, %s8305_s18  ;;  %v4287_v0 = vsel %vm11325_vm9, %v11220_v4, %v4283_v61  ;;  %v4295_v17 = vmul.f32 %v11315_v31, %v11259_v43  ;;  %v4291_v49 = vor.u32 1.1754944e-38, %v4290_v14  ;;  %v5284_v62 = vmul.f32 %v12843_v63, %v4899_v20 }
 0x3aa   : > { %6703 = vrot.lane.b32.xlu1 %v8016_v48, %s8306_s19  ;;  %8021 = vpow2.f32 %v7581_v13  ;;  %v4523_v5 = vadd.f32 %v12844_v27, %v10117_v60  ;;  %vm4289_vm10 = vcmp.eq.f32.partialorder %v4288_v45, 8.507059e+37  ;;  %v4919_v9 = vmul.f32 %v11131_v29, %v4918_v6 }
 0x3ab   : > { %v5556_v25 = vpop.permute.xlu0 %5555  ;;  %v11334_v44 = vpop.permute.xlu2 %6681  ;;  %v4292_v4 = vsel %vm4289_vm10, %v4291_v49, %v4287_v0  ;;  %v4932_v34 = vmul.f32 %v11280_v56, %v11218_v1  ;;  %v4904_v35 = vmul.f32 %v10940_v18, %v4903_v3  ;;  %v11344_v52 = vadd.f32 1.0, %v11268_v7 }
 0x3ac   : > { %v5426_v51 = vpop.permute.xlu1 %5425  ;;  %v8018_v23 = vpop.eup %8017  ;;  %v5636_v57 = vadd.f32 %v5556_v25, %v5284_v62  ;;  %v4296_v12 = vsub.f32 1.0, %v4295_v17  ;;  %v7582_v22 = vmul.f32 -1.442695, %v4523_v5  ;;  %v4524_v40 = vadd.f32 %v12845_v55, %v10165_v58  ;;  %v12856_v17 = vld [vmem:[#allocation46_spill] sm:$0xff] }
 0x3ad   : > { %v5491_v2 = vmul.f32 %v5426_v51, %v4292_v4  ;;  %v11346_v15 = vadd.f32 1.0, %v8018_v23  ;;  %v4920_v16 = vadd.f32 %v11131_v29, %v4919_v9  ;;  %vm4922_vm11 = vweird.f32 %v11131_v29 }
 0x3ae   : > { %v8020_v54 = vpop.eup %8019  ;;  %8023 = vtanh.f32 %v5636_v57  ;;  %v4933_v7 = vsub.f32 1.0, %v4932_v34  ;;  %v4925_v8 = vand.u32 2147483647, %v10987_v42  ;;  %v4927_v14 = vand.u32 2147483648, %v10987_v42 }
 0x3af   : > { %v4905_v48 = vadd.f32 %v10940_v18, %v4904_v35  ;;  %vm4907_vm12 = vweird.f32 %v10940_v18  ;;  %8025 = vrcp.f32 %v11344_v52  ;;  %v4297_v45 = vmul.f32 %v11315_v31, %v4296_v12 }
 0x3b0   : > { %v8022_v61 = vpop.eup %8021  ;;  %vm4921_vm13 = vweird.f32 %v10987_v42  ;;  %8027 = vrcp.f32 %v11346_v15  ;;  %vm4906_vm15 = vweird.f32 %v10795_v50  ;;  %v4910_v42 = vand.u32 2147483647, %v10795_v50 }
 0x3b1   : > { %5585 = vrot.lane.b32.xlu0 %v5491_v2, %s8305_s18  ;;  %6705 = vrot.lane.b32.xlu2 %v8020_v54, %s8306_s19  ;;  %vm11373_vm14 = vmor %vm4921_vm13, %vm4922_vm11  ;;  %v11381_v25 = vadd.f32 1.0, %v8022_v61  ;;  %8029 = vpow2.f32 %v7582_v22  ;;  %v4934_v49 = vmul.f32 %v11280_v56, %v4933_v7  ;;  %v7583_v51 = vmul.f32 -1.442695, %v4524_v40  ;;  %v12852_v22 = vld [vmem:[#allocation14_spill] sm:$0xff] }
 0x3b2   : > { %5745 = vrot.lane.b32.xlu1 %v5635_v30, %s8307_s13  ;;  %v4912_v30 = vand.u32 2147483648, %v10795_v50  ;;  %v4924_v3 = vsel %vm11373_vm14, %v11131_v29, %v4920_v16  ;;  %vm11388_vm0 = vmor %vm4906_vm15, %vm4907_vm12  ;;  %vm4926_vm1 = vcmp.eq.f32.partialorder %v4925_v8, 8.507059e+37  ;;  %v4928_v50 = vor.u32 1.1754944e-38, %v4927_v14  ;;  %v12853_v8 = vld [vmem:[#allocation67_spill] sm:$0xff] }
 0x3b3   : > { %v11359_v13 = vpop.permute.xlu0 %6677  ;;  %v11365_v6 = vpop.permute.xlu2 %5723  ;;  %v4909_v63 = vsel %vm11388_vm0, %v10940_v18, %v4905_v48  ;;  %v5813_v27 = vmul.f32 %v11195_v46, %v5653_v11  ;;  %v4298_v29 = vadd.f32 %v11315_v31, %v4297_v45  ;;  %vm4300_vm3 = vweird.f32 %v11315_v31 }
 0x3b4   : > { %v5558_v20 = vpop.permute.xlu1 %5557  ;;  %6808 = vst.msk [vmem:[#allocation3 + $0x18] sm:$0xff] %vm529_vm2, %v11365_v6  ;;  %v8024_v62 = vpop.eup %8023  ;;  %v4913_v5 = vor.u32 1.1754944e-38, %v4912_v30  ;;  %v4305_v23 = vand.u32 2147483648, %v11259_v43  ;;  %v4929_v9 = vsel %vm4926_vm1, %v4928_v50, %v4924_v3  ;;  %vm4911_vm4 = vcmp.eq.f32.partialorder %v4910_v42, 8.507059e+37 }
 0x3b5   : > { %vm4937_vm5 = vweird.f32 %v11280_v56  ;;  %v11402_v4 = vpop.eup %8025  ;;  %vm4299_vm6 = vweird.f32 %v11259_v43  ;;  %v4303_v18 = vand.u32 2147483647, %v11259_v43  ;;  %v4935_v34 = vadd.f32 %v11280_v56, %v4934_v49 }
 0x3b6   : > { %v4914_v46 = vsel %vm4911_vm4, %v4913_v5, %v4909_v63  ;;  %v11409_v2 = vpop.eup %8027  ;;  %8031 = vrcp.f32 %v11381_v25  ;;  %vm11414_vm7 = vmor %vm4299_vm6, %vm4300_vm3  ;;  %v4942_v43 = vand.u32 2147483648, %v11218_v1  ;;  %v5286_v55 = vmul.f32 %v12852_v22, %v4929_v9  ;;  %v12857_v9 = vld [vmem:[#allocation68_spill] sm:$0xff] }
 0x3b7   : > { %v8030_v54 = vpop.eup %8029  ;;  %vm4936_vm8 = vweird.f32 %v11218_v1  ;;  %v4940_v7 = vand.u32 2147483647, %v11218_v1  ;;  %8033 = vpow2.f32 %v7583_v51  ;;  %v4306_v61 = vor.u32 1.1754944e-38, %v4305_v23 }
 0x3b8   : > { %v5285_v14 = vmul.f32 %v12853_v8, %v4914_v46  ;;  %vm11436_vm9 = vmor %vm4936_vm8, %vm4937_vm5  ;;  %vm4304_vm10 = vcmp.eq.f32.partialorder %v4303_v18, 8.507059e+37  ;;  %v11441_v45 = vadd.f32 %v11289_v59, %v5286_v55  ;;  %v4962_v1 = vmul.f32 %v11409_v2, %v11346_v15 }
 0x3b9   : > { %6707 = vrot.lane.b32.xlu0 %v8024_v62, %s8306_s19  ;;  %5747 = vrot.lane.b32.xlu2 %v5636_v57, %s8307_s13  ;;  %v4302_v57 = vsel %vm11414_vm7, %v11315_v31, %v4298_v29  ;;  %v5654_v31 = vld [vmem:[%s12535_s4 + $0x8] sm:$0xff]  ;;  %v4939_v30 = vsel %vm11436_vm9, %v11280_v56, %v4935_v34  ;;  %v4943_v42 = vor.u32 1.1754944e-38, %v4942_v43  ;;  %v4947_v3 = vmul.f32 %v11402_v4, %v11344_v52 }
 0x3ba   : > { %5877 = vrot.lane.b32.xlu1 %v5813_v27, %s8307_s13  ;;  %v4307_v11 = vsel %vm4304_vm10, %v4306_v61, %v4302_v57  ;;  %v5637_v0 = vadd.f32 %v5558_v20, %v5285_v14  ;;  %v4525_v49 = vadd.f32 %v12856_v17, %v10221_v33  ;;  %vm4941_vm11 = vcmp.eq.f32.partialorder %v4940_v7, 8.507059e+37 }
 0x3bb   : > { %v5720_v12 = vpop.permute.xlu0 %5719  ;;  %v11425_v16 = vpop.permute.xlu2 %5565  ;;  %v5492_v51 = vmul.f32 %v11246_v19, %v4307_v11  ;;  %v4944_v63 = vsel %vm4941_vm11, %v4943_v42, %v4939_v30  ;;  %8035 = vtanh.f32 %v11441_v45  ;;  %v4963_v56 = vsub.f32 1.0, %v4962_v1  ;;  %v5655_v19 = vld [vmem:[%s12535_s4 + $0x10] sm:$0xff] }
 0x3bc   : > { %v11423_v40 = vpop.permute.xlu1 %6679  ;;  %6806 = vst.msk [vmem:[#allocation3 + $0x8] sm:$0xff] %vm529_vm2, %v5720_v12  ;;  %v5814_v59 = vmul.f32 %v5720_v12, %v5654_v31  ;;  %v11453_v50 = vpop.eup %8031  ;;  %8037 = vtanh.f32 %v5637_v0  ;;  %v4948_v27 = vsub.f32 1.0, %v4947_v3  ;;  %v7584_v29 = vmul.f32 -1.442695, %v4525_v49  ;;  %v12860_v3 = vld [vmem:[#allocation44_spill] sm:$0xff] }
 0x3bd   : > { %v8034_v20 = vpop.eup %8033  ;;  %v5287_v18 = vmul.f32 %v12857_v9, %v4944_v63  ;;  %v4964_v46 = vmul.f32 %v11409_v2, %v4963_v56  ;;  %v4977_v35 = vmul.f32 %v11453_v50, %v11381_v25  ;;  %v11470_v55 = vadd.f32 1.0, %v8030_v54 }
 0x3be   : > { %v4949_v43 = vmul.f32 %v11402_v4, %v4948_v27  ;;  %8039 = vpow2.f32 %v7584_v29  ;;  %v11472_v7 = vadd.f32 1.0, %v8034_v20  ;;  %vm4967_vm12 = vweird.f32 %v11409_v2 }
 0x3bf   : > { %v4965_v61 = vadd.f32 %v11409_v2, %v4964_v46  ;;  %v4978_v8 = vsub.f32 1.0, %v4977_v35  ;;  %v4972_v14 = vand.u32 2147483648, %v11346_v15  ;;  %vm4952_vm13 = vweird.f32 %v11402_v4 }
 0x3c0   : > { %v4950_v31 = vadd.f32 %v11402_v4, %v4949_v43  ;;  %vm4966_vm14 = vweird.f32 %v11346_v15  ;;  %v4970_v48 = vand.u32 2147483647, %v11346_v15  ;;  %v4957_v1 = vand.u32 2147483648, %v11344_v52 }
 0x3c1   : > { %5749 = vrot.lane.b32.xlu0 %v5637_v0, %s8307_s13  ;;  %5879 = vrot.lane.b32.xlu2 %v5814_v59, %s8307_s13  ;;  %v8036_v57 = vpop.eup %8035  ;;  %vm11492_vm15 = vmor %vm4966_vm14, %vm4967_vm12  ;;  %vm4951_vm0 = vweird.f32 %v11344_v52  ;;  %v4955_v42 = vand.u32 2147483647, %v11344_v52  ;;  %v4526_v17 = vadd.f32 %v12860_v3, %v10284_v36  ;;  %v12861_v52 = vld [vmem:[#allocation5_spill] sm:$0xff]  ;;  %v4973_v63 = vor.u32 1.1754944e-38, %v4972_v14  ;;  %v5657_v14 = vld [vmem:[%s12535_s4 + $0x20] sm:$0xff] }
 0x3c2   : > { %5587 = vrot.lane.b32.xlu1 %v5492_v51, %s8305_s18  ;;  %v8038_v22 = vpop.eup %8037  ;;  %v4969_v49 = vsel %vm11492_vm15, %v11409_v2, %v4965_v61  ;;  %vm4953_vm1 = vmor %vm4951_vm0, %vm4952_vm13  ;;  %v4979_v51 = vmul.f32 %v11453_v50, %v4978_v8  ;;  %v4527_v59 = vadd.f32 %v12861_v52, %v10329_v41  ;;  %vm4971_vm3 = vcmp.eq.f32.partialorder %v4970_v48, 8.507059e+37  ;;  %v12863_v61 = vld [vmem:[#allocation16_spill] sm:$0xff] }
 0x3c3   : > { %v5562_v62 = vpop.permute.xlu0 %5561  ;;  %v11462_v23 = vpop.permute.xlu2 %6687  ;;  %v4954_v56 = vsel %vm4953_vm1, %v11402_v4, %v4950_v31  ;;  %v4974_v29 = vsel %vm4971_vm3, %v4973_v63, %v4969_v49  ;;  %vm4956_vm4 = vcmp.eq.f32.partialorder %v4955_v42, 8.507059e+37  ;;  %v7585_v2 = vmul.f32 -1.442695, %v4526_v17 }
 0x3c4   : > { %v5722_v5 = vpop.permute.xlu1 %5721  ;;  %v5639_v34 = vadd.f32 %v5562_v62, %v5287_v18  ;;  %v8040_v15 = vpop.eup %8039  ;;  %v4958_v62 = vor.u32 1.1754944e-38, %v4957_v1  ;;  %vm4982_vm5 = vweird.f32 %v11453_v50  ;;  %v7586_v9 = vmul.f32 -1.442695, %v4527_v59 }
 0x3c5   : > { %6807 = vst.msk [vmem:[#allocation3 + $0x10] sm:$0xff] %vm529_vm2, %v5722_v5  ;;  %v5815_v12 = vmul.f32 %v5722_v5, %v5655_v19  ;;  %v11512_v27 = vadd.f32 1.0, %v8040_v15  ;;  %v4980_v5 = vadd.f32 %v11453_v50, %v4979_v51  ;;  %v4987_v46 = vand.u32 2147483648, %v11381_v25  ;;  %v12864_v15 = vld [vmem:[#allocation49_spill] sm:$0xff] }
 0x3c6   : > { %8041 = vtanh.f32 %v5639_v34  ;;  %v4959_v19 = vsel %vm4956_vm4, %v4958_v62, %v4954_v56  ;;  %vm4981_vm6 = vweird.f32 %v11381_v25  ;;  %v4528_v3 = vadd.f32 %v12864_v15, %v12792_v53  ;;  %v12865_v62 = vld [vmem:[#allocation70_spill] sm:$0xff] }
 0x3c7   : > { %8043 = vrcp.f32 %v11472_v7  ;;  %v5288_v8 = vmul.f32 %v12863_v61, %v4959_v19  ;;  %vm4983_vm7 = vmor %vm4981_vm6, %vm4982_vm5  ;;  %v4988_v0 = vor.u32 1.1754944e-38, %v4987_v46  ;;  %vm5011_vm11 = vweird.f32 %v11472_v7 }
 0x3c8   : > { %8045 = vrcp.f32 %v11470_v55  ;;  %v4984_v48 = vsel %vm4983_vm7, %v11453_v50, %v4980_v5  ;;  %v7587_v63 = vmul.f32 -1.442695, %v4528_v3  ;;  %vm4996_vm13 = vweird.f32 %v11470_v55 }
 0x3c9   : > { %5881 = vrot.lane.b32.xlu0 %v5815_v12, %s8307_s13  ;;  %6711 = vrot.lane.b32.xlu2 %v8036_v57, %s8306_s19  ;;  %v12862_v12 = vld [vmem:[#allocation15_spill] sm:$0xff]  ;;  %8047 = vrcp.f32 %v11512_v27  ;;  %vm5026_vm3 = vweird.f32 %v11512_v27 }
 0x3ca   : > { %6709 = vrot.lane.b32.xlu1 %v8038_v22, %s8306_s19  ;;  %v5289_v43 = vmul.f32 %v12862_v12, %v4974_v29  ;;  %8049 = vpow2.f32 %v7585_v2 }
 0x3cb   : > { %v11482_v54 = vpop.permute.xlu0 %6683  ;;  %v11487_v11 = vpop.permute.xlu2 %5729  ;;  %8051 = vpow2.f32 %v7586_v9 }
 0x3cc   : > { %v5564_v30 = vpop.permute.xlu1 %5563  ;;  %6811 = vst.msk [vmem:[#allocation3 + $0x30] sm:$0xff] %vm529_vm2, %v11487_v11  ;;  %v8042_v20 = vpop.eup %8041  ;;  %v11544_v31 = vadd.f32 %v11425_v16, %v5289_v43 }
 0x3cd   : > { %v11520_v4 = vpop.eup %8043  ;;  %v5640_v1 = vadd.f32 %v5564_v30, %v5288_v8 }
 0x3ce   : > { %v11523_v35 = vpop.eup %8045  ;;  %8053 = vtanh.f32 %v11544_v31  ;;  %vm5012_vm9 = vweird.f32 %v11520_v4 }
 0x3cf   : > { %v4992_v42 = vmul.f32 %v11523_v35, %v11470_v55  ;;  %v11558_v50 = vpop.eup %8047  ;;  %8055 = vtanh.f32 %v5640_v1  ;;  %vm4997_vm10 = vweird.f32 %v11523_v35  ;;  %vm11593_vm12 = vmor %vm5011_vm11, %vm5012_vm9 }
 0x3d0   : > { %v8050_v59 = vpop.eup %8049  ;;  %v5022_v9 = vmul.f32 %v11558_v50, %v11512_v27  ;;  %8057 = vpow2.f32 %v7587_v63  ;;  %vm4998_vm14 = vmor %vm4996_vm13, %vm4997_vm10  ;;  %vm5027_vm1 = vweird.f32 %v11558_v50 }
 0x3d1   : > { %6713 = vrot.lane.b32.xlu0 %v8042_v20, %s8306_s19  ;;  %5753 = vrot.lane.b32.xlu2 %v5639_v34, %s8307_s13  ;;  %v5656_v34 = vld [vmem:[%s12535_s4 + $0x18] sm:$0xff]  ;;  %v4993_v52 = vsub.f32 1.0, %v4992_v42  ;;  %v8052_v2 = vpop.eup %8051  ;;  %vm5028_vm4 = vmor %vm5026_vm3, %vm5027_vm1 }
 0x3d2   : > { %5751 = vrot.lane.b32.xlu1 %v11441_v45, %s8307_s13  ;;  %v4985_v45 = vand.u32 2147483647, %v11381_v25  ;;  %v5007_v25 = vmul.f32 %v11520_v4, %v11472_v7  ;;  %v5816_v17 = vmul.f32 %v11365_v6, %v5656_v34  ;;  %v5658_v6 = vld [vmem:[%s12535_s4 + $0x28] sm:$0xff]  ;;  %v11573_v34 = vadd.f32 1.0, %v8052_v2 }
 0x3d3   : > { %v5726_v18 = vpop.permute.xlu0 %5725  ;;  %v11528_v22 = vpop.permute.xlu2 %5571  ;;  %v4994_v46 = vmul.f32 %v11523_v35, %v4993_v52  ;;  %v5023_v8 = vsub.f32 1.0, %v5022_v9 }
 0x3d4   : > { %v11526_v57 = vpop.permute.xlu1 %6685  ;;  %6809 = vst.msk [vmem:[#allocation3 + $0x20] sm:$0xff] %vm529_vm2, %v5726_v18  ;;  %v5817_v49 = vmul.f32 %v5726_v18, %v5657_v14  ;;  %vm4986_vm8 = vcmp.eq.f32.partialorder %v4985_v45, 8.507059e+37  ;;  %v5008_v51 = vsub.f32 1.0, %v5007_v25  ;;  %v8054_v12 = vpop.eup %8053  ;;  %v11571_v45 = vadd.f32 1.0, %v8050_v59 }
 0x3d5   : > { %v4989_v16 = vsel %vm4986_vm8, %v4988_v0, %v4984_v48  ;;  %v8056_v43 = vpop.eup %8055  ;;  %v5017_v14 = vand.u32 2147483648, %v11472_v7  ;;  %v4995_v25 = vadd.f32 %v11523_v35, %v4994_v46  ;;  %v5002_v0 = vand.u32 2147483648, %v11470_v55 }
 0x3d6   : > { %v5290_v29 = vmul.f32 %v12865_v62, %v4989_v16  ;;  %v5009_v19 = vmul.f32 %v11520_v4, %v5008_v51  ;;  %v5032_v46 = vand.u32 2147483648, %v11512_v27  ;;  %vm5056_vm8 = vweird.f32 %v11573_v34 }
 0x3d7   : > { %v5018_v59 = vor.u32 1.1754944e-38, %v5017_v14  ;;  %v4999_v63 = vsel %vm4998_vm14, %v11523_v35, %v4995_v25  ;;  %v12871_v25 = vld [vmem:[#allocation17_spill] sm:$0xff]  ;;  %vm5041_vm10 = vweird.f32 %v11571_v45 }
 0x3d8   : > { %v5010_v61 = vadd.f32 %v11520_v4, %v5009_v19 }
 0x3d9   : > { %5755 = vrot.lane.b32.xlu0 %v5640_v1, %s8307_s13  ;;  %5885 = vrot.lane.b32.xlu2 %v5817_v49, %s8307_s13  ;;  %v5015_v1 = vand.u32 2147483647, %v11472_v7  ;;  %v8058_v7 = vpop.eup %8057  ;;  %v12868_v49 = vld [vmem:[#allocation47_spill] sm:$0xff] }
 0x3da   : > { %5883 = vrot.lane.b32.xlu1 %v5816_v17, %s8307_s13  ;;  %v5000_v17 = vand.u32 2147483647, %v11470_v55  ;;  %v4529_v16 = vadd.f32 %v12868_v49, %v12798_v28  ;;  %v5014_v51 = vsel %vm11593_vm12, %v11520_v4, %v5010_v61  ;;  %v12869_v55 = vld [vmem:[#allocation6_spill] sm:$0xff]  ;;  %v11613_v62 = vadd.f32 1.0, %v8058_v7 }
 0x3db   : > { %v5568_v30 = vpop.permute.xlu0 %5567  ;;  %v11563_v20 = vpop.permute.xlu2 %6693  ;;  %v4530_v52 = vadd.f32 %v12869_v55, %v12804_v21  ;;  %vm5016_vm15 = vcmp.eq.f32.partialorder %v5015_v1, 8.507059e+37  ;;  %v5033_v49 = vor.u32 1.1754944e-38, %v5032_v46 }
 0x3dc   : > { %v5728_v56 = vpop.permute.xlu1 %5727  ;;  %v5642_v5 = vadd.f32 %v5568_v30, %v5290_v29  ;;  %v5024_v30 = vmul.f32 %v11558_v50, %v5023_v8  ;;  %v5019_v29 = vsel %vm5016_vm15, %v5018_v59, %v5014_v51  ;;  %vm5001_vm0 = vcmp.eq.f32.partialorder %v5000_v17, 8.507059e+37  ;;  %v12872_v51 = vld [vmem:[#allocation7_spill] sm:$0xff] }
 0x3dd   : > { %6810 = vst.msk [vmem:[#allocation3 + $0x28] sm:$0xff] %vm529_vm2, %v5728_v56  ;;  %v5818_v18 = vmul.f32 %v5728_v56, %v5658_v6  ;;  %v5003_v56 = vor.u32 1.1754944e-38, %v5002_v0  ;;  %v7588_v4 = vmul.f32 -1.442695, %v4529_v16  ;;  %v7589_v9 = vmul.f32 -1.442695, %v4530_v52 }
 0x3de   : > { %8059 = vtanh.f32 %v5642_v5  ;;  %v5025_v19 = vadd.f32 %v11558_v50, %v5024_v30  ;;  %v5660_v0 = vld [vmem:[%s12535_s4 + $0x38] sm:$0xff]  ;;  %v4531_v30 = vadd.f32 %v12872_v51, %v12808_v47  ;;  %v5060_v51 = vand.u32 2147483647, %v11573_v34 }
 0x3df   : > { %8061 = vrcp.f32 %v11573_v34  ;;  %v5004_v2 = vsel %vm5001_vm0, %v5003_v56, %v4999_v63  ;;  %vm5071_vm15 = vweird.f32 %v11613_v62 }
 0x3e0   : > { %8063 = vrcp.f32 %v11571_v45  ;;  %v5291_v1 = vmul.f32 %v12871_v25, %v5004_v2  ;;  %v5029_v17 = vsel %vm5028_vm4, %v11558_v50, %v5025_v19  ;;  %v7590_v56 = vmul.f32 -1.442695, %v4531_v30  ;;  %v12873_v2 = vld [vmem:[#allocation73_spill] sm:$0xff] }
 0x3e1   : > { %5887 = vrot.lane.b32.xlu0 %v5818_v18, %s8307_s13  ;;  %6717 = vrot.lane.b32.xlu2 %v8054_v12, %s8306_s19  ;;  %8065 = vrcp.f32 %v11613_v62  ;;  %v5047_v30 = vand.u32 2147483648, %v11571_v45  ;;  %vm5061_vm12 = vcmp.eq.f32.partialorder %v5060_v51, 8.507059e+37 }
 0x3e2   : > { %6715 = vrot.lane.b32.xlu1 %v8056_v43, %s8306_s19  ;;  %v12870_v43 = vld [vmem:[#allocation71_spill] sm:$0xff]  ;;  %8067 = vpow2.f32 %v7588_v4 }
 0x3e3   : > { %v11583_v48 = vpop.permute.xlu0 %6689  ;;  %v11588_v15 = vpop.permute.xlu2 %5735  ;;  %v5292_v61 = vmul.f32 %v12870_v43, %v5019_v29  ;;  %8069 = vpow2.f32 %v7589_v9 }
 0x3e4   : > { %v5570_v42 = vpop.permute.xlu1 %5569  ;;  %6814 = vst.msk [vmem:[#allocation3 + $0x48] sm:$0xff] %vm529_vm2, %v11588_v15  ;;  %v8060_v6 = vpop.eup %8059 }
 0x3e5   : > { %v11621_v35 = vpop.eup %8061  ;;  %v11645_v3 = vadd.f32 %v11528_v22, %v5292_v61  ;;  %v5643_v7 = vadd.f32 %v5570_v42, %v5291_v1 }
 0x3e6   : > { %v11624_v12 = vpop.eup %8063  ;;  %vm5057_vm6 = vweird.f32 %v11621_v35 }
 0x3e7   : > { %v5037_v16 = vmul.f32 %v11624_v12, %v11571_v45  ;;  %8071 = vtanh.f32 %v11645_v3  ;;  %v11659_v50 = vpop.eup %8065  ;;  %vm5042_vm7 = vweird.f32 %v11624_v12  ;;  %vm11694_vm9 = vmor %vm5056_vm8, %vm5057_vm6 }
 0x3e8   : > { %8073 = vtanh.f32 %v5643_v7  ;;  %v5067_v43 = vmul.f32 %v11659_v50, %v11613_v62  ;;  %vm5043_vm11 = vmor %vm5041_vm10, %vm5042_vm7  ;;  %vm5072_vm14 = vweird.f32 %v11659_v50 }
 0x3e9   : > { %6719 = vrot.lane.b32.xlu0 %v8060_v6, %s8306_s19  ;;  %5759 = vrot.lane.b32.xlu2 %v5642_v5, %s8307_s13  ;;  %v5659_v5 = vld [vmem:[%s12535_s4 + $0x30] sm:$0xff]  ;;  %v5038_v63 = vsub.f32 1.0, %v5037_v16  ;;  %v8068_v6 = vpop.eup %8067  ;;  %8075 = vpow2.f32 %v7590_v56  ;;  %vm5073_vm0 = vmor %vm5071_vm15, %vm5072_vm14 }
 0x3ea   : > { %5757 = vrot.lane.b32.xlu1 %v11544_v31, %s8307_s13  ;;  %v5030_v31 = vand.u32 2147483647, %v11512_v27  ;;  %v5052_v27 = vmul.f32 %v11621_v35, %v11573_v34  ;;  %v5819_v55 = vmul.f32 %v11487_v11, %v5659_v5  ;;  %v5661_v11 = vld [vmem:[%s12535_s4 + $0x40] sm:$0xff]  ;;  %v8070_v9 = vpop.eup %8069  ;;  %v11672_v1 = vadd.f32 1.0, %v8068_v6 }
 0x3eb   : > { %v5732_v18 = vpop.permute.xlu0 %5731  ;;  %v11629_v14 = vpop.permute.xlu2 %5577 }
 0x3ec   : > { %v11627_v8 = vpop.permute.xlu1 %6691  ;;  %6812 = vst.msk [vmem:[#allocation3 + $0x38] sm:$0xff] %vm529_vm2, %v5732_v18  ;;  %v5820_v52 = vmul.f32 %v5732_v18, %v5660_v0  ;;  %vm5031_vm5 = vcmp.eq.f32.partialorder %v5030_v31, 8.507059e+37  ;;  %v5053_v59 = vsub.f32 1.0, %v5052_v27  ;;  %v5039_v31 = vmul.f32 %v11624_v12, %v5038_v63 }
 0x3ed   : > { %v5034_v22 = vsel %vm5031_vm5, %v5033_v49, %v5029_v17  ;;  %v8072_v5 = vpop.eup %8071  ;;  %v11674_v0 = vadd.f32 1.0, %v8070_v9  ;;  %v5068_v17 = vsub.f32 1.0, %v5067_v43  ;;  %vm5086_vm7 = vweird.f32 %v11672_v1 }
 0x3ee   : > { %v5293_v19 = vmul.f32 %v12873_v2, %v5034_v22  ;;  %v5054_v18 = vmul.f32 %v11621_v35, %v5053_v59  ;;  %v8074_v25 = vpop.eup %8073  ;;  %v5040_v49 = vadd.f32 %v11624_v12, %v5039_v31  ;;  %v5045_v59 = vand.u32 2147483647, %v11571_v45  ;;  %v12876_v45 = vld [vmem:[#allocation50_spill] sm:$0xff] }
 0x3ef   : > { %v5069_v63 = vmul.f32 %v11659_v50, %v5068_v17  ;;  %v5048_v2 = vor.u32 1.1754944e-38, %v5047_v30  ;;  %v5663_v30 = vld [vmem:[%s12535_s4 + $0x50] sm:$0xff]  ;;  %vm5101_vm5 = vweird.f32 %v11674_v0 }
 0x3f0   : > { %v5055_v27 = vadd.f32 %v11621_v35, %v5054_v18  ;;  %v5044_v56 = vsel %vm5043_vm11, %v11624_v12, %v5040_v49  ;;  %vm5046_vm13 = vcmp.eq.f32.partialorder %v5045_v59, 8.507059e+37  ;;  %v12878_v49 = vld [vmem:[#allocation18_spill] sm:$0xff] }
 0x3f1   : > { %5761 = vrot.lane.b32.xlu0 %v5643_v7, %s8307_s13  ;;  %5891 = vrot.lane.b32.xlu2 %v5820_v52, %s8307_s13  ;;  %v5062_v7 = vand.u32 2147483648, %v11573_v34  ;;  %v8076_v34 = vpop.eup %8075  ;;  %v5070_v12 = vadd.f32 %v11659_v50, %v5069_v63 }
 0x3f2   : > { %5889 = vrot.lane.b32.xlu1 %v5819_v55, %s8307_s13 }
 0x3f3   : > { %v5574_v42 = vpop.permute.xlu0 %5573  ;;  %v11664_v4 = vpop.permute.xlu2 %6699  ;;  %v5063_v6 = vor.u32 1.1754944e-38, %v5062_v7  ;;  %v5074_v59 = vsel %vm5073_vm0, %v11659_v50, %v5070_v12 }
 0x3f4   : > { %v5734_v29 = vpop.permute.xlu1 %5733  ;;  %v5645_v46 = vadd.f32 %v5574_v42, %v5293_v19  ;;  %v5059_v42 = vsel %vm11694_vm9, %v11621_v35, %v5055_v27  ;;  %v11712_v19 = vadd.f32 1.0, %v8076_v34  ;;  %v5049_v35 = vsel %vm5046_vm13, %v5048_v2, %v5044_v56 }
 0x3f5   : > { %6813 = vst.msk [vmem:[#allocation3 + $0x40] sm:$0xff] %vm529_vm2, %v5734_v29  ;;  %v5821_v61 = vmul.f32 %v5734_v29, %v5661_v11  ;;  %v4532_v29 = vadd.f32 %v12876_v45, %v10593_v38  ;;  %v5064_v9 = vsel %vm5061_vm12, %v5063_v6, %v5059_v42  ;;  %v5294_v51 = vmul.f32 %v12878_v49, %v5049_v35 }
 0x3f6   : > { %8077 = vtanh.f32 %v5645_v46  ;;  %vm5116_vm12 = vweird.f32 %v11712_v19 }
 0x3f7   : > { %8079 = vrcp.f32 %v11674_v0 }
 0x3f8   : > { %8081 = vrcp.f32 %v11672_v1 }
 0x3f9   : > { %5893 = vrot.lane.b32.xlu0 %v5821_v61, %s8307_s13  ;;  %6723 = vrot.lane.b32.xlu2 %v8072_v5, %s8306_s19  ;;  %v5077_v61 = vand.u32 2147483648, %v11613_v62  ;;  %v7591_v5 = vmul.f32 -1.442695, %v4532_v29  ;;  %8083 = vrcp.f32 %v11712_v19 }
 0x3fa   : > { %6721 = vrot.lane.b32.xlu1 %v8074_v25, %s8306_s19  ;;  %v12877_v25 = vld [vmem:[#allocation75_spill] sm:$0xff] }
 0x3fb   : > { %v11684_v16 = vpop.permute.xlu0 %6695  ;;  %v11689_v52 = vpop.permute.xlu2 %5741  ;;  %v5295_v27 = vmul.f32 %v12877_v25, %v5064_v9  ;;  %v5078_v42 = vor.u32 1.1754944e-38, %v5077_v61  ;;  %8085 = vpow2.f32 %v7591_v5  ;;  %v12879_v9 = vld [vmem:[#allocation76_spill] sm:$0xff] }
 0x3fc   : > { %v5576_v55 = vpop.permute.xlu1 %5575  ;;  %6817 = vst.msk [vmem:[#allocation3 + $0x60] sm:$0xff] %vm529_vm2, %v11689_v52  ;;  %v8078_v11 = vpop.eup %8077 }
 0x3fd   : > { %v11720_v18 = vpop.eup %8079  ;;  %v11744_v22 = vadd.f32 %v11629_v14, %v5295_v27  ;;  %v5646_v34 = vadd.f32 %v5576_v55, %v5294_v51 }
 0x3fe   : > { %v11723_v31 = vpop.eup %8081  ;;  %vm5102_vm3 = vweird.f32 %v11720_v18 }
 0x3ff   : > { %v5082_v63 = vmul.f32 %v11723_v31, %v11672_v1  ;;  %8087 = vtanh.f32 %v11744_v22  ;;  %v11756_v50 = vpop.eup %8083  ;;  %vm5087_vm4 = vweird.f32 %v11723_v31  ;;  %vm5103_vm6 = vmor %vm5101_vm5, %vm5102_vm3 }
 0x400   : > { %8089 = vtanh.f32 %v5646_v34  ;;  %v5112_v5 = vmul.f32 %v11756_v50, %v11712_v19  ;;  %vm5088_vm8 = vmor %vm5086_vm7, %vm5087_vm4  ;;  %vm5117_vm11 = vweird.f32 %v11756_v50 }
 0x401   : > { %6725 = vrot.lane.b32.xlu0 %v8078_v11, %s8306_s19  ;;  %5765 = vrot.lane.b32.xlu2 %v5645_v46, %s8307_s13  ;;  %v5662_v46 = vld [vmem:[%s12535_s4 + $0x48] sm:$0xff]  ;;  %v5083_v45 = vsub.f32 1.0, %v5082_v63  ;;  %v8086_v12 = vpop.eup %8085  ;;  %v5092_v63 = vand.u32 2147483648, %v11672_v1  ;;  %vm5118_vm13 = vmor %vm5116_vm12, %vm5117_vm11 }
 0x402   : > { %5763 = vrot.lane.b32.xlu1 %v11645_v3, %s8307_s13  ;;  %v5075_v3 = vand.u32 2147483647, %v11613_v62  ;;  %v5097_v62 = vmul.f32 %v11720_v18, %v11674_v0  ;;  %v5822_v6 = vmul.f32 %v11588_v15, %v5662_v46  ;;  %v5664_v15 = vld [vmem:[%s12535_s4 + $0x58] sm:$0xff]  ;;  %v11769_v49 = vadd.f32 1.0, %v8086_v12 }
 0x403   : > { %v5738_v43 = vpop.permute.xlu0 %5737  ;;  %v11728_v7 = vpop.permute.xlu2 %5583  ;;  %v5084_v27 = vmul.f32 %v11723_v31, %v5083_v45 }
 0x404   : > { %v11726_v17 = vpop.permute.xlu1 %6697  ;;  %6815 = vst.msk [vmem:[#allocation3 + $0x50] sm:$0xff] %vm529_vm2, %v5738_v43  ;;  %v5823_v56 = vmul.f32 %v5738_v43, %v5663_v30  ;;  %vm5076_vm1 = vcmp.eq.f32.partialorder %v5075_v3, 8.507059e+37  ;;  %v5098_v14 = vsub.f32 1.0, %v5097_v62  ;;  %v5113_v30 = vsub.f32 1.0, %v5112_v5 }
 0x405   : > { %v5079_v11 = vsel %vm5076_vm1, %v5078_v42, %v5074_v59  ;;  %v8088_v3 = vpop.eup %8087  ;;  %v5107_v62 = vand.u32 2147483648, %v11674_v0  ;;  %v5085_v59 = vadd.f32 %v11723_v31, %v5084_v27  ;;  %v5105_v42 = vand.u32 2147483647, %v11674_v0 }
 0x406   : > { %v5296_v35 = vmul.f32 %v12879_v9, %v5079_v11  ;;  %v5099_v43 = vmul.f32 %v11720_v18, %v5098_v14  ;;  %v8090_v46 = vpop.eup %8089  ;;  %v5090_v11 = vand.u32 2147483647, %v11672_v1  ;;  %v5114_v0 = vmul.f32 %v11756_v50, %v5113_v30 }
 0x407   : > { %v5089_v45 = vsel %vm5088_vm8, %v11723_v31, %v5085_v59  ;;  %vm5106_vm9 = vcmp.eq.f32.partialorder %v5105_v42, 8.507059e+37  ;;  %v5122_v31 = vand.u32 2147483648, %v11712_v19  ;;  %v12882_v42 = vld [vmem:[#allocation48_spill] sm:$0xff]  ;;  %vm5131_vm0 = vweird.f32 %v11769_v49 }
 0x408   : > { %v5100_v51 = vadd.f32 %v11720_v18, %v5099_v43  ;;  %vm5091_vm10 = vcmp.eq.f32.partialorder %v5090_v11, 8.507059e+37  ;;  %v12880_v43 = vld [vmem:[#allocation19_spill] sm:$0xff] }
 0x409   : > { %5767 = vrot.lane.b32.xlu0 %v5646_v34, %s8307_s13  ;;  %5897 = vrot.lane.b32.xlu2 %v5823_v56, %s8307_s13  ;;  %v5123_v11 = vor.u32 1.1754944e-38, %v5122_v31 }
 0x40a   : > { %5895 = vrot.lane.b32.xlu1 %v5822_v6, %s8307_s13  ;;  %v5104_v14 = vsel %vm5103_vm6, %v11720_v18, %v5100_v51  ;;  %v5115_v18 = vadd.f32 %v11756_v50, %v5114_v0  ;;  %v5666_v51 = vld [vmem:[%s12535_s4 + $0x68] sm:$0xff] }
 0x40b   : > { %v5580_v55 = vpop.permute.xlu0 %5579  ;;  %v11761_v2 = vpop.permute.xlu2 %6705 }
 0x40c   : > { %v5740_v29 = vpop.permute.xlu1 %5739  ;;  %v5648_v61 = vadd.f32 %v5580_v55, %v5296_v35  ;;  %v5108_v55 = vor.u32 1.1754944e-38, %v5107_v62  ;;  %v5119_v62 = vsel %vm5118_vm13, %v11756_v50, %v5115_v18 }
 0x40d   : > { %6816 = vst.msk [vmem:[#allocation3 + $0x58] sm:$0xff] %vm529_vm2, %v5740_v29  ;;  %v5824_v25 = vmul.f32 %v5740_v29, %v5664_v15  ;;  %v5093_v29 = vor.u32 1.1754944e-38, %v5092_v63 }
 0x40e   : > { %8091 = vtanh.f32 %v5648_v61  ;;  %v5109_v9 = vsel %vm5106_vm9, %v5108_v55, %v5104_v14 }
 0x40f   : > { %8093 = vrcp.f32 %v11769_v49  ;;  %v5094_v1 = vsel %vm5091_vm10, %v5093_v29, %v5089_v45  ;;  %v5298_v5 = vmul.f32 %v12880_v43, %v5109_v9  ;;  %v5667_v45 = vld [vmem:[%s12535_s4 + $0x70] sm:$0xff]  ;;  %v12883_v29 = vld [vmem:[#allocation78_spill] sm:$0xff] }
 0x411   : > { %5899 = vrot.lane.b32.xlu0 %v5824_v25, %s8307_s13  ;;  %6729 = vrot.lane.b32.xlu2 %v8088_v3, %s8306_s19  ;;  %v12881_v3 = vld [vmem:[#allocation77_spill] sm:$0xff]  ;;  %v5650_v30 = vadd.f32 %v11728_v7, %v5298_v5 }
 0x412   : > { %6727 = vrot.lane.b32.xlu1 %v8090_v46, %s8306_s19  ;;  %v5297_v46 = vmul.f32 %v12881_v3, %v5094_v1  ;;  %v5137_v3 = vand.u32 2147483648, %v11769_v49 }
 0x413   : > { %v11779_v34 = vpop.permute.xlu0 %6701  ;;  %v11784_v56 = vpop.permute.xlu2 %5747  ;;  %8095 = vtanh.f32 %v5650_v30 }
 0x414   : > { %v5582_v6 = vpop.permute.xlu1 %5581  ;;  %6820 = vst.msk [vmem:[#allocation3 + $0x78] sm:$0xff] %vm529_vm2, %v11784_v56  ;;  %v8092_v15 = vpop.eup %8091 }
 0x415   : > { %v11801_v12 = vpop.eup %8093  ;;  %v5649_v59 = vadd.f32 %v5582_v6, %v5297_v46 }
 0x416   : > { %vm5132_vm15 = vweird.f32 %v11801_v12 }
 0x417   : > { %8097 = vtanh.f32 %v5649_v59  ;;  %vm5133_vm1 = vmor %vm5131_vm0, %vm5132_vm15 }
 0x419   : > { %6731 = vrot.lane.b32.xlu0 %v8092_v15, %s8306_s19  ;;  %5771 = vrot.lane.b32.xlu2 %v5648_v61, %s8307_s13  ;;  %v5665_v61 = vld [vmem:[%s12535_s4 + $0x60] sm:$0xff]  ;;  %v8096_v31 = vpop.eup %8095 }
 0x41a   : > { %5769 = vrot.lane.b32.xlu1 %v11744_v22, %s8307_s13  ;;  %v5120_v22 = vand.u32 2147483647, %v11712_v19  ;;  %v5127_v19 = vmul.f32 %v11801_v12, %v11769_v49  ;;  %v5825_v14 = vmul.f32 %v11689_v52, %v5665_v61 }
 0x41b   : > { %v5744_v35 = vpop.permute.xlu0 %5743  ;;  %v5880_v27 = vpop.permute.xlu2 %5879 }
 0x41c   : > { %v11804_v25 = vpop.permute.xlu1 %6703  ;;  %6818 = vst.msk [vmem:[#allocation3 + $0x68] sm:$0xff] %vm529_vm2, %v5744_v35  ;;  %v5974_v63 = vadd.f32 %v5880_v27, %v12882_v42  ;;  %v5826_v0 = vmul.f32 %v5744_v35, %v5666_v51  ;;  %vm5121_vm14 = vcmp.eq.f32.partialorder %v5120_v22, 8.507059e+37  ;;  %v5128_v6 = vsub.f32 1.0, %v5127_v19  ;;  %v12884_v51 = vld [vmem:[#allocation45_spill] sm:$0xff] }
 0x41d   : > { %v5124_v55 = vsel %vm5121_vm14, %v5123_v11, %v5119_v62  ;;  %v8098_v43 = vpop.eup %8097 }
 0x41e   : > { %v7593_v7 = vmul.f32 -1.442695, %v5974_v63  ;;  %v5299_v9 = vmul.f32 %v12883_v29, %v5124_v55  ;;  %v5129_v35 = vmul.f32 %v11801_v12, %v5128_v6 }
 0x420   : > { %8099 = vpow2.f32 %v7593_v7  ;;  %v5130_v27 = vadd.f32 %v11801_v12, %v5129_v35 }
 0x421   : > { %5773 = vrot.lane.b32.xlu0 %v5649_v59, %s8307_s13  ;;  %5903 = vrot.lane.b32.xlu2 %v5826_v0, %s8307_s13  ;;  %v5135_v59 = vand.u32 2147483647, %v11769_v49 }
 0x422   : > { %5901 = vrot.lane.b32.xlu1 %v5825_v14, %s8307_s13  ;;  %v5134_v63 = vsel %vm5133_vm1, %v11801_v12, %v5130_v27  ;;  %v5138_v14 = vor.u32 1.1754944e-38, %v5137_v3  ;;  %v5668_v12 = vld [vmem:[%s12535_s4 + $0x78] sm:$0xff] }
 0x423   : > { %v5586_v50 = vpop.permute.xlu0 %5585  ;;  %v11828_v52 = vpop.permute.xlu2 %6711  ;;  %vm5136_vm3 = vcmp.eq.f32.partialorder %v5135_v59, 8.507059e+37 }
 0x424   : > { %v5746_v15 = vpop.permute.xlu1 %5745  ;;  %v5651_v1 = vadd.f32 %v5586_v50, %v5299_v9  ;;  %v5139_v0 = vsel %vm5136_vm3, %v5138_v14, %v5134_v63  ;;  %v12885_v50 = vld [vmem:[#allocation21_spill] sm:$0xff]  ;;  %v5670_v14 = vld [vmem:[%s12535_s4 + $0x88] sm:$0xff] }
 0x425   : > { %6819 = vst.msk [vmem:[#allocation3 + $0x70] sm:$0xff] %vm529_vm2, %v5746_v15  ;;  %v5827_v18 = vmul.f32 %v5746_v15, %v5667_v45  ;;  %v5300_v6 = vmul.f32 %v12885_v50, %v5139_v0  ;;  %v12886_v45 = vld [vmem:[#allocation53_spill] sm:$0xff] }
 0x426   : > { %8101 = vtanh.f32 %v5651_v1  ;;  %v8100_v46 = vpop.eup %8099 }
 0x427   : > { %v11849_v19 = vadd.f32 1.0, %v8100_v46  ;;  %v12887_v46 = vld [vmem:[#allocation51_spill] sm:$0xff] }
 0x429   : > { %5905 = vrot.lane.b32.xlu0 %v5827_v18, %s8307_s13  ;;  %6735 = vrot.lane.b32.xlu2 %v8096_v31, %s8306_s19  ;;  %vm6153_vm6 = vweird.f32 %v11849_v19 }
 0x42a   : > { %6733 = vrot.lane.b32.xlu1 %v8098_v43, %s8306_s19 }
 0x42b   : > { %v11836_v5 = vpop.permute.xlu0 %6707  ;;  %v11840_v61 = vpop.permute.xlu2 %5753 }
 0x42c   : > { %v5878_v22 = vpop.permute.xlu1 %5877  ;;  %6823 = vst.msk [vmem:[#allocation3 + $0x90] sm:$0xff] %vm529_vm2, %v11840_v61  ;;  %v8102_v11 = vpop.eup %8101 }
 0x42d   : > { %v5973_v62 = vadd.f32 %v5878_v22, %v12884_v51 }
 0x42f   : > { %v7592_v42 = vmul.f32 -1.442695, %v5973_v62 }
 0x431   : > { %8103 = vpow2.f32 %v7592_v42  ;;  %6737 = vrot.lane.b32.xlu0 %v8102_v11, %s8306_s19  ;;  %5777 = vrot.lane.b32.xlu2 %v5651_v1, %s8307_s13  ;;  %v5828_v1 = vmul.f32 %v11784_v56, %v5668_v12 }
 0x432   : > { %5775 = vrot.lane.b32.xlu1 %v5650_v30, %s8307_s13  ;;  %8105 = vrcp.f32 %v11849_v19  ;;  %v5669_v30 = vld [vmem:[%s12535_s4 + $0x80] sm:$0xff] }
 0x433   : > { %v5750_v55 = vpop.permute.xlu0 %5749  ;;  %v5886_v7 = vpop.permute.xlu2 %5885 }
 0x434   : > { %v5588_v49 = vpop.permute.xlu1 %5587  ;;  %6821 = vst.msk [vmem:[#allocation3 + $0x80] sm:$0xff] %vm529_vm2, %v5750_v55  ;;  %v5977_v15 = vadd.f32 %v5886_v7, %v12886_v45  ;;  %v5829_v35 = vmul.f32 %v5750_v55, %v5669_v30 }
 0x435   : > { %v5652_v9 = vadd.f32 %v5588_v49, %v5300_v6  ;;  %v5671_v6 = vld [vmem:[%s12535_s4 + $0x90] sm:$0xff] }
 0x436   : > { %v7596_v31 = vmul.f32 -1.442695, %v5977_v15 }
 0x437   : > { %v8104_v29 = vpop.eup %8103 }
 0x438   : > { %v6101_v18 = vadd.f32 1.0, %v8104_v29  ;;  %v11866_v43 = vpop.eup %8105 }
 0x439   : > { %5779 = vrot.lane.b32.xlu0 %v5652_v9, %s8307_s13  ;;  %5909 = vrot.lane.b32.xlu2 %v5829_v35, %s8307_s13  ;;  %v6149_v51 = vmul.f32 %v11866_v43, %v11849_v19  ;;  %vm6154_vm7 = vweird.f32 %v11866_v43 }
 0x43a   : > { %8107 = vrcp.f32 %v6101_v18  ;;  %5907 = vrot.lane.b32.xlu1 %v5828_v1, %s8307_s13  ;;  %v6144_v50 = vand.u32 2147483648, %v6101_v18  ;;  %v6142_v30 = vand.u32 2147483647, %v6101_v18  ;;  %vm6138_vm5 = vweird.f32 %v6101_v18  ;;  %vm11901_vm9 = vmor %vm6153_vm6, %vm6154_vm7 }
 0x43b   : > { %8109 = vtanh.f32 %v5652_v9  ;;  %v5882_v27 = vpop.permute.xlu0 %5881  ;;  %v11872_v3 = vpop.permute.xlu2 %6717  ;;  %v6150_v63 = vsub.f32 1.0, %v6149_v51 }
 0x43c   : > { %v11870_v22 = vpop.permute.xlu1 %6709  ;;  %v5975_v56 = vadd.f32 %v5882_v27, %v12887_v46  ;;  %8111 = vpow2.f32 %v7596_v31  ;;  %v6157_v46 = vand.u32 2147483647, %v11849_v19  ;;  %v6145_v51 = vor.u32 1.1754944e-38, %v6144_v50 }
 0x43d   : > { %v6151_v29 = vmul.f32 %v11866_v43, %v6150_v63  ;;  %vm6143_vm10 = vcmp.eq.f32.partialorder %v6142_v30, 8.507059e+37 }
 0x43e   : > { %v7594_v62 = vmul.f32 -1.442695, %v5975_v56  ;;  %v5831_v56 = vmul.f32 %v11840_v61, %v5671_v6  ;;  %vm6158_vm11 = vcmp.eq.f32.partialorder %v6157_v46, 8.507059e+37 }
 0x43f   : > { %v6152_v27 = vadd.f32 %v11866_v43, %v6151_v29 }
 0x440   : > { %v8108_v59 = vpop.eup %8107  ;;  %8113 = vpow2.f32 %v7594_v62 }
 0x441   : > { %v8110_v42 = vpop.eup %8109  ;;  %v6134_v11 = vmul.f32 %v8108_v59, %v6101_v18  ;;  %vm6139_vm4 = vweird.f32 %v8108_v59  ;;  %v6159_v18 = vand.u32 2147483648, %v11849_v19  ;;  %v6156_v63 = vsel %vm11901_vm9, %v11866_v43, %v6152_v27 }
 0x442   : > { %6739 = vrot.lane.b32.xlu1 %v8110_v42, %s8306_s19  ;;  %v8112_v0 = vpop.eup %8111  ;;  %vm6140_vm8 = vmor %vm6138_vm5, %vm6139_vm4 }
 0x443   : > { %v6135_v55 = vsub.f32 1.0, %v6134_v11  ;;  %v11881_v49 = vpop.permute.xlu0 %6713  ;;  %v11883_v12 = vpop.permute.xlu2 %5759  ;;  %v11890_v1 = vadd.f32 1.0, %v8112_v0 }
 0x444   : > { %v5752_v7 = vpop.permute.xlu1 %5751  ;;  %6826 = vst.msk [vmem:[#allocation3 + $0xa8] sm:$0xff] %vm529_vm2, %v11883_v12 }
 0x445   : > { %v5830_v45 = vmul.f32 %v5752_v7, %v5670_v14  ;;  %6822 = vst.msk [vmem:[#allocation3 + $0x88] sm:$0xff] %vm529_vm2, %v5752_v7  ;;  %v6136_v15 = vmul.f32 %v8108_v59, %v6135_v55  ;;  %v6160_v14 = vor.u32 1.1754944e-38, %v6159_v18  ;;  %vm6198_vm1 = vweird.f32 %v11890_v1 }
 0x446   : > { %v8114_v9 = vpop.eup %8113 }
 0x447   : > { %v6103_v35 = vadd.f32 1.0, %v8114_v9  ;;  %5911 = vrot.lane.b32.xlu0 %v5830_v45, %s8307_s13  ;;  %v6137_v31 = vadd.f32 %v8108_v59, %v6136_v15  ;;  %v6161_v19 = vsel %vm6158_vm11, %v6160_v14, %v6156_v63 }
 0x448   : > { %v6774_v43 = vmul.f32 %v11423_v40, %v6161_v19 }
 0x449   : > { %8115 = vrcp.f32 %v6103_v35  ;;  %v6141_v42 = vsel %vm6140_vm8, %v8108_v59, %v6137_v31  ;;  %v12890_v59 = vld [vmem:[#allocation52_spill] sm:$0xff]  ;;  %v6174_v27 = vand.u32 2147483648, %v6103_v35  ;;  %v6172_v62 = vand.u32 2147483647, %v6103_v35 }
 0x44a   : > { %5913 = vrot.lane.b32.xlu1 %v5831_v56, %s8307_s13  ;;  %v6146_v11 = vsel %vm6143_vm10, %v6145_v51, %v6141_v42  ;;  %8117 = vrcp.f32 %v11890_v1  ;;  %vm6168_vm13 = vweird.f32 %v6103_v35 }
 0x44b   : > { %v5756_v61 = vpop.permute.xlu0 %5755  ;;  %v6773_v0 = vmul.f32 %v11359_v13, %v6146_v11  ;;  %v11912_v7 = vpop.permute.xlu2 %5891  ;;  %v5672_v13 = vld [vmem:[%s12535_s4 + $0x98] sm:$0xff]  ;;  %v6175_v63 = vor.u32 1.1754944e-38, %v6174_v27  ;;  %vm6173_vm15 = vcmp.eq.f32.partialorder %v6172_v62, 8.507059e+37 }
 0x44c   : > { %v5884_v55 = vpop.permute.xlu1 %5883  ;;  %6824 = vst.msk [vmem:[#allocation3 + $0x98] sm:$0xff] %vm529_vm2, %v5756_v61  ;;  %v5832_v9 = vmul.f32 %v5756_v61, %v5672_v13 }
 0x44d   : > { %v5976_v50 = vadd.f32 %v5884_v55, %v12890_v59  ;;  %6869 = vrot.lane.b32.xlu2 %v6773_v0, %s8305_s18  ;;  %v5673_v55 = vld [vmem:[%s12535_s4 + $0xa0] sm:$0xff] }
 0x44f   : > { %v8116_v6 = vpop.eup %8115  ;;  %v7595_v45 = vmul.f32 -1.442695, %v5976_v50  ;;  %6871 = vrot.lane.b32.xlu0 %v6774_v43, %s8305_s18 }
 0x450   : > { %v6164_v15 = vmul.f32 %v8116_v6, %v6103_v35  ;;  %v8118_v30 = vpop.eup %8117  ;;  %vm6169_vm12 = vweird.f32 %v8116_v6 }
 0x451   : > { %8119 = vpow2.f32 %v7595_v45  ;;  %v6194_v46 = vmul.f32 %v8118_v30, %v11890_v1  ;;  %vm6170_vm14 = vmor %vm6168_vm13, %vm6169_vm12  ;;  %vm6199_vm0 = vweird.f32 %v8118_v30 }
 0x452   : > { %v6165_v29 = vsub.f32 1.0, %v6164_v15  ;;  %v6204_v15 = vand.u32 2147483648, %v11890_v1  ;;  %vm6200_vm3 = vmor %vm6198_vm1, %vm6199_vm0 }
 0x453   : > { %v5888_v31 = vpop.permute.xlu0 %5887  ;;  %v11925_v40 = vpop.permute.xlu2 %6723  ;;  %v6195_v11 = vsub.f32 1.0, %v6194_v46 }
 0x454   : > { %v11923_v56 = vpop.permute.xlu1 %6715  ;;  %12891 = vst [vmem:[#allocation28_spill] sm:$0xff] %v11925_v40  ;;  %v6166_v51 = vmul.f32 %v8116_v6, %v6165_v29  ;;  %v6205_v27 = vor.u32 1.1754944e-38, %v6204_v15 }
 0x455   : > { %5915 = vrot.lane.b32.xlu2 %v5832_v9, %s8307_s13  ;;  %v6196_v35 = vmul.f32 %v8118_v30, %v6195_v11 }
 0x456   : > { %v6167_v18 = vadd.f32 %v8116_v6, %v6166_v51 }
 0x457   : > { %v8120_v42 = vpop.eup %8119  ;;  %v6197_v13 = vadd.f32 %v8118_v30, %v6196_v35 }
 0x458   : > { %v6104_v14 = vadd.f32 1.0, %v8120_v42  ;;  %v6171_v61 = vsel %vm6170_vm14, %v8116_v6, %v6167_v18  ;;  %v6202_v6 = vand.u32 2147483647, %v11890_v1 }
 0x459   : > { %v6176_v0 = vsel %vm6173_vm15, %v6175_v63, %v6171_v61  ;;  %v6201_v9 = vsel %vm6200_vm3, %v8118_v30, %v6197_v13 }
 0x45a   : > { %8121 = vrcp.f32 %v6104_v14  ;;  %v6775_v19 = vmul.f32 %v11334_v44, %v6176_v0  ;;  %v5674_v44 = vld [vmem:[%s12535_s4 + $0xa8] sm:$0xff]  ;;  %vm6203_vm4 = vcmp.eq.f32.partialorder %v6202_v6, 8.507059e+37  ;;  %v6189_v1 = vand.u32 2147483648, %v6104_v14 }
 0x45b   : > { %v11932_v59 = vpop.permute.xlu0 %6719  ;;  %v5766_v43 = vpop.permute.xlu2 %5765  ;;  %v5834_v51 = vmul.f32 %v11883_v12, %v5674_v44  ;;  %v6206_v62 = vsel %vm6203_vm4, %v6205_v27, %v6201_v9  ;;  %v6187_v30 = vand.u32 2147483647, %v6104_v14  ;;  %v5677_v12 = vld [vmem:[%s12535_s4 + $0xc0] sm:$0xff]  ;;  %vm6183_vm6 = vweird.f32 %v6104_v14  ;;  %v12894_v27 = vld [vmem:[#allocation62_spill] sm:$0xff] }
 0x45c   : > { %v5758_v50 = vpop.permute.xlu1 %5757  ;;  %6873 = vrot.lane.b32.xlu1 %v6775_v19, %s8305_s18  ;;  %6829 = vst.msk [vmem:[#allocation3 + $0xc0] sm:$0xff] %vm529_vm2, %v5766_v43  ;;  %v6777_v61 = vmul.f32 %v11526_v57, %v6206_v62  ;;  %v6190_v35 = vor.u32 1.1754944e-38, %v6189_v1  ;;  %v5837_v15 = vmul.f32 %v5766_v43, %v5677_v12  ;;  %v12895_v12 = vld [vmem:[#allocation60_spill] sm:$0xff] }
 0x45d   : > { %v5833_v45 = vmul.f32 %v5758_v50, %v5673_v55  ;;  %6825 = vst.msk [vmem:[#allocation3 + $0xa0] sm:$0xff] %vm529_vm2, %v5758_v50  ;;  %v12892_v55 = vld [vmem:[#allocation54_spill] sm:$0xff]  ;;  %vm6188_vm8 = vcmp.eq.f32.partialorder %v6187_v30, 8.507059e+37 }
 0x45e   : > { %v5978_v19 = vadd.f32 %v5888_v31, %v12892_v55 }
 0x45f   : > { %5917 = vrot.lane.b32.xlu0 %v5833_v45, %s8307_s13 }
 0x460   : > { %v8122_v29 = vpop.eup %8121  ;;  %v7597_v6 = vmul.f32 -1.442695, %v5978_v19 }
 0x461   : > { %v6179_v46 = vmul.f32 %v8122_v29, %v6104_v14  ;;  %vm6184_vm5 = vweird.f32 %v8122_v29  ;;  %v5675_v14 = vld [vmem:[%s12535_s4 + $0xb0] sm:$0xff] }
 0x462   : > { %vm6185_vm7 = vmor %vm6183_vm6, %vm6184_vm5  ;;  %8123 = vpow2.f32 %v7597_v6 }
 0x463   : > { %v6180_v18 = vsub.f32 1.0, %v6179_v46  ;;  %v5762_v42 = vpop.permute.xlu0 %5761  ;;  %v5898_v11 = vpop.permute.xlu2 %5897 }
 0x464   : > { %v5890_v63 = vpop.permute.xlu1 %5889  ;;  %6827 = vst.msk [vmem:[#allocation3 + $0xb0] sm:$0xff] %vm529_vm2, %v5762_v42  ;;  %5919 = vrot.lane.b32.xlu1 %v5834_v51, %s8307_s13  ;;  %v5835_v51 = vmul.f32 %v5762_v42, %v5675_v14  ;;  %v5678_v42 = vld [vmem:[%s12535_s4 + $0xc8] sm:$0xff] }
 0x465   : > { %v6181_v0 = vmul.f32 %v8122_v29, %v6180_v18 }
 0x467   : > { %6877 = vrot.lane.b32.xlu0 %v6777_v61, %s8305_s18  ;;  %v6182_v50 = vadd.f32 %v8122_v29, %v6181_v0 }
 0x468   : > { %v8124_v18 = vpop.eup %8123 }
 0x469   : > { %v6186_v45 = vsel %vm6185_vm7, %v8122_v29, %v6182_v50  ;;  %v5680_v29 = vld [vmem:[%s12535_s4 + $0xd8] sm:$0xff]  ;;  %v11975_v55 = vadd.f32 1.0, %v8124_v18  ;;  %v5980_v50 = vadd.f32 %v11912_v7, %v12895_v12  ;;  %v12899_v18 = vld [vmem:[#allocation69_spill] sm:$0xff] }
 0x46a   : > { %v6191_v57 = vsel %vm6188_vm8, %v6190_v35, %v6186_v45  ;;  %v12896_v35 = vld [vmem:[#allocation66_spill] sm:$0xff] }
 0x46b   : > { %v5894_v13 = vpop.permute.xlu0 %5893  ;;  %v6776_v44 = vmul.f32 %v11482_v54, %v6191_v57  ;;  %v11956_v31 = vpop.permute.xlu2 %6729  ;;  %v5676_v54 = vld [vmem:[%s12535_s4 + $0xb8] sm:$0xff]  ;;  %v5983_v45 = vadd.f32 %v5898_v11, %v12896_v35  ;;  %vm6213_vm10 = vweird.f32 %v11975_v55 }
 0x46c   : > { %v11954_v9 = vpop.permute.xlu1 %6721  ;;  %12893 = vst [vmem:[#allocation26_spill] sm:$0xff] %v11956_v31  ;;  %v5981_v46 = vadd.f32 %v5894_v13, %v12894_v27  ;;  %5925 = vrot.lane.b32.xlu1 %v5837_v15, %s8307_s13  ;;  %v7599_v27 = vmul.f32 -1.442695, %v5980_v50  ;;  %v12900_v50 = vld [vmem:[#allocation65_spill] sm:$0xff] }
 0x46d   : > { %6875 = vrot.lane.b32.xlu2 %v6776_v44, %s8305_s18 }
 0x46e   : > { %v7600_v43 = vmul.f32 -1.442695, %v5981_v46  ;;  %v7602_v46 = vmul.f32 -1.442695, %v5983_v45  ;;  %v5679_v45 = vld [vmem:[%s12535_s4 + $0xd0] sm:$0xff] }
 0x470   : > { %8125 = vpow2.f32 %v7600_v43  ;;  %v12897_v43 = vld [vmem:[#allocation57_spill] sm:$0xff] }
 0x471   : > { %8127 = vrcp.f32 %v11975_v55 }
 0x473   : > { %v11970_v62 = vpop.permute.xlu0 %6725  ;;  %v5772_v61 = vpop.permute.xlu2 %5771 }
 0x474   : > { %v5764_v1 = vpop.permute.xlu1 %5763  ;;  %v5840_v30 = vmul.f32 %v5772_v61, %v5680_v29  ;;  %6832 = vst.msk [vmem:[#allocation3 + $0xd8] sm:$0xff] %vm529_vm2, %v5772_v61 }
 0x475   : > { %v5836_v0 = vmul.f32 %v5764_v1, %v5676_v54  ;;  %6828 = vst.msk [vmem:[#allocation3 + $0xb8] sm:$0xff] %vm529_vm2, %v5764_v1  ;;  %5921 = vrot.lane.b32.xlu2 %v5835_v51, %s8307_s13  ;;  %v5979_v54 = vadd.f32 %v5890_v63, %v12897_v43 }
 0x476   : > { %5931 = vrot.lane.b32.xlu1 %v5840_v30, %s8307_s13  ;;  %v8126_v19 = vpop.eup %8125 }
 0x477   : > { %5923 = vrot.lane.b32.xlu0 %v5836_v0, %s8307_s13  ;;  %v11987_v44 = vadd.f32 1.0, %v8126_v19  ;;  %v8128_v14 = vpop.eup %8127  ;;  %v7598_v61 = vmul.f32 -1.442695, %v5979_v54 }
 0x478   : > { %v6209_v11 = vmul.f32 %v8128_v14, %v11975_v55  ;;  %vm6214_vm9 = vweird.f32 %v8128_v14 }
 0x479   : > { %8129 = vrcp.f32 %v11987_v44  ;;  %vm6215_vm11 = vmor %vm6213_vm10, %vm6214_vm9  ;;  %vm6258_vm14 = vweird.f32 %v11987_v44 }
 0x47a   : > { %8131 = vpow2.f32 %v7599_v27  ;;  %v6210_v19 = vsub.f32 1.0, %v6209_v11  ;;  %v12901_v27 = vld [vmem:[#allocation74_spill] sm:$0xff] }
 0x47b   : > { %v5768_v6 = vpop.permute.xlu0 %5767  ;;  %v5904_v57 = vpop.permute.xlu2 %5903  ;;  %8133 = vpow2.f32 %v7602_v46 }
 0x47c   : > { %v5896_v15 = vpop.permute.xlu1 %5895  ;;  %v5838_v13 = vmul.f32 %v5768_v6, %v5678_v42  ;;  %6830 = vst.msk [vmem:[#allocation3 + $0xc8] sm:$0xff] %vm529_vm2, %v5768_v6  ;;  %v5683_v6 = vld [vmem:[%s12535_s4 + $0xf0] sm:$0xff]  ;;  %v5986_v46 = vadd.f32 %v5904_v57, %v12901_v27 }
 0x47d   : > { %v5982_v35 = vadd.f32 %v5896_v15, %v12900_v50  ;;  %v6217_v15 = vand.u32 2147483647, %v11975_v55 }
 0x47e   : > { %5927 = vrot.lane.b32.xlu2 %v5838_v13, %s8307_s13 }
 0x47f   : > { %v11998_v30 = vpop.eup %8129  ;;  %vm6218_vm12 = vcmp.eq.f32.partialorder %v6217_v15, 8.507059e+37 }
 0x480   : > { %v8132_v42 = vpop.eup %8131  ;;  %v6254_v12 = vmul.f32 %v11998_v30, %v11987_v44  ;;  %vm6259_vm13 = vweird.f32 %v11998_v30 }
 0x481   : > { %v8134_v63 = vpop.eup %8133  ;;  %v12009_v13 = vadd.f32 1.0, %v8132_v42  ;;  %vm6260_vm15 = vmor %vm6258_vm14, %vm6259_vm13 }
 0x482   : > { %v12014_v54 = vadd.f32 1.0, %v8134_v63  ;;  %v6255_v50 = vsub.f32 1.0, %v6254_v12 }
 0x483   : > { %v5900_v7 = vpop.permute.xlu0 %5899  ;;  %v11995_v51 = vpop.permute.xlu2 %6735  ;;  %vm6243_vm7 = vweird.f32 %v12009_v13 }
 0x484   : > { %v11993_v29 = vpop.permute.xlu1 %6727  ;;  %12898 = vst [vmem:[#allocation32_spill] sm:$0xff] %v11995_v51  ;;  %v5984_v1 = vadd.f32 %v5900_v7, %v12899_v18  ;;  %v6211_v18 = vmul.f32 %v8128_v14, %v6210_v19  ;;  %v7601_v51 = vmul.f32 -1.442695, %v5982_v35  ;;  %v7605_v19 = vmul.f32 -1.442695, %v5986_v46 }
 0x485   : > { %v6256_v46 = vmul.f32 %v11998_v30, %v6255_v50 }
 0x486   : > { %v7603_v0 = vmul.f32 -1.442695, %v5984_v1  ;;  %v6212_v57 = vadd.f32 %v8128_v14, %v6211_v18 }
 0x488   : > { %8135 = vpow2.f32 %v7603_v0  ;;  %v6219_v0 = vand.u32 2147483648, %v11975_v55  ;;  %v6216_v12 = vsel %vm6215_vm11, %v8128_v14, %v6212_v57  ;;  %v5681_v55 = vld [vmem:[%s12535_s4 + $0xe0] sm:$0xff]  ;;  %v6262_v57 = vand.u32 2147483647, %v11987_v44 }
 0x489   : > { %8137 = vpow2.f32 %v7598_v61  ;;  %vm6288_vm11 = vweird.f32 %v12014_v54 }
 0x48a   : > { %8139 = vrcp.f32 %v12009_v13  ;;  %vm6263_vm0 = vcmp.eq.f32.partialorder %v6262_v57, 8.507059e+37 }
 0x48b   : > { %v12012_v43 = vpop.permute.xlu0 %6731  ;;  %v5778_v11 = vpop.permute.xlu2 %5777  ;;  %8141 = vrcp.f32 %v12014_v54 }
 0x48c   : > { %v5770_v7 = vpop.permute.xlu1 %5769  ;;  %v5843_v61 = vmul.f32 %v5778_v11, %v5683_v6  ;;  %6835 = vst.msk [vmem:[#allocation3 + $0xf0] sm:$0xff] %vm529_vm2, %v5778_v11 }
 0x48d   : > { %v5839_v1 = vmul.f32 %v5770_v7, %v5679_v45  ;;  %6831 = vst.msk [vmem:[#allocation3 + $0xd0] sm:$0xff] %vm529_vm2, %v5770_v7  ;;  %v6220_v45 = vor.u32 1.1754944e-38, %v6219_v0 }
 0x48e   : > { %v8136_v42 = vpop.eup %8135  ;;  %5937 = vrot.lane.b32.xlu1 %v5843_v61, %s8307_s13  ;;  %v6264_v61 = vand.u32 2147483648, %v11987_v44 }
 0x48f   : > { %v8138_v63 = vpop.eup %8137  ;;  %v12022_v27 = vadd.f32 1.0, %v8136_v42  ;;  %5929 = vrot.lane.b32.xlu0 %v5839_v1, %s8307_s13  ;;  %v6221_v35 = vsel %vm6218_vm12, %v6220_v45, %v6216_v12  ;;  %v6257_v1 = vadd.f32 %v11998_v30, %v6256_v46 }
 0x490   : > { %v12032_v6 = vadd.f32 1.0, %v8138_v63  ;;  %v6778_v15 = vmul.f32 %v11462_v23, %v6221_v35  ;;  %v12040_v0 = vpop.eup %8139  ;;  %v6265_v44 = vor.u32 1.1754944e-38, %v6264_v61 }
 0x491   : > { %8143 = vrcp.f32 %v12022_v27  ;;  %v12046_v63 = vpop.eup %8141  ;;  %v6309_v61 = vand.u32 2147483648, %v12022_v27  ;;  %v6307_v57 = vand.u32 2147483647, %v12022_v27  ;;  %vm6303_vm3 = vweird.f32 %v12022_v27 }
 0x492   : > { %8145 = vpow2.f32 %v7601_v51  ;;  %v12902_v51 = vld [vmem:[#allocation72_spill] sm:$0xff]  ;;  %vm6244_vm6 = vweird.f32 %v12040_v0  ;;  %vm6289_vm10 = vweird.f32 %v12046_v63  ;;  %vm6228_vm13 = vweird.f32 %v12032_v6 }
 0x493   : > { %8147 = vpow2.f32 %v7605_v19  ;;  %v5774_v7 = vpop.permute.xlu0 %5773  ;;  %v5910_v18 = vpop.permute.xlu2 %5909  ;;  %vm6308_vm5 = vcmp.eq.f32.partialorder %v6307_v57, 8.507059e+37  ;;  %v6249_v57 = vand.u32 2147483648, %v12009_v13  ;;  %vm12098_vm8 = vmor %vm6243_vm7, %vm6244_vm6 }
 0x494   : > { %v5902_v11 = vpop.permute.xlu1 %5901  ;;  %v5841_v14 = vmul.f32 %v5774_v7, %v5681_v55  ;;  %6833 = vst.msk [vmem:[#allocation3 + $0xe0] sm:$0xff] %vm529_vm2, %v5774_v7  ;;  %v5989_v50 = vadd.f32 %v5910_v18, %v12727_v26  ;;  %8149 = vrcp.f32 %v12032_v6  ;;  %v6261_v26 = vsel %vm6260_vm15, %v11998_v30, %v6257_v1  ;;  %vm12141_vm12 = vmor %vm6288_vm11, %vm6289_vm10 }
 0x495   : > { %v5985_v42 = vadd.f32 %v5902_v11, %v12902_v51  ;;  %v6266_v7 = vsel %vm6263_vm0, %v6265_v44, %v6261_v26  ;;  %v6239_v11 = vmul.f32 %v12040_v0, %v12009_v13 }
 0x496   : > { %5933 = vrot.lane.b32.xlu2 %v5841_v14, %s8307_s13  ;;  %v7608_v45 = vmul.f32 -1.442695, %v5989_v50  ;;  %6879 = vrot.lane.b32.xlu1 %v6778_v15, %s8305_s18  ;;  %v6781_v50 = vmul.f32 %v11563_v20, %v6266_v7 }
 0x497   : > { %v8144_v23 = vpop.eup %8143  ;;  %v7604_v19 = vmul.f32 -1.442695, %v5985_v42 }
 0x498   : > { %v8146_v12 = vpop.eup %8145  ;;  %v6299_v55 = vmul.f32 %v8144_v23, %v12022_v27  ;;  %vm6304_vm1 = vweird.f32 %v8144_v23 }
 0x499   : > { %v8148_v35 = vpop.eup %8147  ;;  %8151 = vpow2.f32 %v7604_v19  ;;  %v12057_v18 = vadd.f32 1.0, %v8146_v12  ;;  %v6284_v19 = vmul.f32 %v12046_v63, %v12014_v54  ;;  %vm6305_vm4 = vmor %vm6303_vm3, %vm6304_vm1 }
 0x49a   : > { %v6300_v46 = vsub.f32 1.0, %v6299_v55  ;;  %8153 = vpow2.f32 %v7608_v45  ;;  %v12059_v51 = vpop.eup %8149  ;;  %v12065_v42 = vadd.f32 1.0, %v8148_v35  ;;  %v6240_v55 = vsub.f32 1.0, %v6239_v11  ;;  %v5682_v11 = vld [vmem:[%s12535_s4 + $0xe8] sm:$0xff] }
 0x49b   : > { %v5906_v14 = vpop.permute.xlu0 %5905  ;;  %8155 = vrcp.f32 %v12057_v18  ;;  %v6285_v27 = vsub.f32 1.0, %v6284_v19  ;;  %vm6229_vm14 = vweird.f32 %v12059_v51  ;;  %vm6273_vm11 = vweird.f32 %v12057_v18 }
 0x49c   : > { %v12061_v15 = vpop.permute.xlu1 %6733  ;;  %v5987_v30 = vadd.f32 %v5906_v14, %v9767_v10  ;;  %v6301_v1 = vmul.f32 %v8144_v23, %v6300_v46  ;;  %v6224_v10 = vmul.f32 %v12059_v51, %v12032_v6  ;;  %v6310_v46 = vor.u32 1.1754944e-38, %v6309_v61  ;;  %vm12153_vm15 = vmor %vm6228_vm13, %vm6229_vm14 }
 0x49d   : > { %12903 = vst [vmem:[#allocation23_spill] sm:$0xff] %v12061_v15 }
 0x49e   : > { %v7606_v45 = vmul.f32 -1.442695, %v5987_v30  ;;  %v6302_v26 = vadd.f32 %v8144_v23, %v6301_v1  ;;  %6885 = vrot.lane.b32.xlu1 %v6781_v50, %s8305_s18  ;;  %v6241_v1 = vmul.f32 %v12040_v0, %v6240_v55  ;;  %v6247_v50 = vand.u32 2147483647, %v12009_v13 }
 0x49f   : > { %v8152_v12 = vpop.eup %8151  ;;  %v6250_v13 = vor.u32 1.1754944e-38, %v6249_v57 }
 0x4a0   : > { %v8154_v20 = vpop.eup %8153  ;;  %v12076_v44 = vadd.f32 1.0, %v8152_v12  ;;  %8157 = vpow2.f32 %v7606_v45  ;;  %v6306_v35 = vsel %vm6305_vm4, %v8144_v23, %v6302_v26  ;;  %v6225_v23 = vsub.f32 1.0, %v6224_v10 }
 0x4a1   : > { %8159 = vrcp.f32 %v12065_v42  ;;  %v12079_v7 = vadd.f32 1.0, %v8154_v20  ;;  %v6311_v14 = vsel %vm6308_vm5, %v6310_v46, %v6306_v35  ;;  %v12092_v19 = vpop.eup %8155  ;;  %v6242_v12 = vadd.f32 %v12040_v0, %v6241_v1 }
 0x4a2   : > { %8161 = vrcp.f32 %v12076_v44  ;;  %v6784_v26 = vmul.f32 %v11664_v4, %v6311_v14  ;;  %v6286_v20 = vmul.f32 %v12046_v63, %v6285_v27  ;;  %vm6248_vm9 = vcmp.eq.f32.partialorder %v6247_v50, 8.507059e+37 }
 0x4a3   : > { %v12085_v30 = vpop.permute.xlu0 %6737  ;;  %8163 = vrcp.f32 %v12079_v7  ;;  %v6246_v4 = vsel %vm12098_vm8, %v12040_v0, %v6242_v12  ;;  %v6226_v1 = vmul.f32 %v12059_v51, %v6225_v23  ;;  %v5684_v0 = vld [vmem:[%s12535_s4 + $0xf8] sm:$0xff]  ;;  %v6292_v23 = vand.u32 2147483647, %v12014_v54 }
 0x4a4   : > { %12904 = vst [vmem:[#allocation36_spill] sm:$0xff] %v12085_v30  ;;  %v5776_v61 = vpop.permute.xlu1 %5775  ;;  %v6287_v27 = vadd.f32 %v12046_v63, %v6286_v20  ;;  %v6251_v57 = vsel %vm6248_vm9, %v6250_v13, %v6246_v4  ;;  %v6232_v4 = vand.u32 2147483647, %v12032_v6  ;;  %v6234_v30 = vand.u32 2147483648, %v12032_v6 }
 0x4a5   : > { %v5842_v45 = vmul.f32 %v5776_v61, %v5682_v11  ;;  %6834 = vst.msk [vmem:[#allocation3 + $0xe8] sm:$0xff] %vm529_vm2, %v5776_v61  ;;  %v12123_v61 = vmul.f32 %v12092_v19, %v12057_v18  ;;  %v6227_v12 = vadd.f32 %v12059_v51, %v6226_v1  ;;  %vm6293_vm0 = vcmp.eq.f32.partialorder %v6292_v23, 8.507059e+37 }
 0x4a6   : > { %v8158_v55 = vpop.eup %8157  ;;  %6891 = vrot.lane.b32.xlu1 %v6784_v26, %s8305_s18  ;;  %v6291_v1 = vsel %vm12141_vm12, %v12046_v63, %v6287_v27  ;;  %v6235_v63 = vor.u32 1.1754944e-38, %v6234_v30  ;;  %vm6233_vm1 = vcmp.eq.f32.partialorder %v6232_v4, 8.507059e+37  ;;  %vm6333_vm5 = vweird.f32 %v12065_v42 }
 0x4a7   : > { %v12103_v35 = vpop.eup %8159  ;;  %v12105_v46 = vadd.f32 1.0, %v8158_v55  ;;  %5935 = vrot.lane.b32.xlu0 %v5842_v45, %s8307_s13  ;;  %v12108_v11 = vpop.permute.xlu2 %6869  ;;  %v6294_v45 = vand.u32 2147483648, %v12014_v54  ;;  %v6780_v54 = vmul.f32 %v11627_v8, %v6251_v57  ;;  %v6231_v8 = vsel %vm12153_vm15, %v12059_v51, %v6227_v12 }
 0x4a8   : > { %12907 = vst [vmem:[#allocation25_spill] sm:$0xff] %v12108_v11  ;;  %v12114_v14 = vpop.eup %8161  ;;  %v6329_v26 = vmul.f32 %v12103_v35, %v12065_v42  ;;  %v6270_v31 = vsub.f32 1.0, %v12123_v61  ;;  %vm6334_vm7 = vweird.f32 %v12103_v35  ;;  %vm6274_vm12 = vweird.f32 %v12092_v19 }
 0x4a9   : > { %6965 = vst.msk [vmem:[#allocation2 + $0x19] sm:$0xff] %vm529_vm2, %v12108_v11  ;;  %8165 = vrcp.f32 %v12105_v46  ;;  %v12130_v50 = vpop.eup %8163  ;;  %v12139_v55 = vmul.f32 %v12114_v14, %v12076_v44  ;;  %v6295_v15 = vor.u32 1.1754944e-38, %v6294_v45  ;;  %v6236_v45 = vsel %vm6233_vm1, %v6235_v63, %v6231_v8  ;;  %vm12199_vm9 = vmor %vm6333_vm5, %vm6334_vm7 }
 0x4aa   : > { %v12160_v21 = vmul.f32 %v12130_v50, %v12079_v7  ;;  %v6330_v20 = vsub.f32 1.0, %v6329_v26  ;;  %vm6348_vm3 = vweird.f32 %v12105_v46  ;;  %v6352_v26 = vand.u32 2147483647, %v12105_v46  ;;  %vm6275_vm14 = vmor %vm6273_vm11, %vm6274_vm12 }
 0x4ab   : > { %v5780_v10 = vpop.permute.xlu0 %5779  ;;  %v6315_v51 = vsub.f32 1.0, %v12139_v55  ;;  %v6271_v8 = vmul.f32 %v12092_v19, %v6270_v31  ;;  %vm6378_vm15 = vweird.f32 %v12079_v7  ;;  %vm6319_vm5 = vweird.f32 %v12114_v14 }
 0x4ac   : > { %v5908_v13 = vpop.permute.xlu1 %5907  ;;  %v5844_v11 = vmul.f32 %v5780_v10, %v5684_v0  ;;  %6836 = vst.msk [vmem:[#allocation3 + $0xf8] sm:$0xff] %vm529_vm2, %v5780_v10  ;;  %v6296_v10 = vsel %vm6293_vm0, %v6295_v15, %v6291_v1  ;;  %v6779_v15 = vmul.f32 %v11583_v48, %v6236_v45  ;;  %vm12182_vm6 = vcmp.eq.f32.partialorder %v6352_v26, 8.507059e+37 }
 0x4ad   : > { %v5988_v0 = vadd.f32 %v5908_v13, %v9792_v24  ;;  %v6783_v12 = vmul.f32 %v11726_v17, %v6296_v10  ;;  %v6337_v17 = vand.u32 2147483647, %v12065_v42  ;;  %vm6379_vm0 = vweird.f32 %v12130_v50 }
 0x4ae   : > { %5939 = vrot.lane.b32.xlu2 %v5844_v11, %s8307_s13  ;;  %v6375_v11 = vsub.f32 1.0, %v12160_v21  ;;  %v6331_v21 = vmul.f32 %v12103_v35, %v6330_v20  ;;  %vm12251_vm1 = vmor %vm6378_vm15, %vm6379_vm0 }
 0x4af   : > { %v8166_v27 = vpop.eup %8165  ;;  %v7607_v57 = vmul.f32 -1.442695, %v5988_v0  ;;  %6883 = vrot.lane.b32.xlu0 %v6780_v54, %s8305_s18  ;;  %v5916_v6 = vpop.permute.xlu2 %5915  ;;  %v6339_v0 = vand.u32 2147483648, %v12065_v42  ;;  %vm12203_vm10 = vcmp.eq.f32.partialorder %v6337_v17, 8.507059e+37 }
 0x4b0   : > { %v6344_v40 = vmul.f32 %v8166_v27, %v12105_v46  ;;  %v5992_v24 = vadd.f32 %v5916_v6, %v12821_v32  ;;  %vm6349_vm4 = vweird.f32 %v8166_v27  ;;  %v6354_v32 = vand.u32 2147483648, %v12105_v46 }
 0x4b1   : > { %8167 = vpow2.f32 %v7607_v57  ;;  %vm12191_vm8 = vmor %vm6348_vm3, %vm6349_vm4  ;;  %v6332_v1 = vadd.f32 %v12103_v35, %v6331_v21  ;;  %v6277_v46 = vand.u32 2147483647, %v12057_v18  ;;  %v6316_v57 = vmul.f32 %v12114_v14, %v6315_v51 }
 0x4b2   : > { %v6345_v30 = vsub.f32 1.0, %v6344_v40  ;;  %v7611_v23 = vmul.f32 -1.442695, %v5992_v24  ;;  %v6355_v48 = vor.u32 1.1754944e-38, %v6354_v32  ;;  %v6340_v24 = vor.u32 1.1754944e-38, %v6339_v0 }
 0x4b3   : > { %v6336_v20 = vsel %vm12199_vm9, %v12103_v35, %v6332_v1  ;;  %vm12220_vm13 = vcmp.eq.f32.partialorder %v6277_v46, 8.507059e+37  ;;  %vm6318_vm4 = vweird.f32 %v12076_v44  ;;  %v6322_v46 = vand.u32 2147483647, %v12076_v44 }
 0x4b4   : > { %8169 = vpow2.f32 %v7611_v23  ;;  %v12178_v61 = vpop.permute.xlu1 %6739  ;;  %v6346_v4 = vmul.f32 %v8166_v27, %v6345_v30  ;;  %v6272_v30 = vadd.f32 %v12092_v19, %v6271_v8  ;;  %v6341_v32 = vsel %vm12203_vm10, %v6340_v24, %v6336_v20 }
 0x4b5   : > { %v6786_v21 = vmul.f32 %v11804_v25, %v6341_v32  ;;  %v6317_v51 = vadd.f32 %v12114_v14, %v6316_v57  ;;  %v6324_v20 = vand.u32 2147483648, %v12076_v44  ;;  %vm6323_vm7 = vcmp.eq.f32.partialorder %v6322_v46, 8.507059e+37 }
 0x4b6   : > { %6881 = vrot.lane.b32.xlu2 %v6779_v15, %s8305_s18  ;;  %v6347_v13 = vadd.f32 %v8166_v27, %v6346_v4  ;;  %v6276_v40 = vsel %vm6275_vm14, %v12092_v19, %v6272_v30  ;;  %v6382_v19 = vand.u32 2147483647, %v12079_v7 }
 0x4b7   : > { %v8168_v63 = vpop.eup %8167  ;;  %6889 = vrot.lane.b32.xlu0 %v6783_v12, %s8305_s18  ;;  %v6279_v12 = vand.u32 2147483648, %v12057_v18  ;;  %v12923_v18 = vld [vmem:[#allocation80_spill] sm:$0xff]  ;;  %v6325_v30 = vor.u32 1.1754944e-38, %v6324_v20 }
 0x4b8   : > { %v12210_v42 = vadd.f32 1.0, %v8168_v63  ;;  %v6351_v10 = vsel %vm12191_vm8, %v8166_v27, %v6347_v13  ;;  %v12922_v27 = vld [vmem:[#allocation79_spill] sm:$0xff]  ;;  %vm6383_vm3 = vcmp.eq.f32.partialorder %v6382_v19, 8.507059e+37 }
 0x4b9   : > { %v5912_v45 = vpop.permute.xlu0 %5911  ;;  %v6356_v31 = vsel %vm12182_vm6, %v6355_v48, %v6351_v10  ;;  %v6280_v48 = vor.u32 1.1754944e-38, %v6279_v12  ;;  %vm6320_vm6 = vmor %vm6318_vm4, %vm6319_vm5 }
 0x4ba   : > { %v8170_v15 = vpop.eup %8169  ;;  %8171 = vrcp.f32 %v12210_v42  ;;  %v5990_v26 = vadd.f32 %v5912_v45, %v12922_v27  ;;  %v6787_v35 = vmul.f32 %v11761_v2, %v6356_v31  ;;  %v6376_v2 = vmul.f32 %v12130_v50, %v6375_v11 }
 0x4bb   : > { %v12234_v4 = vadd.f32 1.0, %v8170_v15  ;;  %v6281_v25 = vsel %vm12220_vm13, %v6280_v48, %v6276_v40  ;;  %v6384_v11 = vand.u32 2147483648, %v12079_v7  ;;  %v6321_v31 = vsel %vm6320_vm6, %v12114_v14, %v6317_v51 }
 0x4bc   : > { %v7609_v17 = vmul.f32 -1.442695, %v5990_v26  ;;  %v5914_v13 = vpop.permute.xlu1 %5913  ;;  %6897 = vrot.lane.b32.xlu1 %v6787_v35, %s8305_s18  ;;  %v6782_v1 = vmul.f32 %v11684_v16, %v6281_v25  ;;  %v6377_v0 = vadd.f32 %v12130_v50, %v6376_v2  ;;  %v6326_v26 = vsel %vm6323_vm7, %v6325_v30, %v6321_v31 }
 0x4bd   : > { %8173 = vrcp.f32 %v12234_v4  ;;  %v5991_v54 = vadd.f32 %v5914_v13, %v12923_v18  ;;  %v6385_v7 = vor.u32 1.1754944e-38, %v6384_v11  ;;  %v6785_v35 = vmul.f32 %v11779_v34, %v6326_v26 }
 0x4be   : > { %8175 = vpow2.f32 %v7609_v17  ;;  %6887 = vrot.lane.b32.xlu2 %v6782_v1, %s8305_s18  ;;  %v6381_v16 = vsel %vm12251_vm1, %v12130_v50, %v6377_v0  ;;  %vm6363_vm8 = vweird.f32 %v12210_v42  ;;  %v6367_v40 = vand.u32 2147483647, %v12210_v42 }
 0x4bf   : > { %v7610_v8 = vmul.f32 -1.442695, %v5991_v54  ;;  %6895 = vrot.lane.b32.xlu0 %v6786_v21, %s8305_s18  ;;  %v6386_v24 = vsel %vm6383_vm3, %v6385_v7, %v6381_v16  ;;  %v6369_v48 = vand.u32 2147483648, %v12210_v42  ;;  %vm6423_vm10 = vweird.f32 %v12234_v4 }
 0x4c0   : > { %v8172_v6 = vpop.eup %8171  ;;  %v6789_v27 = vmul.f32 %v11870_v22, %v6386_v24  ;;  %vm6368_vm12 = vcmp.eq.f32.partialorder %v6367_v40, 8.507059e+37  ;;  %v6427_v2 = vand.u32 2147483647, %v12234_v4  ;;  %v6429_v54 = vand.u32 2147483648, %v12234_v4 }
 0x4c1   : > { %v6359_v10 = vmul.f32 %v8172_v6, %v12210_v42  ;;  %8177 = vpow2.f32 %v7610_v8  ;;  %v12266_v55 = vpop.permute.xlu0 %6871  ;;  %vm6364_vm9 = vweird.f32 %v8172_v6  ;;  %v6370_v13 = vor.u32 1.1754944e-38, %v6369_v48 }
 0x4c2   : > { %6966 = vst.msk [vmem:[#allocation2 + $0x21] sm:$0xff] %vm529_vm2, %v12266_v55  ;;  %vm6365_vm11 = vmor %vm6363_vm8, %vm6364_vm9  ;;  %v6430_v1 = vor.u32 1.1754944e-38, %v6429_v54  ;;  %vm6428_vm15 = vcmp.eq.f32.partialorder %v6427_v2, 8.507059e+37 }
 0x4c3   : > { %v8174_v50 = vpop.eup %8173  ;;  %v6360_v45 = vsub.f32 1.0, %v6359_v10 }
 0x4c4   : > { %v8176_v23 = vpop.eup %8175  ;;  %v6419_v12 = vmul.f32 %v8174_v50, %v12234_v4  ;;  %vm6424_vm13 = vweird.f32 %v8174_v50 }
 0x4c5   : > { %v12274_v15 = vadd.f32 1.0, %v8176_v23  ;;  %v6361_v32 = vmul.f32 %v8172_v6, %v6360_v45  ;;  %vm6425_vm14 = vmor %vm6423_vm10, %vm6424_vm13 }
 0x4c6   : > { %v6420_v44 = vsub.f32 1.0, %v6419_v12  ;;  %6893 = vrot.lane.b32.xlu2 %v6785_v35, %s8305_s18 }
 0x4c7   : > { %v8178_v21 = vpop.eup %8177  ;;  %8179 = vrcp.f32 %v12274_v15  ;;  %6901 = vrot.lane.b32.xlu0 %v6789_v27, %s8305_s18  ;;  %v12281_v14 = vpop.permute.xlu2 %6875  ;;  %v6362_v34 = vadd.f32 %v8172_v6, %v6361_v32  ;;  %vm6393_vm1 = vweird.f32 %v12274_v15 }
 0x4c8   : > { %v12285_v22 = vadd.f32 1.0, %v8178_v21  ;;  %6968 = vst.msk [vmem:[#allocation2 + $0x39] sm:$0xff] %vm529_vm2, %v12281_v14  ;;  %v6421_v17 = vmul.f32 %v8174_v50, %v6420_v44 }
 0x4c9   : > { %v6366_v42 = vsel %vm6365_vm11, %v8172_v6, %v6362_v34 }
 0x4ca   : > { %8181 = vrcp.f32 %v12285_v22  ;;  %v6422_v18 = vadd.f32 %v8174_v50, %v6421_v17  ;;  %v6371_v25 = vsel %vm6368_vm12, %v6370_v13, %v6366_v42  ;;  %v6414_v30 = vand.u32 2147483648, %v12285_v22 }
 0x4cb   : > { %v6788_v63 = vmul.f32 %v11836_v5, %v6371_v25  ;;  %v6399_v5 = vand.u32 2147483648, %v12274_v15  ;;  %v6412_v27 = vand.u32 2147483647, %v12285_v22  ;;  %vm6408_vm6 = vweird.f32 %v12285_v22 }
 0x4cc   : > { %v6426_v19 = vsel %vm6425_vm14, %v8174_v50, %v6422_v18  ;;  %v6415_v40 = vor.u32 1.1754944e-38, %v6414_v30 }
 0x4cd   : > { %v8180_v0 = vpop.eup %8179  ;;  %v6431_v57 = vsel %vm6428_vm15, %v6430_v1, %v6426_v19  ;;  %v6400_v23 = vor.u32 1.1754944e-38, %v6399_v5  ;;  %vm6413_vm8 = vcmp.eq.f32.partialorder %v6412_v27, 8.507059e+37 }
 0x4ce   : > { %v6389_v11 = vmul.f32 %v8180_v0, %v12274_v15  ;;  %v12295_v8 = vpop.permute.xlu1 %6873  ;;  %v6792_v16 = vmul.f32 %v11923_v56, %v6431_v57  ;;  %6899 = vrot.lane.b32.xlu2 %v6788_v63, %s8305_s18  ;;  %vm6394_vm0 = vweird.f32 %v8180_v0  ;;  %v6397_v56 = vand.u32 2147483647, %v12274_v15 }
 0x4cf   : > { %6967 = vst.msk [vmem:[#allocation2 + $0x31] sm:$0xff] %vm529_vm2, %v12295_v8  ;;  %v5922_v6 = vpop.permute.xlu2 %5921  ;;  %vm6395_vm3 = vmor %vm6393_vm1, %vm6394_vm0 }
 0x4d0   : > { %v8182_v4 = vpop.eup %8181  ;;  %v6390_v7 = vsub.f32 1.0, %v6389_v11  ;;  %v5995_v46 = vadd.f32 %v5922_v6, %v10117_v60  ;;  %6907 = vrot.lane.b32.xlu0 %v6792_v16, %s8305_s18  ;;  %vm6398_vm5 = vcmp.eq.f32.partialorder %v6397_v56, 8.507059e+37 }
 0x4d1   : > { %v6404_v10 = vmul.f32 %v8182_v4, %v12285_v22  ;;  %v5918_v51 = vpop.permute.xlu0 %5917  ;;  %vm6409_vm4 = vweird.f32 %v8182_v4 }
 0x4d2   : > { %v7614_v20 = vmul.f32 -1.442695, %v5995_v46  ;;  %v5993_v24 = vadd.f32 %v5918_v51, %v12830_v39  ;;  %v6391_v50 = vmul.f32 %v8180_v0, %v6390_v7  ;;  %vm6410_vm7 = vmor %vm6408_vm6, %vm6409_vm4 }
 0x4d3   : > { %v6405_v45 = vsub.f32 1.0, %v6404_v10 }
 0x4d4   : > { %8183 = vpow2.f32 %v7614_v20  ;;  %v7612_v60 = vmul.f32 -1.442695, %v5993_v24  ;;  %v6392_v31 = vadd.f32 %v8180_v0, %v6391_v50 }
 0x4d5   : > { %v6406_v12 = vmul.f32 %v8182_v4, %v6405_v45 }
 0x4d6   : > { %8185 = vpow2.f32 %v7612_v60  ;;  %v5920_v26 = vpop.permute.xlu1 %5919  ;;  %v6396_v39 = vsel %vm6395_vm3, %v8180_v0, %v6392_v31 }
 0x4d7   : > { %v5994_v44 = vadd.f32 %v5920_v26, %v10054_v37  ;;  %v6401_v35 = vsel %vm6398_vm5, %v6400_v23, %v6396_v39  ;;  %v6407_v32 = vadd.f32 %v8182_v4, %v6406_v12 }
 0x4d8   : > { %v5928_v15 = vpop.permute.xlu2 %5927  ;;  %v6790_v21 = vmul.f32 %v11828_v52, %v6401_v35 }
 0x4d9   : > { %v7613_v48 = vmul.f32 -1.442695, %v5994_v44  ;;  %v5998_v34 = vadd.f32 %v5928_v15, %v10284_v36  ;;  %v12315_v17 = vpop.permute.xlu0 %6877  ;;  %v6411_v13 = vsel %vm6410_vm7, %v8182_v4, %v6407_v32 }
 0x4da   : > { %v8184_v2 = vpop.eup %8183  ;;  %6969 = vst.msk [vmem:[#allocation2 + $0x49] sm:$0xff] %vm529_vm2, %v12315_v17  ;;  %6903 = vrot.lane.b32.xlu1 %v6790_v21, %s8305_s18  ;;  %v6416_v37 = vsel %vm6413_vm8, %v6415_v40, %v6411_v13 }
 0x4db   : > { %v6123_v22 = vadd.f32 1.0, %v8184_v2  ;;  %8187 = vpow2.f32 %v7613_v48  ;;  %v7617_v42 = vmul.f32 -1.442695, %v5998_v34  ;;  %v6791_v52 = vmul.f32 %v11881_v49, %v6416_v37 }
 0x4dc   : > { %v8186_v18 = vpop.eup %8185 }
 0x4dd   : > { %8189 = vrcp.f32 %v6123_v22  ;;  %v6121_v54 = vadd.f32 1.0, %v8186_v18  ;;  %6905 = vrot.lane.b32.xlu2 %v6791_v52, %s8305_s18  ;;  %v6472_v49 = vand.u32 2147483647, %v6123_v22  ;;  %v6474_v4 = vand.u32 2147483648, %v6123_v22 }
 0x4de   : > { %8191 = vpow2.f32 %v7617_v42  ;;  %v5926_v36 = vpop.permute.xlu1 %5925  ;;  %vm6468_vm9 = vweird.f32 %v6123_v22 }
 0x4df   : > { %8193 = vrcp.f32 %v6121_v54  ;;  %v5997_v25 = vadd.f32 %v5926_v36, %v10221_v33  ;;  %v6442_v33 = vand.u32 2147483647, %v6121_v54  ;;  %vm12329_vm11 = vcmp.eq.f32.partialorder %v6472_v49, 8.507059e+37 }
 0x4e0   : > { %v6475_v56 = vor.u32 1.1754944e-38, %v6474_v4  ;;  %vm6438_vm12 = vweird.f32 %v6121_v54  ;;  %v6444_v45 = vand.u32 2147483648, %v6121_v54 }
 0x4e1   : > { %v8188_v19 = vpop.eup %8187  ;;  %v7616_v1 = vmul.f32 -1.442695, %v5997_v25  ;;  %vm12340_vm15 = vcmp.eq.f32.partialorder %v6442_v33, 8.507059e+37 }
 0x4e2   : > { %v12323_v0 = vadd.f32 1.0, %v8188_v19  ;;  %v6445_v2 = vor.u32 1.1754944e-38, %v6444_v45 }
 0x4e3   : > { %v8190_v11 = vpop.eup %8189  ;;  %8195 = vpow2.f32 %v7616_v1 }
 0x4e4   : > { %v8192_v63 = vpop.eup %8191  ;;  %v6464_v57 = vmul.f32 %v8190_v11, %v6123_v22  ;;  %8197 = vrcp.f32 %v12323_v0  ;;  %vm6469_vm10 = vweird.f32 %v8190_v11  ;;  %v6457_v44 = vand.u32 2147483647, %v12323_v0 }
 0x4e5   : > { %v8194_v6 = vpop.eup %8193  ;;  %v12326_v16 = vadd.f32 1.0, %v8192_v63  ;;  %vm6470_vm14 = vmor %vm6468_vm9, %vm6469_vm10  ;;  %v6459_v48 = vand.u32 2147483648, %v12323_v0  ;;  %vm6453_vm3 = vweird.f32 %v12323_v0 }
 0x4e6   : > { %v6465_v7 = vsub.f32 1.0, %v6464_v57  ;;  %v6434_v46 = vmul.f32 %v8194_v6, %v6121_v54  ;;  %vm6439_vm13 = vweird.f32 %v8194_v6  ;;  %vm6458_vm7 = vcmp.eq.f32.partialorder %v6457_v44, 8.507059e+37 }
 0x4e7   : > { %8199 = vrcp.f32 %v12326_v16  ;;  %vm6440_vm0 = vmor %vm6438_vm12, %vm6439_vm13  ;;  %v6517_v36 = vand.u32 2147483647, %v12326_v16  ;;  %v6519_v25 = vand.u32 2147483648, %v12326_v16  ;;  %vm6513_vm5 = vweird.f32 %v12326_v16 }
 0x4e8   : > { %v6435_v10 = vsub.f32 1.0, %v6434_v46  ;;  %v6466_v51 = vmul.f32 %v8190_v11, %v6465_v7  ;;  %v5932_v24 = vpop.permute.xlu1 %5931 }
 0x4e9   : > { %v8196_v20 = vpop.eup %8195  ;;  %v5924_v50 = vpop.permute.xlu0 %5923  ;;  %v6000_v30 = vadd.f32 %v5932_v24, %v12792_v53  ;;  %vm6518_vm8 = vcmp.eq.f32.partialorder %v6517_v36, 8.507059e+37  ;;  %v6520_v7 = vor.u32 1.1754944e-38, %v6519_v25 }
 0x4ea   : > { %v8198_v60 = vpop.eup %8197  ;;  %v12333_v31 = vadd.f32 1.0, %v8196_v20  ;;  %v5996_v23 = vadd.f32 %v5924_v50, %v10165_v58  ;;  %v6467_v12 = vadd.f32 %v8190_v11, %v6466_v51  ;;  %v6436_v26 = vmul.f32 %v8194_v6, %v6435_v10 }
 0x4eb   : > { %v6449_v27 = vmul.f32 %v8198_v60, %v12323_v0  ;;  %v7619_v35 = vmul.f32 -1.442695, %v6000_v30  ;;  %vm6454_vm1 = vweird.f32 %v8198_v60 }
 0x4ec   : > { %8201 = vrcp.f32 %v12333_v31  ;;  %v7615_v32 = vmul.f32 -1.442695, %v5996_v23  ;;  %v6471_v53 = vsel %vm6470_vm14, %v8190_v11, %v6467_v12  ;;  %v6437_v40 = vadd.f32 %v8194_v6, %v6436_v26  ;;  %vm6455_vm4 = vmor %vm6453_vm3, %vm6454_vm1 }
 0x4ed   : > { %v8200_v15 = vpop.eup %8199  ;;  %v6450_v58 = vsub.f32 1.0, %v6449_v27  ;;  %v6476_v21 = vsel %vm12329_vm11, %v6475_v56, %v6471_v53  ;;  %8203 = vpow2.f32 %v7619_v35  ;;  %v6460_v11 = vor.u32 1.1754944e-38, %v6459_v48 }
 0x4ee   : > { %v6509_v34 = vmul.f32 %v8200_v15, %v12326_v16  ;;  %v6795_v13 = vmul.f32 %v11954_v9, %v6476_v21  ;;  %8205 = vpow2.f32 %v7615_v32  ;;  %v6441_v37 = vsel %vm6440_vm0, %v8194_v6, %v6437_v40 }
 0x4ef   : > { %v6451_v22 = vmul.f32 %v8198_v60, %v6450_v58  ;;  %v6446_v18 = vsel %vm12340_vm15, %v6445_v2, %v6441_v37  ;;  %vm6514_vm6 = vweird.f32 %v8200_v15  ;;  %v6502_v20 = vand.u32 2147483647, %v12333_v31 }
 0x4f0   : > { %v6510_v42 = vsub.f32 1.0, %v6509_v34  ;;  %6913 = vrot.lane.b32.xlu0 %v6795_v13, %s8305_s18  ;;  %v5934_v52 = vpop.permute.xlu2 %5933  ;;  %v6793_v54 = vmul.f32 %v11872_v3, %v6446_v18  ;;  %vm6515_vm9 = vmor %vm6513_vm5, %vm6514_vm6  ;;  %v6504_v24 = vand.u32 2147483648, %v12333_v31  ;;  %vm6498_vm11 = vweird.f32 %v12333_v31 }
 0x4f1   : > { %v6001_v9 = vadd.f32 %v5934_v52, %v12798_v28  ;;  %v6452_v19 = vadd.f32 %v8198_v60, %v6451_v22  ;;  %vm6503_vm13 = vcmp.eq.f32.partialorder %v6502_v20, 8.507059e+37  ;;  %v12931_v20 = vld [vmem:[#allocation23_spill] sm:$0xff] }
 0x4f2   : > { %v8202_v1 = vpop.eup %8201  ;;  %v6511_v63 = vmul.f32 %v8200_v15, %v6510_v42  ;;  %6909 = vrot.lane.b32.xlu1 %v6793_v54, %s8305_s18  ;;  %v6505_v16 = vor.u32 1.1754944e-38, %v6504_v24 }
 0x4f3   : > { %v6494_v57 = vmul.f32 %v8202_v1, %v12333_v31  ;;  %v7620_v49 = vmul.f32 -1.442695, %v6001_v9  ;;  %v6456_v6 = vsel %vm6455_vm4, %v8198_v60, %v6452_v19  ;;  %v8204_v28 = vpop.eup %8203  ;;  %vm6499_vm10 = vweird.f32 %v8202_v1 }
 0x4f4   : > { %v6461_v4 = vsel %vm6458_vm7, %v6460_v11, %v6456_v6  ;;  %v6512_v3 = vadd.f32 %v8200_v15, %v6511_v63  ;;  %v8206_v0 = vpop.eup %8205  ;;  %v6128_v33 = vadd.f32 1.0, %v8204_v28  ;;  %vm6500_vm12 = vmor %vm6498_vm11, %vm6499_vm10  ;;  %v12930_v28 = vld [vmem:[#allocation28_spill] sm:$0xff] }
 0x4f5   : > { %v6495_v46 = vsub.f32 1.0, %v6494_v57  ;;  %8207 = vpow2.f32 %v7620_v49  ;;  %v6794_v10 = vmul.f32 %v11932_v59, %v6461_v4  ;;  %v6124_v51 = vadd.f32 1.0, %v8206_v0 }
 0x4f6   : > { %v6516_v5 = vsel %vm6515_vm9, %v8200_v15, %v6512_v3  ;;  %8209 = vrcp.f32 %v6128_v33  ;;  %v6547_v15 = vand.u32 2147483647, %v6128_v33  ;;  %v6549_v58 = vand.u32 2147483648, %v6128_v33 }
 0x4f7   : > { %6911 = vrot.lane.b32.xlu2 %v6794_v10, %s8305_s18  ;;  %v6521_v50 = vsel %vm6518_vm8, %v6520_v7, %v6516_v5  ;;  %v6496_v56 = vmul.f32 %v8202_v1, %v6495_v46  ;;  %8211 = vrcp.f32 %v6124_v51  ;;  %v6487_v21 = vand.u32 2147483647, %v6124_v51 }
 0x4f8   : > { %v6798_v45 = vmul.f32 %v11993_v29, %v6521_v50  ;;  %v6489_v34 = vand.u32 2147483648, %v6124_v51  ;;  %vm6543_vm15 = vweird.f32 %v6128_v33  ;;  %vm6483_vm1 = vweird.f32 %v6124_v51 }
 0x4f9   : > { %v6497_v59 = vadd.f32 %v8202_v1, %v6496_v56  ;;  %vm6548_vm4 = vcmp.eq.f32.partialorder %v6547_v15, 8.507059e+37  ;;  %v6550_v18 = vor.u32 1.1754944e-38, %v6549_v58  ;;  %vm6488_vm6 = vcmp.eq.f32.partialorder %v6487_v21, 8.507059e+37 }
 0x4fa   : > { %6919 = vrot.lane.b32.xlu0 %v6798_v45, %s8305_s18 }
 0x4fb   : > { %v8208_v60 = vpop.eup %8207  ;;  %v6501_v30 = vsel %vm6500_vm12, %v8202_v1, %v6497_v59 }
 0x4fc   : > { %v12374_v23 = vadd.f32 1.0, %v8208_v60  ;;  %v6506_v12 = vsel %vm6503_vm13, %v6505_v16, %v6501_v30  ;;  %v8210_v27 = vpop.eup %8209 }
 0x4fd   : > { %v6797_v26 = vmul.f32 %v11970_v62, %v6506_v12  ;;  %v8212_v39 = vpop.eup %8211  ;;  %v6539_v44 = vmul.f32 %v8210_v27, %v6128_v33  ;;  %vm6544_vm14 = vweird.f32 %v8210_v27 }
 0x4fe   : > { %8213 = vrcp.f32 %v12374_v23  ;;  %v6479_v29 = vmul.f32 %v8212_v39, %v6124_v51  ;;  %vm6484_vm0 = vweird.f32 %v8212_v39  ;;  %vm6545_vm3 = vmor %vm6543_vm15, %vm6544_vm14  ;;  %v6562_v63 = vand.u32 2147483647, %v12374_v23 }
 0x4ff   : > { %6917 = vrot.lane.b32.xlu2 %v6797_v26, %s8305_s18  ;;  %v6540_v31 = vsub.f32 1.0, %v6539_v44  ;;  %vm6485_vm5 = vmor %vm6483_vm1, %vm6484_vm0  ;;  %v6564_v57 = vand.u32 2147483648, %v12374_v23  ;;  %vm6558_vm8 = vweird.f32 %v12374_v23 }
 0x500   : > { %v6480_v35 = vsub.f32 1.0, %v6479_v29  ;;  %v5938_v32 = vpop.permute.xlu1 %5937  ;;  %vm6563_vm10 = vcmp.eq.f32.partialorder %v6562_v63, 8.507059e+37 }
 0x501   : > { %v5930_v53 = vpop.permute.xlu0 %5929  ;;  %v6003_v40 = vadd.f32 %v5938_v32, %v12808_v47  ;;  %v6541_v62 = vmul.f32 %v8210_v27, %v6540_v31  ;;  %v6565_v46 = vor.u32 1.1754944e-38, %v6564_v57 }
 0x502   : > { %v5999_v48 = vadd.f32 %v5930_v53, %v10329_v41  ;;  %v6481_v13 = vmul.f32 %v8212_v39, %v6480_v35  ;;  %v6490_v41 = vor.u32 1.1754944e-38, %v6489_v34  ;;  %v12932_v35 = vld [vmem:[#allocation22_spill] sm:$0xff] }
 0x503   : > { %v7622_v37 = vmul.f32 -1.442695, %v6003_v40  ;;  %v6542_v42 = vadd.f32 %v8210_v27, %v6541_v62 }
 0x504   : > { %v8214_v2 = vpop.eup %8213  ;;  %v7618_v22 = vmul.f32 -1.442695, %v5999_v48  ;;  %v6482_v36 = vadd.f32 %v8212_v39, %v6481_v13 }
 0x505   : > { %v6554_v52 = vmul.f32 %v8214_v2, %v12374_v23  ;;  %8215 = vpow2.f32 %v7622_v37  ;;  %v6546_v47 = vsel %vm6545_vm3, %v8210_v27, %v6542_v42  ;;  %vm6559_vm7 = vweird.f32 %v8214_v2 }
 0x506   : > { %8217 = vpow2.f32 %v7618_v22  ;;  %v6551_v9 = vsel %vm6548_vm4, %v6550_v18, %v6546_v47  ;;  %v6486_v54 = vsel %vm6485_vm5, %v8212_v39, %v6482_v36  ;;  %vm6560_vm9 = vmor %vm6558_vm8, %vm6559_vm7  ;;  %v12933_v36 = vld [vmem:[#allocation36_spill] sm:$0xff] }
 0x507   : > { %v6555_v25 = vsub.f32 1.0, %v6554_v52  ;;  %v6800_v1 = vmul.f32 %v12012_v43, %v6551_v9  ;;  %v6491_v11 = vsel %vm6488_vm6, %v6490_v41, %v6486_v54  ;;  %v12934_v54 = vld [vmem:[#allocation26_spill] sm:$0xff] }
 0x508   : > { %v5940_v19 = vpop.permute.xlu2 %5939  ;;  %v12386_v49 = vpop.permute.xlu1 %6879  ;;  %v6796_v4 = vmul.f32 %v12930_v28, %v6491_v11 }
 0x509   : > { %v6004_v6 = vadd.f32 %v5940_v19, %v10593_v38  ;;  %v6556_v3 = vmul.f32 %v8214_v2, %v6555_v25  ;;  %6970 = vst.msk [vmem:[#allocation2 + $0x51] sm:$0xff] %vm529_vm2, %v12386_v49  ;;  %6923 = vrot.lane.b32.xlu2 %v6800_v1, %s8305_s18 }
 0x50a   : > { %6915 = vrot.lane.b32.xlu1 %v6796_v4, %s8305_s18 }
 0x50b   : > { %v7623_v7 = vmul.f32 -1.442695, %v6004_v6  ;;  %v6557_v43 = vadd.f32 %v8214_v2, %v6556_v3  ;;  %v8216_v0 = vpop.eup %8215 }
 0x50c   : > { %v8218_v33 = vpop.eup %8217  ;;  %v6131_v38 = vadd.f32 1.0, %v8216_v0 }
 0x50d   : > { %8219 = vpow2.f32 %v7623_v7  ;;  %v6561_v10 = vsel %vm6560_vm9, %v8214_v2, %v6557_v43  ;;  %v6127_v51 = vadd.f32 1.0, %v8218_v33 }
 0x50e   : > { %v6566_v5 = vsel %vm6563_vm10, %v6565_v46, %v6561_v10  ;;  %8221 = vrcp.f32 %v6131_v38  ;;  %v6592_v44 = vand.u32 2147483647, %v6131_v38  ;;  %v6594_v29 = vand.u32 2147483648, %v6131_v38 }
 0x50f   : > { %v6801_v24 = vmul.f32 %v12931_v20, %v6566_v5  ;;  %8223 = vrcp.f32 %v6127_v51  ;;  %v6534_v15 = vand.u32 2147483648, %v6127_v51  ;;  %v6532_v21 = vand.u32 2147483647, %v6127_v51 }
 0x510   : > { %v12396_v50 = vpop.permute.xlu2 %6881  ;;  %v12398_v56 = vpop.permute.xlu1 %6885  ;;  %vm6588_vm13 = vweird.f32 %v6131_v38  ;;  %v6595_v13 = vor.u32 1.1754944e-38, %v6594_v29  ;;  %vm6528_vm15 = vweird.f32 %v6127_v51  ;;  %vm6593_vm0 = vcmp.eq.f32.partialorder %v6592_v44, 8.507059e+37 }
 0x511   : > { %6971 = vst.msk [vmem:[#allocation2 + $0x61] sm:$0xff] %vm529_vm2, %v12396_v50  ;;  %6925 = vrot.lane.b32.xlu0 %v6801_v24, %s8305_s18  ;;  %v6535_v22 = vor.u32 1.1754944e-38, %v6534_v15  ;;  %vm6533_vm3 = vcmp.eq.f32.partialorder %v6532_v21, 8.507059e+37 }
 0x512   : > { %6973 = vst.msk [vmem:[#allocation2 + $0x79] sm:$0xff] %vm529_vm2, %v12398_v56 }
 0x513   : > { %v8220_v45 = vpop.eup %8219 }
 0x514   : > { %v6132_v59 = vadd.f32 1.0, %v8220_v45  ;;  %v8222_v16 = vpop.eup %8221 }
 0x515   : > { %v8224_v60 = vpop.eup %8223  ;;  %v6584_v30 = vmul.f32 %v8222_v16, %v6131_v38  ;;  %vm6589_vm11 = vweird.f32 %v8222_v16 }
 0x516   : > { %8225 = vrcp.f32 %v6132_v59  ;;  %v6524_v23 = vmul.f32 %v8224_v60, %v6127_v51  ;;  %vm6529_vm12 = vweird.f32 %v8224_v60  ;;  %vm6590_vm14 = vmor %vm6588_vm13, %vm6589_vm11  ;;  %v6609_v25 = vand.u32 2147483648, %v6132_v59 }
 0x517   : > { %v6585_v12 = vsub.f32 1.0, %v6584_v30  ;;  %vm6530_vm1 = vmor %vm6528_vm15, %vm6529_vm12  ;;  %v6607_v11 = vand.u32 2147483647, %v6132_v59  ;;  %vm6603_vm5 = vweird.f32 %v6132_v59 }
 0x518   : > { %v6525_v27 = vsub.f32 1.0, %v6524_v23  ;;  %v12405_v26 = vpop.permute.xlu1 %6891  ;;  %v12409_v31 = vpop.permute.xlu2 %6887  ;;  %v6610_v28 = vor.u32 1.1754944e-38, %v6609_v25  ;;  %v12935_v23 = vld [vmem:[#allocation32_spill] sm:$0xff] }
 0x519   : > { %v5936_v39 = vpop.permute.xlu0 %5935  ;;  %6976 = vst.msk [vmem:[#allocation2 + $0x99] sm:$0xff] %vm529_vm2, %v12405_v26  ;;  %v6586_v53 = vmul.f32 %v8222_v16, %v6585_v12  ;;  %vm6608_vm7 = vcmp.eq.f32.partialorder %v6607_v11, 8.507059e+37 }
 0x51a   : > { %v6002_v32 = vadd.f32 %v5936_v39, %v12932_v35  ;;  %6974 = vst.msk [vmem:[#allocation2 + $0x81] sm:$0xff] %vm529_vm2, %v12409_v31  ;;  %v6526_v58 = vmul.f32 %v8224_v60, %v6525_v27 }
 0x51b   : > { %v6587_v62 = vadd.f32 %v8222_v16, %v6586_v53 }
 0x51c   : > { %v8226_v40 = vpop.eup %8225  ;;  %v7621_v48 = vmul.f32 -1.442695, %v6002_v32  ;;  %v6527_v2 = vadd.f32 %v8224_v60, %v6526_v58 }
 0x51d   : > { %v6599_v34 = vmul.f32 %v8226_v40, %v6132_v59  ;;  %v6591_v37 = vsel %vm6590_vm14, %v8222_v16, %v6587_v62  ;;  %vm6604_vm4 = vweird.f32 %v8226_v40 }
 0x51e   : > { %8227 = vpow2.f32 %v7621_v48  ;;  %v6596_v52 = vsel %vm6593_vm0, %v6595_v13, %v6591_v37  ;;  %v6531_v18 = vsel %vm6530_vm1, %v8224_v60, %v6527_v2  ;;  %vm6605_vm6 = vmor %vm6603_vm5, %vm6604_vm4 }
 0x51f   : > { %v6600_v42 = vsub.f32 1.0, %v6599_v34  ;;  %v6803_v47 = vmul.f32 %v12933_v36, %v6596_v52  ;;  %v6536_v41 = vsel %vm6533_vm3, %v6535_v22, %v6531_v18 }
 0x520   : > { %v6799_v19 = vmul.f32 %v12934_v54, %v6536_v41  ;;  %v12418_v63 = vpop.permute.xlu2 %6893 }
 0x521   : > { %v12415_v9 = vpop.permute.xlu0 %6883  ;;  %v6601_v1 = vmul.f32 %v8226_v40, %v6600_v42  ;;  %6929 = vrot.lane.b32.xlu2 %v6803_v47, %s8305_s18  ;;  %6977 = vst.msk [vmem:[#allocation2 + $0xa9] sm:$0xff] %vm529_vm2, %v12418_v63 }
 0x522   : > { %6972 = vst.msk [vmem:[#allocation2 + $0x69] sm:$0xff] %vm529_vm2, %v12415_v9  ;;  %6921 = vrot.lane.b32.xlu1 %v6799_v19, %s8305_s18 }
 0x523   : > { %v6602_v57 = vadd.f32 %v8226_v40, %v6601_v1 }
 0x524   : > { %v8228_v6 = vpop.eup %8227 }
 0x525   : > { %v6130_v4 = vadd.f32 1.0, %v8228_v6  ;;  %v6606_v3 = vsel %vm6605_vm6, %v8226_v40, %v6602_v57 }
 0x526   : > { %v6611_v7 = vsel %vm6608_vm7, %v6610_v28, %v6606_v3 }
 0x527   : > { %8229 = vrcp.f32 %v6130_v4  ;;  %v6804_v43 = vmul.f32 %v12178_v61, %v6611_v7  ;;  %v6579_v20 = vand.u32 2147483648, %v6130_v4  ;;  %v6577_v24 = vand.u32 2147483647, %v6130_v4 }
 0x528   : > { %v6900_v46 = vpop.permute.xlu2 %6899  ;;  %vm6573_vm9 = vweird.f32 %v6130_v4 }
 0x529   : > { %v12427_v0 = vpop.permute.xlu0 %6889  ;;  %6931 = vrot.lane.b32.xlu0 %v6804_v43, %s8305_s18  ;;  %6980 = vst.msk [vmem:[#allocation2 + $0xc9] sm:$0xff] %vm529_vm2, %v6900_v46  ;;  %v6580_v59 = vor.u32 1.1754944e-38, %v6579_v20  ;;  %vm6578_vm11 = vcmp.eq.f32.partialorder %v6577_v24, 8.507059e+37 }
 0x52a   : > { %6975 = vst.msk [vmem:[#allocation2 + $0x91] sm:$0xff] %vm529_vm2, %v12427_v0 }
 0x52d   : > { %v8230_v33 = vpop.eup %8229 }
 0x52e   : > { %v6569_v38 = vmul.f32 %v8230_v33, %v6130_v4  ;;  %v6898_v10 = vpop.permute.xlu1 %6897  ;;  %vm6574_vm8 = vweird.f32 %v8230_v33 }
 0x52f   : > { %6979 = vst.msk [vmem:[#allocation2 + $0xc1] sm:$0xff] %vm529_vm2, %v6898_v10  ;;  %vm6575_vm10 = vmor %vm6573_vm9, %vm6574_vm8 }
 0x530   : > { %v6570_v51 = vsub.f32 1.0, %v6569_v38 }
 0x531   : > { %v6896_v5 = vpop.permute.xlu0 %6895 }
 0x532   : > { %6978 = vst.msk [vmem:[#allocation2 + $0xb1] sm:$0xff] %vm529_vm2, %v6896_v5  ;;  %v6571_v61 = vmul.f32 %v8230_v33, %v6570_v51 }
 0x534   : > { %v6572_v45 = vadd.f32 %v8230_v33, %v6571_v61 }
 0x536   : > { %v6576_v16 = vsel %vm6575_vm10, %v8230_v33, %v6572_v45 }
 0x537   : > { %v12435_v60 = vpop.permute.xlu2 %6905  ;;  %v6581_v30 = vsel %vm6578_vm11, %v6580_v59, %v6576_v16 }
 0x538   : > { %6983 = vst.msk [vmem:[#allocation2 + $0xf1] sm:$0xff] %vm529_vm2, %v12435_v60  ;;  %v6802_v12 = vmul.f32 %v12935_v23, %v6581_v30 }
 0x539   : > { %v12440_v27 = vpop.permute.xlu0 %6901 }
 0x53a   : > { %6981 = vst.msk [vmem:[#allocation2 + $0xd9] sm:$0xff] %vm529_vm2, %v12440_v27  ;;  %6927 = vrot.lane.b32.xlu1 %v6802_v12, %s8305_s18 }
 0x542   : > { %v6908_v39 = vpop.permute.xlu0 %6907 }
 0x543   : > { %6984 = vst.msk [vmem:[#allocation2 + $0xf9] sm:$0xff] %vm529_vm2, %v6908_v39 }
 0x54c   : > { %v6904_v44 = vpop.permute.xlu1 %6903 }
 0x54d   : > { %6982 = vst.msk [vmem:[#allocation2 + $0xe1] sm:$0xff] %vm529_vm2, %v6904_v44 }
 0x551   : > { %v6912_v29 = vpop.permute.xlu2 %6911 }
 0x552   : > { %6986 = vst.msk [vmem:[#allocation2 + $0x111] sm:$0xff] %vm529_vm2, %v6912_v29 }
 0x559   : > { %v6918_v35 = vpop.permute.xlu2 %6917 }
 0x55a   : > { %6989 = vst.msk [vmem:[#allocation2 + $0x139] sm:$0xff] %vm529_vm2, %v6918_v35 }
 0x562   : > { %v6914_v32 = vpop.permute.xlu0 %6913 }
 0x563   : > { %6987 = vst.msk [vmem:[#allocation2 + $0x121] sm:$0xff] %vm529_vm2, %v6914_v32  ;;  %v6924_v53 = vpop.permute.xlu2 %6923 }
 0x564   : > { %6992 = vst.msk [vmem:[#allocation2 + $0x159] sm:$0xff] %vm529_vm2, %v6924_v53  ;;  %v6910_v15 = vpop.permute.xlu1 %6909 }
 0x565   : > { %6985 = vst.msk [vmem:[#allocation2 + $0x109] sm:$0xff] %vm529_vm2, %v6910_v15 }
 0x56c   : > { %v6920_v58 = vpop.permute.xlu0 %6919 }
 0x56d   : > { %6990 = vst.msk [vmem:[#allocation2 + $0x141] sm:$0xff] %vm529_vm2, %v6920_v58 }
 0x57b   : > { %v6930_v21 = vpop.permute.xlu2 %6929 }
 0x57c   : > { %6995 = vst.msk [vmem:[#allocation2 + $0x181] sm:$0xff] %vm529_vm2, %v6930_v21  ;;  %v6916_v40 = vpop.permute.xlu1 %6915 }
 0x57d   : > { %6988 = vst.msk [vmem:[#allocation2 + $0x129] sm:$0xff] %vm529_vm2, %v6916_v40 }
 0x583   : > { %v6926_v48 = vpop.permute.xlu0 %6925 }
 0x584   : > { %6993 = vst.msk [vmem:[#allocation2 + $0x169] sm:$0xff] %vm529_vm2, %v6926_v48 }
 0x594   : > { %v6922_v62 = vpop.permute.xlu1 %6921 }
 0x595   : > { %6991 = vst.msk [vmem:[#allocation2 + $0x151] sm:$0xff] %vm529_vm2, %v6922_v62 }
 0x59b   : > { %v6932_v34 = vpop.permute.xlu0 %6931 }
 0x59c   : > { %6996 = vst.msk [vmem:[#allocation2 + $0x189] sm:$0xff] %vm529_vm2, %v6932_v34 }
 0x5a9   : > { %7000 = sbr.rel (%p7624_p8) target bundleno = 1649 (0x671), region = 56 }
 0x5ac   : > { %v6928_v13 = vpop.permute.xlu1 %6927 }
 0x5ad   : > { %6994 = vst.msk [vmem:[#allocation2 + $0x171] sm:$0xff] %vm529_vm2, %v6928_v13 }
 0x5ae   : > { %7625 = vmatpush.xpose.msk.msra.mxu0 %vm529_vm2, %v6900_v46  ;;  %7642 = vmatpush.xpose.msk.msra.mxu1 %vm529_vm2, %v6932_v34  ;;  %v8308_v2 = vmov 0   ;;  %vm7118_vm12 = vcmask 1043456  }
 0x5af   : > { %8263 = vset.pattern.permute.xlu0 %v8308_v2 }
 0x5b2   : > { %7626 = vmatpush.xpose.msk.msra.mxu0 %vm529_vm2, %v6898_v10  ;;  %7643 = vmatpush.xpose.msk.msra.mxu1 %vm529_vm2, %v6930_v21 }
 0x5b6   : > { %7627 = vmatpush.xpose.msk.msra.mxu0 %vm529_vm2, %v6896_v5  ;;  %7644 = vmatpush.xpose.msk.msra.mxu1 %vm529_vm2, %v6928_v13 }
 0x5ba   : > { %7628 = vmatpush.xpose.msk.msra.mxu0 %vm529_vm2, %v12418_v63  ;;  %7645 = vmatpush.xpose.msk.msra.mxu1 %vm529_vm2, %v6926_v48 }
 0x5be   : > { %7629 = vmatpush.xpose.msk.msra.mxu0 %vm529_vm2, %v12405_v26  ;;  %7646 = vmatpush.xpose.msk.msra.mxu1 %vm529_vm2, %v6924_v53  ;;  %v7002_v26 = vld [vmem:[%s12537_s6] sm:$0x7] }
 0x5bf   : > { %7005 = vperm.xlu0 %8263, %v7002_v26  }
 0x5c2   : > { %7630 = vmatpush.xpose.msk.msra.mxu0 %vm529_vm2, %v12427_v0  ;;  %7647 = vmatpush.xpose.msk.msra.mxu1 %vm529_vm2, %v6922_v62 }
 0x5c6   : > { %7631 = vmatpush.xpose.msk.msra.mxu0 %vm529_vm2, %v12409_v31  ;;  %7648 = vmatpush.xpose.msk.msra.mxu1 %vm529_vm2, %v6920_v58 }
 0x5ca   : > { %7632 = vmatpush.xpose.msk.msra.mxu0 %vm529_vm2, %v12398_v56  ;;  %7649 = vmatpush.xpose.msk.msra.mxu1 %vm529_vm2, %v6918_v35 }
 0x5ce   : > { %7633 = vmatpush.xpose.msk.msra.mxu0 %vm529_vm2, %v12415_v9  ;;  %7650 = vmatpush.xpose.msk.msra.mxu1 %vm529_vm2, %v6916_v40 }
 0x5d2   : > { %7634 = vmatpush.xpose.msk.msra.mxu0 %vm529_vm2, %v12396_v50  ;;  %7651 = vmatpush.xpose.msk.msra.mxu1 %vm529_vm2, %v6914_v32 }
 0x5d6   : > { %7635 = vmatpush.xpose.msk.msra.mxu0 %vm529_vm2, %v12386_v49  ;;  %7652 = vmatpush.xpose.msk.msra.mxu1 %vm529_vm2, %v6912_v29 }
 0x5da   : > { %7636 = vmatpush.xpose.msk.msra.mxu0 %vm529_vm2, %v12315_v17  ;;  %7653 = vmatpush.xpose.msk.msra.mxu1 %vm529_vm2, %v6910_v15  ;;  %v12936_v17 = vld [vmem:[#allocation25_spill] sm:$0xff] }
 0x5de   : > { %7637 = vmatpush.xpose.msk.msra.mxu0 %vm529_vm2, %v12281_v14  ;;  %7654 = vmatpush.xpose.msk.msra.mxu1 %vm529_vm2, %v6908_v39  ;;  %v7001_v14 = vld [vmem:[%s12536_s5] sm:$0x7] }
 0x5e2   : > { %7638 = vmatpush.xpose.msk.msra.mxu0 %vm529_vm2, %v12295_v8  ;;  %7655 = vmatpush.xpose.msk.msra.mxu1 %vm529_vm2, %v12435_v60 }
 0x5e6   : > { %7639 = vmatpush.xpose.msk.msra.mxu0 %vm529_vm2, %v12266_v55  ;;  %7656 = vmatpush.xpose.msk.msra.mxu1 %vm529_vm2, %v6904_v44 }
 0x5ea   : > { %7640 = vmatpush.xpose.msk.msra.mxu0 %vm529_vm2, %v12936_v17  ;;  %7657 = vmatpush.xpose.msk.msra.mxu1 %vm529_vm2, %v12440_v27 }
 0x5ed   : > { %7641 = vmatmul.msk.f32.vlgmr.msra.gmra.mxu0 %vm529_vm2, %v7001_v14  ;;  %7658 = vmatmul.msk.f32.vlgmr.msra.gmra.mxu1 %vm529_vm2, %v7001_v14 }
 0x631   : > { %v7006_v8 = vpop.permute.xlu0 %7005 }
 0x66a   : > { %v7092_v49 = vpop.f32.mrf.mxu0  ;;  %v7112_v50 = vpop.f32.mrf.mxu1 }
 0x66b   : > { %v7113_v55 = vadd.f32 %v7112_v50, %v7006_v8  ;;  %v7093_v56 = vadd.f32 %v7092_v49, %v7006_v8 }
 0x66d   : > { %v7117_v31 = vrot.slane %v7113_v55, 4 }
 0x66f   : > { %v7119_v37 = vsel %vm7118_vm12, %v7093_v56, %v7117_v31 }
 0x670   : > { %7121 = vst [vmem:[%s8386_s14] sm:$0x77] %v7119_v37 }
 0x671 PF: > { %s17_s28 = sadd.s32 1, %s8302_s28   ;;  %s12937_s24 = smov %s8294_s26 }
 0x672   : > { %p14_p9 = scmp.ge.s32.totalorder %s17_s28, 18   ;;  %s12938_s25 = smov %s8298_s27 }
 0x673   : > { %s12939_s26 = smov %s12942_s29  ;;  %s12940_s27 = smov %s12946_s30 }
 0x674   :  { %16 = sbr.rel (!%p14_p9) target bundleno = 3 (0x3), region = 96 }

</bundles_post_ra>
